<compile_context>
chip_gen: v5e
topology: v5e:2x2
jax: 0.10.0
libtpu: 0.0.40
codegen_flags: <defaults>
</compile_context>

<pallas_src>
import functools

import numpy as np
import jax
import jax.numpy as jnp
from jax.experimental import pallas as pl
from jax.experimental.pallas import tpu as pltpu

TI = 128   # row (foreground-anchor) tile
TJ = 512   # column (comparison-anchor) tile -- reduction axis, kept wide


def _ape_pair_kernel(lr, ur, lc, fc, bc, uc,
                     rank_ref, bce_ref, cnt_ref,
                     rank_acc, bce_acc, cnt_acc, *, lamb):
    """Pairwise O(N x N) hot path of APELoss.

    For every row anchor i (only foreground rows are used downstream) we
    accumulate over all column anchors j:
      rank_ref : sum of sigmoid((x_j - x_i) * lamb) over FP + TP candidates
      bce_ref  : sum of BCE(sigmoid(.), 0) (== softplus) over FP candidates
      cnt_ref  : number of FP candidates
    """
    j = pl.program_id(1)
    nj = pl.num_programs(1)

    @pl.when(j == 0)
    def _():
        rank_acc[...] = jnp.zeros_like(rank_acc)
        bce_acc[...] = jnp.zeros_like(bce_acc)
        cnt_acc[...] = jnp.zeros_like(cnt_acc)

    xi = lr[...]          # (TI, 1) row logits
    ui = ur[...]          # (TI, 1) row ious (valid at fg rows only)
    xj = lc[...]          # (1, TJ) col logits
    uj = uc[...]          # (1, TJ) col ious
    fgj = fc[...]         # (1, TJ) col foreground mask (0/1 float)
    bgj = bc[...]         # (1, TJ) col relevant-background mask (0/1 float)

    z = (xj - xi) * lamb                                    # (TI, TJ)
    # x_j > x_i + th  <=>  (x_j - x_i) * lamb > th * lamb == -4
    gtf = (z > -4.0).astype(jnp.float32)
    s = jax.nn.sigmoid(z)
    # binary_cross_entropy(sigmoid(z), 0) == softplus(z); clamp at 100 to
    # mirror PyTorch's log clamp at -100. Stable form, no 1-sigmoid underflow.
    bce = jnp.minimum(jnp.maximum(z, 0.0) + jnp.log(1.0 + jnp.exp(-jnp.abs(z))),
                      100.0)

    fg_gt = fgj * gtf                                       # fg cols above threshold
    bg_gt = bgj * gtf                                       # relevant-bg cols above threshold
    lt = (uj < ui).astype(jnp.float32)
    fp_mask = bg_gt + fg_gt * lt                            # FP candidates
    rank_mask = bg_gt + fg_gt                               # FP + TP candidates

    rank_acc[...] += rank_mask * s
    bce_acc[...] += fp_mask * bce
    cnt_acc[...] += fp_mask

    @pl.when(j == nj - 1)
    def _():
        rank_ref[...] = jnp.sum(rank_acc[...], axis=1, keepdims=True)
        bce_ref[...] = jnp.sum(bce_acc[...], axis=1, keepdims=True)
        cnt_ref[...] = jnp.sum(cnt_acc[...], axis=1, keepdims=True)


def ape_loss(logits, targets, ious, lamb=4.0, topk=100000, loss_weight=1.0):
    """JAX/Pallas implementation of APELoss.forward (forward semantics only)."""
    th = -4.0 / lamb
    n = logits.shape[0]

    logits = logits.astype(jnp.float32)
    fg_mask = targets == 1
    # p_min = min over foreground logits.
    p_min = jnp.min(jnp.where(fg_mask, logits, jnp.inf))
    bg_rel = (targets == 0) & (logits >= p_min + th)
    # TODO(synk): topk truncation of relevant-bg logits not implemented
    # (assumes their count <= topk, which matches the default topk=100000).

    # Scatter per-foreground ious back to full anchor positions (order-preserving).
    fg_f = fg_mask.astype(jnp.float32)
    pos = jnp.cumsum(fg_mask.astype(jnp.int32)) - 1
    iou_full = jnp.where(
        fg_mask, ious.astype(jnp.float32)[jnp.clip(pos, 0, ious.shape[0] - 1)], 0.0)

    # Pad to a multiple of TJ (TJ is a multiple of TI); padded anchors have zero masks.
    assert TJ % TI == 0
    n_pad = ((n + TJ - 1) // TJ) * TJ
    pad = n_pad - n
    padz = lambda x: jnp.pad(x, (0, pad))
    lg = padz(logits)
    fg = padz(fg_f)
    bg = padz(bg_rel.astype(jnp.float32))
    iu = padz(iou_full)

    lr, ur = lg.reshape(n_pad, 1), iu.reshape(n_pad, 1)
    lc, fc, bc, uc = (lg.reshape(1, n_pad), fg.reshape(1, n_pad),
                      bg.reshape(1, n_pad), iu.reshape(1, n_pad))

    row_spec = pl.BlockSpec((TI, 1), lambda i, j: (i, 0))
    col_spec = pl.BlockSpec((1, TJ), lambda i, j: (0, j))
    out_spec = pl.BlockSpec((TI, 1), lambda i, j: (i, 0))

    rank_sum, bce_sum, fp_cnt = pl.pallas_call(
        functools.partial(_ape_pair_kernel, lamb=float(lamb)),
        out_shape=[jax.ShapeDtypeStruct((n_pad, 1), jnp.float32)] * 3,
        grid_spec=pltpu.PrefetchScalarGridSpec(
            num_scalar_prefetch=0,
            grid=(n_pad // TI, n_pad // TJ),
            in_specs=[row_spec, row_spec,
                      col_spec, col_spec, col_spec, col_spec],
            out_specs=[out_spec, out_spec, out_spec],
            scratch_shapes=[pltpu.VMEM((TI, TJ), jnp.float32)] * 3,
        ),
        compiler_params=pltpu.CompilerParams(
            dimension_semantics=("parallel", "arbitrary")),
    )(lr, ur, lc, fc, bc, uc)

    rank_sum = rank_sum[:, 0]
    bce_sum = bce_sum[:, 0]
    fp_cnt = fp_cnt[:, 0]

    # Final (tiny) reduction: only foreground rows with at least one FP candidate
    # contribute; mean over those rows, then /lamb and *loss_weight.
    valid = (fg > 0) & (fp_cnt > 0)
    loss_i = jnp.where(valid, bce_sum * iu / jnp.where(valid, rank_sum, 1.0), 0.0)
    n_valid = jnp.sum(valid.astype(jnp.float32))
    # Guard n_valid == 0 (PyTorch would crash/NaN on an empty list; stay finite).
    return loss_weight * jnp.sum(loss_i) / jnp.maximum(n_valid, 1.0) / lamb


def _ape_loss_ref(logits, targets, ious, lamb=4.0, loss_weight=1.0):
    """Literal NumPy (float64) port of the PyTorch forward, for a correctness check.

    BCE(sigmoid(z), 0) is evaluated as the mathematically-equal stable softplus,
    clamped at 100 (PyTorch's log clamp)."""
    th = -4.0 / lamb
    sig = lambda x: 1.0 / (1.0 + np.exp(-x))
    softplus = lambda z: np.maximum(z, 0.0) + np.log1p(np.exp(-np.abs(z)))
    fg = targets == 1
    fg_logits = logits[fg]
    p_min = fg_logits.min()
    rel_bg = (targets == 0) & (logits >= p_min + th)
    rel_bg_logits = logits[rel_bg]
    losses = []
    for ii in range(len(fg_logits)):
        neg = rel_bg_logits > fg_logits[ii] + th
        pos = (ious < ious[ii]) & (fg_logits > fg_logits[ii] + th)
        adapt = np.concatenate([rel_bg_logits[neg], fg_logits[pos]])
        fp = sig((adapt - fg_logits[ii]) * lamb)
        tp_m = (ious >= ious[ii]) & (fg_logits > fg_logits[ii] + th)
        tp = sig((fg_logits[tp_m] - fg_logits[ii]) * lamb)
        rank = fp.sum() + tp.sum()
        if fp.size:
            d = np.minimum(softplus((adapt - fg_logits[ii]) * lamb), 100.0).sum()
            losses.append(d * ious[ii] / rank)
    return loss_weight * float(np.mean(losses)) / lamb


if __name__ == "__main__":
    N = 700
    key = jax.random.PRNGKey(0)
    k1, k2 = jax.random.split(key)

    logits = (jax.random.normal(k1, (N,)) * 2.0).astype(jnp.float32)
    idx = jnp.arange(N)
    # Deterministic target pattern: 1 (fg), 0 (bg), -1 (ignored).
    targets = jnp.where(idx % 7 == 0, 1,
                        jnp.where(idx % 7 == 6, -1, 0)).astype(jnp.int32)
    fg_num = int(jnp.sum(targets == 1))          # = 100
    ious = jax.random.uniform(k2, (fg_num,), minval=0.5, maxval=1.0).astype(jnp.float32)

    loss = ape_loss(logits, targets, ious, lamb=4.0, topk=100000, loss_weight=1.0)
    loss = jax.block_until_ready(loss)

    ref = _ape_loss_ref(np.asarray(logits, np.float64),
                        np.asarray(targets),
                        np.asarray(ious, np.float64))
    assert np.isfinite(float(loss))
    np.testing.assert_allclose(float(loss), ref, rtol=2e-3, atol=1e-5)
    print("KERNEL_OK")
</pallas_src>

<mosaic_0001>
module attributes {stable_mosaic.version = 11 : i64} {
  func.func @_ape_pair_kernel(%arg0: i32, %arg1: i32, %arg2: memref<128x1xf32, #tpu.memory_space<vmem>>, %arg3: memref<128x1xf32, #tpu.memory_space<vmem>>, %arg4: memref<1x512xf32, #tpu.memory_space<vmem>>, %arg5: memref<1x512xf32, #tpu.memory_space<vmem>>, %arg6: memref<1x512xf32, #tpu.memory_space<vmem>>, %arg7: memref<1x512xf32, #tpu.memory_space<vmem>>, %arg8: memref<128x1xf32, #tpu.memory_space<vmem>>, %arg9: memref<128x1xf32, #tpu.memory_space<vmem>>, %arg10: memref<128x1xf32, #tpu.memory_space<vmem>>, %arg11: memref<128x512xf32, #tpu.memory_space<vmem>>, %arg12: memref<128x512xf32, #tpu.memory_space<vmem>>, %arg13: memref<128x512xf32, #tpu.memory_space<vmem>>) attributes {dimension_semantics = [#tpu.dimension_semantics<parallel>, #tpu.dimension_semantics<arbitrary>], iteration_bounds = array<i64: 8, 2>, scalar_prefetch = 0 : i64, scratch_operands = 3 : i64, tpu.core_type = #tpu.core_type<tc>, window_params = [{transform_indices = @transform_0, window_bounds = array<i64: 128, 1>}, {transform_indices = @transform_1, window_bounds = array<i64: 128, 1>}, {transform_indices = @transform_2, window_bounds = array<i64: 1, 512>}, {transform_indices = @transform_3, window_bounds = array<i64: 1, 512>}, {transform_indices = @transform_4, window_bounds = array<i64: 1, 512>}, {transform_indices = @transform_5, window_bounds = array<i64: 1, 512>}, {transform_indices = @transform_6, window_bounds = array<i64: 128, 1>}, {transform_indices = @transform_7, window_bounds = array<i64: 128, 1>}, {transform_indices = @transform_8, window_bounds = array<i64: 128, 1>}]} {
    %c0_i32 = arith.constant 0 : i32
    %0 = arith.cmpi eq, %arg1, %c0_i32 : i32
    %1 = arith.extui %0 : i1 to i32
    %c0_i32_0 = arith.constant 0 : i32
    %2 = arith.cmpi ne, %1, %c0_i32_0 : i32
    scf.if %2 {
      %cst_31 = arith.constant 0.000000e+00 : f32
      %61 = vector.broadcast %cst_31 : f32 to vector<128x512xf32>
      %c0_32 = arith.constant 0 : index
      %c0_33 = arith.constant 0 : index
      %62 = vector.load %arg11[%c0_32, %c0_33] : memref<128x512xf32, #tpu.memory_space<vmem>>, vector<128x512xf32>
      tpu.vector_store %arg11[%c0_32, %c0_33], %61 {strides = array<i32>} : memref<128x512xf32, #tpu.memory_space<vmem>>, vector<128x512xf32>,
      %cst_34 = arith.constant 0.000000e+00 : f32
      %63 = vector.broadcast %cst_34 : f32 to vector<128x512xf32>
      %c0_35 = arith.constant 0 : index
      %c0_36 = arith.constant 0 : index
      %64 = vector.load %arg12[%c0_35, %c0_36] : memref<128x512xf32, #tpu.memory_space<vmem>>, vector<128x512xf32>
      tpu.vector_store %arg12[%c0_35, %c0_36], %63 {strides = array<i32>} : memref<128x512xf32, #tpu.memory_space<vmem>>, vector<128x512xf32>,
      %cst_37 = arith.constant 0.000000e+00 : f32
      %65 = vector.broadcast %cst_37 : f32 to vector<128x512xf32>
      %c0_38 = arith.constant 0 : index
      %c0_39 = arith.constant 0 : index
      %66 = vector.load %arg13[%c0_38, %c0_39] : memref<128x512xf32, #tpu.memory_space<vmem>>, vector<128x512xf32>
      tpu.vector_store %arg13[%c0_38, %c0_39], %65 {strides = array<i32>} : memref<128x512xf32, #tpu.memory_space<vmem>>, vector<128x512xf32>,
    } else {
    }
    %c0 = arith.constant 0 : index
    %c0_1 = arith.constant 0 : index
    %3 = vector.load %arg2[%c0, %c0_1] : memref<128x1xf32, #tpu.memory_space<vmem>>, vector<128x1xf32>
    %c0_2 = arith.constant 0 : index
    %c0_3 = arith.constant 0 : index
    %4 = vector.load %arg3[%c0_2, %c0_3] : memref<128x1xf32, #tpu.memory_space<vmem>>, vector<128x1xf32>
    %c0_4 = arith.constant 0 : index
    %c0_5 = arith.constant 0 : index
    %5 = vector.load %arg4[%c0_4, %c0_5] : memref<1x512xf32, #tpu.memory_space<vmem>>, vector<1x512xf32>
    %c0_6 = arith.constant 0 : index
    %c0_7 = arith.constant 0 : index
    %6 = vector.load %arg7[%c0_6, %c0_7] : memref<1x512xf32, #tpu.memory_space<vmem>>, vector<1x512xf32>
    %c0_8 = arith.constant 0 : index
    %c0_9 = arith.constant 0 : index
    %7 = vector.load %arg5[%c0_8, %c0_9] : memref<1x512xf32, #tpu.memory_space<vmem>>, vector<1x512xf32>
    %c0_10 = arith.constant 0 : index
    %c0_11 = arith.constant 0 : index
    %8 = vector.load %arg6[%c0_10, %c0_11] : memref<1x512xf32, #tpu.memory_space<vmem>>, vector<1x512xf32>
    %9 = vector.broadcast %5 : vector<1x512xf32> to vector<128x512xf32>
    %10 = vector.broadcast %3 : vector<128x1xf32> to vector<128x512xf32>
    %11 = arith.subf %9, %10 : vector<128x512xf32>
    %cst = arith.constant 4.000000e+00 : f32
    %12 = vector.broadcast %cst : f32 to vector<128x512xf32>
    %13 = arith.mulf %11, %12 : vector<128x512xf32>
    %cst_12 = arith.constant -4.000000e+00 : f32
    %14 = vector.broadcast %cst_12 : f32 to vector<128x512xf32>
    %15 = arith.cmpf ogt, %13, %14 : vector<128x512xf32>
    %16 = arith.extui %15 : vector<128x512xi1> to vector<128x512xi32>
    %17 = arith.sitofp %16 : vector<128x512xi32> to vector<128x512xf32>
    %18 = arith.negf %13 : vector<128x512xf32>
    %19 = math.exp %18 : vector<128x512xf32>
    %cst_13 = arith.constant 1.000000e+00 : f32
    %20 = vector.broadcast %cst_13 : f32 to vector<128x512xf32>
    %21 = arith.addf %20, %19 : vector<128x512xf32>
    %22 = arith.divf %20, %21 : vector<128x512xf32>
    %cst_14 = arith.constant 0.000000e+00 : f32
    %23 = vector.broadcast %cst_14 : f32 to vector<128x512xf32>
    %24 = arith.maximumf %13, %23 : vector<128x512xf32>
    %25 = math.absf %13 : vector<128x512xf32>
    %cst_15 = arith.constant 0.000000e+00 : f32
    %26 = vector.broadcast %cst_15 : f32 to vector<128x512xf32>
    %27 = arith.subf %26, %25 : vector<128x512xf32>
    %28 = math.exp %27 : vector<128x512xf32>
    %cst_16 = arith.constant 1.000000e+00 : f32
    %29 = vector.broadcast %cst_16 : f32 to vector<128x512xf32>
    %30 = arith.addf %29, %28 : vector<128x512xf32>
    %31 = math.log %30 : vector<128x512xf32>
    %32 = arith.addf %24, %31 : vector<128x512xf32>
    %cst_17 = arith.constant 1.000000e+02 : f32
    %33 = vector.broadcast %cst_17 : f32 to vector<128x512xf32>
    %34 = arith.minimumf %32, %33 : vector<128x512xf32>
    %35 = vector.broadcast %7 : vector<1x512xf32> to vector<128x512xf32>
    %36 = arith.mulf %35, %17 : vector<128x512xf32>
    %37 = vector.broadcast %8 : vector<1x512xf32> to vector<128x512xf32>
    %38 = arith.mulf %37, %17 : vector<128x512xf32>
    %39 = vector.broadcast %6 : vector<1x512xf32> to vector<128x512xf32>
    %40 = vector.broadcast %4 : vector<128x1xf32> to vector<128x512xf32>
    %41 = arith.cmpf olt, %39, %40 : vector<128x512xf32>
    %42 = arith.extui %41 : vector<128x512xi1> to vector<128x512xi32>
    %43 = arith.sitofp %42 : vector<128x512xi32> to vector<128x512xf32>
    %44 = arith.mulf %36, %43 : vector<128x512xf32>
    %45 = arith.addf %38, %44 : vector<128x512xf32>
    %46 = arith.addf %38, %36 : vector<128x512xf32>
    %c0_18 = arith.constant 0 : index
    %c0_19 = arith.constant 0 : index
    %47 = vector.load %arg11[%c0_18, %c0_19] : memref<128x512xf32, #tpu.memory_space<vmem>>, vector<128x512xf32>
    %48 = arith.mulf %46, %22 : vector<128x512xf32>
    %49 = arith.addf %47, %48 : vector<128x512xf32>
    %c0_20 = arith.constant 0 : index
    %c0_21 = arith.constant 0 : index
    %50 = vector.load %arg11[%c0_20, %c0_21] : memref<128x512xf32, #tpu.memory_space<vmem>>, vector<128x512xf32>
    tpu.vector_store %arg11[%c0_20, %c0_21], %49 {strides = array<i32>} : memref<128x512xf32, #tpu.memory_space<vmem>>, vector<128x512xf32>,
    %c0_22 = arith.constant 0 : index
    %c0_23 = arith.constant 0 : index
    %51 = vector.load %arg12[%c0_22, %c0_23] : memref<128x512xf32, #tpu.memory_space<vmem>>, vector<128x512xf32>
    %52 = arith.mulf %45, %34 : vector<128x512xf32>
    %53 = arith.addf %51, %52 : vector<128x512xf32>
    %c0_24 = arith.constant 0 : index
    %c0_25 = arith.constant 0 : index
    %54 = vector.load %arg12[%c0_24, %c0_25] : memref<128x512xf32, #tpu.memory_space<vmem>>, vector<128x512xf32>
    tpu.vector_store %arg12[%c0_24, %c0_25], %53 {strides = array<i32>} : memref<128x512xf32, #tpu.memory_space<vmem>>, vector<128x512xf32>,
    %c0_26 = arith.constant 0 : index
    %c0_27 = arith.constant 0 : index
    %55 = vector.load %arg13[%c0_26, %c0_27] : memref<128x512xf32, #tpu.memory_space<vmem>>, vector<128x512xf32>
    %56 = arith.addf %55, %45 : vector<128x512xf32>
    %c0_28 = arith.constant 0 : index
    %c0_29 = arith.constant 0 : index
    %57 = vector.load %arg13[%c0_28, %c0_29] : memref<128x512xf32, #tpu.memory_space<vmem>>, vector<128x512xf32>
    tpu.vector_store %arg13[%c0_28, %c0_29], %56 {strides = array<i32>} : memref<128x512xf32, #tpu.memory_space<vmem>>, vector<128x512xf32>,
    %c1_i32 = arith.constant 1 : i32
    %58 = arith.cmpi eq, %arg1, %c1_i32 : i32
    %59 = arith.extui %58 : i1 to i32
    %c0_i32_30 = arith.constant 0 : i32
    %60 = arith.cmpi ne, %59, %c0_i32_30 : i32
    scf.if %60 {
      %c0_31 = arith.constant 0 : index
      %c0_32 = arith.constant 0 : index
      %61 = vector.load %arg11[%c0_31, %c0_32] : memref<128x512xf32, #tpu.memory_space<vmem>>, vector<128x512xf32>
      %cst_33 = arith.constant dense<0.000000e+00> : vector<128xf32>
      %62 = vector.multi_reduction <add>, %61, %cst_33 [1] : vector<128x512xf32> to vector<128xf32>
      %63 = vector.shape_cast %62 : vector<128xf32> to vector<128x1xf32>
      %c0_34 = arith.constant 0 : index
      %c0_35 = arith.constant 0 : index
      %64 = vector.load %arg8[%c0_34, %c0_35] : memref<128x1xf32, #tpu.memory_space<vmem>>, vector<128x1xf32>
      tpu.vector_store %arg8[%c0_34, %c0_35], %63 {strides = array<i32>} : memref<128x1xf32, #tpu.memory_space<vmem>>, vector<128x1xf32>,
      %c0_36 = arith.constant 0 : index
      %c0_37 = arith.constant 0 : index
      %65 = vector.load %arg12[%c0_36, %c0_37] : memref<128x512xf32, #tpu.memory_space<vmem>>, vector<128x512xf32>
      %cst_38 = arith.constant dense<0.000000e+00> : vector<128xf32>
      %66 = vector.multi_reduction <add>, %65, %cst_38 [1] : vector<128x512xf32> to vector<128xf32>
      %67 = vector.shape_cast %66 : vector<128xf32> to vector<128x1xf32>
      %c0_39 = arith.constant 0 : index
      %c0_40 = arith.constant 0 : index
      %68 = vector.load %arg9[%c0_39, %c0_40] : memref<128x1xf32, #tpu.memory_space<vmem>>, vector<128x1xf32>
      tpu.vector_store %arg9[%c0_39, %c0_40], %67 {strides = array<i32>} : memref<128x1xf32, #tpu.memory_space<vmem>>, vector<128x1xf32>,
      %c0_41 = arith.constant 0 : index
      %c0_42 = arith.constant 0 : index
      %69 = vector.load %arg13[%c0_41, %c0_42] : memref<128x512xf32, #tpu.memory_space<vmem>>, vector<128x512xf32>
      %cst_43 = arith.constant dense<0.000000e+00> : vector<128xf32>
      %70 = vector.multi_reduction <add>, %69, %cst_43 [1] : vector<128x512xf32> to vector<128xf32>
      %71 = vector.shape_cast %70 : vector<128xf32> to vector<128x1xf32>
      %c0_44 = arith.constant 0 : index
      %c0_45 = arith.constant 0 : index
      %72 = vector.load %arg10[%c0_44, %c0_45] : memref<128x1xf32, #tpu.memory_space<vmem>>, vector<128x1xf32>
      tpu.vector_store %arg10[%c0_44, %c0_45], %71 {strides = array<i32>} : memref<128x1xf32, #tpu.memory_space<vmem>>, vector<128x1xf32>,
    } else {
    }
    return
  }
  func.func @transform_0(%arg0: i32, %arg1: i32) -> (i32, i32) {
    %c0_i32 = arith.constant 0 : i32
    %c0_i32_0 = arith.constant 0 : i32
    return %arg0, %c0_i32 : i32, i32
  }
  func.func @transform_1(%arg0: i32, %arg1: i32) -> (i32, i32) {
    %c0_i32 = arith.constant 0 : i32
    %c0_i32_0 = arith.constant 0 : i32
    return %arg0, %c0_i32 : i32, i32
  }
  func.func @transform_2(%arg0: i32, %arg1: i32) -> (i32, i32) {
    %c0_i32 = arith.constant 0 : i32
    %c0_i32_0 = arith.constant 0 : i32
    return %c0_i32, %arg1 : i32, i32
  }
  func.func @transform_3(%arg0: i32, %arg1: i32) -> (i32, i32) {
    %c0_i32 = arith.constant 0 : i32
    %c0_i32_0 = arith.constant 0 : i32
    return %c0_i32, %arg1 : i32, i32
  }
  func.func @transform_4(%arg0: i32, %arg1: i32) -> (i32, i32) {
    %c0_i32 = arith.constant 0 : i32
    %c0_i32_0 = arith.constant 0 : i32
    return %c0_i32, %arg1 : i32, i32
  }
  func.func @transform_5(%arg0: i32, %arg1: i32) -> (i32, i32) {
    %c0_i32 = arith.constant 0 : i32
    %c0_i32_0 = arith.constant 0 : i32
    return %c0_i32, %arg1 : i32, i32
  }
  func.func @transform_6(%arg0: i32, %arg1: i32) -> (i32, i32) {
    %c0_i32 = arith.constant 0 : i32
    %c0_i32_0 = arith.constant 0 : i32
    return %arg0, %c0_i32 : i32, i32
  }
  func.func @transform_7(%arg0: i32, %arg1: i32) -> (i32, i32) {
    %c0_i32 = arith.constant 0 : i32
    %c0_i32_0 = arith.constant 0 : i32
    return %arg0, %c0_i32 : i32, i32
  }
  func.func @transform_8(%arg0: i32, %arg1: i32) -> (i32, i32) {
    %c0_i32 = arith.constant 0 : i32
    %c0_i32_0 = arith.constant 0 : i32
    return %arg0, %c0_i32 : i32, i32
  }
}

</mosaic_0001>

<bundles_post_ra>
// kernel: tpu_custom_call.1
= control target key start
LH: loop header
LB: loop body
LE: loop exit
PB: predicated region body
PF: predicated region fallthrough
CT: control target
= control target key end

     0   :  { %s5796_s27 = smov 0   ;;  %s5798_s28 = smov 0   ;;  %s9280_s0 = inlined_call_operand.vmem [shape: f32[1024,1], index: 0, kind: input, shape index: {}]   ;;  %s9281_s1 = inlined_call_operand.vmem [shape: f32[1024,1], index: 1, kind: input, shape index: {}]   ;;  %s9282_s2 = inlined_call_operand.vmem [shape: f32[1,1024], index: 2, kind: input, shape index: {}]   ;;  %s9283_s3 = inlined_call_operand.vmem [shape: f32[1,1024], index: 3, kind: input, shape index: {}]   ;;  %s9284_s4 = inlined_call_operand.vmem [shape: f32[1,1024], index: 4, kind: input, shape index: {}]   ;;  %s9285_s5 = inlined_call_operand.vmem [shape: f32[1,1024], index: 5, kind: input, shape index: {}]   ;;  %s9286_s6 = inlined_call_operand.vmem [shape: f32[1024,1], index: 6, kind: output, shape index: {0}]   ;;  %s9287_s7 = inlined_call_operand.vmem [shape: f32[1024,1], index: 7, kind: output, shape index: {1}]   ;;  %s9288_s8 = inlined_call_operand.vmem [shape: f32[1024,1], index: 8, kind: output, shape index: {2}]  }
   0x1   :  { %9648 = sst [smem:[#allocation237_spill]] %s9280_s0  ;;  %s5800_s29 = smov 0  }
   0x2   :  { %9649 = sst [smem:[#allocation238_spill]] %s9281_s1  ;;  %s5802_s30 = smov 0  }
   0x3   :  { %s5804_s9 = smov 0  }
   0x4 LB: > { %s28_s10 = sadd.s32 1, %s5738_s29  ;;  %s31_s11 = sadd.s32 1, %s5742_s30  ;;  %s5746_s9 = sphi %s5804_s9, %s19_s9   ;;  %s5742_s30 = sphi %s5802_s30, %s10427_s30   ;;  %s5738_s29 = sphi %s5800_s29, %s10426_s29   ;;  %s5734_s28 = sphi %s5798_s28, %s10425_s28   ;;  %s5730_s27 = sphi %s5796_s27, %s10424_s27  }
   0x5   : > { %p29_p0 = scmp.ge.s32.totalorder %s28_s10, 2  ;;  %p4939_p1 = scmp.ge.s32.totalorder %s5746_s9, 1 }
   0x6   : > { %p331_p2 = scmp.lt.s32.totalorder %s5746_s9, 17 }
   0x7   : > { %s10429_s10 = smov (%p29_p0, %s28_s10), 0  ;;  %s10431_s11 = smov (!%p29_p0, %s31_s11), %s5742_s30 }
   0x8   : > { %9650 = sst [smem:[#allocation5_spill]] %s10429_s10  ;;  %p332_p3 = pnand %p4939_p1, %p331_p2 }
   0x9   : > { %p33_p4 = scmp.ge.s32.totalorder %s10431_s11, 8 }
   0xa   : > { %335 = sbr.rel (%p332_p3) target bundleno = 1304 (0x518), region = 44 }
   0xb   : > { %s10433_s11 = smov (%p33_p4, %s10431_s11), 0 }
   0xc   : > { %9651 = sst [smem:[#allocation6_spill]] %s10433_s11 }
   0xf   : > { %s4940_s12 = sshll.u32 %s5734_s28, 4  ;;  %s4944_s13 = sshll.u32 %s5730_s27, 2 }
  0x10   : > { %p397_p5 = scmp.lt.s32.totalorder %s4940_s12, 127  ;;  %p409_p6 = scmp.lt.s32.totalorder %s4944_s13, 7 }
  0x11   : > { %s9652_s0 = sld [smem:[#allocation237_spill]]  ;;  %p4954_p7 = scmp.ne.s32.totalorder %s5730_s27, 0 }
  0x12   : > { %s10435_s12 = smov (!%p397_p5, %s4940_s12), 127  ;;  %s10437_s13 = smov (!%p409_p6, %s4944_s13), 7 }
  0x13   : > { %s4941_s14 = sshll.u32 %s10435_s12, 3  ;;  %s9653_s1 = sld [smem:[#allocation238_spill]] }
  0x14   : > { %s411_s23 = scalar_lea.vmem %s9282_s2, %s10437_s13  ;;  %s421_s11 = scalar_lea.vmem %s9284_s4, %s10437_s13 }
  0x15   : > { %s5860_s19 = scalar_lea.vmem %s9286_s6, %s4941_s14  ;;  %s5865_s22 = scalar_lea.vmem %s9287_s7, %s4941_s14 }
  0x16   : > { %s5870_s26 = scalar_lea.vmem %s9288_s8, %s4941_s14  ;;  %449 = sbr.rel (%p4954_p7) target bundleno = 220 (0xdc), region = 48 }
  0x17   : > { %s5834_s17 = scalar_lea.vmem %s9652_s0, %s4941_s14  ;;  %s426_s0 = scalar_lea.vmem %s9285_s5, %s10437_s13 }
  0x19   : > { %s5839_s20 = scalar_lea.vmem %s9653_s1, %s4941_s14 }
  0x1b   : > { %v5748_v0 = vmov 0.0  }
  0x1c   : > { %450 = vst [vmem:[#allocation2 + $0xb0] sm:$0xff] %v5748_v0 }
  0x1d   : > { %451 = vst [vmem:[#allocation2 + $0x1b0] sm:$0xff] %v5748_v0 }
  0x1e   : > { %452 = vst [vmem:[#allocation2 + $0xd8] sm:$0xff] %v5748_v0 }
  0x1f   : > { %453 = vst [vmem:[#allocation2 + $0x18] sm:$0xff] %v5748_v0 }
  0x20   : > { %454 = vst [vmem:[#allocation2 + $0x50] sm:$0xff] %v5748_v0 }
  0x21   : > { %455 = vst [vmem:[#allocation2 + $0x168] sm:$0xff] %v5748_v0 }
  0x22   : > { %456 = vst [vmem:[#allocation2 + $0x130] sm:$0xff] %v5748_v0 }
  0x23   : > { %457 = vst [vmem:[#allocation2 + $0x48] sm:$0xff] %v5748_v0 }
  0x24   : > { %458 = vst [vmem:[#allocation2 + $0x180] sm:$0xff] %v5748_v0 }
  0x25   : > { %459 = vst [vmem:[#allocation2 + $0x110] sm:$0xff] %v5748_v0 }
  0x26   : > { %460 = vst [vmem:[#allocation2 + $0x118] sm:$0xff] %v5748_v0 }
  0x27   : > { %461 = vst [vmem:[#allocation2 + $0x98] sm:$0xff] %v5748_v0 }
  0x28   : > { %462 = vst [vmem:[#allocation2 + $0x120] sm:$0xff] %v5748_v0 }
  0x29   : > { %463 = vst [vmem:[#allocation2 + $0x150] sm:$0xff] %v5748_v0 }
  0x2a   : > { %464 = vst [vmem:[#allocation2 + $0x108] sm:$0xff] %v5748_v0 }
  0x2b   : > { %465 = vst [vmem:[#allocation2 + $0x60] sm:$0xff] %v5748_v0 }
  0x2c   : > { %466 = vst [vmem:[#allocation2 + $0xe0] sm:$0xff] %v5748_v0 }
  0x2d   : > { %467 = vst [vmem:[#allocation2 + $0x188] sm:$0xff] %v5748_v0 }
  0x2e   : > { %468 = vst [vmem:[#allocation2 + $0x138] sm:$0xff] %v5748_v0 }
  0x2f   : > { %469 = vst [vmem:[#allocation2 + $0x140] sm:$0xff] %v5748_v0 }
  0x30   : > { %470 = vst [vmem:[#allocation2 + $0x80] sm:$0xff] %v5748_v0 }
  0x31   : > { %471 = vst [vmem:[#allocation2 + $0x1a8] sm:$0xff] %v5748_v0 }
  0x32   : > { %472 = vst [vmem:[#allocation2 + $0x1b8] sm:$0xff] %v5748_v0 }
  0x33   : > { %473 = vst [vmem:[#allocation2 + $0x28] sm:$0xff] %v5748_v0 }
  0x34   : > { %474 = vst [vmem:[#allocation2 + $0x1e8] sm:$0xff] %v5748_v0 }
  0x35   : > { %475 = vst [vmem:[#allocation2 + $0xf8] sm:$0xff] %v5748_v0 }
  0x36   : > { %476 = vst [vmem:[#allocation2 + $0x160] sm:$0xff] %v5748_v0 }
  0x37   : > { %477 = vst [vmem:[#allocation2 + $0x30] sm:$0xff] %v5748_v0 }
  0x38   : > { %478 = vst [vmem:[#allocation2 + $0x1e0] sm:$0xff] %v5748_v0 }
  0x39   : > { %479 = vst [vmem:[#allocation2] sm:$0xff] %v5748_v0 }
  0x3a   : > { %480 = vst [vmem:[#allocation2 + $0xf0] sm:$0xff] %v5748_v0 }
  0x3b   : > { %481 = vst [vmem:[#allocation2 + $0x8] sm:$0xff] %v5748_v0 }
  0x3c   : > { %482 = vst [vmem:[#allocation2 + $0x148] sm:$0xff] %v5748_v0 }
  0x3d   : > { %483 = vst [vmem:[#allocation2 + $0x1d0] sm:$0xff] %v5748_v0 }
  0x3e   : > { %484 = vst [vmem:[#allocation2 + $0x100] sm:$0xff] %v5748_v0 }
  0x3f   : > { %485 = vst [vmem:[#allocation2 + $0xc8] sm:$0xff] %v5748_v0 }
  0x40   : > { %486 = vst [vmem:[#allocation2 + $0x40] sm:$0xff] %v5748_v0 }
  0x41   : > { %487 = vst [vmem:[#allocation2 + $0x1f8] sm:$0xff] %v5748_v0 }
  0x42   : > { %488 = vst [vmem:[#allocation2 + $0x20] sm:$0xff] %v5748_v0 }
  0x43   : > { %489 = vst [vmem:[#allocation2 + $0x128] sm:$0xff] %v5748_v0 }
  0x44   : > { %490 = vst [vmem:[#allocation2 + $0x1a0] sm:$0xff] %v5748_v0 }
  0x45   : > { %491 = vst [vmem:[#allocation2 + $0x1f0] sm:$0xff] %v5748_v0 }
  0x46   : > { %492 = vst [vmem:[#allocation2 + $0xe8] sm:$0xff] %v5748_v0 }
  0x47   : > { %493 = vst [vmem:[#allocation2 + $0x78] sm:$0xff] %v5748_v0 }
  0x48   : > { %494 = vst [vmem:[#allocation2 + $0x70] sm:$0xff] %v5748_v0 }
  0x49   : > { %495 = vst [vmem:[#allocation2 + $0x90] sm:$0xff] %v5748_v0 }
  0x4a   : > { %496 = vst [vmem:[#allocation2 + $0x1d8] sm:$0xff] %v5748_v0 }
  0x4b   : > { %497 = vst [vmem:[#allocation2 + $0xd0] sm:$0xff] %v5748_v0 }
  0x4c   : > { %498 = vst [vmem:[#allocation2 + $0xb8] sm:$0xff] %v5748_v0 }
  0x4d   : > { %499 = vst [vmem:[#allocation2 + $0x88] sm:$0xff] %v5748_v0 }
  0x4e   : > { %500 = vst [vmem:[#allocation2 + $0xa8] sm:$0xff] %v5748_v0 }
  0x4f   : > { %501 = vst [vmem:[#allocation2 + $0x1c8] sm:$0xff] %v5748_v0 }
  0x50   : > { %502 = vst [vmem:[#allocation2 + $0x170] sm:$0xff] %v5748_v0 }
  0x51   : > { %503 = vst [vmem:[#allocation2 + $0x178] sm:$0xff] %v5748_v0 }
  0x52   : > { %504 = vst [vmem:[#allocation2 + $0x68] sm:$0xff] %v5748_v0 }
  0x53   : > { %505 = vst [vmem:[#allocation2 + $0x190] sm:$0xff] %v5748_v0 }
  0x54   : > { %506 = vst [vmem:[#allocation2 + $0x198] sm:$0xff] %v5748_v0 }
  0x55   : > { %507 = vst [vmem:[#allocation2 + $0x38] sm:$0xff] %v5748_v0 }
  0x56   : > { %508 = vst [vmem:[#allocation2 + $0xc0] sm:$0xff] %v5748_v0 }
  0x57   : > { %509 = vst [vmem:[#allocation2 + $0x1c0] sm:$0xff] %v5748_v0 }
  0x58   : > { %510 = vst [vmem:[#allocation2 + $0x158] sm:$0xff] %v5748_v0 }
  0x59   : > { %511 = vst [vmem:[#allocation2 + $0x10] sm:$0xff] %v5748_v0 }
  0x5a   : > { %512 = vst [vmem:[#allocation2 + $0x58] sm:$0xff] %v5748_v0 }
  0x5b   : > { %513 = vst [vmem:[#allocation2 + $0xa0] sm:$0xff] %v5748_v0 }
  0x5c   : > { %514 = vst [vmem:[#allocation3 + $0x68] sm:$0xff] %v5748_v0 }
  0x5d   : > { %515 = vst [vmem:[#allocation3 + $0x150] sm:$0xff] %v5748_v0 }
  0x5e   : > { %516 = vst [vmem:[#allocation3 + $0x70] sm:$0xff] %v5748_v0 }
  0x5f   : > { %517 = vst [vmem:[#allocation3 + $0x160] sm:$0xff] %v5748_v0 }
  0x60   : > { %518 = vst [vmem:[#allocation3 + $0xd0] sm:$0xff] %v5748_v0 }
  0x61   : > { %519 = vst [vmem:[#allocation3 + $0xd8] sm:$0xff] %v5748_v0 }
  0x62   : > { %520 = vst [vmem:[#allocation3 + $0x1e0] sm:$0xff] %v5748_v0 }
  0x63   : > { %521 = vst [vmem:[#allocation3 + $0x30] sm:$0xff] %v5748_v0 }
  0x64   : > { %522 = vst [vmem:[#allocation3 + $0x148] sm:$0xff] %v5748_v0 }
  0x65   : > { %523 = vst [vmem:[#allocation3 + $0x50] sm:$0xff] %v5748_v0 }
  0x66   : > { %524 = vst [vmem:[#allocation3 + $0x1f0] sm:$0xff] %v5748_v0 }
  0x67   : > { %525 = vst [vmem:[#allocation3 + $0x130] sm:$0xff] %v5748_v0 }
  0x68   : > { %526 = vst [vmem:[#allocation3 + $0x190] sm:$0xff] %v5748_v0 }
  0x69   : > { %527 = vst [vmem:[#allocation3 + $0x8] sm:$0xff] %v5748_v0 }
  0x6a   : > { %528 = vst [vmem:[#allocation3 + $0x88] sm:$0xff] %v5748_v0 }
  0x6b   : > { %529 = vst [vmem:[#allocation3 + $0x38] sm:$0xff] %v5748_v0 }
  0x6c   : > { %530 = vst [vmem:[#allocation3 + $0xe0] sm:$0xff] %v5748_v0 }
  0x6d   : > { %531 = vst [vmem:[#allocation3 + $0x10] sm:$0xff] %v5748_v0 }
  0x6e   : > { %532 = vst [vmem:[#allocation3 + $0x1a8] sm:$0xff] %v5748_v0 }
  0x6f   : > { %533 = vst [vmem:[#allocation3 + $0xa0] sm:$0xff] %v5748_v0 }
  0x70   : > { %534 = vst [vmem:[#allocation3 + $0x1c0] sm:$0xff] %v5748_v0 }
  0x71   : > { %535 = vst [vmem:[#allocation3 + $0x78] sm:$0xff] %v5748_v0 }
  0x72   : > { %536 = vst [vmem:[#allocation3 + $0x108] sm:$0xff] %v5748_v0 }
  0x73   : > { %537 = vst [vmem:[#allocation3 + $0x80] sm:$0xff] %v5748_v0 }
  0x74   : > { %538 = vst [vmem:[#allocation3 + $0x58] sm:$0xff] %v5748_v0 }
  0x75   : > { %539 = vst [vmem:[#allocation3 + $0x48] sm:$0xff] %v5748_v0 }
  0x76   : > { %540 = vst [vmem:[#allocation3 + $0x40] sm:$0xff] %v5748_v0 }
  0x77   : > { %541 = vst [vmem:[#allocation3 + $0x1a0] sm:$0xff] %v5748_v0 }
  0x78   : > { %542 = vst [vmem:[#allocation3 + $0x198] sm:$0xff] %v5748_v0 }
  0x79   : > { %543 = vst [vmem:[#allocation3 + $0xe8] sm:$0xff] %v5748_v0 }
  0x7a   : > { %544 = vst [vmem:[#allocation3 + $0x168] sm:$0xff] %v5748_v0 }
  0x7b   : > { %545 = vst [vmem:[#allocation3 + $0x158] sm:$0xff] %v5748_v0 }
  0x7c   : > { %546 = vst [vmem:[#allocation3 + $0x1d8] sm:$0xff] %v5748_v0 }
  0x7d   : > { %547 = vst [vmem:[#allocation3 + $0x28] sm:$0xff] %v5748_v0 }
  0x7e   : > { %548 = vst [vmem:[#allocation3] sm:$0xff] %v5748_v0 }
  0x7f   : > { %549 = vst [vmem:[#allocation3 + $0x1c8] sm:$0xff] %v5748_v0 }
  0x80   : > { %550 = vst [vmem:[#allocation3 + $0x1e8] sm:$0xff] %v5748_v0 }
  0x81   : > { %551 = vst [vmem:[#allocation3 + $0x140] sm:$0xff] %v5748_v0 }
  0x82   : > { %552 = vst [vmem:[#allocation3 + $0x60] sm:$0xff] %v5748_v0 }
  0x83   : > { %553 = vst [vmem:[#allocation3 + $0x98] sm:$0xff] %v5748_v0 }
  0x84   : > { %554 = vst [vmem:[#allocation3 + $0x1b8] sm:$0xff] %v5748_v0 }
  0x85   : > { %555 = vst [vmem:[#allocation3 + $0x100] sm:$0xff] %v5748_v0 }
  0x86   : > { %556 = vst [vmem:[#allocation3 + $0xc8] sm:$0xff] %v5748_v0 }
  0x87   : > { %557 = vst [vmem:[#allocation3 + $0xf8] sm:$0xff] %v5748_v0 }
  0x88   : > { %558 = vst [vmem:[#allocation3 + $0x178] sm:$0xff] %v5748_v0 }
  0x89   : > { %559 = vst [vmem:[#allocation3 + $0x180] sm:$0xff] %v5748_v0 }
  0x8a   : > { %560 = vst [vmem:[#allocation3 + $0xb0] sm:$0xff] %v5748_v0 }
  0x8b   : > { %561 = vst [vmem:[#allocation3 + $0x110] sm:$0xff] %v5748_v0 }
  0x8c   : > { %562 = vst [vmem:[#allocation3 + $0x20] sm:$0xff] %v5748_v0 }
  0x8d   : > { %563 = vst [vmem:[#allocation3 + $0xb8] sm:$0xff] %v5748_v0 }
  0x8e   : > { %564 = vst [vmem:[#allocation3 + $0x120] sm:$0xff] %v5748_v0 }
  0x8f   : > { %565 = vst [vmem:[#allocation3 + $0x90] sm:$0xff] %v5748_v0 }
  0x90   : > { %566 = vst [vmem:[#allocation3 + $0xa8] sm:$0xff] %v5748_v0 }
  0x91   : > { %567 = vst [vmem:[#allocation3 + $0xc0] sm:$0xff] %v5748_v0 }
  0x92   : > { %568 = vst [vmem:[#allocation3 + $0x138] sm:$0xff] %v5748_v0 }
  0x93   : > { %569 = vst [vmem:[#allocation3 + $0x188] sm:$0xff] %v5748_v0 }
  0x94   : > { %570 = vst [vmem:[#allocation3 + $0x1b0] sm:$0xff] %v5748_v0 }
  0x95   : > { %571 = vst [vmem:[#allocation3 + $0x18] sm:$0xff] %v5748_v0 }
  0x96   : > { %572 = vst [vmem:[#allocation3 + $0xf0] sm:$0xff] %v5748_v0 }
  0x97   : > { %573 = vst [vmem:[#allocation3 + $0x128] sm:$0xff] %v5748_v0 }
  0x98   : > { %574 = vst [vmem:[#allocation3 + $0x1f8] sm:$0xff] %v5748_v0 }
  0x99   : > { %575 = vst [vmem:[#allocation3 + $0x170] sm:$0xff] %v5748_v0 }
  0x9a   : > { %576 = vst [vmem:[#allocation3 + $0x1d0] sm:$0xff] %v5748_v0 }
  0x9b   : > { %577 = vst [vmem:[#allocation3 + $0x118] sm:$0xff] %v5748_v0 }
  0x9c   : > { %578 = vst [vmem:[#allocation4 + $0xc0] sm:$0xff] %v5748_v0 }
  0x9d   : > { %579 = vst [vmem:[#allocation4 + $0x138] sm:$0xff] %v5748_v0 }
  0x9e   : > { %580 = vst [vmem:[#allocation4] sm:$0xff] %v5748_v0 }
  0x9f   : > { %581 = vst [vmem:[#allocation4 + $0xc8] sm:$0xff] %v5748_v0 }
  0xa0   : > { %582 = vst [vmem:[#allocation4 + $0x1d0] sm:$0xff] %v5748_v0 }
  0xa1   : > { %583 = vst [vmem:[#allocation4 + $0x160] sm:$0xff] %v5748_v0 }
  0xa2   : > { %584 = vst [vmem:[#allocation4 + $0x1f0] sm:$0xff] %v5748_v0 }
  0xa3   : > { %585 = vst [vmem:[#allocation4 + $0xe8] sm:$0xff] %v5748_v0 }
  0xa4   : > { %586 = vst [vmem:[#allocation4 + $0x100] sm:$0xff] %v5748_v0 }
  0xa5   : > { %587 = vst [vmem:[#allocation4 + $0xd0] sm:$0xff] %v5748_v0 }
  0xa6   : > { %588 = vst [vmem:[#allocation4 + $0x70] sm:$0xff] %v5748_v0 }
  0xa7   : > { %589 = vst [vmem:[#allocation4 + $0x168] sm:$0xff] %v5748_v0 }
  0xa8   : > { %590 = vst [vmem:[#allocation4 + $0x158] sm:$0xff] %v5748_v0 }
  0xa9   : > { %591 = vst [vmem:[#allocation4 + $0x190] sm:$0xff] %v5748_v0 }
  0xaa   : > { %592 = vst [vmem:[#allocation4 + $0x88] sm:$0xff] %v5748_v0 }
  0xab   : > { %593 = vst [vmem:[#allocation4 + $0x60] sm:$0xff] %v5748_v0 }
  0xac   : > { %594 = vst [vmem:[#allocation4 + $0x68] sm:$0xff] %v5748_v0 }
  0xad   : > { %595 = vst [vmem:[#allocation4 + $0xd8] sm:$0xff] %v5748_v0 }
  0xae   : > { %596 = vst [vmem:[#allocation4 + $0xf0] sm:$0xff] %v5748_v0 }
  0xaf   : > { %597 = vst [vmem:[#allocation4 + $0x80] sm:$0xff] %v5748_v0 }
  0xb0   : > { %598 = vst [vmem:[#allocation4 + $0x78] sm:$0xff] %v5748_v0 }
  0xb1   : > { %599 = vst [vmem:[#allocation4 + $0x180] sm:$0xff] %v5748_v0 }
  0xb2   : > { %600 = vst [vmem:[#allocation4 + $0x18] sm:$0xff] %v5748_v0 }
  0xb3   : > { %601 = vst [vmem:[#allocation4 + $0x148] sm:$0xff] %v5748_v0 }
  0xb4   : > { %602 = vst [vmem:[#allocation4 + $0x1c8] sm:$0xff] %v5748_v0 }
  0xb5   : > { %603 = vst [vmem:[#allocation4 + $0x188] sm:$0xff] %v5748_v0 }
  0xb6   : > { %604 = vst [vmem:[#allocation4 + $0x150] sm:$0xff] %v5748_v0 }
  0xb7   : > { %605 = vst [vmem:[#allocation4 + $0xa8] sm:$0xff] %v5748_v0 }
  0xb8   : > { %606 = vst [vmem:[#allocation4 + $0x108] sm:$0xff] %v5748_v0 }
  0xb9   : > { %607 = vst [vmem:[#allocation4 + $0x50] sm:$0xff] %v5748_v0 }
  0xba   : > { %608 = vst [vmem:[#allocation4 + $0xb8] sm:$0xff] %v5748_v0 }
  0xbb   : > { %609 = vst [vmem:[#allocation4 + $0x28] sm:$0xff] %v5748_v0 }
  0xbc   : > { %610 = vst [vmem:[#allocation4 + $0x38] sm:$0xff] %v5748_v0 }
  0xbd   : > { %611 = vst [vmem:[#allocation4 + $0x40] sm:$0xff] %v5748_v0 }
  0xbe   : > { %612 = vst [vmem:[#allocation4 + $0x98] sm:$0xff] %v5748_v0 }
  0xbf   : > { %613 = vst [vmem:[#allocation4 + $0x90] sm:$0xff] %v5748_v0 }
  0xc0   : > { %614 = vst [vmem:[#allocation4 + $0x30] sm:$0xff] %v5748_v0 }
  0xc1   : > { %615 = vst [vmem:[#allocation4 + $0x140] sm:$0xff] %v5748_v0 }
  0xc2   : > { %616 = vst [vmem:[#allocation4 + $0x1d8] sm:$0xff] %v5748_v0 }
  0xc3   : > { %617 = vst [vmem:[#allocation4 + $0x1e8] sm:$0xff] %v5748_v0 }
  0xc4   : > { %618 = vst [vmem:[#allocation4 + $0x1a8] sm:$0xff] %v5748_v0 }
  0xc5   : > { %619 = vst [vmem:[#allocation4 + $0x1e0] sm:$0xff] %v5748_v0 }
  0xc6   : > { %620 = vst [vmem:[#allocation4 + $0x1b0] sm:$0xff] %v5748_v0 }
  0xc7   : > { %621 = vst [vmem:[#allocation4 + $0x1b8] sm:$0xff] %v5748_v0 }
  0xc8   : > { %622 = vst [vmem:[#allocation4 + $0x110] sm:$0xff] %v5748_v0 }
  0xc9   : > { %623 = vst [vmem:[#allocation4 + $0xa0] sm:$0xff] %v5748_v0 }
  0xca   : > { %624 = vst [vmem:[#allocation4 + $0x118] sm:$0xff] %v5748_v0 }
  0xcb   : > { %625 = vst [vmem:[#allocation4 + $0x198] sm:$0xff] %v5748_v0 }
  0xcc   : > { %626 = vst [vmem:[#allocation4 + $0x178] sm:$0xff] %v5748_v0 }
  0xcd   : > { %627 = vst [vmem:[#allocation4 + $0x58] sm:$0xff] %v5748_v0 }
  0xce   : > { %628 = vst [vmem:[#allocation4 + $0x8] sm:$0xff] %v5748_v0 }
  0xcf   : > { %629 = vst [vmem:[#allocation4 + $0x1c0] sm:$0xff] %v5748_v0 }
  0xd0   : > { %630 = vst [vmem:[#allocation4 + $0x1f8] sm:$0xff] %v5748_v0 }
  0xd1   : > { %631 = vst [vmem:[#allocation4 + $0x130] sm:$0xff] %v5748_v0 }
  0xd2   : > { %632 = vst [vmem:[#allocation4 + $0x120] sm:$0xff] %v5748_v0 }
  0xd3   : > { %633 = vst [vmem:[#allocation4 + $0x10] sm:$0xff] %v5748_v0 }
  0xd4   : > { %634 = vst [vmem:[#allocation4 + $0x170] sm:$0xff] %v5748_v0 }
  0xd5   : > { %635 = vst [vmem:[#allocation4 + $0x20] sm:$0xff] %v5748_v0 }
  0xd6   : > { %636 = vst [vmem:[#allocation4 + $0xf8] sm:$0xff] %v5748_v0 }
  0xd7   : > { %637 = vst [vmem:[#allocation4 + $0xe0] sm:$0xff] %v5748_v0 }
  0xd8   : > { %638 = vst [vmem:[#allocation4 + $0x1a0] sm:$0xff] %v5748_v0 }
  0xd9   : > { %639 = vst [vmem:[#allocation4 + $0xb0] sm:$0xff] %v5748_v0 }
  0xda   : > { %640 = vst [vmem:[#allocation4 + $0x48] sm:$0xff] %v5748_v0 }
  0xdb   : > { %641 = vst [vmem:[#allocation4 + $0x128] sm:$0xff] %v5748_v0 }
  0xdc PF: > { %v646_v1 = vld [vmem:[%s5834_s17 + $0x20] sm:$0xff]  ;;  %v644_v2 = vld [vmem:[%s5834_s17 + $0x10] sm:$0xff]  ;;  %v5749_v4 = vmov 0   ;;  %v647_v5 = vld [vmem:[%s5834_s17 + $0x28] sm:$0xff]  ;;  %p5147_p8 = scmp.ne.s32.totalorder %s5730_s27, 1 }
  0xdd   : > { %v642_v3 = vld [vmem:[%s5834_s17] sm:$0xff]  ;;  %5195 = vset.pattern.permute.xlu2 %v5749_v4  ;;  %5194 = vset.pattern.permute.xlu1 %v5749_v4  ;;  %v645_v6 = vld [vmem:[%s5834_s17 + $0x18] sm:$0xff]  ;;  %v643_v7 = vld [vmem:[%s5834_s17 + $0x8] sm:$0xff] }
  0xde   : > { %5193 = vset.pattern.permute.xlu0 %v5749_v4  ;;  %709 = vperm.xlu2 %5195, %v646_v1   ;;  %v650_v8 = vld [vmem:[%s5834_s17 + $0x40] sm:$0xff]  ;;  %v649_v9 = vld [vmem:[%s5834_s17 + $0x38] sm:$0xff]  ;;  %v648_v10 = vld [vmem:[%s5834_s17 + $0x30] sm:$0xff] }
  0xdf   : > { %699 = vperm.xlu1 %5194, %v644_v2   ;;  %689 = vperm.xlu0 %5193, %v642_v3   ;;  %v653_v11 = vld [vmem:[%s5834_s17 + $0x58] sm:$0xff]  ;;  %v652_v12 = vld [vmem:[%s5834_s17 + $0x50] sm:$0xff]  ;;  %v651_v13 = vld [vmem:[%s5834_s17 + $0x48] sm:$0xff] }
  0xe0   : > { %v656_v14 = vld [vmem:[%s5834_s17 + $0x70] sm:$0xff]  ;;  %v655_v15 = vld [vmem:[%s5834_s17 + $0x68] sm:$0xff]  ;;  %v654_v16 = vld [vmem:[%s5834_s17 + $0x60] sm:$0xff] }
  0xe1   : > { %v659_v17 = vld [vmem:[%s5839_s20 + $0x8] sm:$0xff]  ;;  %v658_v18 = vld [vmem:[%s5839_s20] sm:$0xff]  ;;  %v657_v19 = vld [vmem:[%s5834_s17 + $0x78] sm:$0xff] }
  0xe2   : > { %v662_v20 = vld [vmem:[%s5839_s20 + $0x20] sm:$0xff]  ;;  %v661_v21 = vld [vmem:[%s5839_s20 + $0x18] sm:$0xff]  ;;  %v660_v22 = vld [vmem:[%s5839_s20 + $0x10] sm:$0xff] }
  0xe3   : > { %v665_v23 = vld [vmem:[%s5839_s20 + $0x38] sm:$0xff]  ;;  %v664_v24 = vld [vmem:[%s5839_s20 + $0x30] sm:$0xff]  ;;  %v663_v25 = vld [vmem:[%s5839_s20 + $0x28] sm:$0xff] }
  0xe4   : > { %v668_v26 = vld [vmem:[%s5839_s20 + $0x50] sm:$0xff]  ;;  %v667_v27 = vld [vmem:[%s5839_s20 + $0x48] sm:$0xff]  ;;  %v666_v28 = vld [vmem:[%s5839_s20 + $0x40] sm:$0xff] }
  0xe5   : > { %v671_v29 = vld [vmem:[%s5839_s20 + $0x68] sm:$0xff]  ;;  %v670_v30 = vld [vmem:[%s5839_s20 + $0x60] sm:$0xff]  ;;  %v669_v31 = vld [vmem:[%s5839_s20 + $0x58] sm:$0xff] }
  0xe6   : > { %714 = vperm.xlu2 %5195, %v647_v5   ;;  %v673_v32 = vld [vmem:[%s5839_s20 + $0x78] sm:$0xff]  ;;  %v672_v33 = vld [vmem:[%s5839_s20 + $0x70] sm:$0xff]  ;;  %v674_v34 = vld [vmem:[%s411_s23] sm:$0xf]  ;;  %s9803_s20 = scalar_lea.vmem %s9283_s3, %s10437_s13 }
  0xe7   : > { %704 = vperm.xlu1 %5194, %v645_v6   ;;  %694 = vperm.xlu0 %5193, %v643_v7   ;;  %v6102_v35 = vperm.slane %v674_v34, 0  ;;  %v6104_v36 = vperm.slane %v674_v34, 1  ;;  %v6106_v37 = vperm.slane %v674_v34, 2  ;;  %v6108_v38 = vperm.slane %v674_v34, 3 }
  0xee   : > { %729 = vperm.xlu2 %5195, %v650_v8  }
  0xef   : > { %724 = vperm.xlu1 %5194, %v649_v9   ;;  %719 = vperm.xlu0 %5193, %v648_v10  }
  0xf6   : > { %744 = vperm.xlu2 %5195, %v653_v11  }
  0xf7   : > { %739 = vperm.xlu1 %5194, %v652_v12   ;;  %734 = vperm.xlu0 %5193, %v651_v13  }
  0xfe   : > { %759 = vperm.xlu2 %5195, %v656_v14  }
  0xff   : > { %754 = vperm.xlu1 %5194, %v655_v15   ;;  %749 = vperm.xlu0 %5193, %v654_v16  }
 0x106   : > { %3105 = vperm.xlu2 %5195, %v659_v17  }
 0x107   : > { %3100 = vperm.xlu1 %5194, %v658_v18   ;;  %764 = vperm.xlu0 %5193, %v657_v19  }
 0x10e   : > { %3120 = vperm.xlu2 %5195, %v662_v20  }
 0x10f   : > { %3115 = vperm.xlu1 %5194, %v661_v21   ;;  %3110 = vperm.xlu0 %5193, %v660_v22  }
 0x116   : > { %3135 = vperm.xlu2 %5195, %v665_v23  }
 0x117   : > { %3130 = vperm.xlu1 %5194, %v664_v24   ;;  %3125 = vperm.xlu0 %5193, %v663_v25  }
 0x11e   : > { %3150 = vperm.xlu2 %5195, %v668_v26  }
 0x11f   : > { %3145 = vperm.xlu1 %5194, %v667_v27   ;;  %3140 = vperm.xlu0 %5193, %v666_v28  }
 0x126   : > { %3165 = vperm.xlu2 %5195, %v671_v29  }
 0x127   : > { %3160 = vperm.xlu1 %5194, %v670_v30   ;;  %3155 = vperm.xlu0 %5193, %v669_v31  }
 0x12f   : > { %3175 = vperm.xlu1 %5194, %v673_v32   ;;  %3170 = vperm.xlu0 %5193, %v672_v33  }
 0x138   : > { %v710_v39 = vpop.permute.xlu2 %709 }
 0x139   : > { %v783_v40 = vsub.f32 %v6102_v35, %v710_v39  ;;  %v784_v41 = vsub.f32 %v6104_v36, %v710_v39  ;;  %v785_v42 = vsub.f32 %v6106_v37, %v710_v39  ;;  %v786_v43 = vsub.f32 %v6108_v38, %v710_v39 }
 0x13b   : > { %v6114_v44 = vmul.f32 4.0, %v783_v40  ;;  %v6116_v45 = vmul.f32 4.0, %v784_v41  ;;  %v6118_v46 = vmul.f32 4.0, %v785_v42  ;;  %v6120_v47 = vmul.f32 4.0, %v786_v43 }
 0x13c   : > { %v5035_v48 = vmul.f32 -4.0, %v783_v40  ;;  %v5036_v49 = vmul.f32 -4.0, %v784_v41  ;;  %v5037_v50 = vmul.f32 -4.0, %v785_v42  ;;  %v5038_v51 = vmul.f32 -4.0, %v786_v43 }
 0x13d   : > { %9654 = vst [vmem:[#allocation7_spill] sm:$0xff] %v6116_v45  ;;  %v2383_v56 = vand.u32 2147483647, %v6114_v44  ;;  %v2384_v57 = vand.u32 2147483647, %v6116_v45 }
 0x13e   : > { %9655 = vst [vmem:[#allocation8_spill] sm:$0xff] %v6118_v46  ;;  %v1183_v52 = vmul.f32 1.442695, %v5035_v48  ;;  %v1185_v53 = vmul.f32 1.442695, %v5036_v49 }
 0x13f   : > { %9656 = vst [vmem:[#allocation9_spill] sm:$0xff] %v6120_v47  ;;  %v1187_v54 = vmul.f32 1.442695, %v5037_v50  ;;  %v1189_v55 = vmul.f32 1.442695, %v5038_v51  ;;  %v2447_v61 = vsub.f32 0.0, %v2383_v56 }
 0x140   : > { %5196 = vpow2.f32 %v1183_v52  ;;  %v2385_v58 = vand.u32 2147483647, %v6118_v46  ;;  %v2386_v59 = vand.u32 2147483647, %v6120_v47  ;;  %v715_v60 = vpop.permute.xlu2 %714  ;;  %v2448_v62 = vsub.f32 0.0, %v2384_v57 }
 0x141   : > { %5198 = vpow2.f32 %v1185_v53  ;;  %v787_v63 = vsub.f32 %v6102_v35, %v715_v60  ;;  %v788_v2 = vsub.f32 %v6104_v36, %v715_v60  ;;  %v2527_v3 = vmul.f32 1.442695, %v2447_v61 }
 0x142   : > { %5200 = vpow2.f32 %v1187_v54  ;;  %v2449_v0 = vsub.f32 0.0, %v2385_v58  ;;  %v2450_v1 = vsub.f32 0.0, %v2386_v59  ;;  %v2529_v4 = vmul.f32 1.442695, %v2448_v62 }
 0x143   : > { %5202 = vpow2.f32 %v1189_v55  ;;  %v789_v5 = vsub.f32 %v6106_v37, %v715_v60  ;;  %v790_v8 = vsub.f32 %v6108_v38, %v715_v60  ;;  %v5039_v11 = vmul.f32 -4.0, %v787_v63 }
 0x144   : > { %v2531_v6 = vmul.f32 1.442695, %v2449_v0  ;;  %v2533_v7 = vmul.f32 1.442695, %v2450_v1  ;;  %5204 = vpow2.f32 %v2527_v3  ;;  %v6133_v14 = vmul.f32 4.0, %v787_v63 }
 0x145   : > { %5206 = vpow2.f32 %v2529_v4  ;;  %v5040_v15 = vmul.f32 -4.0, %v788_v2  ;;  %v6137_v18 = vmul.f32 4.0, %v788_v2  ;;  %v5041_v19 = vmul.f32 -4.0, %v789_v5 }
 0x146   : > { %v5197_v12 = vpop.eup %5196  ;;  %9657 = vst [vmem:[#allocation10_spill] sm:$0xff] %v6133_v14  ;;  %5208 = vpow2.f32 %v2531_v6  ;;  %v6141_v22 = vmul.f32 4.0, %v789_v5  ;;  %v6143_v23 = vmul.f32 4.0, %v790_v8  ;;  %v5042_v26 = vmul.f32 -4.0, %v790_v8 }
 0x147   : > { %v5199_v16 = vpop.eup %5198  ;;  %v6135_v17 = vadd.f32 1.0, %v5197_v12  ;;  %9658 = vst [vmem:[#allocation11_spill] sm:$0xff] %v6137_v18  ;;  %5210 = vpow2.f32 %v2533_v7  ;;  %v1191_v27 = vmul.f32 1.442695, %v5039_v11  ;;  %v1193_v30 = vmul.f32 1.442695, %v5040_v15 }
 0x148   : > { %v5201_v20 = vpop.eup %5200  ;;  %v6139_v21 = vadd.f32 1.0, %v5199_v16  ;;  %9660 = vst [vmem:[#allocation13_spill] sm:$0xff] %v6141_v22  ;;  %v1195_v32 = vmul.f32 1.442695, %v5041_v19  ;;  %v2387_v33 = vand.u32 2147483647, %v6133_v14  ;;  %v730_v59 = vpop.permute.xlu2 %729 }
 0x149   : > { %9661 = vst [vmem:[#allocation14_spill] sm:$0xff] %v6143_v23  ;;  %v5203_v24 = vpop.eup %5202  ;;  %v6145_v25 = vadd.f32 1.0, %v5201_v20  ;;  %5212 = vrcp.f32 %v6135_v17  ;;  %v2388_v34 = vand.u32 2147483647, %v6137_v18  ;;  %v2389_v41 = vand.u32 2147483647, %v6141_v22 }
 0x14a   : > { %9659 = vst [vmem:[#allocation12_spill] sm:$0xff] %v6139_v21  ;;  %v6148_v28 = vadd.f32 1.0, %v5203_v24  ;;  %5214 = vrcp.f32 %v6139_v21  ;;  %v5205_v31 = vpop.eup %5204  ;;  %v2390_v42 = vand.u32 2147483647, %v6143_v23  ;;  %v1197_v49 = vmul.f32 1.442695, %v5042_v26 }
 0x14b   : > { %9662 = vst [vmem:[#allocation15_spill] sm:$0xff] %v6145_v25  ;;  %5216 = vrcp.f32 %v6145_v25  ;;  %v5207_v39 = vpop.eup %5206  ;;  %v2639_v40 = vadd.f32 1.0, %v5205_v31  ;;  %v2451_v50 = vsub.f32 0.0, %v2387_v33  ;;  %v2452_v57 = vsub.f32 0.0, %v2388_v34 }
 0x14c   : > { %9663 = vst [vmem:[#allocation16_spill] sm:$0xff] %v6148_v28  ;;  %5218 = vrcp.f32 %v6148_v28  ;;  %v5209_v43 = vpop.eup %5208  ;;  %v2640_v48 = vadd.f32 1.0, %v5207_v39  ;;  %v2453_v58 = vsub.f32 0.0, %v2389_v41  ;;  %v2454_v63 = vsub.f32 0.0, %v2390_v42 }
 0x14d   : > { %5220 = vpow2.f32 %v1191_v27  ;;  %v5211_v51 = vpop.eup %5210  ;;  %v2641_v52 = vadd.f32 1.0, %v5209_v43  ;;  %v2535_v3 = vmul.f32 1.442695, %v2451_v50  ;;  %v799_v6 = vsub.f32 %v6102_v35, %v730_v59 }
 0x14e   : > { %5222 = vlog2.f32 %v2639_v40  ;;  %v2642_v56 = vadd.f32 1.0, %v5211_v51  ;;  %v800_v7 = vsub.f32 %v6104_v36, %v730_v59  ;;  %v2537_v12 = vmul.f32 1.442695, %v2452_v57 }
 0x14f   : > { %v6160_v55 = vpop.eup %5212  ;;  %5224 = vlog2.f32 %v2640_v48  ;;  %v2539_v15 = vmul.f32 1.442695, %v2453_v58  ;;  %v801_v20 = vsub.f32 %v6106_v37, %v730_v59  ;;  %v802_v24 = vsub.f32 %v6108_v38, %v730_v59 }
 0x150   : > { %v6162_v60 = vpop.eup %5214  ;;  %5226 = vlog2.f32 %v2641_v52  ;;  %v6170_v1 = vmul.f32 %v6160_v55, %v6135_v17  ;;  %v2541_v31 = vmul.f32 1.442695, %v2454_v63  ;;  %v5051_v34 = vmul.f32 -4.0, %v799_v6 }
 0x151   : > { %9664 = vst [vmem:[#allocation17_spill] sm:$0xff] %v6162_v60  ;;  %v6166_v0 = vpop.eup %5216  ;;  %v6174_v2 = vmul.f32 %v6162_v60, %v6139_v21  ;;  %5228 = vlog2.f32 %v2642_v56  ;;  %v5052_v39 = vmul.f32 -4.0, %v800_v7  ;;  %v6205_v42 = vmul.f32 4.0, %v799_v6 }
 0x152   : > { %9665 = vst [vmem:[#allocation18_spill] sm:$0xff] %v6166_v0  ;;  %v6176_v4 = vpop.eup %5218  ;;  %v6180_v5 = vmul.f32 %v6166_v0, %v6145_v25  ;;  %5230 = vpow2.f32 %v1193_v30  ;;  %v6207_v43 = vmul.f32 4.0, %v800_v7  ;;  %v6211_v50 = vmul.f32 4.0, %v802_v24 }
 0x153   : > { %9666 = vst [vmem:[#allocation19_spill] sm:$0xff] %v6174_v2  ;;  %v5221_v8 = vpop.eup %5220  ;;  %v6186_v11 = vmul.f32 %v6176_v4, %v6148_v28  ;;  %5232 = vpow2.f32 %v1195_v32  ;;  %v1215_v51 = vmul.f32 1.442695, %v5051_v34  ;;  %v5053_v57 = vmul.f32 -4.0, %v801_v20 }
 0x154   : > { %9667 = vst [vmem:[#allocation20_spill] sm:$0xff] %v6176_v4  ;;  %v6188_v16 = vpop.eup %5222  ;;  %5234 = vpow2.f32 %v1197_v49  ;;  %v6190_v19 = vadd.f32 1.0, %v5221_v8  ;;  %v6209_v49 = vmul.f32 4.0, %v801_v20  ;;  %v5054_v58 = vmul.f32 -4.0, %v802_v24 }
 0x155   : > { %9668 = vst [vmem:[#allocation21_spill] sm:$0xff] %v6180_v5  ;;  %v6194_v26 = vpop.eup %5224  ;;  %5236 = vpow2.f32 %v2535_v3  ;;  %v1217_v3 = vmul.f32 1.442695, %v5052_v39 }
 0x156   : > { %9669 = vst [vmem:[#allocation22_spill] sm:$0xff] %v6186_v11  ;;  %v6198_v32 = vpop.eup %5226  ;;  %5238 = vrcp.f32 %v6190_v19  ;;  %v2401_v24 = vand.u32 2147483647, %v6209_v49 }
 0x157   : > { %9670 = vst [vmem:[#allocation23_spill] sm:$0xff] %v6188_v16  ;;  %v6202_v40 = vpop.eup %5228  ;;  %5240 = vpow2.f32 %v2537_v12  ;;  %v2399_v12 = vand.u32 2147483647, %v6205_v42 }
 0x158   : > { %9671 = vst [vmem:[#allocation24_spill] sm:$0xff] %v6190_v19  ;;  %v5231_v48 = vpop.eup %5230  ;;  %5242 = vpow2.f32 %v2539_v15  ;;  %v2400_v15 = vand.u32 2147483647, %v6207_v43 }
 0x159   : > { %9672 = vst [vmem:[#allocation25_spill] sm:$0xff] %v6194_v26  ;;  %v5233_v52 = vpop.eup %5232  ;;  %v6213_v56 = vadd.f32 1.0, %v5231_v48  ;;  %5244 = vpow2.f32 %v2541_v31  ;;  %v2402_v31 = vand.u32 2147483647, %v6211_v50  ;;  %v1219_v48 = vmul.f32 1.442695, %v5053_v57 }
 0x15a   : > { %9673 = vst [vmem:[#allocation26_spill] sm:$0xff] %v6198_v32  ;;  %v5235_v59 = vpop.eup %5234  ;;  %v6215_v63 = vadd.f32 1.0, %v5233_v52  ;;  %5246 = vpow2.f32 %v1215_v51  ;;  %v1221_v51 = vmul.f32 1.442695, %v5054_v58  ;;  %v2463_v61 = vsub.f32 0.0, %v2399_v12 }
 0x15b   : > { %9674 = vst [vmem:[#allocation27_spill] sm:$0xff] %v6202_v40  ;;  %v5237_v7 = vpop.eup %5236  ;;  %v6218_v8 = vadd.f32 1.0, %v5235_v59  ;;  %5248 = vrcp.f32 %v6213_v56  ;;  %v2464_v13 = vsub.f32 0.0, %v2400_v15  ;;  %v2465_v58 = vsub.f32 0.0, %v2401_v24 }
 0x15c   : > { %9675 = vst [vmem:[#allocation28_spill] sm:$0xff] %v6205_v42  ;;  %v6223_v34 = vpop.eup %5238  ;;  %5250 = vrcp.f32 %v6215_v63  ;;  %v2643_v20 = vadd.f32 1.0, %v5237_v7  ;;  %v745_v7 = vpop.permute.xlu2 %744  ;;  %v2466_v52 = vsub.f32 0.0, %v2402_v31 }
 0x15d   : > { %9676 = vst [vmem:[#allocation29_spill] sm:$0xff] %v6207_v43  ;;  %v5241_v39 = vpop.eup %5240  ;;  %5252 = vrcp.f32 %v6218_v8  ;;  %v6232_v6 = vmul.f32 %v6223_v34, %v6190_v19  ;;  %v811_v12 = vsub.f32 %v6102_v35, %v745_v7  ;;  %v812_v24 = vsub.f32 %v6104_v36, %v745_v7 }
 0x15e   : > { %9677 = vst [vmem:[#allocation30_spill] sm:$0xff] %v6209_v49  ;;  %v5243_v59 = vpop.eup %5242  ;;  %v2644_v62 = vadd.f32 1.0, %v5241_v39  ;;  %5254 = vlog2.f32 %v2643_v20  ;;  %v2565_v20 = vmul.f32 1.442695, %v2466_v52  ;;  %v813_v29 = vsub.f32 %v6106_v37, %v745_v7 }
 0x15f   : > { %9678 = vst [vmem:[#allocation31_spill] sm:$0xff] %v6211_v50  ;;  %v5245_v54 = vpop.eup %5244  ;;  %v2645_v53 = vadd.f32 1.0, %v5243_v59  ;;  %5256 = vpow2.f32 %v1217_v3  ;;  %v2563_v59 = vmul.f32 1.442695, %v2465_v58  ;;  %v5063_v52 = vmul.f32 -4.0, %v811_v12 }
 0x160   : > { %9679 = vst [vmem:[#allocation32_spill] sm:$0xff] %v6213_v56  ;;  %v5247_v10 = vpop.eup %5246  ;;  %v2646_v57 = vadd.f32 1.0, %v5245_v54  ;;  %5258 = vlog2.f32 %v2644_v62  ;;  %v2559_v54 = vmul.f32 1.442695, %v2463_v61  ;;  %v6274_v27 = vmul.f32 4.0, %v812_v24 }
 0x161   : > { %9680 = vst [vmem:[#allocation33_spill] sm:$0xff] %v6215_v63  ;;  %v6235_v9 = vpop.eup %5248  ;;  %5260 = vlog2.f32 %v2645_v53  ;;  %v6237_v41 = vadd.f32 1.0, %v5247_v10  ;;  %v2561_v53 = vmul.f32 1.442695, %v2464_v13  ;;  %v5064_v50 = vmul.f32 -4.0, %v812_v24 }
 0x162   : > { %9681 = vst [vmem:[#allocation34_spill] sm:$0xff] %v6218_v8  ;;  %v6241_v39 = vpop.eup %5250  ;;  %v6246_v15 = vmul.f32 %v6235_v9, %v6213_v56  ;;  %5262 = vlog2.f32 %v2646_v57  ;;  %v814_v57 = vsub.f32 %v6108_v38, %v745_v7  ;;  %v6279_v7 = vmul.f32 4.0, %v813_v29 }
 0x163   : > { %9682 = vst [vmem:[#allocation35_spill] sm:$0xff] %v6223_v34  ;;  %v6248_v62 = vpop.eup %5252  ;;  %v6252_v10 = vmul.f32 %v6241_v39, %v6215_v63  ;;  %5264 = vpow2.f32 %v1219_v48  ;;  %v6264_v48 = vmul.f32 4.0, %v811_v12  ;;  %v5065_v43 = vmul.f32 -4.0, %v813_v29 }
 0x164   : > { %9683 = vst [vmem:[#allocation36_spill] sm:$0xff] %v6232_v6  ;;  %v6255_v31 = vpop.eup %5254  ;;  %5266 = vpow2.f32 %v1221_v51  ;;  %v6260_v61 = vmul.f32 %v6248_v62, %v6218_v8  ;;  %v1239_v33 = vmul.f32 1.442695, %v5063_v52  ;;  %v6282_v12 = vmul.f32 4.0, %v814_v57 }
 0x165   : > { %9684 = vst [vmem:[#allocation37_spill] sm:$0xff] %v6235_v9  ;;  %v5257_v3 = vpop.eup %5256  ;;  %5268 = vrcp.f32 %v6237_v41  ;;  %v5066_v42 = vmul.f32 -4.0, %v814_v57  ;;  %v1241_v24 = vmul.f32 1.442695, %v5064_v50  ;;  %v2411_v29 = vand.u32 2147483647, %v6264_v48 }
 0x166   : > { %9685 = vst [vmem:[#allocation38_spill] sm:$0xff] %v6237_v41  ;;  %v6266_v13 = vpop.eup %5258  ;;  %v6269_v51 = vadd.f32 1.0, %v5257_v3  ;;  %5270 = vpow2.f32 %v2559_v54  ;;  %v2412_v52 = vand.u32 2147483647, %v6274_v27  ;;  %v1243_v57 = vmul.f32 1.442695, %v5065_v43 }
 0x167   : > { %9686 = vst [vmem:[#allocation39_spill] sm:$0xff] %v6241_v39  ;;  %v6271_v58 = vpop.eup %5260  ;;  %5272 = vpow2.f32 %v2561_v53  ;;  %v2475_v43 = vsub.f32 0.0, %v2411_v29 }
 0x168   : > { %9687 = vst [vmem:[#allocation40_spill] sm:$0xff] %v6246_v15  ;;  %v6276_v49 = vpop.eup %5262  ;;  %5274 = vrcp.f32 %v6269_v51 }
 0x169   : > { %9688 = vst [vmem:[#allocation41_spill] sm:$0xff] %v6248_v62  ;;  %v5265_v3 = vpop.eup %5264  ;;  %5276 = vpow2.f32 %v2563_v59  ;;  %v2476_v62 = vsub.f32 0.0, %v2412_v52  ;;  %v2583_v52 = vmul.f32 1.442695, %v2475_v43 }
 0x16a   : > { %9689 = vst [vmem:[#allocation42_spill] sm:$0xff] %v6252_v10  ;;  %v5267_v30 = vpop.eup %5266  ;;  %v6284_v53 = vadd.f32 1.0, %v5265_v3  ;;  %5278 = vpow2.f32 %v2565_v20  ;;  %v2413_v20 = vand.u32 2147483647, %v6279_v7 }
 0x16b   : > { %9690 = vst [vmem:[#allocation43_spill] sm:$0xff] %v6255_v31  ;;  %5280 = vpow2.f32 %v1239_v33  ;;  %v2414_v33 = vand.u32 2147483647, %v6282_v12  ;;  %v1245_v31 = vmul.f32 1.442695, %v5066_v42 }
 0x16c   : > { %9691 = vst [vmem:[#allocation44_spill] sm:$0xff] %v6260_v61  ;;  %5282 = vrcp.f32 %v6284_v53  ;;  %v2477_v63 = vsub.f32 0.0, %v2413_v20 }
 0x16d   : > { %9692 = vst [vmem:[#allocation45_spill] sm:$0xff] %v6264_v48  ;;  %v2478_v29 = vsub.f32 0.0, %v2414_v33 }
 0x16e   : > { %9693 = vst [vmem:[#allocation46_spill] sm:$0xff] %v6266_v13  ;;  %v6289_v13 = vadd.f32 1.0, %v5267_v30 }
 0x16f   : > { %9694 = vst [vmem:[#allocation47_spill] sm:$0xff] %v6269_v51 }
 0x170   : > { %9695 = vst [vmem:[#allocation48_spill] sm:$0xff] %v6271_v58  ;;  %v6287_v58 = vpop.eup %5268  ;;  %5284 = vrcp.f32 %v6289_v13 }
 0x171   : > { %9696 = vst [vmem:[#allocation49_spill] sm:$0xff] %v6274_v27  ;;  %v5271_v59 = vpop.eup %5270  ;;  %5286 = vpow2.f32 %v1241_v24 }
 0x172   : > { %9697 = vst [vmem:[#allocation50_spill] sm:$0xff] %v6276_v49  ;;  %v5273_v50 = vpop.eup %5272  ;;  %v6298_v49 = vmul.f32 %v6287_v58, %v6237_v41  ;;  %v2655_v30 = vadd.f32 1.0, %v5271_v59  ;;  %v700_v41 = vpop.permute.xlu1 %699 }
 0x173   : > { %9698 = vst [vmem:[#allocation51_spill] sm:$0xff] %v6279_v7  ;;  %v6302_v54 = vpop.eup %5274  ;;  %v2656_v48 = vadd.f32 1.0, %v5273_v50  ;;  %v775_v3 = vsub.f32 %v6102_v35, %v700_v41  ;;  %v777_v20 = vsub.f32 %v6106_v37, %v700_v41 }
 0x174   : > { %9699 = vst [vmem:[#allocation52_spill] sm:$0xff] %v6282_v12  ;;  %v5277_v8 = vpop.eup %5276  ;;  %5288 = vlog2.f32 %v2655_v30  ;;  %v6308_v59 = vmul.f32 %v6302_v54, %v6269_v51 }
 0x175   : > { %9700 = vst [vmem:[#allocation53_spill] sm:$0xff] %v6284_v53  ;;  %v2657_v61 = vadd.f32 1.0, %v5277_v8  ;;  %5290 = vlog2.f32 %v2656_v48  ;;  %v2585_v8 = vmul.f32 1.442695, %v2476_v62  ;;  %v776_v48 = vsub.f32 %v6104_v36, %v700_v41 }
 0x176   : > { %9701 = vst [vmem:[#allocation54_spill] sm:$0xff] %v6287_v58  ;;  %v5279_v58 = vpop.eup %5278  ;;  %5292 = vpow2.f32 %v1243_v57  ;;  %v6337_v7 = vmul.f32 4.0, %v775_v3 }
 0x177   : > { %9702 = vst [vmem:[#allocation55_spill] sm:$0xff] %v6289_v13  ;;  %v5281_v50 = vpop.eup %5280  ;;  %v2658_v24 = vadd.f32 1.0, %v5279_v58  ;;  %5294 = vlog2.f32 %v2657_v61  ;;  %v2587_v61 = vmul.f32 1.442695, %v2477_v63  ;;  %v2589_v58 = vmul.f32 1.442695, %v2478_v29 }
 0x178   : > { %9703 = vst [vmem:[#allocation56_spill] sm:$0xff] %v6298_v49  ;;  %v6311_v30 = vpop.eup %5282  ;;  %v6313_v27 = vadd.f32 1.0, %v5281_v50  ;;  %v778_v50 = vsub.f32 %v6108_v38, %v700_v41  ;;  %v5029_v41 = vmul.f32 -4.0, %v777_v20  ;;  %v690_v49 = vpop.permute.xlu0 %689 }
 0x179   : > { %9704 = vst [vmem:[#allocation57_spill] sm:$0xff] %v6302_v54  ;;  %v6316_v12 = vpop.eup %5284  ;;  %5296 = vlog2.f32 %v2658_v24  ;;  %v6323_v57 = vmul.f32 %v6311_v30, %v6284_v53 }
 0x17a   : > { %9705 = vst [vmem:[#allocation58_spill] sm:$0xff] %v6308_v59  ;;  %v5287_v42 = vpop.eup %5286  ;;  %5298 = vpow2.f32 %v1245_v31  ;;  %v6329_v43 = vmul.f32 %v6316_v12, %v6289_v13  ;;  %v5027_v31 = vmul.f32 -4.0, %v775_v3  ;;  %v6342_v13 = vmul.f32 4.0, %v777_v20 }
 0x17b   : > { %9706 = vst [vmem:[#allocation59_spill] sm:$0xff] %v6311_v30  ;;  %v6325_v33 = vpop.eup %5288  ;;  %v6331_v62 = vadd.f32 1.0, %v5287_v42  ;;  %5300 = vrcp.f32 %v6313_v27  ;;  %v5028_v42 = vmul.f32 -4.0, %v776_v48  ;;  %v6352_v30 = vmul.f32 4.0, %v778_v50 }
 0x17c   : > { %9707 = vst [vmem:[#allocation60_spill] sm:$0xff] %v6313_v27  ;;  %v6335_v24 = vpop.eup %5290  ;;  %5302 = vpow2.f32 %v2583_v52  ;;  %v2375_v20 = vand.u32 2147483647, %v6337_v7  ;;  %v1171_v29 = vmul.f32 1.442695, %v5029_v41 }
 0x17d   : > { %9708 = vst [vmem:[#allocation61_spill] sm:$0xff] %v6316_v12  ;;  %v5293_v63 = vpop.eup %5292  ;;  %5304 = vrcp.f32 %v6331_v62  ;;  %v1169_v54 = vmul.f32 1.442695, %v5028_v42 }
 0x17e   : > { %9709 = vst [vmem:[#allocation62_spill] sm:$0xff] %v6323_v57  ;;  %v6344_v12 = vpop.eup %5294  ;;  %v6346_v53 = vadd.f32 1.0, %v5293_v63  ;;  %5306 = vpow2.f32 %v2585_v8  ;;  %v2439_v63 = vsub.f32 0.0, %v2375_v20 }
 0x17f   : > { %9710 = vst [vmem:[#allocation63_spill] sm:$0xff] %v6325_v33  ;;  %v6340_v33 = vmul.f32 4.0, %v776_v48  ;;  %v6348_v52 = vpop.eup %5296  ;;  %5308 = vpow2.f32 %v2587_v61  ;;  %v5030_v48 = vmul.f32 -4.0, %v778_v50  ;;  %v2377_v50 = vand.u32 2147483647, %v6342_v13 }
 0x180   : > { %9711 = vst [vmem:[#allocation64_spill] sm:$0xff] %v6329_v43  ;;  %v5299_v51 = vpop.eup %5298  ;;  %5310 = vrcp.f32 %v6346_v53 }
 0x181   : > { %9712 = vst [vmem:[#allocation65_spill] sm:$0xff] %v6331_v62  ;;  %v6358_v8 = vadd.f32 1.0, %v5299_v51  ;;  %5312 = vpow2.f32 %v2589_v58  ;;  %v2378_v58 = vand.u32 2147483647, %v6352_v30  ;;  %v2441_v10 = vsub.f32 0.0, %v2377_v50 }
 0x182   : > { %9713 = vst [vmem:[#allocation66_spill] sm:$0xff] %v6335_v24  ;;  %v1167_v24 = vmul.f32 1.442695, %v5027_v31  ;;  %v2376_v31 = vand.u32 2147483647, %v6340_v33  ;;  %v768_v50 = vsub.f32 %v6104_v36, %v690_v49 }
 0x183   : > { %9714 = vst [vmem:[#allocation67_spill] sm:$0xff] %v6337_v7 }
 0x184   : > { %9715 = vst [vmem:[#allocation68_spill] sm:$0xff] %v6340_v33  ;;  %5314 = vpow2.f32 %v1167_v24  ;;  %v2440_v59 = vsub.f32 0.0, %v2376_v31  ;;  %v2511_v24 = vmul.f32 1.442695, %v2439_v63  ;;  %v767_v31 = vsub.f32 %v6102_v35, %v690_v49 }
 0x185   : > { %9716 = vst [vmem:[#allocation69_spill] sm:$0xff] %v6342_v13  ;;  %5316 = vrcp.f32 %v6358_v8  ;;  %v2515_v63 = vmul.f32 1.442695, %v2441_v10 }
 0x186   : > { %9717 = vst [vmem:[#allocation70_spill] sm:$0xff] %v6344_v12  ;;  %v6356_v12 = vpop.eup %5300  ;;  %5318 = vpow2.f32 %v1169_v54  ;;  %v6403_v54 = vmul.f32 4.0, %v767_v31  ;;  %v5019_v10 = vmul.f32 -4.0, %v767_v31 }
 0x187   : > { %9718 = vst [vmem:[#allocation71_spill] sm:$0xff] %v6346_v53  ;;  %v5303_v3 = vpop.eup %5302  ;;  %v6364_v61 = vmul.f32 %v6356_v12, %v6313_v27  ;;  %v1173_v27 = vmul.f32 1.442695, %v5030_v48  ;;  %v2442_v48 = vsub.f32 0.0, %v2378_v58 }
 0x188   : > { %9719 = vst [vmem:[#allocation72_spill] sm:$0xff] %v6348_v52  ;;  %v6367_v42 = vpop.eup %5304  ;;  %v2667_v51 = vadd.f32 1.0, %v5303_v3 }
 0x189   : > { %9720 = vst [vmem:[#allocation73_spill] sm:$0xff] %v6352_v30  ;;  %v5307_v52 = vpop.eup %5306  ;;  %v6373_v43 = vmul.f32 %v6367_v42, %v6331_v62 }
 0x18a   : > { %9721 = vst [vmem:[#allocation74_spill] sm:$0xff] %v6356_v12  ;;  %v5309_v41 = vpop.eup %5308  ;;  %v2668_v12 = vadd.f32 1.0, %v5307_v52  ;;  %5320 = vlog2.f32 %v2667_v51  ;;  %v2517_v52 = vmul.f32 1.442695, %v2442_v48 }
 0x18b   : > { %9722 = vst [vmem:[#allocation75_spill] sm:$0xff] %v6358_v8  ;;  %v6377_v3 = vpop.eup %5310  ;;  %v2669_v39 = vadd.f32 1.0, %v5309_v41  ;;  %5322 = vpow2.f32 %v1171_v29  ;;  %v2513_v41 = vmul.f32 1.442695, %v2440_v59  ;;  %v770_v59 = vsub.f32 %v6108_v38, %v690_v49 }
 0x18c   : > { %9723 = vst [vmem:[#allocation76_spill] sm:$0xff] %v6364_v61  ;;  %v5313_v62 = vpop.eup %5312  ;;  %5324 = vlog2.f32 %v2668_v12  ;;  %v6390_v12 = vmul.f32 %v6377_v3, %v6346_v53 }
 0x18d   : > { %9724 = vst [vmem:[#allocation77_spill] sm:$0xff] %v6367_v42  ;;  %v5315_v42 = vpop.eup %5314  ;;  %v2670_v51 = vadd.f32 1.0, %v5313_v62  ;;  %5326 = vlog2.f32 %v2669_v39  ;;  %v769_v62 = vsub.f32 %v6106_v37, %v690_v49 }
 0x18e   : > { %9725 = vst [vmem:[#allocation78_spill] sm:$0xff] %v6373_v43  ;;  %v6383_v57 = vpop.eup %5316  ;;  %5328 = vpow2.f32 %v1173_v27  ;;  %v6385_v29 = vadd.f32 1.0, %v5315_v42 }
 0x18f   : > { %9726 = vst [vmem:[#allocation79_spill] sm:$0xff] %v6377_v3  ;;  %v5319_v20 = vpop.eup %5318  ;;  %5330 = vlog2.f32 %v2670_v51  ;;  %v6397_v58 = vmul.f32 %v6383_v57, %v6358_v8  ;;  %v6415_v49 = vmul.f32 4.0, %v769_v62 }
 0x190   : > { %9727 = vst [vmem:[#allocation80_spill] sm:$0xff] %v6383_v57  ;;  %v6393_v39 = vpop.eup %5320  ;;  %v6399_v27 = vadd.f32 1.0, %v5319_v20  ;;  %5332 = vrcp.f32 %v6385_v29  ;;  %v5020_v20 = vmul.f32 -4.0, %v768_v50 }
 0x191   : > { %9728 = vst [vmem:[#allocation81_spill] sm:$0xff] %v6385_v29  ;;  %v5323_v42 = vpop.eup %5322  ;;  %5334 = vpow2.f32 %v2511_v24  ;;  %v5021_v24 = vmul.f32 -4.0, %v769_v62  ;;  %v2367_v62 = vand.u32 2147483647, %v6403_v54 }
 0x192   : > { %9729 = vst [vmem:[#allocation82_spill] sm:$0xff] %v6390_v12  ;;  %v6405_v51 = vpop.eup %5324  ;;  %v6407_v53 = vadd.f32 1.0, %v5323_v42  ;;  %5336 = vrcp.f32 %v6399_v27  ;;  %v6419_v42 = vmul.f32 4.0, %v770_v59 }
 0x193   : > { %9730 = vst [vmem:[#allocation83_spill] sm:$0xff] %v6393_v39  ;;  %v6410_v39 = vmul.f32 4.0, %v768_v50  ;;  %v6412_v8 = vpop.eup %5326  ;;  %5338 = vpow2.f32 %v2513_v41  ;;  %v5022_v50 = vmul.f32 -4.0, %v770_v59  ;;  %v2431_v41 = vsub.f32 0.0, %v2367_v62 }
 0x194   : > { %9731 = vst [vmem:[#allocation84_spill] sm:$0xff] %v6397_v58  ;;  %v5329_v48 = vpop.eup %5328  ;;  %5340 = vrcp.f32 %v6407_v53 }
 0x195   : > { %9732 = vst [vmem:[#allocation85_spill] sm:$0xff] %v6399_v27  ;;  %v6421_v3 = vpop.eup %5330  ;;  %v6423_v43 = vadd.f32 1.0, %v5329_v48  ;;  %5342 = vpow2.f32 %v2515_v63  ;;  %v2368_v31 = vand.u32 2147483647, %v6410_v39  ;;  %v1155_v48 = vmul.f32 1.442695, %v5021_v24 }
 0x196   : > { %9733 = vst [vmem:[#allocation86_spill] sm:$0xff] %v6403_v54  ;;  %v6425_v57 = vpop.eup %5332  ;;  %5344 = vpow2.f32 %v2517_v52  ;;  %v2369_v63 = vand.u32 2147483647, %v6415_v49  ;;  %v2370_v52 = vand.u32 2147483647, %v6419_v42 }
 0x197   : > { %9734 = vst [vmem:[#allocation87_spill] sm:$0xff] %v6405_v51  ;;  %v1151_v51 = vmul.f32 1.442695, %v5019_v10  ;;  %v5335_v58 = vpop.eup %5334  ;;  %v6432_v10 = vmul.f32 %v6425_v57, %v6385_v29  ;;  %5346 = vrcp.f32 %v6423_v43  ;;  %v1157_v61 = vmul.f32 1.442695, %v5022_v50 }
 0x198   : > { %9735 = vst [vmem:[#allocation88_spill] sm:$0xff] %v6407_v53  ;;  %v6436_v59 = vpop.eup %5336  ;;  %v2433_v6 = vsub.f32 0.0, %v2369_v63  ;;  %v2434_v50 = vsub.f32 0.0, %v2370_v52  ;;  %v2495_v56 = vmul.f32 1.442695, %v2431_v41 }
 0x199   : > { %9736 = vst [vmem:[#allocation89_spill] sm:$0xff] %v6410_v39  ;;  %5348 = vpow2.f32 %v1151_v51  ;;  %v6441_v12 = vmul.f32 %v6436_v59, %v6399_v27  ;;  %v760_v51 = vpop.permute.xlu2 %759 }
 0x19a   : > { %9737 = vst [vmem:[#allocation90_spill] sm:$0xff] %v6412_v8  ;;  %v1153_v8 = vmul.f32 1.442695, %v5020_v20  ;;  %v2631_v20 = vadd.f32 1.0, %v5335_v58  ;;  %v2432_v58 = vsub.f32 0.0, %v2368_v31  ;;  %v823_v31 = vsub.f32 %v6102_v35, %v760_v51 }
 0x19b   : > { %9738 = vst [vmem:[#allocation91_spill] sm:$0xff] %v6415_v49  ;;  %v2499_v52 = vmul.f32 1.442695, %v2433_v6  ;;  %v2501_v62 = vmul.f32 1.442695, %v2434_v50  ;;  %v826_v34 = vsub.f32 %v6108_v38, %v760_v51 }
 0x19c   : > { %9739 = vst [vmem:[#allocation92_spill] sm:$0xff] %v6419_v42  ;;  %5350 = vpow2.f32 %v1153_v8  ;;  %v2497_v63 = vmul.f32 1.442695, %v2432_v58  ;;  %v5075_v6 = vmul.f32 -4.0, %v823_v31 }
 0x19d   : > { %9740 = vst [vmem:[#allocation93_spill] sm:$0xff] %v6421_v3  ;;  %v5339_v3 = vpop.eup %5338  ;;  %5352 = vlog2.f32 %v2631_v20 }
 0x19e   : > { %9741 = vst [vmem:[#allocation94_spill] sm:$0xff] %v6423_v43  ;;  %v6444_v9 = vpop.eup %5340  ;;  %v2632_v24 = vadd.f32 1.0, %v5339_v3  ;;  %5354 = vpow2.f32 %v1155_v48  ;;  %v825_v3 = vsub.f32 %v6106_v37, %v760_v51 }
 0x19f   : > { %9742 = vst [vmem:[#allocation95_spill] sm:$0xff] %v6425_v57  ;;  %v5343_v19 = vpop.eup %5342  ;;  %v6455_v48 = vmul.f32 %v6444_v9, %v6407_v53  ;;  %v5078_v53 = vmul.f32 -4.0, %v826_v34 }
 0x1a0   : > { %9743 = vst [vmem:[#allocation96_spill] sm:$0xff] %v6432_v10  ;;  %v5345_v23 = vpop.eup %5344  ;;  %v2633_v8 = vadd.f32 1.0, %v5343_v19  ;;  %5356 = vlog2.f32 %v2632_v24  ;;  %v824_v19 = vsub.f32 %v6104_v36, %v760_v51  ;;  %v6481_v14 = vmul.f32 4.0, %v825_v3 }
 0x1a1   : > { %9744 = vst [vmem:[#allocation97_spill] sm:$0xff] %v6436_v59  ;;  %v6449_v22 = vpop.eup %5346  ;;  %v2634_v20 = vadd.f32 1.0, %v5345_v23  ;;  %5358 = vpow2.f32 %v1157_v61 }
 0x1a2   : > { %9745 = vst [vmem:[#allocation98_spill] sm:$0xff] %v6441_v12  ;;  %v5349_v15 = vpop.eup %5348  ;;  %5360 = vlog2.f32 %v2633_v8  ;;  %v6468_v58 = vmul.f32 %v6449_v22, %v6423_v43  ;;  %v5076_v50 = vmul.f32 -4.0, %v824_v19  ;;  %v705_v12 = vpop.permute.xlu1 %704 }
 0x1a3   : > { %9746 = vst [vmem:[#allocation99_spill] sm:$0xff] %v6444_v9  ;;  %v5351_v24 = vpop.eup %5350  ;;  %5362 = vlog2.f32 %v2634_v20  ;;  %v6458_v41 = vadd.f32 1.0, %v5349_v15  ;;  %v6471_v15 = vmul.f32 4.0, %v823_v31  ;;  %v1263_v31 = vmul.f32 1.442695, %v5075_v6 }
 0x1a4   : > { %9747 = vst [vmem:[#allocation100_spill] sm:$0xff] %v6449_v22  ;;  %v6461_v23 = vpop.eup %5352  ;;  %v6463_v61 = vadd.f32 1.0, %v5351_v24  ;;  %5364 = vpow2.f32 %v2495_v56  ;;  %v6478_v56 = vmul.f32 4.0, %v824_v19 }
 0x1a5   : > { %9748 = vst [vmem:[#allocation101_spill] sm:$0xff] %v6455_v48  ;;  %v5355_v18 = vpop.eup %5354  ;;  %5366 = vrcp.f32 %v6458_v41 }
 0x1a6   : > { %9749 = vst [vmem:[#allocation102_spill] sm:$0xff] %v6458_v41  ;;  %v6473_v8 = vpop.eup %5356  ;;  %v6475_v20 = vadd.f32 1.0, %v5355_v18  ;;  %5368 = vrcp.f32 %v6463_v61  ;;  %v6488_v18 = vmul.f32 4.0, %v826_v34 }
 0x1a7   : > { %9750 = vst [vmem:[#allocation103_spill] sm:$0xff] %v6461_v23  ;;  %v5359_v51 = vpop.eup %5358  ;;  %5370 = vpow2.f32 %v2497_v63  ;;  %v5077_v23 = vmul.f32 -4.0, %v825_v3  ;;  %v1265_v3 = vmul.f32 1.442695, %v5076_v50 }
 0x1a8   : > { %9751 = vst [vmem:[#allocation104_spill] sm:$0xff] %v6463_v61  ;;  %v6483_v43 = vpop.eup %5360  ;;  %v6485_v22 = vadd.f32 1.0, %v5359_v51  ;;  %5372 = vrcp.f32 %v6475_v20  ;;  %v2423_v51 = vand.u32 2147483647, %v6471_v15 }
 0x1a9   : > { %9752 = vst [vmem:[#allocation105_spill] sm:$0xff] %v6468_v58  ;;  %5374 = vpow2.f32 %v2499_v52  ;;  %v1267_v48 = vmul.f32 1.442695, %v5077_v23  ;;  %v2426_v52 = vand.u32 2147483647, %v6488_v18 }
 0x1aa   : > { %9753 = vst [vmem:[#allocation106_spill] sm:$0xff] %v6471_v15  ;;  %5376 = vrcp.f32 %v6485_v22  ;;  %v2487_v50 = vsub.f32 0.0, %v2423_v51  ;;  %v1269_v15 = vmul.f32 1.442695, %v5078_v53 }
 0x1ab   : > { %9754 = vst [vmem:[#allocation107_spill] sm:$0xff] %v6473_v8  ;;  %v6490_v8 = vpop.eup %5362  ;;  %5378 = vpow2.f32 %v2501_v62 }
 0x1ac   : > { %9755 = vst [vmem:[#allocation108_spill] sm:$0xff] %v6475_v20  ;;  %v5365_v24 = vpop.eup %5364  ;;  %5380 = vpow2.f32 %v1263_v31  ;;  %v2607_v53 = vmul.f32 1.442695, %v2487_v50  ;;  %v781_v50 = vsub.f32 %v6106_v37, %v705_v12 }
 0x1ad   : > { %9756 = vst [vmem:[#allocation109_spill] sm:$0xff] %v6478_v56  ;;  %v6497_v9 = vpop.eup %5366  ;;  %v2623_v6 = vadd.f32 1.0, %v5365_v24 }
 0x1ae   : > { %9757 = vst [vmem:[#allocation110_spill] sm:$0xff] %v6481_v14  ;;  %v6500_v19 = vpop.eup %5368  ;;  %v6504_v34 = vmul.f32 %v6497_v9, %v6458_v41  ;;  %v5033_v30 = vmul.f32 -4.0, %v781_v50 }
 0x1af   : > { %9758 = vst [vmem:[#allocation111_spill] sm:$0xff] %v6483_v43  ;;  %v2424_v43 = vand.u32 2147483647, %v6478_v56  ;;  %v5371_v63 = vpop.eup %5370  ;;  %5382 = vlog2.f32 %v2623_v6  ;;  %v6514_v31 = vmul.f32 %v6500_v19, %v6463_v61 }
 0x1b0   : > { %9759 = vst [vmem:[#allocation112_spill] sm:$0xff] %v6485_v22  ;;  %v6508_v24 = vpop.eup %5372  ;;  %v2624_v23 = vadd.f32 1.0, %v5371_v63  ;;  %5384 = vpow2.f32 %v1265_v3  ;;  %v2490_v63 = vsub.f32 0.0, %v2426_v52 }
 0x1b1   : > { %9760 = vst [vmem:[#allocation113_spill] sm:$0xff] %v6488_v18  ;;  %v2488_v62 = vsub.f32 0.0, %v2424_v43  ;;  %v5375_v29 = vpop.eup %5374  ;;  %5386 = vpow2.f32 %v1267_v48  ;;  %v6521_v59 = vmul.f32 %v6508_v24, %v6475_v20  ;;  %v779_v18 = vsub.f32 %v6102_v35, %v705_v12 }
 0x1b2   : > { %9761 = vst [vmem:[#allocation114_spill] sm:$0xff] %v6490_v8  ;;  %v2425_v8 = vand.u32 2147483647, %v6481_v14  ;;  %v6516_v6 = vpop.eup %5376  ;;  %v2625_v58 = vadd.f32 1.0, %v5375_v29  ;;  %5388 = vlog2.f32 %v2624_v23  ;;  %v782_v23 = vsub.f32 %v6108_v38, %v705_v12 }
 0x1b3   : > { %9762 = vst [vmem:[#allocation115_spill] sm:$0xff] %v6497_v9  ;;  %v5379_v3 = vpop.eup %5378  ;;  %5390 = vpow2.f32 %v1269_v15  ;;  %v2609_v27 = vmul.f32 1.442695, %v2488_v62  ;;  %v6533_v15 = vmul.f32 %v6516_v6, %v6485_v22  ;;  %v2613_v62 = vmul.f32 1.442695, %v2490_v63 }
 0x1b4   : > { %9763 = vst [vmem:[#allocation116_spill] sm:$0xff] %v6500_v19  ;;  %v2489_v51 = vsub.f32 0.0, %v2425_v8  ;;  %v5381_v14 = vpop.eup %5380  ;;  %v2626_v48 = vadd.f32 1.0, %v5379_v3  ;;  %5392 = vlog2.f32 %v2625_v58  ;;  %v780_v8 = vsub.f32 %v6104_v36, %v705_v12 }
 0x1b5   : > { %9764 = vst [vmem:[#allocation117_spill] sm:$0xff] %v6504_v34  ;;  %v6526_v43 = vpop.eup %5382  ;;  %v6528_v29 = vadd.f32 1.0, %v5381_v14  ;;  %5394 = vpow2.f32 %v2607_v53  ;;  %v6535_v58 = vmul.f32 4.0, %v779_v18  ;;  %v5031_v53 = vmul.f32 -4.0, %v779_v18 }
 0x1b6   : > { %9765 = vst [vmem:[#allocation118_spill] sm:$0xff] %v6508_v24  ;;  %v2611_v52 = vmul.f32 1.442695, %v2489_v51  ;;  %v5385_v56 = vpop.eup %5384  ;;  %5396 = vlog2.f32 %v2626_v48  ;;  %v6540_v14 = vmul.f32 4.0, %v780_v8  ;;  %v5032_v10 = vmul.f32 -4.0, %v780_v8 }
 0x1b7   : > { %9766 = vst [vmem:[#allocation119_spill] sm:$0xff] %v6514_v31  ;;  %v5387_v3 = vpop.eup %5386  ;;  %v6537_v57 = vadd.f32 1.0, %v5385_v56  ;;  %5398 = vrcp.f32 %v6528_v29  ;;  %v6547_v63 = vmul.f32 4.0, %v781_v50  ;;  %v6549_v48 = vmul.f32 4.0, %v782_v23 }
 0x1b8   : > { %9767 = vst [vmem:[#allocation120_spill] sm:$0xff] %v6516_v6  ;;  %v6542_v51 = vpop.eup %5388  ;;  %v6544_v12 = vadd.f32 1.0, %v5387_v3  ;;  %5400 = vpow2.f32 %v2609_v27  ;;  %v5034_v56 = vmul.f32 -4.0, %v782_v23  ;;  %v1175_v3 = vmul.f32 1.442695, %v5031_v53 }
 0x1b9   : > { %9768 = vst [vmem:[#allocation121_spill] sm:$0xff] %v6521_v59  ;;  %v5391_v13 = vpop.eup %5390  ;;  %5402 = vrcp.f32 %v6537_v57  ;;  %v1177_v50 = vmul.f32 1.442695, %v5032_v10  ;;  %v1179_v23 = vmul.f32 1.442695, %v5033_v30 }
 0x1ba   : > { %9769 = vst [vmem:[#allocation122_spill] sm:$0xff] %v6526_v43  ;;  %v6551_v33 = vpop.eup %5392  ;;  %v6554_v18 = vadd.f32 1.0, %v5391_v13  ;;  %5404 = vrcp.f32 %v6544_v12  ;;  %v2379_v7 = vand.u32 2147483647, %v6535_v58  ;;  %v2380_v53 = vand.u32 2147483647, %v6540_v14 }
 0x1bb   : > { %9770 = vst [vmem:[#allocation123_spill] sm:$0xff] %v6528_v29  ;;  %v5395_v27 = vpop.eup %5394  ;;  %5406 = vpow2.f32 %v2611_v52  ;;  %v2381_v22 = vand.u32 2147483647, %v6547_v63  ;;  %v2382_v8 = vand.u32 2147483647, %v6549_v48 }
 0x1bc   : > { %9771 = vst [vmem:[#allocation124_spill] sm:$0xff] %v6533_v15  ;;  %v6559_v43 = vpop.eup %5396  ;;  %5408 = vrcp.f32 %v6554_v18  ;;  %v2444_v6 = vsub.f32 0.0, %v2380_v53  ;;  %v695_v15 = vpop.permute.xlu0 %694  ;;  %v6575_v24 = vadd.f32 1.0, %v5395_v27 }
 0x1bd   : > { %9772 = vst [vmem:[#allocation125_spill] sm:$0xff] %v6535_v58  ;;  %v6563_v13 = vpop.eup %5398  ;;  %5410 = vpow2.f32 %v2613_v62  ;;  %v2445_v62 = vsub.f32 0.0, %v2381_v22  ;;  %v2446_v59 = vsub.f32 0.0, %v2382_v8  ;;  %v771_v22 = vsub.f32 %v6102_v35, %v695_v15 }
 0x1be   : > { %9773 = vst [vmem:[#allocation126_spill] sm:$0xff] %v6537_v57  ;;  %5412 = vpow2.f32 %v1175_v3  ;;  %v772_v53 = vsub.f32 %v6104_v36, %v695_v15  ;;  %v6584_v27 = vmul.f32 %v6563_v13, %v6528_v29 }
 0x1bf   : > { %9774 = vst [vmem:[#allocation127_spill] sm:$0xff] %v6540_v14  ;;  %5414 = vpow2.f32 %v1177_v50  ;;  %v2523_v10 = vmul.f32 1.442695, %v2445_v62  ;;  %v2525_v50 = vmul.f32 1.442695, %v2446_v59 }
 0x1c0   : > { %9775 = vst [vmem:[#allocation128_spill] sm:$0xff] %v6542_v51  ;;  %v5401_v51 = vpop.eup %5400  ;;  %5416 = vpow2.f32 %v1179_v23 }
 0x1c1   : > { %9776 = vst [vmem:[#allocation129_spill] sm:$0xff] %v6544_v12  ;;  %v6570_v30 = vpop.eup %5402 }
 0x1c2   : > { %9777 = vst [vmem:[#allocation130_spill] sm:$0xff] %v6547_v63  ;;  %v6573_v20 = vpop.eup %5404  ;;  %v6591_v8 = vmul.f32 %v6570_v30, %v6537_v57 }
 0x1c3   : > { %9778 = vst [vmem:[#allocation131_spill] sm:$0xff] %v6549_v48  ;;  %v5407_v61 = vpop.eup %5406  ;;  %v6595_v59 = vmul.f32 %v6573_v20, %v6544_v12  ;;  %v5024_v12 = vmul.f32 -4.0, %v772_v53  ;;  %v677_v48 = vld [vmem:[%s421_s11] sm:$0xf] }
 0x1c4   : > { %9779 = vst [vmem:[#allocation132_spill] sm:$0xff] %v6551_v33  ;;  %v1181_v33 = vmul.f32 1.442695, %v5034_v56  ;;  %v6578_v14 = vpop.eup %5408  ;;  %v6597_v23 = vadd.f32 1.0, %v5407_v61 }
 0x1c5   : > { %9780 = vst [vmem:[#allocation133_spill] sm:$0xff] %v6554_v18  ;;  %v5411_v56 = vpop.eup %5410 }
 0x1c6   : > { %9781 = vst [vmem:[#allocation134_spill] sm:$0xff] %v6559_v43  ;;  %v2443_v43 = vsub.f32 0.0, %v2379_v7  ;;  %5418 = vpow2.f32 %v1181_v33  ;;  %v2521_v7 = vmul.f32 1.442695, %v2444_v6  ;;  %v773_v33 = vsub.f32 %v6106_v37, %v695_v15  ;;  %v5413_v6 = vpop.eup %5412 }
 0x1c7   : > { %9782 = vst [vmem:[#allocation135_spill] sm:$0xff] %v6563_v13  ;;  %v5415_v62 = vpop.eup %5414 }
 0x1c8   : > { %9783 = vst [vmem:[#allocation136_spill] sm:$0xff] %v6570_v30  ;;  %v2519_v3 = vmul.f32 1.442695, %v2443_v43  ;;  %v6586_v43 = vadd.f32 1.0, %v5401_v51  ;;  %v6601_v51 = vmul.f32 %v6578_v14, %v6554_v18  ;;  %v5417_v52 = vpop.eup %5416 }
 0x1c9   : > { %9784 = vst [vmem:[#allocation137_spill] sm:$0xff] %v6573_v20  ;;  %v5023_v20 = vmul.f32 -4.0, %v771_v22 }
 0x1ca   : > { %9785 = vst [vmem:[#allocation138_spill] sm:$0xff] %v6575_v24  ;;  %5420 = vpow2.f32 %v2519_v3  ;;  %v6603_v3 = vadd.f32 1.0, %v5413_v6  ;;  %v6608_v24 = vadd.f32 1.0, %v5415_v62 }
 0x1cb   : > { %9786 = vst [vmem:[#allocation139_spill] sm:$0xff] %v6578_v14  ;;  %5422 = vpow2.f32 %v2521_v7  ;;  %v774_v7 = vsub.f32 %v6108_v38, %v695_v15  ;;  %v5025_v14 = vmul.f32 -4.0, %v773_v33  ;;  %v6618_v15 = vmul.f32 4.0, %v772_v53 }
 0x1cc   : > { %9787 = vst [vmem:[#allocation140_spill] sm:$0xff] %v6584_v27  ;;  %5424 = vpow2.f32 %v2523_v10  ;;  %v5419_v61 = vpop.eup %5418  ;;  %v6613_v10 = vmul.f32 4.0, %v771_v22 }
 0x1cd   : > { %9788 = vst [vmem:[#allocation141_spill] sm:$0xff] %v6586_v43  ;;  %5426 = vpow2.f32 %v2525_v50  ;;  %v6606_v43 = vadd.f32 1.0, %v5411_v56  ;;  %v6615_v18 = vadd.f32 1.0, %v5419_v61  ;;  %v6620_v56 = vmul.f32 4.0, %v773_v33 }
 0x1ce   : > { %9789 = vst [vmem:[#allocation142_spill] sm:$0xff] %v6591_v8  ;;  %5428 = vrcp.f32 %v6603_v3  ;;  %v1161_v61 = vmul.f32 1.442695, %v5024_v12  ;;  %v1163_v53 = vmul.f32 1.442695, %v5025_v14  ;;  %vm899_vm0 = vcmp.gt.f32.partialorder %v6613_v10, -4.0 }
 0x1cf   : > { %9790 = vst [vmem:[#allocation143_spill] sm:$0xff] %v6595_v59  ;;  %5430 = vrcp.f32 %v6608_v24  ;;  %v1159_v59 = vmul.f32 1.442695, %v5023_v20  ;;  %v2371_v33 = vand.u32 2147483647, %v6613_v10  ;;  %vm900_vm1 = vcmp.gt.f32.partialorder %v6618_v15, -4.0 }
 0x1d0   : > { %9791 = vst [vmem:[#allocation144_spill] sm:$0xff] %v6597_v23  ;;  %v6610_v23 = vadd.f32 1.0, %v5417_v52  ;;  %v5421_v6 = vpop.eup %5420  ;;  %v6623_v52 = vmul.f32 4.0, %v774_v7  ;;  %v2372_v13 = vand.u32 2147483647, %v6618_v15  ;;  %vm901_vm2 = vcmp.gt.f32.partialorder %v6620_v56, -4.0 }
 0x1d1   : > { %9792 = vst [vmem:[#allocation145_spill] sm:$0xff] %v6601_v51  ;;  %v5423_v50 = vpop.eup %5422  ;;  %v2635_v62 = vadd.f32 1.0, %v5421_v6  ;;  %v2373_v6 = vand.u32 2147483647, %v6620_v56  ;;  %v2435_v20 = vsub.f32 0.0, %v2371_v33 }
 0x1d2   : > { %9793 = vst [vmem:[#allocation146_spill] sm:$0xff] %v6603_v3  ;;  %5432 = vrcp.f32 %v6610_v23  ;;  %v5425_v51 = vpop.eup %5424  ;;  %v2636_v22 = vadd.f32 1.0, %v5423_v50  ;;  %v2374_v50 = vand.u32 2147483647, %v6623_v52  ;;  %vm902_vm3 = vcmp.gt.f32.partialorder %v6623_v52, -4.0 }
 0x1d3   : > { %9794 = vst [vmem:[#allocation147_spill] sm:$0xff] %v6606_v43  ;;  %v5026_v43 = vmul.f32 -4.0, %v774_v7  ;;  %5434 = vrcp.f32 %v6615_v18  ;;  %v5427_v30 = vpop.eup %5426  ;;  %v2637_v57 = vadd.f32 1.0, %v5425_v51  ;;  %v2437_v51 = vsub.f32 0.0, %v2373_v6 }
 0x1d4   : > { %9795 = vst [vmem:[#allocation148_spill] sm:$0xff] %v6608_v24  ;;  %5436 = vlog2.f32 %v2635_v62  ;;  %v2638_v8 = vadd.f32 1.0, %v5427_v30  ;;  %v6629_v29 = vpop.eup %5428  ;;  %v2436_v30 = vsub.f32 0.0, %v2372_v13  ;;  %v676_v13 = vld [vmem:[%s9803_s20] sm:$0xf] }
 0x1d5   : > { %9796 = vst [vmem:[#allocation149_spill] sm:$0xff] %v6610_v23  ;;  %5438 = vlog2.f32 %v2636_v22  ;;  %v1165_v7 = vmul.f32 1.442695, %v5026_v43  ;;  %v6632_v12 = vpop.eup %5430  ;;  %v6636_v14 = vmul.f32 %v6629_v29, %v6603_v3  ;;  %v2503_v43 = vmul.f32 1.442695, %v2435_v20 }
 0x1d6   : > { %9797 = vst [vmem:[#allocation150_spill] sm:$0xff] %v6615_v18  ;;  %5440 = vlog2.f32 %v2637_v57  ;;  %v2438_v57 = vsub.f32 0.0, %v2374_v50  ;;  %v2505_v3 = vmul.f32 1.442695, %v2436_v30  ;;  %v2507_v6 = vmul.f32 1.442695, %v2437_v51 }
 0x1d7   : > { %9798 = vst [vmem:[#allocation151_spill] sm:$0xff] %v6629_v29  ;;  %5442 = vlog2.f32 %v2638_v8  ;;  %v6658_v20 = vmul.f32 %v6632_v12, %v6608_v24  ;;  %v6686_v22 = vperm.slane %v676_v13, 2 }
 0x1d8   : > { %9799 = vst [vmem:[#allocation152_spill] sm:$0xff] %v6632_v12  ;;  %v6638_v62 = vpop.eup %5432  ;;  %5444 = vpow2.f32 %v1159_v59  ;;  %v2509_v30 = vmul.f32 1.442695, %v2438_v57  ;;  %v6680_v57 = vperm.slane %v676_v13, 0  ;;  %v6684_v59 = vperm.slane %v676_v13, 1 }
 0x1d9   : > { %9800 = vst [vmem:[#allocation153_spill] sm:$0xff] %v6636_v14  ;;  %v6641_v27 = vpop.eup %5434  ;;  %5446 = vpow2.f32 %v1161_v61  ;;  %v9478_v14 = vmov 0.0  }
 0x1da   : > { %9801 = vst [vmem:[#allocation154_spill] sm:$0xff] %v6638_v62  ;;  %v6650_v8 = vpop.eup %5436  ;;  %5448 = vpow2.f32 %v1163_v53  ;;  %v6669_v53 = vmul.f32 %v6638_v62, %v6610_v23  ;;  %v6673_v51 = vmul.f32 %v6641_v27, %v6615_v18  ;;  %v6694_v18 = vperm.slane %v677_v48, 2 }
 0x1db   : > { %9802 = vst [vmem:[#allocation155_spill] sm:$0xff] %v6641_v27  ;;  %v6653_v50 = vpop.eup %5438  ;;  %5450 = vpow2.f32 %v1165_v7  ;;  %v675_v7 = vld [vmem:[%s426_s0] sm:$0xf]  ;;  %v6724_v63 = vsel %vm899_vm0, 1.0, %v9478_v14  ;;  %v6733_v19 = vsel %vm901_vm2, 1.0, %v9478_v14  ;;  %v6737_v9 = vsel %vm902_vm3, 1.0, %v9478_v14 }
 0x1dc   : > { %9804 = vst [vmem:[#allocation156_spill] sm:$0xff] %v6650_v8  ;;  %v6665_v33 = vpop.eup %5440  ;;  %5452 = vpow2.f32 %v2503_v43  ;;  %v6690_v8 = vperm.slane %v677_v48, 0  ;;  %v6692_v43 = vperm.slane %v677_v48, 1 }
 0x1dd   : > { %9805 = vst [vmem:[#allocation157_spill] sm:$0xff] %v6653_v50  ;;  %v6682_v61 = vpop.eup %5442  ;;  %5454 = vpow2.f32 %v2505_v3  ;;  %v6700_v3 = vperm.slane %v675_v7, 0 }
 0x1de   : > { %9806 = vst [vmem:[#allocation158_spill] sm:$0xff] %v6658_v20  ;;  %v5445_v50 = vpop.eup %5444  ;;  %5456 = vpow2.f32 %v2507_v6 }
 0x1df   : > { %9807 = vst [vmem:[#allocation159_spill] sm:$0xff] %v6665_v33  ;;  %v6688_v33 = vperm.slane %v676_v13, 3  ;;  %v5447_v27 = vpop.eup %5446  ;;  %v6696_v23 = vadd.f32 1.0, %v5445_v50  ;;  %5458 = vpow2.f32 %v2509_v30  ;;  %v6704_v13 = vperm.slane %v675_v7, 1 }
 0x1e0   : > { %9808 = vst [vmem:[#allocation160_spill] sm:$0xff] %v6669_v53  ;;  %v5449_v62 = vpop.eup %5448  ;;  %v6702_v24 = vadd.f32 1.0, %v5447_v27  ;;  %v6711_v50 = vperm.slane %v675_v7, 2  ;;  %v6717_v27 = vperm.slane %v675_v7, 3 }
 0x1e1   : > { %9809 = vst [vmem:[#allocation161_spill] sm:$0xff] %v6673_v51  ;;  %v5451_v6 = vpop.eup %5450  ;;  %v6708_v12 = vadd.f32 1.0, %v5449_v62  ;;  %5460 = vrcp.f32 %v6696_v23  ;;  %v1414_v34 = vand.u32 2147483648, %v6696_v23  ;;  %vm1408_vm4 = vweird.f32 %v6696_v23 }
 0x1e2   : > { %9810 = vst [vmem:[#allocation162_spill] sm:$0xff] %v6680_v57  ;;  %v6714_v30 = vadd.f32 1.0, %v5451_v6  ;;  %5462 = vrcp.f32 %v6702_v24  ;;  %v6729_v6 = vsel %vm900_vm1, 1.0, %v9478_v14  ;;  %v1427_v49 = vand.u32 2147483647, %v6702_v24 }
 0x1e3   : > { %9811 = vst [vmem:[#allocation163_spill] sm:$0xff] %v6682_v61  ;;  %v6698_v61 = vperm.slane %v677_v48, 3  ;;  %v5453_v48 = vpop.eup %5452  ;;  %5464 = vrcp.f32 %v6708_v12  ;;  %v1415_v39 = vor.u32 1.1754944e-38, %v1414_v34  ;;  %vm1423_vm5 = vweird.f32 %v6702_v24 }
 0x1e4   : > { %9812 = vst [vmem:[#allocation164_spill] sm:$0xff] %v6684_v59  ;;  %v5455_v29 = vpop.eup %5454  ;;  %v2627_v62 = vadd.f32 1.0, %v5453_v48  ;;  %5466 = vrcp.f32 %v6714_v30  ;;  %v1412_v48 = vand.u32 2147483647, %v6696_v23  ;;  %v1429_v54 = vand.u32 2147483648, %v6702_v24 }
 0x1e5   : > { %9813 = vst [vmem:[#allocation165_spill] sm:$0xff] %v6686_v22  ;;  %v5457_v58 = vpop.eup %5456  ;;  %v2628_v7 = vadd.f32 1.0, %v5455_v29  ;;  %vm1438_vm8 = vweird.f32 %v6708_v12  ;;  %vm6751_vm10 = vcmp.eq.f32.partialorder %v1427_v49, 8.507059e+37  ;;  %v1442_v40 = vand.u32 2147483647, %v6708_v12 }
 0x1e6   : > { %9814 = vst [vmem:[#allocation166_spill] sm:$0xff] %v6688_v33  ;;  %v5459_v31 = vpop.eup %5458  ;;  %v2629_v41 = vadd.f32 1.0, %v5457_v58  ;;  %5468 = vlog2.f32 %v2627_v62  ;;  %vm6745_vm7 = vcmp.eq.f32.partialorder %v1412_v48, 8.507059e+37  ;;  %v1430_v34 = vor.u32 1.1754944e-38, %v1429_v54 }
 0x1e7   : > { %9815 = vst [vmem:[#allocation167_spill] sm:$0xff] %v6690_v8  ;;  %v2630_v42 = vadd.f32 1.0, %v5459_v31  ;;  %5470 = vlog2.f32 %v2628_v7  ;;  %v5461_v29 = vpop.eup %5460  ;;  %v1444_v26 = vand.u32 2147483648, %v6708_v12  ;;  %vm6759_vm12 = vcmp.eq.f32.partialorder %v1442_v40, 8.507059e+37 }
 0x1e8   : > { %9816 = vst [vmem:[#allocation168_spill] sm:$0xff] %v6692_v43  ;;  %5472 = vlog2.f32 %v2629_v41  ;;  %v5463_v58 = vpop.eup %5462  ;;  %v1404_v62 = vmul.f32 %v5461_v29, %v6696_v23  ;;  %vm1409_vm6 = vweird.f32 %v5461_v29  ;;  %vm1453_vm13 = vweird.f32 %v6714_v30 }
 0x1e9   : > { %9817 = vst [vmem:[#allocation169_spill] sm:$0xff] %v6694_v18  ;;  %5474 = vlog2.f32 %v2630_v42  ;;  %v5465_v31 = vpop.eup %5464  ;;  %v1419_v7 = vmul.f32 %v5463_v58, %v6702_v24  ;;  %vm1424_vm9 = vweird.f32 %v5463_v58  ;;  %v1445_v0 = vor.u32 1.1754944e-38, %v1444_v26  ;;  %vm1410_vm15 = vmor %vm1408_vm4, %vm1409_vm6 }
 0x1ea   : > { %9818 = vst [vmem:[#allocation170_spill] sm:$0xff] %v6698_v61  ;;  %v5467_v32 = vpop.eup %5466  ;;  %v1405_v42 = vsub.f32 1.0, %v1404_v62  ;;  %v1434_v48 = vmul.f32 %v5465_v31, %v6708_v12  ;;  %vm1439_vm11 = vweird.f32 %v5465_v31  ;;  %v1457_v60 = vand.u32 2147483647, %v6714_v30  ;;  %vm1425_vm1 = vmor %vm1423_vm5, %vm1424_vm9 }
 0x1eb   : > { %9819 = vst [vmem:[#allocation171_spill] sm:$0xff] %v6700_v3  ;;  %v1420_v28 = vsub.f32 1.0, %v1419_v7  ;;  %v1449_v4 = vmul.f32 %v5467_v32, %v6714_v30  ;;  %vm1454_vm14 = vweird.f32 %v5467_v32  ;;  %v1459_v7 = vand.u32 2147483648, %v6714_v30  ;;  %vm1440_vm2 = vmor %vm1438_vm8, %vm1439_vm11 }
 0x1ec   : > { %9820 = vst [vmem:[#allocation172_spill] sm:$0xff] %v6704_v13  ;;  %v5469_v16 = vpop.eup %5468  ;;  %v1435_v49 = vsub.f32 1.0, %v1434_v48  ;;  %v1406_v25 = vmul.f32 %v5461_v29, %v1405_v42  ;;  %vm6769_vm0 = vcmp.eq.f32.partialorder %v1457_v60, 8.507059e+37  ;;  %v9831_v60 = vmax.f32 %v6613_v10, 0.0  ;;  %vm1455_vm3 = vmor %vm1453_vm13, %vm1454_vm14 }
 0x1ed   : > { %9821 = vst [vmem:[#allocation173_spill] sm:$0xff] %v6711_v50  ;;  %v5471_v54 = vpop.eup %5470  ;;  %v1450_v5 = vsub.f32 1.0, %v1449_v4  ;;  %v1421_v21 = vmul.f32 %v5463_v58, %v1420_v28  ;;  %v2696_v46 = vmul.f32 0.6931472, %v5469_v16  ;;  %v1460_v28 = vor.u32 1.1754944e-38, %v1459_v7 }
 0x1ee   : > { %9822 = vst [vmem:[#allocation174_spill] sm:$0xff] %v6717_v27  ;;  %v5473_v62 = vpop.eup %5472  ;;  %v1407_v47 = vadd.f32 %v5461_v29, %v1406_v25  ;;  %v1436_v40 = vmul.f32 %v5465_v31, %v1435_v49  ;;  %v2698_v45 = vmul.f32 0.6931472, %v5471_v54  ;;  %v9833_v14 = vmax.f32 %v6620_v56, 0.0 }
 0x1ef   : > { %v5475_v2 = vpop.eup %5474  ;;  %v1422_v48 = vadd.f32 %v5463_v58, %v1421_v21  ;;  %v1451_v42 = vmul.f32 %v5467_v32, %v1450_v5  ;;  %v2700_v49 = vmul.f32 0.6931472, %v5473_v62  ;;  %v2819_v5 = vadd.f32 %v2696_v46, %v9831_v60  ;;  %v3567_v60 = vld [vmem:[#allocation2 + $0x168] sm:$0xff] }
 0x1f0   : > { %v1411_v4 = vsel %vm1410_vm15, %v5461_v29, %v1407_v47  ;;  %v1437_v25 = vadd.f32 %v5465_v31, %v1436_v40  ;;  %v2702_v16 = vmul.f32 0.6931472, %v5475_v2  ;;  %v9832_v2 = vmax.f32 %v6618_v15, 0.0 }
 0x1f1   : > { %v1416_v54 = vsel %vm6745_vm7, %v1415_v39, %v1411_v4  ;;  %v1426_v23 = vsel %vm1425_vm1, %v5463_v58, %v1422_v48  ;;  %v1452_v21 = vadd.f32 %v5467_v32, %v1451_v42  ;;  %v2821_v29 = vadd.f32 %v2700_v49, %v9833_v14 }
 0x1f2   : > { %v1431_v47 = vsel %vm6751_vm10, %v1430_v34, %v1426_v23  ;;  %v1441_v24 = vsel %vm1440_vm2, %v5465_v31, %v1437_v25  ;;  %v2820_v39 = vadd.f32 %v2698_v45, %v9832_v2  ;;  %v9834_v46 = vmax.f32 %v6623_v52, 0.0  ;;  %v3106_v34 = vpop.permute.xlu2 %3105 }
 0x1f3   : > { %v1446_v12 = vsel %vm6759_vm12, %v1445_v0, %v1441_v24  ;;  %v1456_v58 = vsel %vm1455_vm3, %v5467_v32, %v1452_v21  ;;  %v2883_v41 = vmin.f32 %v2819_v5, 100.0  ;;  %v2885_v62 = vmin.f32 %v2821_v29, 100.0  ;;  %v3566_v21 = vld [vmem:[#allocation2 + $0x50] sm:$0xff]  ;;  %v3569_v29 = vld [vmem:[#allocation2 + $0x48] sm:$0xff] }
 0x1f4   : > { %v2822_v10 = vadd.f32 %v2702_v16, %v9834_v46  ;;  %v1461_v31 = vsel %vm6769_vm0, %v1460_v28, %v1456_v58  ;;  %v2884_v30 = vmin.f32 %v2820_v39, 100.0  ;;  %v2956_v45 = vmul.f32 %v6724_v63, %v6680_v57  ;;  %v3568_v5 = vld [vmem:[#allocation2 + $0x130] sm:$0xff]  ;;  %v3823_v46 = vld [vmem:[#allocation3 + $0xd8] sm:$0xff] }
 0x1f5   : > { %v2957_v56 = vmul.f32 %v6729_v6, %v6684_v59  ;;  %v2958_v0 = vmul.f32 %v6733_v19, %v6686_v22  ;;  %v2959_v11 = vmul.f32 %v6737_v9, %v6688_v33  ;;  %v3029_v32 = vmul.f32 %v6724_v63, %v6690_v8  ;;  %v3822_v58 = vld [vmem:[#allocation3 + $0xd0] sm:$0xff] }
 0x1f6   : > { %v2886_v15 = vmin.f32 %v2822_v10, 100.0  ;;  %v3030_v52 = vmul.f32 %v6729_v6, %v6692_v43  ;;  %v3031_v7 = vmul.f32 %v6733_v19, %v6694_v18  ;;  %v3032_v40 = vmul.f32 %v6737_v9, %v6698_v61 }
 0x1f7   : > { %vm3182_vm4 = vcmp.lt.f32.partialorder %v6700_v3, %v3106_v34  ;;  %vm3183_vm5 = vcmp.lt.f32.partialorder %v6704_v13, %v3106_v34  ;;  %vm3184_vm6 = vcmp.lt.f32.partialorder %v6711_v50, %v3106_v34  ;;  %vm3185_vm7 = vcmp.lt.f32.partialorder %v6717_v27, %v3106_v34 }
 0x1f8   : > { %v9835_v48 = vmov 0.0   ;;  %v3502_v25 = vadd.f32 %v3029_v32, %v2956_v45  ;;  %v3503_v49 = vadd.f32 %v3030_v52, %v2957_v56  ;;  %v3504_v16 = vadd.f32 %v3031_v7, %v2958_v0 }
 0x1f9   : > { %v5087_v42 = vsel %vm3182_vm4, 1.0, %v9835_v48  ;;  %v5088_v63 = vsel %vm3183_vm5, 1.0, %v9835_v48  ;;  %v5089_v6 = vsel %vm3184_vm6, 1.0, %v9835_v48  ;;  %v5090_v26 = vsel %vm3185_vm7, 1.0, %v9835_v48 }
 0x1fa   : > { %v3374_v19 = vmul.f32 %v5087_v42, %v2956_v45  ;;  %v3375_v28 = vmul.f32 %v5088_v63, %v2957_v56  ;;  %v3376_v4 = vmul.f32 %v5089_v6, %v2958_v0  ;;  %v3377_v9 = vmul.f32 %v5090_v26, %v2959_v11  ;;  %v3824_v6 = vld [vmem:[#allocation3 + $0x1e0] sm:$0xff]  ;;  %v3825_v26 = vld [vmem:[#allocation3 + $0x30] sm:$0xff] }
 0x1fb   : > { %v3505_v23 = vadd.f32 %v3032_v40, %v2959_v11  ;;  %v3630_v10 = vmul.f32 %v3502_v25, %v1416_v54  ;;  %v3631_v34 = vmul.f32 %v3503_v49, %v1431_v47  ;;  %v3632_v42 = vmul.f32 %v3504_v16, %v1446_v12  ;;  %v4078_v45 = vld [vmem:[#allocation4 + $0x1d0] sm:$0xff]  ;;  %v4079_v47 = vld [vmem:[#allocation4 + $0x160] sm:$0xff] }
 0x1fc   : > { %v3438_v24 = vadd.f32 %v3374_v19, %v3029_v32  ;;  %v3439_v2 = vadd.f32 %v3375_v28, %v3030_v52  ;;  %v3440_v39 = vadd.f32 %v3376_v4, %v3031_v7  ;;  %v3441_v14 = vadd.f32 %v3377_v9, %v3032_v40  ;;  %v725_v40 = vpop.permute.xlu1 %724  ;;  %v4080_v12 = vld [vmem:[#allocation4 + $0x1f0] sm:$0xff]  ;;  %v720_v9 = vpop.permute.xlu0 %719 }
 0x1fd   : > { %v3633_v63 = vmul.f32 %v3505_v23, %v1461_v31  ;;  %v3694_v32 = vadd.f32 %v3630_v10, %v3566_v21  ;;  %v3695_v52 = vadd.f32 %v3631_v34, %v3567_v60  ;;  %v3696_v7 = vadd.f32 %v3632_v42, %v3568_v5  ;;  %v4081_v31 = vld [vmem:[#allocation4 + $0xe8] sm:$0xff] }
 0x1fe   : > { %v3886_v56 = vmul.f32 %v3438_v24, %v2883_v41  ;;  %v3887_v0 = vmul.f32 %v3439_v2, %v2884_v30  ;;  %v3888_v11 = vmul.f32 %v3440_v39, %v2885_v62  ;;  %v3889_v27 = vmul.f32 %v3441_v14, %v2886_v15 }
 0x1ff   : > { %v3697_v28 = vadd.f32 %v3633_v63, %v3569_v29  ;;  %3758 = vst [vmem:[#allocation2 + $0x50] sm:$0xff] %v3694_v32  ;;  %v4142_v15 = vadd.f32 %v4078_v45, %v3438_v24  ;;  %v795_v25 = vsub.f32 %v6102_v35, %v725_v40  ;;  %v796_v49 = vsub.f32 %v6104_v36, %v725_v40 }
 0x200   : > { %v3950_v4 = vadd.f32 %v3886_v56, %v3822_v58  ;;  %v3951_v41 = vadd.f32 %v3887_v0, %v3823_v46  ;;  %v3952_v30 = vadd.f32 %v3888_v11, %v3824_v6  ;;  %v3953_v62 = vadd.f32 %v3889_v27, %v3825_v26  ;;  %3759 = vst [vmem:[#allocation2 + $0x168] sm:$0xff] %v3695_v52 }
 0x201   : > { %v797_v16 = vsub.f32 %v6106_v37, %v725_v40  ;;  %v798_v23 = vsub.f32 %v6108_v38, %v725_v40  ;;  %3760 = vst [vmem:[#allocation2 + $0x130] sm:$0xff] %v3696_v7  ;;  %v4143_v21 = vadd.f32 %v4079_v47, %v3439_v2  ;;  %v4144_v60 = vadd.f32 %v4080_v12, %v3440_v39  ;;  %v9857_v39 = vld [vmem:[#allocation17_spill] sm:$0xff] }
 0x202   : > { %v4145_v5 = vadd.f32 %v4081_v31, %v3441_v14  ;;  %v791_v29 = vsub.f32 %v6102_v35, %v720_v9  ;;  %3761 = vst [vmem:[#allocation2 + $0x48] sm:$0xff] %v3697_v28  ;;  %v6830_v58 = vmul.f32 4.0, %v795_v25  ;;  %v6832_v27 = vmul.f32 4.0, %v796_v49 }
 0x203   : > { %v6834_v24 = vmul.f32 4.0, %v797_v16  ;;  %v6836_v46 = vmul.f32 4.0, %v798_v23  ;;  %4014 = vst [vmem:[#allocation3 + $0xd0] sm:$0xff] %v3950_v4  ;;  %v5047_v10 = vmul.f32 -4.0, %v795_v25  ;;  %v5048_v34 = vmul.f32 -4.0, %v796_v49 }
 0x204   : > { %v5049_v42 = vmul.f32 -4.0, %v797_v16  ;;  %v5050_v63 = vmul.f32 -4.0, %v798_v23  ;;  %4015 = vst [vmem:[#allocation3 + $0xd8] sm:$0xff] %v3951_v41  ;;  %v792_v6 = vsub.f32 %v6104_v36, %v720_v9  ;;  %v793_v0 = vsub.f32 %v6106_v37, %v720_v9 }
 0x205   : > { %4016 = vst [vmem:[#allocation3 + $0x1e0] sm:$0xff] %v3952_v30  ;;  %v1207_v26 = vmul.f32 1.442695, %v5047_v10  ;;  %v1209_v45 = vmul.f32 1.442695, %v5048_v34  ;;  %v794_v52 = vsub.f32 %v6108_v38, %v720_v9  ;;  %v6845_v7 = vmul.f32 4.0, %v791_v29 }
 0x206   : > { %4017 = vst [vmem:[#allocation3 + $0x30] sm:$0xff] %v3953_v62  ;;  %v1211_v11 = vmul.f32 1.442695, %v5049_v42  ;;  %v1213_v32 = vmul.f32 1.442695, %v5050_v63  ;;  %v9837_v12 = vsub.f32 1.0, %v6170_v1  ;;  %vm1588_vm8 = vweird.f32 %v6135_v17 }
 0x207   : > { %9836 = vst [vmem:[#allocation175_spill] sm:$0xff] %v6845_v7  ;;  %5476 = vpow2.f32 %v1207_v26  ;;  %v2395_v40 = vand.u32 2147483647, %v6830_v58  ;;  %v2396_v47 = vand.u32 2147483647, %v6832_v27  ;;  %v6854_v41 = vmul.f32 4.0, %v792_v6 }
 0x208   : > { %4206 = vst [vmem:[#allocation4 + $0x1d0] sm:$0xff] %v4142_v15  ;;  %v1586_v31 = vmul.f32 %v6160_v55, %v9837_v12  ;;  %5478 = vpow2.f32 %v1209_v45  ;;  %v2397_v28 = vand.u32 2147483647, %v6834_v24  ;;  %v2398_v4 = vand.u32 2147483647, %v6836_v46 }
 0x209   : > { %4207 = vst [vmem:[#allocation4 + $0x160] sm:$0xff] %v4143_v21  ;;  %5480 = vpow2.f32 %v1211_v11  ;;  %v2459_v9 = vsub.f32 0.0, %v2395_v40  ;;  %v2460_v30 = vsub.f32 0.0, %v2396_v47  ;;  %v5043_v62 = vmul.f32 -4.0, %v791_v29 }
 0x20a   : > { %9838 = vst [vmem:[#allocation176_spill] sm:$0xff] %v6854_v41  ;;  %5482 = vpow2.f32 %v1213_v32  ;;  %v2461_v15 = vsub.f32 0.0, %v2397_v28  ;;  %v2462_v25 = vsub.f32 0.0, %v2398_v4  ;;  %v5044_v1 = vmul.f32 -4.0, %v792_v6 }
 0x20b   : > { %4208 = vst [vmem:[#allocation4 + $0x1f0] sm:$0xff] %v4144_v60  ;;  %v2551_v49 = vmul.f32 1.442695, %v2459_v9  ;;  %v2553_v16 = vmul.f32 1.442695, %v2460_v30  ;;  %v5045_v23 = vmul.f32 -4.0, %v793_v0  ;;  %vm1589_vm13 = vweird.f32 %v6160_v55 }
 0x20c   : > { %4209 = vst [vmem:[#allocation4 + $0xe8] sm:$0xff] %v4145_v5  ;;  %v5046_v21 = vmul.f32 -4.0, %v794_v52  ;;  %v2555_v10 = vmul.f32 1.442695, %v2461_v15  ;;  %v2557_v34 = vmul.f32 1.442695, %v2462_v25  ;;  %v6861_v5 = vadd.f32 %v6160_v55, %v1586_v31  ;;  %vm6930_vm14 = vmor %vm1588_vm8, %vm1589_vm13 }
 0x20d   : > { %v6856_v42 = vmul.f32 4.0, %v793_v0  ;;  %v6858_v63 = vmul.f32 4.0, %v794_v52  ;;  %v5477_v60 = vpop.eup %5476  ;;  %5484 = vpow2.f32 %v2551_v49  ;;  %v1199_v26 = vmul.f32 1.442695, %v5043_v62 }
 0x20e   : > { %v1201_v45 = vmul.f32 1.442695, %v5044_v1  ;;  %v5479_v29 = vpop.eup %5478  ;;  %v6863_v11 = vadd.f32 1.0, %v5477_v60  ;;  %5486 = vpow2.f32 %v2553_v16  ;;  %v1203_v6 = vmul.f32 1.442695, %v5045_v23  ;;  %v9844_v16 = vld [vmem:[#allocation8_spill] sm:$0xff] }
 0x20f   : > { %9839 = vst [vmem:[#allocation177_spill] sm:$0xff] %v6856_v42  ;;  %v6865_v32 = vmul.f32 1.442695, %v5046_v21  ;;  %v5481_v40 = vpop.eup %5480  ;;  %v6867_v47 = vadd.f32 1.0, %v5479_v29  ;;  %5488 = vpow2.f32 %v2555_v10  ;;  %v2391_v28 = vand.u32 2147483647, %v6845_v7 }
 0x210   : > { %9840 = vst [vmem:[#allocation178_spill] sm:$0xff] %v6858_v63  ;;  %v5483_v12 = vpop.eup %5482  ;;  %v6872_v31 = vadd.f32 1.0, %v5481_v40  ;;  %5490 = vrcp.f32 %v6863_v11  ;;  %v2392_v4 = vand.u32 2147483647, %v6854_v41  ;;  %v2393_v30 = vand.u32 2147483647, %v6856_v42 }
 0x211   : > { %v6877_v9 = vadd.f32 1.0, %v5483_v12  ;;  %5492 = vrcp.f32 %v6867_v47  ;;  %v2394_v62 = vand.u32 2147483647, %v6858_v63  ;;  %v2455_v25 = vsub.f32 0.0, %v2391_v28  ;;  %v9843_v29 = vld [vmem:[#allocation7_spill] sm:$0xff] }
 0x212   : > { %9841 = vst [vmem:[#allocation179_spill] sm:$0xff] %v6872_v31  ;;  %5494 = vrcp.f32 %v6872_v31  ;;  %v2456_v1 = vsub.f32 0.0, %v2392_v4  ;;  %v2457_v23 = vsub.f32 0.0, %v2393_v30  ;;  %vm911_vm9 = vcmp.gt.f32.partialorder %v6114_v44, -4.0 }
 0x213   : > { %9842 = vst [vmem:[#allocation180_spill] sm:$0xff] %v6877_v9  ;;  %v5485_v49 = vpop.eup %5484  ;;  %5496 = vrcp.f32 %v6877_v9  ;;  %v2458_v21 = vsub.f32 0.0, %v2394_v62  ;;  %vm912_vm10 = vcmp.gt.f32.partialorder %v9843_v29, -4.0  ;;  %v2543_v15 = vmul.f32 1.442695, %v2455_v25 }
 0x214   : > { %v5487_v10 = vpop.eup %5486  ;;  %5498 = vpow2.f32 %v2557_v34  ;;  %v2651_v60 = vadd.f32 1.0, %v5485_v49  ;;  %v2545_v28 = vmul.f32 1.442695, %v2456_v1  ;;  %v2547_v0 = vmul.f32 1.442695, %v2457_v23  ;;  %v9845_v49 = vld [vmem:[#allocation9_spill] sm:$0xff] }
 0x215   : > { %v5489_v40 = vpop.eup %5488  ;;  %v2652_v12 = vadd.f32 1.0, %v5487_v10  ;;  %5500 = vpow2.f32 %v1199_v26  ;;  %vm913_vm11 = vcmp.gt.f32.partialorder %v9844_v16, -4.0  ;;  %v2549_v62 = vmul.f32 1.442695, %v2458_v21 }
 0x216   : > { %v6888_v4 = vpop.eup %5490  ;;  %v2653_v52 = vadd.f32 1.0, %v5489_v40  ;;  %5502 = vlog2.f32 %v2651_v60  ;;  %vm914_vm12 = vcmp.gt.f32.partialorder %v9845_v49, -4.0  ;;  %v6907_v1 = vsel %vm911_vm9, 1.0, %v9835_v48 }
 0x217   : > { %v6891_v30 = vpop.eup %5492  ;;  %v6895_v34 = vmul.f32 %v6888_v4, %v6863_v11  ;;  %5504 = vlog2.f32 %v2652_v12  ;;  %v6912_v23 = vsel %vm912_vm10, 1.0, %v9835_v48  ;;  %v6921_v60 = vsel %vm913_vm11, 1.0, %v9835_v48 }
 0x218   : > { %v6898_v26 = vpop.eup %5494  ;;  %v6902_v25 = vmul.f32 %v6891_v30, %v6867_v47  ;;  %5506 = vlog2.f32 %v2653_v52  ;;  %v6926_v12 = vsel %vm914_vm12, 1.0, %v9835_v48  ;;  %v1591_v40 = vsel %vm6930_vm14, %v6160_v55, %v6861_v5 }
 0x219   : > { %v6914_v21 = vpop.eup %5496  ;;  %v6918_v10 = vmul.f32 %v6898_v26, %v6872_v31  ;;  %5508 = vpow2.f32 %v1201_v45  ;;  %v1592_v45 = vand.u32 2147483647, %v6135_v17  ;;  %vm1604_vm1 = vweird.f32 %v9857_v39 }
 0x21a   : > { %9846 = vst [vmem:[#allocation7_spill] sm:$0xff] %v6914_v21  ;;  %v5499_v52 = vpop.eup %5498  ;;  %5510 = vpow2.f32 %v1203_v6  ;;  %v6938_v56 = vmul.f32 %v6914_v21, %v6877_v9  ;;  %v9879_v21 = vld [vmem:[#allocation16_spill] sm:$0xff] }
 0x21b   : > { %v5501_v19 = vpop.eup %5500  ;;  %v2654_v14 = vadd.f32 1.0, %v5499_v52  ;;  %5512 = vpow2.f32 %v6865_v32  ;;  %vm6952_vm15 = vcmp.eq.f32.partialorder %v1592_v45, 8.507059e+37  ;;  %v1594_v32 = vand.u32 2147483648, %v6135_v17  ;;  %v9855_v52 = vld [vmem:[#allocation19_spill] sm:$0xff]  ;;  %v9860_v17 = vld [vmem:[#allocation21_spill] sm:$0xff] }
 0x21c   : > { %9849 = vst [vmem:[#allocation8_spill] sm:$0xff] %v6938_v56  ;;  %v6941_v6 = vpop.eup %5502  ;;  %v6944_v2 = vadd.f32 1.0, %v5501_v19  ;;  %5514 = vpow2.f32 %v2543_v15  ;;  %v9856_v42 = vsub.f32 1.0, %v9855_v52  ;;  %v9859_v15 = vld [vmem:[#allocation12_spill] sm:$0xff]  ;;  %v9861_v45 = vsub.f32 1.0, %v9860_v17  ;;  %v9862_v52 = vld [vmem:[#allocation18_spill] sm:$0xff] }
 0x21d   : > { %9850 = vst [vmem:[#allocation9_spill] sm:$0xff] %v6941_v6  ;;  %v6950_v50 = vpop.eup %5504  ;;  %5516 = vlog2.f32 %v2654_v14  ;;  %vm1603_vm0 = vweird.f32 %v9859_v15  ;;  %v1607_v55 = vand.u32 2147483647, %v9859_v15  ;;  %v1609_v54 = vand.u32 2147483648, %v9859_v15 }
 0x21e   : > { %9851 = vst [vmem:[#allocation181_spill] sm:$0xff] %v6944_v2  ;;  %v1601_v19 = vmul.f32 %v9857_v39, %v9856_v42  ;;  %v6960_v41 = vpop.eup %5506  ;;  %5518 = vrcp.f32 %v6944_v2  ;;  %v1595_v5 = vor.u32 1.1754944e-38, %v1594_v32  ;;  %v1616_v7 = vmul.f32 %v9862_v52, %v9861_v45  ;;  %vm6991_vm3 = vmor %vm1603_vm0, %vm1604_vm1  ;;  %v9877_v45 = vld [vmem:[#allocation20_spill] sm:$0xff] }
 0x21f   : > { %9852 = vst [vmem:[#allocation182_spill] sm:$0xff] %v6950_v50  ;;  %v5509_v14 = vpop.eup %5508  ;;  %5520 = vpow2.f32 %v2545_v28  ;;  %vm6976_vm2 = vcmp.eq.f32.partialorder %v1607_v55, 8.507059e+37  ;;  %v1610_v32 = vor.u32 1.1754944e-38, %v1609_v54  ;;  %v9871_v55 = vld [vmem:[#allocation15_spill] sm:$0xff]  ;;  %vm1619_vm5 = vweird.f32 %v9862_v52  ;;  %v9875_v54 = vld [vmem:[#allocation22_spill] sm:$0xff] }
 0x220   : > { %9858 = vst [vmem:[#allocation19_spill] sm:$0xff] %v6960_v41  ;;  %v5511_v42 = vpop.eup %5510  ;;  %v6971_v53 = vadd.f32 1.0, %v5509_v14  ;;  %5522 = vpow2.f32 %v2547_v0  ;;  %v1602_v20 = vadd.f32 %v9857_v39, %v1601_v19  ;;  %v6985_v14 = vsel %vm6952_vm15, %v1595_v5, %v1591_v40 }
 0x221   : > { %v5513_v41 = vpop.eup %5512  ;;  %v6974_v50 = vadd.f32 1.0, %v5511_v42  ;;  %5524 = vpow2.f32 %v2549_v62  ;;  %v1617_v62 = vadd.f32 %v9862_v52, %v1616_v7  ;;  %vm1618_vm4 = vweird.f32 %v9871_v55 }
 0x222   : > { %9863 = vst [vmem:[#allocation17_spill] sm:$0xff] %v6971_v53  ;;  %v5515_v17 = vpop.eup %5514  ;;  %v6980_v6 = vadd.f32 1.0, %v5513_v41  ;;  %5526 = vrcp.f32 %v6971_v53  ;;  %vm7004_vm6 = vmor %vm1618_vm4, %vm1619_vm5  ;;  %v1622_v15 = vand.u32 2147483647, %v9871_v55  ;;  %v1624_v7 = vand.u32 2147483648, %v9871_v55 }
 0x223   : > { %9864 = vst [vmem:[#allocation12_spill] sm:$0xff] %v6974_v50  ;;  %v6996_v19 = vpop.eup %5516  ;;  %5528 = vrcp.f32 %v6974_v50  ;;  %v2647_v41 = vadd.f32 1.0, %v5515_v17  ;;  %v9876_v5 = vsub.f32 1.0, %v9875_v54  ;;  %v1621_v9 = vsel %vm7004_vm6, %v9862_v52, %v1617_v62 }
 0x224   : > { %9867 = vst [vmem:[#allocation21_spill] sm:$0xff] %v6980_v6  ;;  %v7001_v63 = vpop.eup %5518  ;;  %5530 = vrcp.f32 %v6980_v6  ;;  %vm1633_vm7 = vweird.f32 %v9879_v21  ;;  %vm7024_vm8 = vcmp.eq.f32.partialorder %v1622_v15, 8.507059e+37  ;;  %vm1634_vm9 = vweird.f32 %v9877_v45 }
 0x225   : > { %9870 = vst [vmem:[#allocation18_spill] sm:$0xff] %v6996_v19  ;;  %v1631_v42 = vmul.f32 %v9877_v45, %v9876_v5  ;;  %v5521_v17 = vpop.eup %5520  ;;  %v7015_v51 = vmul.f32 %v7001_v63, %v6944_v2  ;;  %v1606_v19 = vsel %vm6991_vm3, %v9857_v39, %v1602_v20  ;;  %v1625_v5 = vor.u32 1.1754944e-38, %v1624_v7  ;;  %vm7037_vm10 = vmor %vm1633_vm7, %vm1634_vm9 }
 0x226   : > { %9872 = vst [vmem:[#allocation15_spill] sm:$0xff] %v7001_v63  ;;  %v5523_v55 = vpop.eup %5522  ;;  %v2648_v56 = vadd.f32 1.0, %v5521_v17  ;;  %5532 = vlog2.f32 %v2647_v41  ;;  %v1637_v20 = vand.u32 2147483647, %v9879_v21  ;;  %v1611_v0 = vsel %vm6976_vm2, %v1610_v32, %v1606_v19  ;;  %v9888_v19 = vld [vmem:[#allocation23_spill] sm:$0xff]  ;;  %v9890_v17 = vld [vmem:[#allocation25_spill] sm:$0xff] }
 0x227   : > { %9878 = vst [vmem:[#allocation22_spill] sm:$0xff] %v7015_v51  ;;  %v1632_v2 = vadd.f32 %v9877_v45, %v1631_v42  ;;  %v5525_v63 = vpop.eup %5524  ;;  %v2649_v31 = vadd.f32 1.0, %v5523_v55  ;;  %v1639_v40 = vand.u32 2147483648, %v9879_v21  ;;  %v9891_v55 = vld [vmem:[#allocation26_spill] sm:$0xff]  ;;  %v2968_v15 = vmul.f32 %v6907_v1, %v6680_v57 }
 0x228   : > { %v7031_v39 = vpop.eup %5526  ;;  %v2650_v52 = vadd.f32 1.0, %v5525_v63  ;;  %5534 = vlog2.f32 %v2648_v56  ;;  %v1626_v56 = vsel %vm7024_vm8, %v1625_v5, %v1621_v9  ;;  %vm1638_vm11 = vcmp.eq.f32.partialorder %v1637_v20, 8.507059e+37 }
 0x229   : > { %9882 = vst [vmem:[#allocation20_spill] sm:$0xff] %v7031_v39  ;;  %v7042_v41 = vpop.eup %5528  ;;  %v7047_v7 = vmul.f32 %v7031_v39, %v6971_v53  ;;  %5536 = vlog2.f32 %v2649_v31  ;;  %v1636_v32 = vsel %vm7037_vm10, %v9877_v45, %v1632_v2  ;;  %v1640_v21 = vor.u32 1.1754944e-38, %v1639_v40  ;;  %v9893_v2 = vld [vmem:[#allocation27_spill] sm:$0xff] }
 0x22a   : > { %9885 = vst [vmem:[#allocation16_spill] sm:$0xff] %v7042_v41  ;;  %v7051_v28 = vpop.eup %5530  ;;  %v2720_v63 = vmul.f32 0.6931472, %v9888_v19  ;;  %v7059_v42 = vmul.f32 %v7042_v41, %v6974_v50  ;;  %5538 = vlog2.f32 %v2650_v52  ;;  %v2722_v31 = vmul.f32 0.6931472, %v9890_v17 }
 0x22b   : > { %9886 = vst [vmem:[#allocation183_spill] sm:$0xff] %v7047_v7  ;;  %v2724_v54 = vmul.f32 0.6931472, %v9891_v55  ;;  %v7066_v5 = vmul.f32 %v7051_v28, %v6980_v6  ;;  %v2726_v45 = vmul.f32 0.6931472, %v9893_v2  ;;  %v9894_v20 = vmax.f32 %v6114_v44, 0.0 }
 0x22c   : > { %9887 = vst [vmem:[#allocation184_spill] sm:$0xff] %v7051_v28  ;;  %v7073_v40 = vpop.eup %5532  ;;  %v1641_v19 = vsel %vm1638_vm11, %v1640_v21, %v1636_v32  ;;  %v9896_v52 = vmax.f32 %v9843_v29, 0.0  ;;  %v9897_v55 = vmax.f32 %v9844_v16, 0.0  ;;  %v9899_v44 = vmax.f32 %v9845_v49, 0.0  ;;  %v3121_v16 = vpop.permute.xlu2 %3120  ;;  %v3581_v28 = vld [vmem:[#allocation2 + $0x140] sm:$0xff] }
 0x22d   : > { %9889 = vst [vmem:[#allocation23_spill] sm:$0xff] %v7059_v42  ;;  %v7071_v62 = vadd.f32 %v2720_v63, %v9894_v20  ;;  %v2969_v29 = vmul.f32 %v6912_v23, %v6684_v59  ;;  %v2970_v32 = vmul.f32 %v6921_v60, %v6686_v22  ;;  %v2971_v49 = vmul.f32 %v6926_v12, %v6688_v33  ;;  %v4092_v33 = vld [vmem:[#allocation4 + $0xf0] sm:$0xff] }
 0x22e   : > { %9892 = vst [vmem:[#allocation25_spill] sm:$0xff] %v7066_v5  ;;  %v7077_v17 = vadd.f32 %v2722_v31, %v9896_v52  ;;  %v7081_v9 = vadd.f32 %v2724_v54, %v9897_v55  ;;  %v7085_v6 = vpop.eup %5534  ;;  %v7089_v63 = vadd.f32 %v2726_v45, %v9899_v44  ;;  %v3041_v45 = vmul.f32 %v6907_v1, %v6690_v8  ;;  %v9902_v44 = vld [vmem:[#allocation173_spill] sm:$0xff]  ;;  %v4091_v8 = vld [vmem:[#allocation4 + $0xd8] sm:$0xff]  ;;  %v9963_v5 = vld [vmem:[#allocation171_spill] sm:$0xff] }
 0x22f   : > { %9895 = vst [vmem:[#allocation26_spill] sm:$0xff] %v7073_v40  ;;  %v2895_v2 = vmin.f32 %v7071_v62, 100.0  ;;  %v7096_v21 = vpop.eup %5536  ;;  %v3042_v62 = vmul.f32 %v6912_v23, %v6692_v43  ;;  %v3043_v52 = vmul.f32 %v6921_v60, %v6694_v18  ;;  %v3044_v55 = vmul.f32 %v6926_v12, %v6698_v61  ;;  %v9903_v23 = vld [vmem:[#allocation174_spill] sm:$0xff]  ;;  %v3579_v40 = vld [vmem:[#allocation2 + $0x188] sm:$0xff] }
 0x230   : > { %9898 = vst [vmem:[#allocation27_spill] sm:$0xff] %v7085_v6  ;;  %v2896_v31 = vmin.f32 %v7077_v17, 100.0  ;;  %v2897_v54 = vmin.f32 %v7081_v9, 100.0  ;;  %v2898_v20 = vmin.f32 %v7089_v63, 100.0  ;;  %v7111_v17 = vpop.eup %5538  ;;  %v3514_v9 = vadd.f32 %v3041_v45, %v2968_v15  ;;  %v3578_v6 = vld [vmem:[#allocation2 + $0xe0] sm:$0xff]  ;;  %v3580_v60 = vld [vmem:[#allocation2 + $0x138] sm:$0xff] }
 0x231   : > { %9900 = vst [vmem:[#allocation185_spill] sm:$0xff] %v7096_v21  ;;  %vm3194_vm12 = vcmp.lt.f32.partialorder %v6700_v3, %v3121_v16  ;;  %vm3195_vm13 = vcmp.lt.f32.partialorder %v6704_v13, %v3121_v16  ;;  %vm3196_vm14 = vcmp.lt.f32.partialorder %v9902_v44, %v3121_v16  ;;  %v3515_v1 = vadd.f32 %v3042_v62, %v2969_v29  ;;  %v740_v44 = vpop.permute.xlu1 %739 }
 0x232   : > { %9901 = vst [vmem:[#allocation186_spill] sm:$0xff] %v7111_v17  ;;  %v3516_v63 = vadd.f32 %v3043_v52, %v2970_v32  ;;  %v3517_v21 = vadd.f32 %v3044_v55, %v2971_v49  ;;  %vm3197_vm15 = vcmp.lt.f32.partialorder %v9903_v23, %v3121_v16  ;;  %v3642_v12 = vmul.f32 %v3514_v9, %v6985_v14  ;;  %v4090_v14 = vld [vmem:[#allocation4 + $0x68] sm:$0xff] }
 0x233   : > { %v5099_v17 = vsel %vm3194_vm12, 1.0, %v9835_v48  ;;  %v5100_v50 = vsel %vm3195_vm13, 1.0, %v9835_v48  ;;  %v5101_v41 = vsel %vm3196_vm14, 1.0, %v9835_v48  ;;  %v3643_v53 = vmul.f32 %v3515_v1, %v1611_v0 }
 0x234   : > { %v3644_v39 = vmul.f32 %v3516_v63, %v1626_v56  ;;  %v3645_v7 = vmul.f32 %v3517_v21, %v1641_v19  ;;  %v5102_v51 = vsel %vm3197_vm15, 1.0, %v9835_v48  ;;  %v3706_v13 = vadd.f32 %v3642_v12, %v3578_v6  ;;  %v3834_v19 = vld [vmem:[#allocation3 + $0xe0] sm:$0xff]  ;;  %v3835_v21 = vld [vmem:[#allocation3 + $0x10] sm:$0xff]  ;;  %v3836_v6 = vld [vmem:[#allocation3 + $0x1a8] sm:$0xff] }
 0x235   : > { %v3386_v3 = vmul.f32 %v5099_v17, %v2968_v15  ;;  %v3387_v16 = vmul.f32 %v5100_v50, %v2969_v29  ;;  %v3388_v23 = vmul.f32 %v5101_v41, %v2970_v32  ;;  %v3707_v61 = vadd.f32 %v3643_v53, %v3579_v40  ;;  %v4093_v32 = vld [vmem:[#allocation4 + $0x80] sm:$0xff] }
 0x236   : > { %v3708_v18 = vadd.f32 %v3644_v39, %v3580_v60  ;;  %v3709_v43 = vadd.f32 %v3645_v7, %v3581_v28  ;;  %v3389_v9 = vmul.f32 %v5102_v51, %v2971_v49  ;;  %3770 = vst [vmem:[#allocation2 + $0xe0] sm:$0xff] %v3706_v13  ;;  %v807_v56 = vsub.f32 %v6102_v35, %v740_v44  ;;  %v3837_v51 = vld [vmem:[#allocation3 + $0xa0] sm:$0xff] }
 0x237   : > { %v3450_v22 = vadd.f32 %v3386_v3, %v3041_v45  ;;  %v3451_v59 = vadd.f32 %v3387_v16, %v3042_v62  ;;  %v3452_v0 = vadd.f32 %v3388_v23, %v3043_v52  ;;  %3771 = vst [vmem:[#allocation2 + $0x188] sm:$0xff] %v3707_v61  ;;  %v808_v50 = vsub.f32 %v6104_v36, %v740_v44 }
 0x238   : > { %v3453_v15 = vadd.f32 %v3389_v9, %v3044_v55  ;;  %v809_v53 = vsub.f32 %v6106_v37, %v740_v44  ;;  %v810_v39 = vsub.f32 %v6108_v38, %v740_v44  ;;  %3772 = vst [vmem:[#allocation2 + $0x138] sm:$0xff] %v3708_v18  ;;  %v7127_v52 = vmul.f32 4.0, %v807_v56 }
 0x239   : > { %v3898_v13 = vmul.f32 %v3450_v22, %v2895_v2  ;;  %v3899_v41 = vmul.f32 %v3451_v59, %v2896_v31  ;;  %v3900_v3 = vmul.f32 %v3452_v0, %v2897_v54  ;;  %v4154_v7 = vadd.f32 %v4090_v14, %v3450_v22  ;;  %3773 = vst [vmem:[#allocation2 + $0x140] sm:$0xff] %v3709_v43  ;;  %v735_v31 = vpop.permute.xlu0 %734 }
 0x23a   : > { %v3901_v61 = vmul.f32 %v3453_v15, %v2898_v20  ;;  %v4155_v40 = vadd.f32 %v4091_v8, %v3451_v59  ;;  %v4156_v29 = vadd.f32 %v4092_v33, %v3452_v0  ;;  %v7129_v18 = vmul.f32 4.0, %v808_v50 }
 0x23b   : > { %v3962_v49 = vadd.f32 %v3898_v13, %v3834_v19  ;;  %v3963_v45 = vadd.f32 %v3899_v41, %v3835_v21  ;;  %v3964_v62 = vadd.f32 %v3900_v3, %v3836_v6  ;;  %4218 = vst [vmem:[#allocation4 + $0x68] sm:$0xff] %v4154_v7  ;;  %v7131_v2 = vmul.f32 4.0, %v809_v53 }
 0x23c   : > { %v3965_v55 = vadd.f32 %v3901_v61, %v3837_v51  ;;  %4219 = vst [vmem:[#allocation4 + $0xd8] sm:$0xff] %v4155_v40  ;;  %v7133_v22 = vmul.f32 4.0, %v810_v39  ;;  %v5059_v43 = vmul.f32 -4.0, %v807_v56  ;;  %v5060_v8 = vmul.f32 -4.0, %v808_v50 }
 0x23d   : > { %4026 = vst [vmem:[#allocation3 + $0xe0] sm:$0xff] %v3962_v49  ;;  %v5061_v33 = vmul.f32 -4.0, %v809_v53  ;;  %v5062_v59 = vmul.f32 -4.0, %v810_v39  ;;  %v4157_v20 = vadd.f32 %v4093_v32, %v3453_v15  ;;  %v803_v60 = vsub.f32 %v6102_v35, %v735_v31 }
 0x23e   : > { %4027 = vst [vmem:[#allocation3 + $0x10] sm:$0xff] %v3963_v45  ;;  %v1231_v1 = vmul.f32 1.442695, %v5059_v43  ;;  %v1233_v63 = vmul.f32 1.442695, %v5060_v8  ;;  %v804_v9 = vsub.f32 %v6104_v36, %v735_v31  ;;  %v805_v19 = vsub.f32 %v6106_v37, %v735_v31 }
 0x23f   : > { %4028 = vst [vmem:[#allocation3 + $0x1a8] sm:$0xff] %v3964_v62  ;;  %v1235_v12 = vmul.f32 1.442695, %v5061_v33  ;;  %v1237_v16 = vmul.f32 1.442695, %v5062_v59  ;;  %v806_v15 = vsub.f32 %v6108_v38, %v735_v31  ;;  %v7148_v39 = vmul.f32 4.0, %v803_v60 }
 0x240   : > { %4029 = vst [vmem:[#allocation3 + $0xa0] sm:$0xff] %v3965_v55  ;;  %5540 = vpow2.f32 %v1231_v1  ;;  %v2407_v0 = vand.u32 2147483647, %v7127_v52  ;;  %v2408_v56 = vand.u32 2147483647, %v7129_v18  ;;  %v7150_v41 = vmul.f32 4.0, %v804_v9 }
 0x241   : > { %4220 = vst [vmem:[#allocation4 + $0xf0] sm:$0xff] %v4156_v29  ;;  %5542 = vpow2.f32 %v1233_v63  ;;  %v2409_v21 = vand.u32 2147483647, %v7131_v2  ;;  %v2410_v6 = vand.u32 2147483647, %v7133_v22  ;;  %v5055_v61 = vmul.f32 -4.0, %v803_v60 }
 0x242   : > { %4221 = vst [vmem:[#allocation4 + $0x80] sm:$0xff] %v4157_v20  ;;  %5544 = vpow2.f32 %v1235_v12  ;;  %v2471_v50 = vsub.f32 0.0, %v2407_v0  ;;  %v2472_v53 = vsub.f32 0.0, %v2408_v56  ;;  %v5056_v40 = vmul.f32 -4.0, %v804_v9 }
 0x243   : > { %9904 = vst [vmem:[#allocation187_spill] sm:$0xff] %v7148_v39  ;;  %5546 = vpow2.f32 %v1237_v16  ;;  %v2473_v51 = vsub.f32 0.0, %v2409_v21  ;;  %v2474_v13 = vsub.f32 0.0, %v2410_v6  ;;  %v7152_v32 = vmul.f32 4.0, %v805_v19 }
 0x244   : > { %9905 = vst [vmem:[#allocation188_spill] sm:$0xff] %v7150_v41  ;;  %v2575_v3 = vmul.f32 1.442695, %v2471_v50  ;;  %v2577_v7 = vmul.f32 1.442695, %v2472_v53  ;;  %v5057_v49 = vmul.f32 -4.0, %v805_v19  ;;  %vm1768_vm4 = vweird.f32 %v6863_v11 }
 0x245   : > { %v2579_v29 = vmul.f32 1.442695, %v2473_v51  ;;  %9906 = vst [vmem:[#allocation189_spill] sm:$0xff] %v7152_v32  ;;  %v5058_v45 = vmul.f32 -4.0, %v806_v15  ;;  %v2581_v55 = vmul.f32 1.442695, %v2474_v13  ;;  %vm1769_vm5 = vweird.f32 %v6888_v4 }
 0x246   : > { %v5541_v62 = vpop.eup %5540  ;;  %5548 = vpow2.f32 %v2575_v3  ;;  %v7154_v31 = vmul.f32 4.0, %v806_v15  ;;  %v1223_v43 = vmul.f32 1.442695, %v5055_v61  ;;  %v1225_v59 = vmul.f32 1.442695, %v5056_v40  ;;  %vm7240_vm6 = vmor %vm1768_vm4, %vm1769_vm5  ;;  %v9930_v13 = vld [vmem:[#allocation8_spill] sm:$0xff] }
 0x247   : > { %v5543_v8 = vpop.eup %5542  ;;  %v7156_v33 = vadd.f32 1.0, %v5541_v62  ;;  %5550 = vpow2.f32 %v2577_v7  ;;  %v1227_v60 = vmul.f32 1.442695, %v5057_v49  ;;  %v1229_v12 = vmul.f32 1.442695, %v5058_v45 }
 0x248   : > { %9907 = vst [vmem:[#allocation190_spill] sm:$0xff] %v7154_v31  ;;  %v5545_v1 = vpop.eup %5544  ;;  %v7159_v63 = vadd.f32 1.0, %v5543_v8  ;;  %5552 = vpow2.f32 %v2579_v29  ;;  %v2403_v56 = vand.u32 2147483647, %v7148_v39  ;;  %v2404_v21 = vand.u32 2147483647, %v7150_v41 }
 0x249   : > { %v5547_v16 = vpop.eup %5546  ;;  %v7161_v9 = vadd.f32 1.0, %v5545_v1  ;;  %5554 = vrcp.f32 %v7156_v33  ;;  %v2405_v6 = vand.u32 2147483647, %v7152_v32  ;;  %v2406_v50 = vand.u32 2147483647, %v7154_v31  ;;  %v9932_v31 = vld [vmem:[#allocation7_spill] sm:$0xff] }
 0x24a   : > { %v7166_v19 = vadd.f32 1.0, %v5547_v16  ;;  %5556 = vrcp.f32 %v7159_v63  ;;  %v2467_v53 = vsub.f32 0.0, %v2403_v56  ;;  %v2468_v3 = vsub.f32 0.0, %v2404_v21  ;;  %v9962_v41 = vld [vmem:[#allocation170_spill] sm:$0xff] }
 0x24b   : > { %5558 = vrcp.f32 %v7161_v9  ;;  %v2469_v7 = vsub.f32 0.0, %v2405_v6  ;;  %v2470_v29 = vsub.f32 0.0, %v2406_v50  ;;  %vm923_vm0 = vcmp.gt.f32.partialorder %v6830_v58, -4.0 }
 0x24c   : > { %v5549_v51 = vpop.eup %5548  ;;  %5560 = vrcp.f32 %v7166_v19  ;;  %v2567_v62 = vmul.f32 1.442695, %v2467_v53  ;;  %vm924_vm1 = vcmp.gt.f32.partialorder %v6832_v27, -4.0  ;;  %v2569_v16 = vmul.f32 1.442695, %v2468_v3 }
 0x24d   : > { %v5551_v61 = vpop.eup %5550  ;;  %5562 = vpow2.f32 %v2581_v55  ;;  %v2663_v40 = vadd.f32 1.0, %v5549_v51  ;;  %vm925_vm2 = vcmp.gt.f32.partialorder %v6834_v24, -4.0  ;;  %v2571_v21 = vmul.f32 1.442695, %v2469_v7 }
 0x24e   : > { %v5553_v49 = vpop.eup %5552  ;;  %v2664_v45 = vadd.f32 1.0, %v5551_v61  ;;  %5564 = vpow2.f32 %v1223_v43  ;;  %vm926_vm3 = vcmp.gt.f32.partialorder %v6836_v46, -4.0  ;;  %v2573_v50 = vmul.f32 1.442695, %v2470_v29 }
 0x24f   : > { %v7178_v8 = vpop.eup %5554  ;;  %v2665_v1 = vadd.f32 1.0, %v5553_v49  ;;  %5566 = vlog2.f32 %v2663_v40  ;;  %v7197_v53 = vsel %vm923_vm0, 1.0, %v9835_v48  ;;  %v7205_v7 = vsel %vm924_vm1, 1.0, %v9835_v48 }
 0x250   : > { %v7181_v56 = vpop.eup %5556  ;;  %v7185_v55 = vmul.f32 %v7178_v8, %v7156_v33  ;;  %5568 = vlog2.f32 %v2664_v45  ;;  %v7208_v61 = vsel %vm925_vm2, 1.0, %v9835_v48  ;;  %v7215_v49 = vsel %vm926_vm3, 1.0, %v9835_v48 }
 0x251   : > { %v7188_v43 = vpop.eup %5558  ;;  %v7192_v6 = vmul.f32 %v7181_v56, %v7159_v63  ;;  %5570 = vlog2.f32 %v2665_v1  ;;  %v9908_v45 = vsub.f32 1.0, %v6895_v34  ;;  %v1774_v28 = vand.u32 2147483648, %v6863_v11 }
 0x252   : > { %v7199_v51 = vpop.eup %5560  ;;  %5572 = vpow2.f32 %v1225_v59  ;;  %v7212_v29 = vmul.f32 %v7188_v43, %v7161_v9  ;;  %vm1783_vm7 = vweird.f32 %v6867_v47  ;;  %vm1784_vm8 = vweird.f32 %v6891_v30 }
 0x253   : > { %v5563_v40 = vpop.eup %5562  ;;  %5574 = vpow2.f32 %v1227_v60  ;;  %v1766_v59 = vmul.f32 %v6888_v4, %v9908_v45  ;;  %v7223_v15 = vmul.f32 %v7199_v51, %v7166_v19  ;;  %v1772_v45 = vand.u32 2147483647, %v6863_v11  ;;  %vm7269_vm10 = vmor %vm1783_vm7, %vm1784_vm8 }
 0x254   : > { %v5565_v1 = vpop.eup %5564  ;;  %v2666_v0 = vadd.f32 1.0, %v5563_v40  ;;  %5576 = vpow2.f32 %v1229_v12  ;;  %v1775_v14 = vor.u32 1.1754944e-38, %v1774_v28  ;;  %vm1799_vm12 = vweird.f32 %v6898_v26 }
 0x255   : > { %v7225_v20 = vpop.eup %5566  ;;  %v7227_v54 = vadd.f32 1.0, %v5565_v1  ;;  %5578 = vpow2.f32 %v2567_v62  ;;  %v1767_v60 = vadd.f32 %v6888_v4, %v1766_v59  ;;  %v9915_v59 = vsub.f32 1.0, %v6902_v25 }
 0x256   : > { %9909 = vst [vmem:[#allocation191_spill] sm:$0xff] %v7225_v20  ;;  %v7231_v34 = vpop.eup %5568  ;;  %5580 = vlog2.f32 %v2666_v0  ;;  %v1787_v25 = vand.u32 2147483647, %v6867_v47  ;;  %vm1773_vm9 = vcmp.eq.f32.partialorder %v1772_v45, 8.507059e+37  ;;  %v9931_v3 = vsub.f32 1.0, %v9930_v13 }
 0x257   : > { %9910 = vst [vmem:[#allocation192_spill] sm:$0xff] %v7227_v54  ;;  %v7236_v40 = vpop.eup %5570  ;;  %5582 = vrcp.f32 %v7227_v54  ;;  %v1781_v0 = vmul.f32 %v6891_v30, %v9915_v59  ;;  %v1771_v11 = vsel %vm7240_vm6, %v6888_v4, %v1767_v60  ;;  %vm1814_vm1 = vweird.f32 %v9932_v31 }
 0x258   : > { %9911 = vst [vmem:[#allocation193_spill] sm:$0xff] %v7231_v34  ;;  %v5573_v1 = vpop.eup %5572  ;;  %5584 = vpow2.f32 %v2569_v16  ;;  %v1789_v16 = vand.u32 2147483648, %v6867_v47  ;;  %v7263_v60 = vsel %vm1773_vm9, %v1775_v14, %v1771_v11  ;;  %v9922_v14 = vsub.f32 1.0, %v6918_v10  ;;  %v9926_v11 = vld [vmem:[#allocation179_spill] sm:$0xff] }
 0x259   : > { %9912 = vst [vmem:[#allocation194_spill] sm:$0xff] %v7236_v40  ;;  %v5575_v23 = vpop.eup %5574  ;;  %v7252_v44 = vadd.f32 1.0, %v5573_v1  ;;  %5586 = vpow2.f32 %v2571_v21  ;;  %v1782_v17 = vadd.f32 %v6891_v30, %v1781_v0  ;;  %vm7285_vm11 = vcmp.eq.f32.partialorder %v1787_v25, 8.507059e+37  ;;  %v3847_v40 = vld [vmem:[#allocation3 + $0xe8] sm:$0xff] }
 0x25a   : > { %v5577_v59 = vpop.eup %5576  ;;  %v7256_v12 = vadd.f32 1.0, %v5575_v23  ;;  %5588 = vpow2.f32 %v2573_v50  ;;  %v1796_v0 = vmul.f32 %v6898_v26, %v9922_v14  ;;  %v1790_v10 = vor.u32 1.1754944e-38, %v1789_v16 }
 0x25b   : > { %9916 = vst [vmem:[#allocation195_spill] sm:$0xff] %v7252_v44  ;;  %v5579_v62 = vpop.eup %5578  ;;  %v7260_v28 = vadd.f32 1.0, %v5577_v59  ;;  %5590 = vrcp.f32 %v7252_v44  ;;  %v1786_v45 = vsel %vm7269_vm10, %v6891_v30, %v1782_v17  ;;  %v1802_v59 = vand.u32 2147483647, %v9926_v11 }
 0x25c   : > { %9917 = vst [vmem:[#allocation196_spill] sm:$0xff] %v7256_v12  ;;  %v7273_v21 = vpop.eup %5580  ;;  %5592 = vrcp.f32 %v7256_v12  ;;  %v2659_v50 = vadd.f32 1.0, %v5579_v62  ;;  %v1797_v17 = vadd.f32 %v6898_v26, %v1796_v0  ;;  %vm1798_vm13 = vweird.f32 %v9926_v11  ;;  %v9948_v0 = vld [vmem:[#allocation18_spill] sm:$0xff] }
 0x25d   : > { %9918 = vst [vmem:[#allocation197_spill] sm:$0xff] %v7260_v28  ;;  %v7282_v1 = vpop.eup %5582  ;;  %5594 = vrcp.f32 %v7260_v28  ;;  %vm7297_vm14 = vmor %vm1798_vm13, %vm1799_vm12  ;;  %v1804_v4 = vand.u32 2147483648, %v9926_v11  ;;  %v1811_v32 = vmul.f32 %v9932_v31, %v9931_v3  ;;  %v7307_v16 = vsel %vm7285_vm11, %v1790_v10, %v1786_v45  ;;  %v9936_v3 = vld [vmem:[#allocation180_spill] sm:$0xff] }
 0x25e   : > { %9921 = vst [vmem:[#allocation198_spill] sm:$0xff] %v7273_v21  ;;  %v5585_v62 = vpop.eup %5584  ;;  %v7293_v30 = vmul.f32 %v7282_v1, %v7227_v54  ;;  %5596 = vlog2.f32 %v2659_v50  ;;  %v1801_v50 = vsel %vm7297_vm14, %v6898_v26, %v1797_v17  ;;  %vm7312_vm15 = vcmp.eq.f32.partialorder %v1802_v59, 8.507059e+37  ;;  %v3846_v21 = vld [vmem:[#allocation3 + $0x198] sm:$0xff] }
 0x25f   : > { %9923 = vst [vmem:[#allocation199_spill] sm:$0xff] %v7282_v1  ;;  %v5587_v23 = vpop.eup %5586  ;;  %v2660_v14 = vadd.f32 1.0, %v5585_v62  ;;  %v1812_v13 = vadd.f32 %v9932_v31, %v1811_v32  ;;  %vm1813_vm0 = vweird.f32 %v9936_v3  ;;  %v1805_v47 = vor.u32 1.1754944e-38, %v1804_v4 }
 0x260   : > { %9927 = vst [vmem:[#allocation179_spill] sm:$0xff] %v7293_v30  ;;  %v5589_v54 = vpop.eup %5588  ;;  %v2661_v1 = vadd.f32 1.0, %v5587_v23  ;;  %v1817_v26 = vand.u32 2147483647, %v9936_v3  ;;  %vm7335_vm2 = vmor %vm1813_vm0, %vm1814_vm1  ;;  %v1819_v17 = vand.u32 2147483648, %v9936_v3  ;;  %v9946_v3 = vld [vmem:[#allocation182_spill] sm:$0xff]  ;;  %v3056_v39 = vmul.f32 %v7215_v49, %v9962_v41 }
 0x261   : > { %v7316_v62 = vpop.eup %5590  ;;  %v2662_v11 = vadd.f32 1.0, %v5589_v54  ;;  %5598 = vlog2.f32 %v2660_v14  ;;  %v1806_v14 = vsel %vm7312_vm15, %v1805_v47, %v1801_v50  ;;  %v1816_v25 = vsel %vm7335_vm2, %v9932_v31, %v1812_v13  ;;  %v9955_v30 = vld [vmem:[#allocation165_spill] sm:$0xff] }
 0x262   : > { %9935 = vst [vmem:[#allocation8_spill] sm:$0xff] %v7316_v62  ;;  %v7320_v23 = vpop.eup %5592  ;;  %v7324_v45 = vmul.f32 %v7316_v62, %v7252_v44  ;;  %5600 = vlog2.f32 %v2661_v1  ;;  %v2746_v62 = vmul.f32 0.6931472, %v9946_v3  ;;  %vm1818_vm3 = vcmp.eq.f32.partialorder %v1817_v26, 8.507059e+37  ;;  %v3136_v26 = vpop.permute.xlu2 %3135 }
 0x263   : > { %9937 = vst [vmem:[#allocation7_spill] sm:$0xff] %v7320_v23  ;;  %v7328_v59 = vpop.eup %5594  ;;  %v7333_v32 = vmul.f32 %v7320_v23, %v7256_v12  ;;  %5602 = vlog2.f32 %v2662_v11  ;;  %v1820_v12 = vor.u32 1.1754944e-38, %v1819_v17  ;;  %v9945_v23 = vld [vmem:[#allocation9_spill] sm:$0xff]  ;;  %v9947_v11 = vld [vmem:[#allocation19_spill] sm:$0xff]  ;;  %v2750_v50 = vmul.f32 0.6931472, %v9948_v0 }
 0x264   : > { %9938 = vst [vmem:[#allocation180_spill] sm:$0xff] %v7324_v45  ;;  %v7346_v54 = vpop.eup %5596  ;;  %v7350_v1 = vmul.f32 %v7328_v59, %v7260_v28  ;;  %v2744_v44 = vmul.f32 0.6931472, %v9945_v23  ;;  %v2748_v4 = vmul.f32 0.6931472, %v9947_v11  ;;  %v2980_v47 = vmul.f32 %v7197_v53, %v6680_v57  ;;  %v9952_v23 = vld [vmem:[#allocation164_spill] sm:$0xff] }
 0x265   : > { %9939 = vst [vmem:[#allocation200_spill] sm:$0xff] %v7328_v59  ;;  %v1821_v13 = vsel %vm1818_vm3, %v1820_v12, %v1816_v25  ;;  %v9950_v10 = vmax.f32 %v6830_v58, 0.0  ;;  %v9951_v17 = vmax.f32 %v6832_v27, 0.0  ;;  %v2981_v3 = vmul.f32 %v7205_v7, %v9952_v23  ;;  %v9956_v12 = vld [vmem:[#allocation166_spill] sm:$0xff]  ;;  %v9958_v25 = vld [vmem:[#allocation167_spill] sm:$0xff]  ;;  %v3593_v57 = vld [vmem:[#allocation2 + $0x8] sm:$0xff] }
 0x266   : > { %9940 = vst [vmem:[#allocation201_spill] sm:$0xff] %v7333_v32  ;;  %v9953_v11 = vmax.f32 %v6834_v24, 0.0  ;;  %v9954_v0 = vmax.f32 %v6836_v46, 0.0  ;;  %v2983_v58 = vmul.f32 %v7215_v49, %v9956_v12  ;;  %vm3206_vm4 = vcmp.lt.f32.partialorder %v9963_v5, %v3136_v26  ;;  %v3603_v32 = vld [vmem:[#allocation2 + $0x1f0] sm:$0xff] }
 0x267   : > { %9943 = vst [vmem:[#allocation202_spill] sm:$0xff] %v7346_v54  ;;  %v7358_v31 = vpop.eup %5598  ;;  %v2843_v54 = vadd.f32 %v2744_v44, %v9950_v10  ;;  %v2844_v28 = vadd.f32 %v2746_v62, %v9951_v17  ;;  %v3053_v10 = vmul.f32 %v7197_v53, %v9958_v25  ;;  %v9959_v17 = vld [vmem:[#allocation168_spill] sm:$0xff]  ;;  %v9966_v53 = vld [vmem:[#allocation174_spill] sm:$0xff]  ;;  %v3592_v25 = vld [vmem:[#allocation2 + $0xf0] sm:$0xff]  ;;  %vm1948_vm8 = vweird.f32 %v7156_v33 }
 0x268   : > { %9944 = vst [vmem:[#allocation203_spill] sm:$0xff] %v7350_v1  ;;  %v2845_v59 = vadd.f32 %v2748_v4, %v9953_v11  ;;  %v2846_v45 = vadd.f32 %v2750_v50, %v9954_v0  ;;  %v7374_v44 = vpop.eup %5600  ;;  %v3054_v24 = vmul.f32 %v7205_v7, %v9959_v17  ;;  %v9961_v11 = vld [vmem:[#allocation169_spill] sm:$0xff]  ;;  %vm3209_vm7 = vcmp.lt.f32.partialorder %v9966_v53, %v3136_v26  ;;  %v3590_v17 = vld [vmem:[#allocation2 + $0x1e0] sm:$0xff] }
 0x269   : > { %9949 = vst [vmem:[#allocation9_spill] sm:$0xff] %v7358_v31  ;;  %v2982_v31 = vmul.f32 %v7208_v61, %v9955_v30  ;;  %v2907_v27 = vmin.f32 %v2843_v54, 100.0  ;;  %v2908_v62 = vmin.f32 %v2844_v28, 100.0  ;;  %v7380_v4 = vpop.eup %5602  ;;  %v3055_v0 = vmul.f32 %v7208_v61, %v9961_v11  ;;  %v9964_v54 = vld [vmem:[#allocation172_spill] sm:$0xff]  ;;  %v9965_v28 = vld [vmem:[#allocation173_spill] sm:$0xff]  ;;  %v3602_v1 = vld [vmem:[#allocation2 + $0x1a0] sm:$0xff] }
 0x26a   : > { %9957 = vst [vmem:[#allocation182_spill] sm:$0xff] %v7374_v44  ;;  %v2909_v46 = vmin.f32 %v2845_v59, 100.0  ;;  %v2910_v50 = vmin.f32 %v2846_v45, 100.0  ;;  %vm3207_vm5 = vcmp.lt.f32.partialorder %v9964_v54, %v3136_v26  ;;  %vm3208_vm6 = vcmp.lt.f32.partialorder %v9965_v28, %v3136_v26  ;;  %v3591_v28 = vld [vmem:[#allocation2] sm:$0xff]  ;;  %v4102_v26 = vld [vmem:[#allocation4 + $0x108] sm:$0xff] }
 0x26b   : > { %9960 = vst [vmem:[#allocation19_spill] sm:$0xff] %v7380_v4  ;;  %v5111_v7 = vsel %vm3206_vm4, 1.0, %v9835_v48  ;;  %v5112_v4 = vsel %vm3207_vm5, 1.0, %v9835_v48  ;;  %v5113_v45 = vsel %vm3208_vm6, 1.0, %v9835_v48  ;;  %v5114_v59 = vsel %vm3209_vm7, 1.0, %v9835_v48 }
 0x26c   : > { %v3398_v61 = vmul.f32 %v5111_v7, %v2980_v47  ;;  %v3399_v44 = vmul.f32 %v5112_v4, %v2981_v3  ;;  %v3400_v42 = vmul.f32 %v5113_v45, %v2982_v31  ;;  %v3401_v49 = vmul.f32 %v5114_v59, %v2983_v58  ;;  %v4103_v45 = vld [vmem:[#allocation4 + $0x50] sm:$0xff] }
 0x26d   : > { %v3526_v41 = vadd.f32 %v3053_v10, %v2980_v47  ;;  %v3527_v5 = vadd.f32 %v3054_v24, %v2981_v3  ;;  %v3528_v11 = vadd.f32 %v3055_v0, %v2982_v31  ;;  %v3529_v54 = vadd.f32 %v3056_v39, %v2983_v58  ;;  %v3848_v31 = vld [vmem:[#allocation3 + $0x168] sm:$0xff]  ;;  %v3849_v58 = vld [vmem:[#allocation3 + $0x158] sm:$0xff] }
 0x26e   : > { %v3462_v53 = vadd.f32 %v3398_v61, %v3053_v10  ;;  %v3463_v12 = vadd.f32 %v3399_v44, %v3054_v24  ;;  %v3464_v30 = vadd.f32 %v3400_v42, %v3055_v0  ;;  %v7394_v23 = vadd.f32 %v3401_v49, %v3056_v39  ;;  %v755_v0 = vpop.permute.xlu1 %754  ;;  %v4105_v61 = vld [vmem:[#allocation4 + $0x28] sm:$0xff] }
 0x26f   : > { %v3654_v4 = vmul.f32 %v3526_v41, %v7263_v60  ;;  %v3655_v7 = vmul.f32 %v3527_v5, %v7307_v16  ;;  %v3656_v47 = vmul.f32 %v3528_v11, %v1806_v14  ;;  %v3657_v3 = vmul.f32 %v3529_v54, %v1821_v13  ;;  %v750_v14 = vpop.permute.xlu0 %749 }
 0x270   : > { %v3910_v59 = vmul.f32 %v3462_v53, %v2907_v27  ;;  %v3911_v34 = vmul.f32 %v3463_v12, %v2908_v62  ;;  %v3912_v20 = vmul.f32 %v3464_v30, %v2909_v46  ;;  %v3913_v44 = vmul.f32 %v7394_v23, %v2910_v50 }
 0x271   : > { %v3718_v39 = vadd.f32 %v3654_v4, %v3590_v17  ;;  %v3719_v10 = vadd.f32 %v3655_v7, %v3591_v28  ;;  %v3720_v24 = vadd.f32 %v3656_v47, %v3592_v25  ;;  %v3721_v60 = vadd.f32 %v3657_v3, %v3593_v57 }
 0x272   : > { %v3974_v5 = vadd.f32 %v3910_v59, %v3846_v21  ;;  %v3975_v16 = vadd.f32 %v3911_v34, %v3847_v40  ;;  %v3976_v13 = vadd.f32 %v3912_v20, %v3848_v31  ;;  %v3977_v11 = vadd.f32 %v3913_v44, %v3849_v58  ;;  %v4104_v21 = vld [vmem:[#allocation4 + $0xb8] sm:$0xff] }
 0x273   : > { %3782 = vst [vmem:[#allocation2 + $0x1e0] sm:$0xff] %v3718_v39  ;;  %v4166_v27 = vadd.f32 %v4102_v26, %v3462_v53  ;;  %v4167_v62 = vadd.f32 %v4103_v45, %v3463_v12  ;;  %v819_v46 = vsub.f32 %v6102_v35, %v755_v0  ;;  %v820_v50 = vsub.f32 %v6104_v36, %v755_v0 }
 0x274   : > { %3783 = vst [vmem:[#allocation2] sm:$0xff] %v3719_v10  ;;  %v821_v17 = vsub.f32 %v6106_v37, %v755_v0  ;;  %v822_v25 = vsub.f32 %v6108_v38, %v755_v0  ;;  %v815_v57 = vsub.f32 %v6102_v35, %v750_v14  ;;  %v816_v34 = vsub.f32 %v6104_v36, %v750_v14 }
 0x275   : > { %3784 = vst [vmem:[#allocation2 + $0xf0] sm:$0xff] %v3720_v24  ;;  %v817_v40 = vsub.f32 %v6106_v37, %v750_v14  ;;  %v818_v20 = vsub.f32 %v6108_v38, %v750_v14  ;;  %v7409_v12 = vmul.f32 4.0, %v819_v46  ;;  %v7411_v54 = vmul.f32 4.0, %v820_v50 }
 0x276   : > { %3785 = vst [vmem:[#allocation2 + $0x8] sm:$0xff] %v3721_v60  ;;  %v7413_v28 = vmul.f32 4.0, %v821_v17  ;;  %v7415_v53 = vmul.f32 4.0, %v822_v25  ;;  %v5071_v49 = vmul.f32 -4.0, %v819_v46  ;;  %v5072_v26 = vmul.f32 -4.0, %v820_v50 }
 0x277   : > { %4038 = vst [vmem:[#allocation3 + $0x198] sm:$0xff] %v3974_v5  ;;  %v5073_v4 = vmul.f32 -4.0, %v821_v17  ;;  %v5074_v7 = vmul.f32 -4.0, %v822_v25  ;;  %v4168_v45 = vadd.f32 %v4104_v21, %v3464_v30  ;;  %v7421_v39 = vmul.f32 4.0, %v815_v57 }
 0x278   : > { %4039 = vst [vmem:[#allocation3 + $0xe8] sm:$0xff] %v3975_v16  ;;  %v1255_v59 = vmul.f32 1.442695, %v5071_v49  ;;  %v1257_v44 = vmul.f32 1.442695, %v5072_v26  ;;  %v4169_v10 = vadd.f32 %v4105_v61, %v7394_v23  ;;  %v7424_v60 = vmul.f32 4.0, %v816_v34 }
 0x279   : > { %4040 = vst [vmem:[#allocation3 + $0x168] sm:$0xff] %v3976_v13  ;;  %v1259_v24 = vmul.f32 1.442695, %v5073_v4  ;;  %v1261_v0 = vmul.f32 1.442695, %v5074_v7  ;;  %v7428_v14 = vmul.f32 4.0, %v817_v40  ;;  %vm1963_vm11 = vweird.f32 %v7159_v63 }
 0x27a   : > { %9967 = vst [vmem:[#allocation18_spill] sm:$0xff] %v7421_v39  ;;  %5604 = vpow2.f32 %v1255_v59  ;;  %v2419_v5 = vand.u32 2147483647, %v7409_v12  ;;  %v2420_v16 = vand.u32 2147483647, %v7411_v54  ;;  %v5068_v25 = vmul.f32 -4.0, %v816_v34 }
 0x27b   : > { %4041 = vst [vmem:[#allocation3 + $0x158] sm:$0xff] %v3977_v11  ;;  %5606 = vpow2.f32 %v1257_v44  ;;  %v2421_v30 = vand.u32 2147483647, %v7413_v28  ;;  %v2422_v13 = vand.u32 2147483647, %v7415_v53  ;;  %v7432_v11 = vmul.f32 4.0, %v818_v20 }
 0x27c   : > { %9968 = vst [vmem:[#allocation204_spill] sm:$0xff] %v7424_v60  ;;  %5608 = vpow2.f32 %v1259_v24  ;;  %v2483_v23 = vsub.f32 0.0, %v2419_v5  ;;  %v2484_v46 = vsub.f32 0.0, %v2420_v16  ;;  %v5070_v49 = vmul.f32 -4.0, %v818_v20 }
 0x27d   : > { %4230 = vst [vmem:[#allocation4 + $0x108] sm:$0xff] %v4166_v27  ;;  %v5067_v27 = vmul.f32 -4.0, %v815_v57  ;;  %5610 = vpow2.f32 %v1261_v0  ;;  %v2485_v50 = vsub.f32 0.0, %v2421_v30  ;;  %v2486_v17 = vsub.f32 0.0, %v2422_v13 }
 0x27e   : > { %9969 = vst [vmem:[#allocation205_spill] sm:$0xff] %v7428_v14  ;;  %v2599_v21 = vmul.f32 1.442695, %v2483_v23  ;;  %v2601_v61 = vmul.f32 1.442695, %v2484_v46  ;;  %v9971_v59 = vsub.f32 1.0, %v7185_v55  ;;  %vm1949_vm14 = vweird.f32 %v7178_v8 }
 0x27f   : > { %4231 = vst [vmem:[#allocation4 + $0x50] sm:$0xff] %v4167_v62  ;;  %v5069_v62 = vmul.f32 -4.0, %v817_v40  ;;  %v2603_v26 = vmul.f32 1.442695, %v2485_v50  ;;  %v2605_v4 = vmul.f32 1.442695, %v2486_v17  ;;  %vm7516_vm15 = vmor %vm1948_vm8, %vm1949_vm14  ;;  %vm1964_vm1 = vweird.f32 %v7181_v56 }
 0x280   : > { %9970 = vst [vmem:[#allocation206_spill] sm:$0xff] %v7432_v11  ;;  %v1247_v7 = vmul.f32 1.442695, %v5067_v27  ;;  %v5605_v44 = vpop.eup %5604  ;;  %5612 = vpow2.f32 %v2599_v21  ;;  %v1249_v57 = vmul.f32 1.442695, %v5068_v25  ;;  %vm935_vm9 = vcmp.gt.f32.partialorder %v7127_v52, -4.0  ;;  %vm7544_vm2 = vmor %vm1963_vm11, %vm1964_vm1 }
 0x281   : > { %4232 = vst [vmem:[#allocation4 + $0xb8] sm:$0xff] %v4168_v45  ;;  %v7437_v45 = vmul.f32 %v7178_v8, %v9971_v59  ;;  %v1253_v24 = vmul.f32 1.442695, %v5070_v49  ;;  %v5607_v0 = vpop.eup %5606  ;;  %v7439_v5 = vadd.f32 1.0, %v5605_v44  ;;  %5614 = vpow2.f32 %v2601_v61 }
 0x282   : > { %4233 = vst [vmem:[#allocation4 + $0x28] sm:$0xff] %v4169_v10  ;;  %v1251_v10 = vmul.f32 1.442695, %v5069_v62  ;;  %v5609_v20 = vpop.eup %5608  ;;  %v7443_v16 = vadd.f32 1.0, %v5607_v0  ;;  %5616 = vpow2.f32 %v2603_v26  ;;  %v2415_v46 = vand.u32 2147483647, %v7421_v39 }
 0x283   : > { %9972 = vst [vmem:[#allocation207_spill] sm:$0xff] %v7439_v5  ;;  %v5611_v13 = vpop.eup %5610  ;;  %v7447_v23 = vadd.f32 1.0, %v5609_v20  ;;  %5618 = vrcp.f32 %v7439_v5  ;;  %v2416_v27 = vand.u32 2147483647, %v7424_v60  ;;  %v2417_v17 = vand.u32 2147483647, %v7428_v14 }
 0x284   : > { %9973 = vst [vmem:[#allocation208_spill] sm:$0xff] %v7443_v16  ;;  %v7452_v50 = vadd.f32 1.0, %v5611_v13  ;;  %5620 = vrcp.f32 %v7443_v16  ;;  %v2418_v25 = vand.u32 2147483647, %v7432_v11  ;;  %v2479_v21 = vsub.f32 0.0, %v2415_v46  ;;  %v10032_v14 = vld [vmem:[#allocation172_spill] sm:$0xff] }
 0x285   : > { %9974 = vst [vmem:[#allocation209_spill] sm:$0xff] %v7447_v23  ;;  %5622 = vrcp.f32 %v7447_v23  ;;  %v2480_v61 = vsub.f32 0.0, %v2416_v27  ;;  %v2481_v49 = vsub.f32 0.0, %v2417_v17  ;;  %vm936_vm10 = vcmp.gt.f32.partialorder %v7129_v18, -4.0 }
 0x286   : > { %9975 = vst [vmem:[#allocation210_spill] sm:$0xff] %v7452_v50  ;;  %v5613_v62 = vpop.eup %5612  ;;  %5624 = vrcp.f32 %v7452_v50  ;;  %v2482_v26 = vsub.f32 0.0, %v2418_v25  ;;  %v2591_v0 = vmul.f32 1.442695, %v2479_v21  ;;  %vm937_vm12 = vcmp.gt.f32.partialorder %v7131_v2, -4.0 }
 0x287   : > { %v5615_v59 = vpop.eup %5614  ;;  %5626 = vpow2.f32 %v2605_v4  ;;  %v7462_v44 = vadd.f32 1.0, %v5613_v62  ;;  %v2593_v20 = vmul.f32 1.442695, %v2480_v61  ;;  %v2595_v46 = vmul.f32 1.442695, %v2481_v49 }
 0x288   : > { %v5617_v13 = vpop.eup %5616  ;;  %v7464_v30 = vadd.f32 1.0, %v5615_v59  ;;  %5628 = vpow2.f32 %v1247_v7  ;;  %v2597_v27 = vmul.f32 1.442695, %v2482_v26  ;;  %vm938_vm13 = vcmp.gt.f32.partialorder %v7133_v22, -4.0 }
 0x289   : > { %9976 = vst [vmem:[#allocation211_spill] sm:$0xff] %v7462_v44  ;;  %v7467_v55 = vpop.eup %5618  ;;  %v7469_v17 = vadd.f32 1.0, %v5617_v13  ;;  %5630 = vpow2.f32 %v1249_v57  ;;  %v7482_v7 = vsel %vm935_vm9, 1.0, %v9835_v48  ;;  %v7487_v57 = vsel %vm936_vm10, 1.0, %v9835_v48 }
 0x28a   : > { %9977 = vst [vmem:[#allocation212_spill] sm:$0xff] %v7464_v30  ;;  %v7473_v4 = vpop.eup %5620  ;;  %v7477_v25 = vmul.f32 %v7467_v55, %v7439_v5  ;;  %5632 = vpow2.f32 %v1251_v10  ;;  %v7496_v62 = vsel %vm937_vm12, 1.0, %v9835_v48  ;;  %v7499_v10 = vsel %vm938_vm13, 1.0, %v9835_v48 }
 0x28b   : > { %9978 = vst [vmem:[#allocation213_spill] sm:$0xff] %v7467_v55  ;;  %v7489_v21 = vpop.eup %5622  ;;  %v7493_v61 = vmul.f32 %v7473_v4, %v7443_v16  ;;  %5634 = vpow2.f32 %v1253_v24  ;;  %v1947_v59 = vadd.f32 %v7178_v8, %v7437_v45  ;;  %v1952_v34 = vand.u32 2147483647, %v7156_v33  ;;  %v3859_v16 = vld [vmem:[#allocation3 + $0x100] sm:$0xff] }
 0x28c   : > { %9979 = vst [vmem:[#allocation214_spill] sm:$0xff] %v7469_v17  ;;  %v7501_v49 = vpop.eup %5624  ;;  %v7505_v26 = vmul.f32 %v7489_v21, %v7447_v23  ;;  %5636 = vpow2.f32 %v2591_v0  ;;  %v1954_v0 = vand.u32 2147483648, %v7156_v33  ;;  %v1967_v40 = vand.u32 2147483647, %v7159_v63 }
 0x28d   : > { %9980 = vst [vmem:[#allocation215_spill] sm:$0xff] %v7473_v4  ;;  %v5627_v13 = vpop.eup %5626  ;;  %v7512_v24 = vmul.f32 %v7501_v49, %v7452_v50  ;;  %5638 = vpow2.f32 %v2593_v20  ;;  %v1951_v42 = vsel %vm7516_vm15, %v7178_v8, %v1947_v59  ;;  %v9990_v20 = vsub.f32 1.0, %v7192_v6  ;;  %v3858_v50 = vld [vmem:[#allocation3 + $0x1b8] sm:$0xff] }
 0x28e   : > { %9981 = vst [vmem:[#allocation216_spill] sm:$0xff] %v7477_v25  ;;  %v5629_v41 = vpop.eup %5628  ;;  %v7522_v45 = vadd.f32 1.0, %v5627_v13  ;;  %5640 = vpow2.f32 %v2595_v46  ;;  %vm1953_vm0 = vcmp.eq.f32.partialorder %v1952_v34, 8.507059e+37  ;;  %v1955_v47 = vor.u32 1.1754944e-38, %v1954_v0 }
 0x28f   : > { %9982 = vst [vmem:[#allocation217_spill] sm:$0xff] %v7489_v21  ;;  %v1961_v58 = vmul.f32 %v7181_v56, %v9990_v20  ;;  %v5631_v31 = vpop.eup %5630  ;;  %v7530_v3 = vadd.f32 1.0, %v5629_v41  ;;  %5642 = vpow2.f32 %v2597_v27  ;;  %vm1968_vm3 = vcmp.eq.f32.partialorder %v1967_v40, 8.507059e+37 }
 0x290   : > { %9983 = vst [vmem:[#allocation218_spill] sm:$0xff] %v7493_v61  ;;  %v5633_v11 = vpop.eup %5632  ;;  %v7532_v33 = vadd.f32 1.0, %v5631_v31  ;;  %v7540_v6 = vsel %vm1953_vm0, %v1955_v47, %v1951_v42  ;;  %v1969_v31 = vand.u32 2147483648, %v7159_v63  ;;  %v9997_v59 = vsub.f32 1.0, %v7212_v29  ;;  %v10018_v29 = vld [vmem:[#allocation162_spill] sm:$0xff]  ;;  %v3860_v61 = vld [vmem:[#allocation3 + $0xc8] sm:$0xff] }
 0x291   : > { %9984 = vst [vmem:[#allocation219_spill] sm:$0xff] %v7501_v49  ;;  %v1962_v13 = vadd.f32 %v7181_v56, %v1961_v58  ;;  %v5635_v8 = vpop.eup %5634  ;;  %v7537_v46 = vadd.f32 1.0, %v5633_v11  ;;  %5644 = vrcp.f32 %v7530_v3  ;;  %vm1978_vm4 = vweird.f32 %v7161_v9  ;;  %v3604_v49 = vld [vmem:[#allocation2 + $0xe8] sm:$0xff] }
 0x292   : > { %9985 = vst [vmem:[#allocation220_spill] sm:$0xff] %v7505_v26  ;;  %v5637_v58 = vpop.eup %5636  ;;  %v7549_v34 = vadd.f32 1.0, %v5635_v8  ;;  %5646 = vrcp.f32 %v7532_v33  ;;  %v1970_v27 = vor.u32 1.1754944e-38, %v1969_v31  ;;  %v1976_v0 = vmul.f32 %v7188_v43, %v9997_v59 }
 0x293   : > { %9986 = vst [vmem:[#allocation221_spill] sm:$0xff] %v7512_v24  ;;  %v1966_v11 = vsel %vm7544_vm2, %v7181_v56, %v1962_v13  ;;  %v5639_v42 = vpop.eup %5638  ;;  %5648 = vrcp.f32 %v7537_v46  ;;  %v2671_v47 = vadd.f32 1.0, %v5637_v58  ;;  %vm1979_vm5 = vweird.f32 %v7188_v43  ;;  %v4114_v24 = vld [vmem:[#allocation4 + $0x1a8] sm:$0xff] }
 0x294   : > { %9989 = vst [vmem:[#allocation222_spill] sm:$0xff] %v7522_v45  ;;  %v5641_v63 = vpop.eup %5640  ;;  %5650 = vrcp.f32 %v7549_v34  ;;  %v2672_v20 = vadd.f32 1.0, %v5639_v42  ;;  %v7562_v13 = vsel %vm1968_vm3, %v1970_v27, %v1966_v11  ;;  %v1977_v40 = vadd.f32 %v7188_v43, %v1976_v0  ;;  %vm7565_vm6 = vmor %vm1978_vm4, %vm1979_vm5 }
 0x295   : > { %9991 = vst [vmem:[#allocation223_spill] sm:$0xff] %v7530_v3  ;;  %v5643_v8 = vpop.eup %5642  ;;  %v2673_v56 = vadd.f32 1.0, %v5641_v63  ;;  %5652 = vlog2.f32 %v2671_v47  ;;  %v1982_v31 = vand.u32 2147483647, %v7161_v9  ;;  %v1984_v58 = vand.u32 2147483648, %v7161_v9 }
 0x296   : > { %9992 = vst [vmem:[#allocation224_spill] sm:$0xff] %v7532_v33  ;;  %v2674_v41 = vadd.f32 1.0, %v5643_v8  ;;  %5654 = vlog2.f32 %v2672_v20  ;;  %v1981_v11 = vsel %vm7565_vm6, %v7188_v43, %v1977_v40  ;;  %v10001_v47 = vsub.f32 1.0, %v7223_v15 }
 0x297   : > { %9993 = vst [vmem:[#allocation225_spill] sm:$0xff] %v7537_v46  ;;  %v7571_v42 = vpop.eup %5644  ;;  %5656 = vlog2.f32 %v2673_v56  ;;  %vm1993_vm7 = vweird.f32 %v7166_v19  ;;  %vm1983_vm8 = vcmp.eq.f32.partialorder %v1982_v31, 8.507059e+37  ;;  %v1985_v9 = vor.u32 1.1754944e-38, %v1984_v58 }
 0x298   : > { %9996 = vst [vmem:[#allocation226_spill] sm:$0xff] %v7549_v34  ;;  %v1991_v27 = vmul.f32 %v7199_v51, %v10001_v47  ;;  %v7580_v59 = vpop.eup %5646  ;;  %v7584_v0 = vmul.f32 %v7571_v42, %v7530_v3  ;;  %5658 = vlog2.f32 %v2674_v41  ;;  %vm1994_vm9 = vweird.f32 %v7199_v51  ;;  %v3151_v47 = vpop.permute.xlu2 %3150 }
 0x299   : > { %10000 = vst [vmem:[#allocation227_spill] sm:$0xff] %v7571_v42  ;;  %v7586_v63 = vpop.eup %5648  ;;  %v7590_v43 = vmul.f32 %v7580_v59, %v7532_v33  ;;  %v1997_v20 = vand.u32 2147483647, %v7166_v19  ;;  %v7602_v41 = vsel %vm1983_vm8, %v1985_v9, %v1981_v11  ;;  %vm7606_vm10 = vmor %vm1993_vm7, %vm1994_vm9  ;;  %v1999_v31 = vand.u32 2147483648, %v7166_v19  ;;  %v10014_v33 = vld [vmem:[#allocation193_spill] sm:$0xff] }
 0x29a   : > { %10002 = vst [vmem:[#allocation228_spill] sm:$0xff] %v7580_v59  ;;  %v1992_v15 = vadd.f32 %v7199_v51, %v1991_v27  ;;  %v7595_v8 = vpop.eup %5650  ;;  %v7600_v40 = vmul.f32 %v7586_v63, %v7537_v46  ;;  %v10025_v42 = vld [vmem:[#allocation165_spill] sm:$0xff]  ;;  %vm3219_vm13 = vcmp.lt.f32.partialorder %v10032_v14, %v3151_v47 }
 0x29b   : > { %10003 = vst [vmem:[#allocation229_spill] sm:$0xff] %v7584_v0  ;;  %v7611_v58 = vpop.eup %5652  ;;  %v7616_v27 = vmul.f32 %v7595_v8, %v7549_v34  ;;  %vm1998_vm11 = vcmp.eq.f32.partialorder %v1997_v20, 8.507059e+37  ;;  %v2000_v46 = vor.u32 1.1754944e-38, %v1999_v31  ;;  %v10016_v34 = vld [vmem:[#allocation194_spill] sm:$0xff]  ;;  %v10020_v31 = vmax.f32 %v7127_v52, 0.0 }
 0x29c   : > { %10004 = vst [vmem:[#allocation230_spill] sm:$0xff] %v7586_v63  ;;  %v1996_v11 = vsel %vm7606_vm10, %v7199_v51, %v1992_v15  ;;  %v7621_v9 = vpop.eup %5654  ;;  %v10013_v63 = vld [vmem:[#allocation191_spill] sm:$0xff]  ;;  %v2992_v51 = vmul.f32 %v7482_v7, %v10018_v29 }
 0x29d   : > { %10005 = vst [vmem:[#allocation231_spill] sm:$0xff] %v7590_v43  ;;  %v2768_v19 = vmul.f32 0.6931472, %v10013_v63  ;;  %v7626_v59 = vpop.eup %5656  ;;  %v10017_v43 = vld [vmem:[#allocation198_spill] sm:$0xff]  ;;  %v2001_v20 = vsel %vm1998_vm11, %v2000_v46, %v1996_v11  ;;  %v10021_v63 = vmax.f32 %v7129_v18, 0.0  ;;  %v10027_v18 = vld [vmem:[#allocation167_spill] sm:$0xff] }
 0x29e   : > { %10006 = vst [vmem:[#allocation232_spill] sm:$0xff] %v7595_v8  ;;  %v2772_v8 = vmul.f32 0.6931472, %v10016_v34  ;;  %v2774_v3 = vmul.f32 0.6931472, %v10017_v43  ;;  %v7633_v15 = vpop.eup %5658  ;;  %v10023_v34 = vmax.f32 %v7131_v2, 0.0 }
 0x29f   : > { %10007 = vst [vmem:[#allocation233_spill] sm:$0xff] %v7600_v40  ;;  %v2855_v56 = vadd.f32 %v2768_v19, %v10020_v31  ;;  %v10024_v43 = vmax.f32 %v7133_v22, 0.0  ;;  %v10026_v46 = vld [vmem:[#allocation166_spill] sm:$0xff]  ;;  %v10028_v31 = vld [vmem:[#allocation168_spill] sm:$0xff] }
 0x2a0   : > { %10010 = vst [vmem:[#allocation234_spill] sm:$0xff] %v7611_v58  ;;  %v2770_v58 = vmul.f32 0.6931472, %v10014_v33  ;;  %v2995_v52 = vmul.f32 %v7499_v10, %v10026_v46 }
 0x2a1   : > { %10011 = vst [vmem:[#allocation235_spill] sm:$0xff] %v7616_v27  ;;  %v2857_v27 = vadd.f32 %v2772_v8, %v10023_v34  ;;  %v2858_v40 = vadd.f32 %v2774_v3, %v10024_v43  ;;  %v2919_v11 = vmin.f32 %v2855_v56, 100.0  ;;  %v10029_v8 = vld [vmem:[#allocation169_spill] sm:$0xff]  ;;  %v10030_v3 = vld [vmem:[#allocation170_spill] sm:$0xff]  ;;  %v10031_v43 = vld [vmem:[#allocation171_spill] sm:$0xff] }
 0x2a2   : > { %10012 = vst [vmem:[#allocation236_spill] sm:$0xff] %v7621_v9  ;;  %v2856_v33 = vadd.f32 %v2770_v58, %v10021_v63  ;;  %v10022_v9 = vld [vmem:[#allocation164_spill] sm:$0xff]  ;;  %v3065_v58 = vmul.f32 %v7482_v7, %v10027_v18  ;;  %v3066_v63 = vmul.f32 %v7487_v57, %v10028_v31  ;;  %v3067_v22 = vmul.f32 %v7496_v62, %v10029_v8  ;;  %v10033_v56 = vld [vmem:[#allocation173_spill] sm:$0xff] }
 0x2a3   : > { %10015 = vst [vmem:[#allocation191_spill] sm:$0xff] %v7626_v59  ;;  %v2993_v59 = vmul.f32 %v7487_v57, %v10022_v9  ;;  %v2921_v0 = vmin.f32 %v2857_v27, 100.0  ;;  %v2922_v2 = vmin.f32 %v2858_v40, 100.0  ;;  %v3068_v34 = vmul.f32 %v7499_v10, %v10030_v3 }
 0x2a4   : > { %10019 = vst [vmem:[#allocation193_spill] sm:$0xff] %v7633_v15  ;;  %v2994_v15 = vmul.f32 %v7496_v62, %v10025_v42  ;;  %v2920_v19 = vmin.f32 %v2856_v33, 100.0  ;;  %vm3218_vm12 = vcmp.lt.f32.partialorder %v10031_v43, %v3151_v47  ;;  %vm3220_vm14 = vcmp.lt.f32.partialorder %v10033_v56, %v3151_v47  ;;  %v10034_v33 = vld [vmem:[#allocation174_spill] sm:$0xff] }
 0x2a5   : > { %vm3221_vm15 = vcmp.lt.f32.partialorder %v10034_v33, %v3151_v47  ;;  %v5123_v7 = vsel %vm3218_vm12, 1.0, %v9835_v48  ;;  %v5124_v57 = vsel %vm3219_vm13, 1.0, %v9835_v48  ;;  %v5125_v40 = vsel %vm3220_vm14, 1.0, %v9835_v48  ;;  %v3605_v47 = vld [vmem:[#allocation2 + $0x78] sm:$0xff] }
 0x2a6   : > { %v5126_v27 = vsel %vm3221_vm15, 1.0, %v9835_v48  ;;  %v3410_v62 = vmul.f32 %v5123_v7, %v2992_v51  ;;  %v3411_v60 = vmul.f32 %v5124_v57, %v2993_v59  ;;  %v3412_v39 = vmul.f32 %v5125_v40, %v2994_v15  ;;  %v3861_v7 = vld [vmem:[#allocation3 + $0xf8] sm:$0xff] }
 0x2a7   : > { %v3413_v10 = vmul.f32 %v5126_v27, %v2995_v52  ;;  %v3538_v45 = vadd.f32 %v3065_v58, %v2992_v51  ;;  %v3539_v17 = vadd.f32 %v3066_v63, %v2993_v59  ;;  %v3540_v30 = vadd.f32 %v3067_v22, %v2994_v15  ;;  %v4115_v15 = vld [vmem:[#allocation4 + $0x1e0] sm:$0xff]  ;;  %v4117_v27 = vld [vmem:[#allocation4 + $0x1b8] sm:$0xff] }
 0x2a8   : > { %v3541_v44 = vadd.f32 %v3068_v34, %v2995_v52  ;;  %v3474_v21 = vadd.f32 %v3410_v62, %v3065_v58  ;;  %v3475_v23 = vadd.f32 %v3411_v60, %v3066_v63  ;;  %v3476_v26 = vadd.f32 %v3412_v39, %v3067_v22  ;;  %v4116_v52 = vld [vmem:[#allocation4 + $0x1b0] sm:$0xff] }
 0x2a9   : > { %v3477_v4 = vadd.f32 %v3413_v10, %v3068_v34  ;;  %v3666_v57 = vmul.f32 %v3538_v45, %v7540_v6  ;;  %v3667_v40 = vmul.f32 %v3539_v17, %v7562_v13  ;;  %v3668_v51 = vmul.f32 %v3540_v30, %v7602_v41  ;;  %v10035_v13 = vld [vmem:[#allocation86_spill] sm:$0xff]  ;;  %v10036_v41 = vld [vmem:[#allocation89_spill] sm:$0xff] }
 0x2aa   : > { %v3669_v59 = vmul.f32 %v3541_v44, %v2001_v20  ;;  %v3922_v25 = vmul.f32 %v3474_v21, %v2919_v11  ;;  %v3923_v55 = vmul.f32 %v3475_v23, %v2920_v19  ;;  %v3924_v5 = vmul.f32 %v3476_v26, %v2921_v0  ;;  %v10037_v0 = vld [vmem:[#allocation91_spill] sm:$0xff]  ;;  %v10045_v20 = vld [vmem:[#allocation116_spill] sm:$0xff] }
 0x2ab   : > { %v3925_v58 = vmul.f32 %v3477_v4, %v2922_v2  ;;  %v3730_v60 = vadd.f32 %v3666_v57, %v3602_v1  ;;  %v3731_v39 = vadd.f32 %v3667_v40, %v3603_v32  ;;  %v3732_v63 = vadd.f32 %v3668_v51, %v3604_v49  ;;  %v10038_v1 = vld [vmem:[#allocation92_spill] sm:$0xff] }
 0x2ac   : > { %v3733_v22 = vadd.f32 %v3669_v59, %v3605_v47  ;;  %v3986_v34 = vadd.f32 %v3922_v25, %v3858_v50  ;;  %v3987_v62 = vadd.f32 %v3923_v55, %v3859_v16  ;;  %v3988_v10 = vadd.f32 %v3924_v5, %v3860_v61  ;;  %v10046_v19 = vld [vmem:[#allocation104_spill] sm:$0xff]  ;;  %v10049_v59 = vld [vmem:[#allocation121_spill] sm:$0xff] }
 0x2ad   : > { %v3989_v45 = vadd.f32 %v3925_v58, %v3861_v7  ;;  %3794 = vst [vmem:[#allocation2 + $0x1a0] sm:$0xff] %v3730_v60  ;;  %v4178_v17 = vadd.f32 %v4114_v24, %v3474_v21  ;;  %v4179_v6 = vadd.f32 %v4115_v15, %v3475_v23  ;;  %v4180_v30 = vadd.f32 %v4116_v52, %v3476_v26  ;;  %v10039_v23 = vld [vmem:[#allocation117_spill] sm:$0xff]  ;;  %v10042_v21 = vld [vmem:[#allocation102_spill] sm:$0xff]  ;;  %v10043_v26 = vld [vmem:[#allocation119_spill] sm:$0xff] }
 0x2ae   : > { %v4181_v44 = vadd.f32 %v4117_v27, %v3477_v4  ;;  %3795 = vst [vmem:[#allocation2 + $0x1f0] sm:$0xff] %v3731_v39  ;;  %vm895_vm0 = vcmp.gt.f32.partialorder %v10035_v13, -4.0  ;;  %vm896_vm1 = vcmp.gt.f32.partialorder %v10036_v41, -4.0  ;;  %vm897_vm2 = vcmp.gt.f32.partialorder %v10037_v0, -4.0  ;;  %v10041_v4 = vld [vmem:[#allocation115_spill] sm:$0xff]  ;;  %v10051_v52 = vld [vmem:[#allocation118_spill] sm:$0xff] }
 0x2af   : > { %vm898_vm3 = vcmp.gt.f32.partialorder %v10038_v1, -4.0  ;;  %3796 = vst [vmem:[#allocation2 + $0xe8] sm:$0xff] %v3732_v63  ;;  %v7673_v32 = vsel %vm895_vm0, 1.0, %v9835_v48  ;;  %v7676_v5 = vsel %vm896_vm1, 1.0, %v9835_v48  ;;  %v7679_v16 = vsel %vm897_vm2, 1.0, %v9835_v48  ;;  %v10052_v58 = vld [vmem:[#allocation108_spill] sm:$0xff] }
 0x2b0   : > { %v7682_v55 = vsel %vm898_vm3, 1.0, %v9835_v48  ;;  %3797 = vst [vmem:[#allocation2 + $0x78] sm:$0xff] %v3733_v22  ;;  %v10040_v50 = vsub.f32 1.0, %v10039_v23  ;;  %vm1348_vm4 = vweird.f32 %v10042_v21  ;;  %vm1349_vm5 = vweird.f32 %v10041_v4 }
 0x2b1   : > { %v1352_v61 = vand.u32 2147483647, %v10042_v21  ;;  %4050 = vst [vmem:[#allocation3 + $0x1b8] sm:$0xff] %v3986_v34  ;;  %v1354_v49 = vand.u32 2147483648, %v10042_v21  ;;  %v10044_v24 = vsub.f32 1.0, %v10043_v26  ;;  %vm1363_vm6 = vweird.f32 %v10046_v19  ;;  %vm1350_vm9 = vmor %vm1348_vm4, %vm1349_vm5  ;;  %v10058_v21 = vld [vmem:[#allocation112_spill] sm:$0xff] }
 0x2b2   : > { %v1346_v25 = vmul.f32 %v10041_v4, %v10040_v50  ;;  %vm1364_vm7 = vweird.f32 %v10045_v20  ;;  %4051 = vst [vmem:[#allocation3 + $0x100] sm:$0xff] %v3987_v62  ;;  %v1367_v7 = vand.u32 2147483647, %v10046_v19  ;;  %v1369_v57 = vand.u32 2147483648, %v10046_v19 }
 0x2b3   : > { %v1361_v11 = vmul.f32 %v10045_v20, %v10044_v24  ;;  %vm7697_vm8 = vcmp.eq.f32.partialorder %v1352_v61, 8.507059e+37  ;;  %4052 = vst [vmem:[#allocation3 + $0xc8] sm:$0xff] %v3988_v10  ;;  %v1355_v40 = vor.u32 1.1754944e-38, %v1354_v49  ;;  %v10050_v15 = vsub.f32 1.0, %v10049_v59  ;;  %vm1365_vm11 = vmor %vm1363_vm6, %vm1364_vm7 }
 0x2b4   : > { %v1347_v2 = vadd.f32 %v10041_v4, %v1346_v25  ;;  %vm1378_vm10 = vweird.f32 %v10052_v58  ;;  %4053 = vst [vmem:[#allocation3 + $0xf8] sm:$0xff] %v3989_v45  ;;  %vm1368_vm12 = vcmp.eq.f32.partialorder %v1367_v7, 8.507059e+37  ;;  %v1370_v39 = vor.u32 1.1754944e-38, %v1369_v57 }
 0x2b5   : > { %v1362_v51 = vadd.f32 %v10045_v20, %v1361_v11  ;;  %v1376_v27 = vmul.f32 %v10051_v52, %v10050_v15  ;;  %vm1379_vm13 = vweird.f32 %v10051_v52  ;;  %4242 = vst [vmem:[#allocation4 + $0x1a8] sm:$0xff] %v4178_v17  ;;  %v1382_v62 = vand.u32 2147483647, %v10052_v58  ;;  %v10055_v17 = vld [vmem:[#allocation124_spill] sm:$0xff] }
 0x2b6   : > { %v1351_v60 = vsel %vm1350_vm9, %v10041_v4, %v1347_v2  ;;  %4243 = vst [vmem:[#allocation4 + $0x1e0] sm:$0xff] %v4179_v6  ;;  %vm7721_vm14 = vmor %vm1378_vm10, %vm1379_vm13  ;;  %v1384_v23 = vand.u32 2147483648, %v10052_v58  ;;  %v10056_v50 = vsub.f32 1.0, %v10055_v17  ;;  %v10057_v4 = vld [vmem:[#allocation120_spill] sm:$0xff]  ;;  %vm1393_vm15 = vweird.f32 %v10058_v21 }
 0x2b7   : > { %v7714_v63 = vsel %vm7697_vm8, %v1355_v40, %v1351_v60  ;;  %v1366_v22 = vsel %vm1365_vm11, %v10045_v20, %v1362_v51  ;;  %v1377_v34 = vadd.f32 %v10051_v52, %v1376_v27  ;;  %4244 = vst [vmem:[#allocation4 + $0x1b0] sm:$0xff] %v4180_v30  ;;  %vm1383_vm0 = vcmp.eq.f32.partialorder %v1382_v62, 8.507059e+37  ;;  %v10059_v20 = vld [vmem:[#allocation122_spill] sm:$0xff]  ;;  %v10060_v30 = vld [vmem:[#allocation128_spill] sm:$0xff] }
 0x2b8   : > { %v7719_v10 = vsel %vm1368_vm12, %v1370_v39, %v1366_v22  ;;  %v1391_v25 = vmul.f32 %v10057_v4, %v10056_v50  ;;  %vm1394_vm1 = vweird.f32 %v10057_v4  ;;  %v1397_v6 = vand.u32 2147483647, %v10058_v21  ;;  %4245 = vst [vmem:[#allocation4 + $0x1b8] sm:$0xff] %v4181_v44  ;;  %v10061_v2 = vld [vmem:[#allocation132_spill] sm:$0xff]  ;;  %v10062_v51 = vld [vmem:[#allocation134_spill] sm:$0xff] }
 0x2b9   : > { %v1381_v61 = vsel %vm7721_vm14, %v10051_v52, %v1377_v34  ;;  %v1385_v49 = vor.u32 1.1754944e-38, %v1384_v23  ;;  %v1399_v24 = vand.u32 2147483648, %v10058_v21  ;;  %v2688_v11 = vmul.f32 0.6931472, %v10059_v20  ;;  %vm1395_vm2 = vmor %vm1393_vm15, %vm1394_vm1  ;;  %v3101_v34 = vpop.permute.xlu1 %3100  ;;  %v3562_v20 = vld [vmem:[#allocation2 + $0xb0] sm:$0xff] }
 0x2ba   : > { %v1392_v26 = vadd.f32 %v10057_v4, %v1391_v25  ;;  %vm1398_vm3 = vcmp.eq.f32.partialorder %v1397_v6, 8.507059e+37  ;;  %v2690_v19 = vmul.f32 0.6931472, %v10060_v30  ;;  %v2692_v47 = vmul.f32 0.6931472, %v10061_v2  ;;  %v3564_v30 = vld [vmem:[#allocation2 + $0xd8] sm:$0xff] }
 0x2bb   : > { %v2952_v7 = vmul.f32 %v7673_v32, %v10018_v29  ;;  %v1386_v57 = vsel %vm1383_vm0, %v1385_v49, %v1381_v61  ;;  %v1400_v44 = vor.u32 1.1754944e-38, %v1399_v24  ;;  %v2694_v59 = vmul.f32 0.6931472, %v10062_v51  ;;  %v3818_v51 = vld [vmem:[#allocation3 + $0x68] sm:$0xff] }
 0x2bc   : > { %v1396_v40 = vsel %vm1395_vm2, %v10057_v4, %v1392_v26  ;;  %v10063_v15 = vmax.f32 %v10035_v13, 0.0  ;;  %v10064_v27 = vmax.f32 %v10036_v41, 0.0  ;;  %v10065_v60 = vmax.f32 %v10037_v0, 0.0 }
 0x2bd   : > { %v2953_v22 = vmul.f32 %v7676_v5, %v10022_v9  ;;  %v1401_v62 = vsel %vm1398_vm3, %v1400_v44, %v1396_v40  ;;  %v10066_v45 = vmax.f32 %v10038_v1, 0.0  ;;  %v2954_v17 = vmul.f32 %v7679_v16, %v10025_v42  ;;  %v3565_v44 = vld [vmem:[#allocation2 + $0x18] sm:$0xff] }
 0x2be   : > { %v2815_v52 = vadd.f32 %v2688_v11, %v10063_v15  ;;  %v2816_v58 = vadd.f32 %v2690_v19, %v10064_v27  ;;  %v2817_v39 = vadd.f32 %v2692_v47, %v10065_v60  ;;  %v2955_v13 = vmul.f32 %v7682_v55, %v10026_v46  ;;  %v3563_v11 = vld [vmem:[#allocation2 + $0x1b0] sm:$0xff] }
 0x2bf   : > { %v2818_v23 = vadd.f32 %v2694_v59, %v10066_v45  ;;  %v3025_v0 = vmul.f32 %v7673_v32, %v10027_v18  ;;  %v3026_v21 = vmul.f32 %v7676_v5, %v10028_v31  ;;  %v3027_v1 = vmul.f32 %v7679_v16, %v10029_v8  ;;  %v4074_v59 = vld [vmem:[#allocation4 + $0xc0] sm:$0xff]  ;;  %v3819_v60 = vld [vmem:[#allocation3 + $0x150] sm:$0xff] }
 0x2c0   : > { %v2879_v50 = vmin.f32 %v2815_v52, 100.0  ;;  %v2880_v41 = vmin.f32 %v2816_v58, 100.0  ;;  %v2881_v4 = vmin.f32 %v2817_v39, 100.0  ;;  %v3028_v61 = vmul.f32 %v7682_v55, %v10030_v3  ;;  %v3820_v39 = vld [vmem:[#allocation3 + $0x70] sm:$0xff] }
 0x2c1   : > { %v2882_v25 = vmin.f32 %v2818_v23, 100.0  ;;  %vm3178_vm4 = vcmp.lt.f32.partialorder %v10031_v43, %v3101_v34  ;;  %vm3179_vm5 = vcmp.lt.f32.partialorder %v10032_v14, %v3101_v34  ;;  %vm3180_vm6 = vcmp.lt.f32.partialorder %v10033_v56, %v3101_v34 }
 0x2c2   : > { %vm3181_vm7 = vcmp.lt.f32.partialorder %v10034_v33, %v3101_v34  ;;  %v5083_v32 = vsel %vm3178_vm4, 1.0, %v9835_v48  ;;  %v5084_v6 = vsel %vm3179_vm5, 1.0, %v9835_v48  ;;  %v5085_v5 = vsel %vm3180_vm6, 1.0, %v9835_v48  ;;  %v3821_v34 = vld [vmem:[#allocation3 + $0x160] sm:$0xff] }
 0x2c3   : > { %v5086_v49 = vsel %vm3181_vm7, 1.0, %v9835_v48  ;;  %v3370_v16 = vmul.f32 %v5083_v32, %v2952_v7  ;;  %v3371_v26 = vmul.f32 %v5084_v6, %v2953_v22  ;;  %v3372_v24 = vmul.f32 %v5085_v5, %v2954_v17 }
 0x2c4   : > { %v3373_v55 = vmul.f32 %v5086_v49, %v2955_v13  ;;  %v3498_v19 = vadd.f32 %v3025_v0, %v2952_v7  ;;  %v3499_v2 = vadd.f32 %v3026_v21, %v2953_v22  ;;  %v3500_v47 = vadd.f32 %v3027_v1, %v2954_v17  ;;  %v4075_v7 = vld [vmem:[#allocation4 + $0x138] sm:$0xff]  ;;  %v4076_v22 = vld [vmem:[#allocation4] sm:$0xff]  ;;  %v4077_v17 = vld [vmem:[#allocation4 + $0xc8] sm:$0xff] }
 0x2c5   : > { %v3501_v40 = vadd.f32 %v3028_v61, %v2955_v13  ;;  %v3434_v15 = vadd.f32 %v3370_v16, %v3025_v0  ;;  %v3435_v52 = vadd.f32 %v3371_v26, %v3026_v21  ;;  %v3436_v27 = vadd.f32 %v3372_v24, %v3027_v1  ;;  %v765_v16 = vpop.permute.xlu0 %764 }
 0x2c6   : > { %v3437_v58 = vadd.f32 %v3373_v55, %v3028_v61  ;;  %v3626_v45 = vmul.f32 %v3498_v19, %v7714_v63  ;;  %v3627_v23 = vmul.f32 %v3499_v2, %v7719_v10  ;;  %v3628_v32 = vmul.f32 %v3500_v47, %v1386_v57 }
 0x2c7   : > { %v3629_v6 = vmul.f32 %v3501_v40, %v1401_v62  ;;  %v3882_v13 = vmul.f32 %v3434_v15, %v2879_v50  ;;  %v3883_v5 = vmul.f32 %v3435_v52, %v2880_v41  ;;  %v3884_v49 = vmul.f32 %v3436_v27, %v2881_v4 }
 0x2c8   : > { %v3885_v33 = vmul.f32 %v3437_v58, %v2882_v25  ;;  %v3690_v0 = vadd.f32 %v3626_v45, %v3562_v20  ;;  %v3691_v21 = vadd.f32 %v3627_v23, %v3563_v11  ;;  %v3692_v1 = vadd.f32 %v3628_v32, %v3564_v30 }
 0x2c9   : > { %v3693_v61 = vadd.f32 %v3629_v6, %v3565_v44  ;;  %v3946_v26 = vadd.f32 %v3882_v13, %v3818_v51  ;;  %v3947_v24 = vadd.f32 %v3883_v5, %v3819_v60  ;;  %v3948_v55 = vadd.f32 %v3884_v49, %v3820_v39  ;;  %v10068_v39 = vld [vmem:[#allocation213_spill] sm:$0xff]  ;;  %v10069_v13 = vld [vmem:[#allocation216_spill] sm:$0xff] }
 0x2ca   : > { %v3949_v63 = vadd.f32 %v3885_v33, %v3821_v34  ;;  %3754 = vst [vmem:[#allocation2 + $0xb0] sm:$0xff] %v3690_v0  ;;  %v4138_v10 = vadd.f32 %v4074_v59, %v3434_v15  ;;  %v4139_v57 = vadd.f32 %v4075_v7, %v3435_v52  ;;  %v4140_v62 = vadd.f32 %v4076_v22, %v3436_v27  ;;  %v10067_v52 = vld [vmem:[#allocation207_spill] sm:$0xff] }
 0x2cb   : > { %v4141_v19 = vadd.f32 %v4077_v17, %v3437_v58  ;;  %3755 = vst [vmem:[#allocation2 + $0x1b0] sm:$0xff] %v3691_v21  ;;  %v827_v50 = vsub.f32 %v6102_v35, %v765_v16  ;;  %v828_v41 = vsub.f32 %v6104_v36, %v765_v16  ;;  %v829_v4 = vsub.f32 %v6106_v37, %v765_v16 }
 0x2cc   : > { %v830_v25 = vsub.f32 %v6108_v38, %v765_v16  ;;  %3756 = vst [vmem:[#allocation2 + $0xd8] sm:$0xff] %v3692_v1  ;;  %vm947_vm8 = vcmp.gt.f32.partialorder %v7409_v12, -4.0  ;;  %vm948_vm9 = vcmp.gt.f32.partialorder %v7411_v54, -4.0  ;;  %vm949_vm10 = vcmp.gt.f32.partialorder %v7413_v28, -4.0 }
 0x2cd   : > { %vm950_vm11 = vcmp.gt.f32.partialorder %v7415_v53, -4.0  ;;  %3757 = vst [vmem:[#allocation2 + $0x18] sm:$0xff] %v3693_v61  ;;  %v7784_v33 = vmul.f32 4.0, %v827_v50  ;;  %v7786_v20 = vmul.f32 4.0, %v828_v41  ;;  %v7788_v35 = vmul.f32 4.0, %v829_v4 }
 0x2ce   : > { %v7790_v36 = vmul.f32 4.0, %v830_v25  ;;  %4010 = vst [vmem:[#allocation3 + $0x68] sm:$0xff] %v3946_v26  ;;  %v5079_v37 = vmul.f32 -4.0, %v827_v50  ;;  %v5080_v38 = vmul.f32 -4.0, %v828_v41  ;;  %v5081_v11 = vmul.f32 -4.0, %v829_v4  ;;  %v10073_v41 = vld [vmem:[#allocation208_spill] sm:$0xff] }
 0x2cf   : > { %v5082_v30 = vmul.f32 -4.0, %v830_v25  ;;  %4011 = vst [vmem:[#allocation3 + $0x150] sm:$0xff] %v3947_v24  ;;  %v7799_v15 = vsel %vm947_vm8, 1.0, %v9835_v48  ;;  %vm2128_vm12 = vweird.f32 %v10067_v52  ;;  %v7805_v60 = vsel %vm948_vm9, 1.0, %v9835_v48 }
 0x2d0   : > { %4012 = vst [vmem:[#allocation3 + $0x70] sm:$0xff] %v3948_v55  ;;  %v1271_v51 = vmul.f32 1.442695, %v5079_v37  ;;  %v1273_v59 = vmul.f32 1.442695, %v5080_v38  ;;  %vm2129_vm13 = vweird.f32 %v10068_v39  ;;  %v7813_v23 = vsel %vm949_vm10, 1.0, %v9835_v48 }
 0x2d1   : > { %4013 = vst [vmem:[#allocation3 + $0x160] sm:$0xff] %v3949_v63  ;;  %v1275_v27 = vmul.f32 1.442695, %v5081_v11  ;;  %v1277_v58 = vmul.f32 1.442695, %v5082_v30  ;;  %v7820_v7 = vsel %vm950_vm11, 1.0, %v9835_v48  ;;  %vm2143_vm15 = vweird.f32 %v10073_v41  ;;  %vm2130_vm0 = vmor %vm2128_vm12, %vm2129_vm13 }
 0x2d2   : > { %4202 = vst [vmem:[#allocation4 + $0xc0] sm:$0xff] %v4138_v10  ;;  %5660 = vpow2.f32 %v1271_v51  ;;  %v2427_v34 = vand.u32 2147483647, %v7784_v33  ;;  %v2428_v45 = vand.u32 2147483647, %v7786_v20  ;;  %v2125_v5 = vsub.f32 1.0, %v10069_v13 }
 0x2d3   : > { %4203 = vst [vmem:[#allocation4 + $0x138] sm:$0xff] %v4139_v57  ;;  %5662 = vpow2.f32 %v1273_v59  ;;  %v2429_v32 = vand.u32 2147483647, %v7788_v35  ;;  %v2430_v6 = vand.u32 2147483647, %v7790_v36  ;;  %v2134_v26 = vand.u32 2147483648, %v10067_v52 }
 0x2d4   : > { %4204 = vst [vmem:[#allocation4] sm:$0xff] %v4140_v62  ;;  %5664 = vpow2.f32 %v1275_v27  ;;  %v2491_v22 = vsub.f32 0.0, %v2427_v34  ;;  %v2492_v17 = vsub.f32 0.0, %v2428_v45  ;;  %v2132_v21 = vand.u32 2147483647, %v10067_v52  ;;  %v10072_v10 = vld [vmem:[#allocation218_spill] sm:$0xff] }
 0x2d5   : > { %4205 = vst [vmem:[#allocation4 + $0xc8] sm:$0xff] %v4141_v19  ;;  %5666 = vpow2.f32 %v1277_v58  ;;  %v2493_v49 = vsub.f32 0.0, %v2429_v32  ;;  %v2494_v0 = vsub.f32 0.0, %v2430_v6  ;;  %v2126_v16 = vmul.f32 %v10068_v39, %v2125_v5  ;;  %v10074_v37 = vld [vmem:[#allocation215_spill] sm:$0xff]  ;;  %v10083_v5 = vld [vmem:[#allocation209_spill] sm:$0xff] }
 0x2d6   : > { %v2615_v1 = vmul.f32 1.442695, %v2491_v22  ;;  %v2617_v61 = vmul.f32 1.442695, %v2492_v17  ;;  %vm7826_vm14 = vcmp.eq.f32.partialorder %v2132_v21, 8.507059e+37  ;;  %v2140_v57 = vsub.f32 1.0, %v10072_v10 }
 0x2d7   : > { %v2619_v24 = vmul.f32 1.442695, %v2493_v49  ;;  %v2621_v55 = vmul.f32 1.442695, %v2494_v0  ;;  %v2127_v19 = vadd.f32 %v10068_v39, %v2126_v16  ;;  %v2135_v50 = vor.u32 1.1754944e-38, %v2134_v26  ;;  %v10082_v17 = vld [vmem:[#allocation220_spill] sm:$0xff] }
 0x2d8   : > { %v5661_v62 = vpop.eup %5660  ;;  %5668 = vpow2.f32 %v2615_v1  ;;  %v2141_v38 = vmul.f32 %v10074_v37, %v2140_v57  ;;  %vm2144_vm1 = vweird.f32 %v10074_v37  ;;  %v2147_v59 = vand.u32 2147483647, %v10073_v41  ;;  %v10084_v21 = vld [vmem:[#allocation217_spill] sm:$0xff] }
 0x2d9   : > { %v5663_v4 = vpop.eup %5662  ;;  %v7833_v25 = vadd.f32 1.0, %v5661_v62  ;;  %5670 = vpow2.f32 %v2617_v61  ;;  %v2131_v51 = vsel %vm2130_vm0, %v10068_v39, %v2127_v19  ;;  %vm7858_vm2 = vmor %vm2143_vm15, %vm2144_vm1  ;;  %v2149_v6 = vand.u32 2147483648, %v10073_v41  ;;  %v10089_v19 = vld [vmem:[#allocation221_spill] sm:$0xff]  ;;  %v3166_v62 = vpop.permute.xlu2 %3165 }
 0x2da   : > { %v5665_v11 = vpop.eup %5664  ;;  %v7841_v30 = vadd.f32 1.0, %v5663_v4  ;;  %5672 = vpow2.f32 %v2619_v24  ;;  %v7850_v52 = vsel %vm7826_vm14, %v2135_v50, %v2131_v51  ;;  %v2142_v34 = vadd.f32 %v10074_v37, %v2141_v38  ;;  %v10091_v38 = vld [vmem:[#allocation210_spill] sm:$0xff] }
 0x2db   : > { %v5667_v27 = vpop.eup %5666  ;;  %v7845_v58 = vadd.f32 1.0, %v5665_v11  ;;  %5674 = vrcp.f32 %v7833_v25  ;;  %vm7862_vm3 = vcmp.eq.f32.partialorder %v2147_v59, 8.507059e+37  ;;  %v2155_v13 = vsub.f32 1.0, %v10082_v17  ;;  %v10093_v59 = vld [vmem:[#allocation219_spill] sm:$0xff] }
 0x2dc   : > { %10075 = vst [vmem:[#allocation194_spill] sm:$0xff] %v7841_v30  ;;  %v7853_v45 = vadd.f32 1.0, %v5667_v27  ;;  %5676 = vrcp.f32 %v7841_v30  ;;  %v2146_v22 = vsel %vm7858_vm2, %v10074_v37, %v2142_v34  ;;  %vm2158_vm4 = vweird.f32 %v10083_v5  ;;  %v10096_v17 = vld [vmem:[#allocation211_spill] sm:$0xff] }
 0x2dd   : > { %10076 = vst [vmem:[#allocation198_spill] sm:$0xff] %v7845_v58  ;;  %5678 = vrcp.f32 %v7845_v58  ;;  %v2150_v0 = vor.u32 1.1754944e-38, %v2149_v6  ;;  %vm2159_vm5 = vweird.f32 %v10084_v21  ;;  %v2162_v1 = vand.u32 2147483647, %v10083_v5 }
 0x2de   : > { %10077 = vst [vmem:[#allocation162_spill] sm:$0xff] %v7853_v45  ;;  %v5669_v49 = vpop.eup %5668  ;;  %5680 = vrcp.f32 %v7853_v45  ;;  %v2156_v26 = vmul.f32 %v10084_v21, %v2155_v13  ;;  %v2164_v24 = vand.u32 2147483648, %v10083_v5  ;;  %v2170_v50 = vsub.f32 1.0, %v10089_v19  ;;  %vm2160_vm8 = vmor %vm2158_vm4, %vm2159_vm5 }
 0x2df   : > { %v5671_v61 = vpop.eup %5670  ;;  %5682 = vpow2.f32 %v2621_v55  ;;  %v7876_v16 = vadd.f32 1.0, %v5669_v49  ;;  %v7884_v57 = vsel %vm7862_vm3, %v2150_v0, %v2146_v22  ;;  %vm7886_vm6 = vcmp.eq.f32.partialorder %v2162_v1, 8.507059e+37 }
 0x2e0   : > { %v5673_v63 = vpop.eup %5672  ;;  %v7880_v10 = vadd.f32 1.0, %v5671_v61  ;;  %v2157_v4 = vadd.f32 %v10084_v21, %v2156_v26  ;;  %v2165_v37 = vor.u32 1.1754944e-38, %v2164_v24  ;;  %vm2173_vm7 = vweird.f32 %v10091_v38  ;;  %v10100_v26 = vld [vmem:[#allocation212_spill] sm:$0xff] }
 0x2e1   : > { %10085 = vst [vmem:[#allocation164_spill] sm:$0xff] %v7876_v16  ;;  %v7891_v55 = vpop.eup %5674  ;;  %v7893_v41 = vadd.f32 1.0, %v5673_v63  ;;  %v2171_v27 = vmul.f32 %v10093_v59, %v2170_v50  ;;  %vm2174_vm9 = vweird.f32 %v10093_v59  ;;  %v2177_v34 = vand.u32 2147483647, %v10091_v38  ;;  %v10102_v50 = vld [vmem:[#allocation214_spill] sm:$0xff] }
 0x2e2   : > { %10086 = vst [vmem:[#allocation165_spill] sm:$0xff] %v7880_v10  ;;  %v7897_v11 = vpop.eup %5676  ;;  %v7901_v51 = vmul.f32 %v7891_v55, %v7833_v25  ;;  %v2161_v6 = vsel %vm2160_vm8, %v10084_v21, %v2157_v4  ;;  %v2179_v22 = vand.u32 2147483648, %v10091_v38  ;;  %5684 = vlog2.f32 %v10096_v17  ;;  %vm2175_vm11 = vmor %vm2173_vm7, %vm2174_vm9 }
 0x2e3   : > { %10090 = vst [vmem:[#allocation166_spill] sm:$0xff] %v7893_v41  ;;  %v7910_v39 = vpop.eup %5678  ;;  %v7914_v32 = vmul.f32 %v7897_v11, %v7841_v30  ;;  %v7927_v49 = vsel %vm7886_vm6, %v2165_v37, %v2161_v6  ;;  %v2172_v0 = vadd.f32 %v10093_v59, %v2171_v27  ;;  %vm2178_vm10 = vcmp.eq.f32.partialorder %v2177_v34, 8.507059e+37  ;;  %v10103_v27 = vld [vmem:[#allocation222_spill] sm:$0xff]  ;;  %v4089_v30 = vld [vmem:[#allocation4 + $0x60] sm:$0xff] }
 0x2e4   : > { %10092 = vst [vmem:[#allocation167_spill] sm:$0xff] %v7897_v11  ;;  %v7919_v13 = vpop.eup %5680  ;;  %v7923_v5 = vmul.f32 %v7910_v39, %v7845_v58  ;;  %v2180_v61 = vor.u32 1.1754944e-38, %v2179_v22  ;;  %5686 = vlog2.f32 %v10100_v26  ;;  %v3004_v24 = vmul.f32 %v7799_v15, %v10018_v29  ;;  %v4088_v11 = vld [vmem:[#allocation4 + $0x88] sm:$0xff] }
 0x2e5   : > { %10094 = vst [vmem:[#allocation168_spill] sm:$0xff] %v7910_v39  ;;  %v5683_v1 = vpop.eup %5682  ;;  %v7932_v21 = vmul.f32 %v7919_v13, %v7853_v45  ;;  %v2176_v19 = vsel %vm2175_vm11, %v10093_v59, %v2172_v0  ;;  %5688 = vlog2.f32 %v10102_v50  ;;  %v3005_v4 = vmul.f32 %v7805_v60, %v10022_v9 }
 0x2e6   : > { %10095 = vst [vmem:[#allocation169_spill] sm:$0xff] %v7914_v32  ;;  %v7939_v63 = vadd.f32 1.0, %v5683_v1  ;;  %v2181_v37 = vsel %vm2178_vm10, %v2180_v61, %v2176_v19  ;;  %5690 = vlog2.f32 %v10103_v27  ;;  %v3006_v38 = vmul.f32 %v7813_v23, %v10025_v42  ;;  %v10104_v1 = vld [vmem:[#allocation174_spill] sm:$0xff] }
 0x2e7   : > { %10097 = vst [vmem:[#allocation170_spill] sm:$0xff] %v7919_v13  ;;  %v3007_v34 = vmul.f32 %v7820_v7, %v10026_v46  ;;  %v3077_v6 = vmul.f32 %v7799_v15, %v10027_v18  ;;  %v3078_v59 = vmul.f32 %v7805_v60, %v10028_v31  ;;  %v3079_v22 = vmul.f32 %v7813_v23, %v10029_v8 }
 0x2e8   : > { %10098 = vst [vmem:[#allocation171_spill] sm:$0xff] %v7923_v5  ;;  %v3080_v17 = vmul.f32 %v7820_v7, %v10030_v3  ;;  %v5685_v0 = vpop.eup %5684  ;;  %vm3230_vm12 = vcmp.lt.f32.partialorder %v10031_v43, %v3166_v62  ;;  %vm3231_vm13 = vcmp.lt.f32.partialorder %v10032_v14, %v3166_v62  ;;  %vm3232_vm14 = vcmp.lt.f32.partialorder %v10033_v56, %v3166_v62 }
 0x2e9   : > { %10099 = vst [vmem:[#allocation172_spill] sm:$0xff] %v7932_v21  ;;  %vm3233_vm15 = vcmp.lt.f32.partialorder %v10104_v1, %v3166_v62  ;;  %v2792_v61 = vmul.f32 0.6931472, %v5685_v0  ;;  %v5135_v15 = vsel %vm3230_vm12, 1.0, %v9835_v48  ;;  %v5136_v60 = vsel %vm3231_vm13, 1.0, %v9835_v48 }
 0x2ea   : > { %10101 = vst [vmem:[#allocation173_spill] sm:$0xff] %v7939_v63  ;;  %v5137_v26 = vsel %vm3232_vm14, 1.0, %v9835_v48  ;;  %v5687_v23 = vpop.eup %5686  ;;  %v5138_v19 = vsel %vm3233_vm15, 1.0, %v9835_v48  ;;  %v3422_v7 = vmul.f32 %v5135_v15, %v3004_v24  ;;  %v3423_v50 = vmul.f32 %v5136_v60, %v3005_v4  ;;  %v3614_v60 = vld [vmem:[#allocation2 + $0x170] sm:$0xff] }
 0x2eb   : > { %v3424_v27 = vmul.f32 %v5137_v26, %v3006_v38  ;;  %v5689_v44 = vpop.eup %5688  ;;  %v2794_v40 = vmul.f32 0.6931472, %v5687_v23  ;;  %v10105_v47 = vmax.f32 %v7409_v12, 0.0  ;;  %v3425_v63 = vmul.f32 %v5138_v19, %v3007_v34  ;;  %v3870_v26 = vld [vmem:[#allocation3 + $0xa8] sm:$0xff] }
 0x2ec   : > { %v3550_v62 = vadd.f32 %v3077_v6, %v3004_v24  ;;  %v5691_v0 = vpop.eup %5690  ;;  %v2796_v41 = vmul.f32 0.6931472, %v5689_v44  ;;  %v3486_v10 = vadd.f32 %v3422_v7, %v3077_v6  ;;  %v3487_v16 = vadd.f32 %v3423_v50, %v3078_v59  ;;  %v3615_v24 = vld [vmem:[#allocation2 + $0x178] sm:$0xff]  ;;  %v3616_v19 = vld [vmem:[#allocation2 + $0x68] sm:$0xff]  ;;  %v3617_v44 = vld [vmem:[#allocation2 + $0x190] sm:$0xff] }
 0x2ed   : > { %v2867_v2 = vadd.f32 %v2792_v61, %v10105_v47  ;;  %v3488_v13 = vadd.f32 %v3424_v27, %v3079_v22  ;;  %v2798_v45 = vmul.f32 0.6931472, %v5691_v0  ;;  %v10106_v21 = vmax.f32 %v7411_v54, 0.0 }
 0x2ee   : > { %v3489_v15 = vadd.f32 %v3425_v63, %v3080_v17  ;;  %v10107_v23 = vmax.f32 %v7413_v28, 0.0  ;;  %v3551_v12 = vadd.f32 %v3078_v59, %v3005_v4  ;;  %v3552_v47 = vadd.f32 %v3079_v22, %v3006_v38  ;;  %v4127_v63 = vld [vmem:[#allocation4 + $0x130] sm:$0xff]  ;;  %v3872_v38 = vld [vmem:[#allocation3 + $0x138] sm:$0xff] }
 0x2ef   : > { %v2868_v39 = vadd.f32 %v2794_v40, %v10106_v21  ;;  %v2931_v58 = vmin.f32 %v2867_v2, 100.0  ;;  %v3553_v61 = vadd.f32 %v3080_v17, %v3007_v34  ;;  %v10108_v6 = vmax.f32 %v7415_v53, 0.0  ;;  %v3871_v2 = vld [vmem:[#allocation3 + $0xc0] sm:$0xff]  ;;  %v4126_v21 = vld [vmem:[#allocation4 + $0x1f8] sm:$0xff]  ;;  %v4129_v59 = vld [vmem:[#allocation4 + $0x10] sm:$0xff] }
 0x2f0   : > { %v2869_v5 = vadd.f32 %v2796_v41, %v10107_v23  ;;  %v3678_v54 = vmul.f32 %v3550_v62, %v7850_v52  ;;  %v3679_v28 = vmul.f32 %v3551_v12, %v7884_v57  ;;  %v3680_v41 = vmul.f32 %v3552_v47, %v7927_v49  ;;  %v4128_v34 = vld [vmem:[#allocation4 + $0x120] sm:$0xff]  ;;  %v10109_v47 = vld [vmem:[#allocation125_spill] sm:$0xff] }
 0x2f1   : > { %v2870_v7 = vadd.f32 %v2798_v45, %v10108_v6  ;;  %v2932_v50 = vmin.f32 %v2868_v39, 100.0  ;;  %v3934_v40 = vmul.f32 %v3486_v10, %v2931_v58  ;;  %v3681_v4 = vmul.f32 %v3553_v61, %v2181_v37  ;;  %v3873_v39 = vld [vmem:[#allocation3 + $0x188] sm:$0xff]  ;;  %v10110_v61 = vld [vmem:[#allocation127_spill] sm:$0xff] }
 0x2f2   : > { %v2933_v27 = vmin.f32 %v2869_v5, 100.0  ;;  %v3742_v17 = vadd.f32 %v3678_v54, %v3614_v60  ;;  %v3743_v0 = vadd.f32 %v3679_v28, %v3615_v24  ;;  %v3744_v52 = vadd.f32 %v3680_v41, %v3616_v19  ;;  %v10112_v24 = vld [vmem:[#allocation131_spill] sm:$0xff]  ;;  %v10116_v54 = vld [vmem:[#allocation146_spill] sm:$0xff]  ;;  %v10120_v41 = vld [vmem:[#allocation148_spill] sm:$0xff] }
 0x2f3   : > { %v2934_v22 = vmin.f32 %v2870_v7, 100.0  ;;  %v3935_v53 = vmul.f32 %v3487_v16, %v2932_v50  ;;  %v3998_v45 = vadd.f32 %v3934_v40, %v3870_v26  ;;  %v3745_v58 = vadd.f32 %v3681_v4, %v3617_v44  ;;  %v10111_v26 = vld [vmem:[#allocation130_spill] sm:$0xff]  ;;  %v10115_v7 = vld [vmem:[#allocation151_spill] sm:$0xff] }
 0x2f4   : > { %v3936_v62 = vmul.f32 %v3488_v13, %v2933_v27  ;;  %3806 = vst [vmem:[#allocation2 + $0x170] sm:$0xff] %v3742_v17  ;;  %v4190_v6 = vadd.f32 %v4126_v21, %v3486_v10  ;;  %v4191_v57 = vadd.f32 %v4127_v63, %v3487_v16  ;;  %v4192_v37 = vadd.f32 %v4128_v34, %v3488_v13  ;;  %v10117_v21 = vld [vmem:[#allocation158_spill] sm:$0xff]  ;;  %v10119_v27 = vld [vmem:[#allocation152_spill] sm:$0xff] }
 0x2f5   : > { %v3937_v23 = vmul.f32 %v3489_v15, %v2934_v22  ;;  %v3999_v5 = vadd.f32 %v3935_v53, %v3871_v2  ;;  %3807 = vst [vmem:[#allocation2 + $0x178] sm:$0xff] %v3743_v0  ;;  %v4193_v12 = vadd.f32 %v4129_v59, %v3489_v15  ;;  %vm907_vm0 = vcmp.gt.f32.partialorder %v10109_v47, -4.0  ;;  %v10113_v15 = vld [vmem:[#allocation153_spill] sm:$0xff]  ;;  %v10123_v53 = vld [vmem:[#allocation160_spill] sm:$0xff] }
 0x2f6   : > { %v4000_v49 = vadd.f32 %v3936_v62, %v3872_v38  ;;  %3808 = vst [vmem:[#allocation2 + $0x68] sm:$0xff] %v3744_v52  ;;  %vm908_vm1 = vcmp.gt.f32.partialorder %v10110_v61, -4.0  ;;  %vm909_vm2 = vcmp.gt.f32.partialorder %v10111_v26, -4.0  ;;  %vm910_vm3 = vcmp.gt.f32.partialorder %v10112_v24, -4.0  ;;  %v10126_v52 = vld [vmem:[#allocation149_spill] sm:$0xff]  ;;  %v10135_v38 = vld [vmem:[#allocation159_spill] sm:$0xff] }
 0x2f7   : > { %v4001_v60 = vadd.f32 %v3937_v23, %v3873_v39  ;;  %3809 = vst [vmem:[#allocation2 + $0x190] sm:$0xff] %v3745_v58  ;;  %v7982_v19 = vsel %vm907_vm0, 1.0, %v9835_v48  ;;  %v7985_v16 = vsel %vm908_vm1, 1.0, %v9835_v48  ;;  %v7988_v10 = vsel %vm909_vm2, 1.0, %v9835_v48  ;;  %v10125_v39 = vld [vmem:[#allocation154_spill] sm:$0xff] }
 0x2f8   : > { %v7991_v13 = vsel %vm910_vm3, 1.0, %v9835_v48  ;;  %4062 = vst [vmem:[#allocation3 + $0xa8] sm:$0xff] %v3998_v45  ;;  %v10114_v44 = vsub.f32 1.0, %v10113_v15  ;;  %vm1528_vm4 = vweird.f32 %v10116_v54  ;;  %vm1529_vm5 = vweird.f32 %v10115_v7 }
 0x2f9   : > { %v1532_v40 = vand.u32 2147483647, %v10116_v54  ;;  %4063 = vst [vmem:[#allocation3 + $0xc0] sm:$0xff] %v3999_v5  ;;  %v1534_v2 = vand.u32 2147483648, %v10116_v54  ;;  %v10118_v63 = vsub.f32 1.0, %v10117_v21  ;;  %vm1543_vm6 = vweird.f32 %v10120_v41  ;;  %vm1530_vm9 = vmor %vm1528_vm4, %vm1529_vm5 }
 0x2fa   : > { %v1526_v50 = vmul.f32 %v10115_v7, %v10114_v44  ;;  %vm1544_vm7 = vweird.f32 %v10119_v27  ;;  %4064 = vst [vmem:[#allocation3 + $0x138] sm:$0xff] %v4000_v49  ;;  %v1547_v34 = vand.u32 2147483647, %v10120_v41  ;;  %v1549_v59 = vand.u32 2147483648, %v10120_v41 }
 0x2fb   : > { %v1541_v28 = vmul.f32 %v10119_v27, %v10118_v63  ;;  %vm8006_vm8 = vcmp.eq.f32.partialorder %v1532_v40, 8.507059e+37  ;;  %4065 = vst [vmem:[#allocation3 + $0x188] sm:$0xff] %v4001_v60  ;;  %v1535_v22 = vor.u32 1.1754944e-38, %v1534_v2  ;;  %v10124_v45 = vsub.f32 1.0, %v10123_v53  ;;  %vm1545_vm11 = vmor %vm1543_vm6, %vm1544_vm7  ;;  %v10132_v40 = vld [vmem:[#allocation150_spill] sm:$0xff] }
 0x2fc   : > { %v1527_v4 = vadd.f32 %v10115_v7, %v1526_v50  ;;  %vm1558_vm10 = vweird.f32 %v10126_v52  ;;  %4254 = vst [vmem:[#allocation4 + $0x1f8] sm:$0xff] %v4190_v6  ;;  %vm1548_vm12 = vcmp.eq.f32.partialorder %v1547_v34, 8.507059e+37  ;;  %v1550_v62 = vor.u32 1.1754944e-38, %v1549_v59 }
 0x2fd   : > { %v1542_v17 = vadd.f32 %v10119_v27, %v1541_v28  ;;  %v1556_v0 = vmul.f32 %v10125_v39, %v10124_v45  ;;  %vm1559_vm13 = vweird.f32 %v10125_v39  ;;  %4255 = vst [vmem:[#allocation4 + $0x130] sm:$0xff] %v4191_v57  ;;  %v1562_v60 = vand.u32 2147483647, %v10126_v52  ;;  %v10131_v57 = vld [vmem:[#allocation155_spill] sm:$0xff]  ;;  %v10133_v28 = vld [vmem:[#allocation156_spill] sm:$0xff] }
 0x2fe   : > { %v1531_v58 = vsel %vm1530_vm9, %v10115_v7, %v1527_v4  ;;  %4256 = vst [vmem:[#allocation4 + $0x120] sm:$0xff] %v4192_v37  ;;  %vm8026_vm14 = vmor %vm1558_vm10, %vm1559_vm13  ;;  %v1564_v44 = vand.u32 2147483648, %v10126_v52  ;;  %v10129_v7 = vld [vmem:[#allocation161_spill] sm:$0xff]  ;;  %vm1573_vm15 = vweird.f32 %v10132_v40  ;;  %vm1574_vm1 = vweird.f32 %v10131_v57  ;;  %v10136_v45 = vld [vmem:[#allocation163_spill] sm:$0xff] }
 0x2ff   : > { %v1536_v23 = vsel %vm8006_vm8, %v1535_v22, %v1531_v58  ;;  %v1546_v5 = vsel %vm1545_vm11, %v10119_v27, %v1542_v17  ;;  %v1557_v49 = vadd.f32 %v10125_v39, %v1556_v0  ;;  %v10130_v50 = vsub.f32 1.0, %v10129_v7  ;;  %4257 = vst [vmem:[#allocation4 + $0x10] sm:$0xff] %v4193_v12  ;;  %vm1575_vm2 = vmor %vm1573_vm15, %vm1574_vm1  ;;  %v10134_v4 = vld [vmem:[#allocation157_spill] sm:$0xff] }
 0x300   : > { %v1551_v6 = vsel %vm1548_vm12, %v1550_v62, %v1546_v5  ;;  %vm1563_vm0 = vcmp.eq.f32.partialorder %v1562_v60, 8.507059e+37  ;;  %v1577_v37 = vand.u32 2147483647, %v10132_v40  ;;  %v1565_v21 = vor.u32 1.1754944e-38, %v1564_v44 }
 0x301   : > { %v1571_v54 = vmul.f32 %v10131_v57, %v10130_v50  ;;  %v1561_v2 = vsel %vm8026_vm14, %v10125_v39, %v1557_v49  ;;  %v1579_v27 = vand.u32 2147483648, %v10132_v40  ;;  %v2712_v41 = vmul.f32 0.6931472, %v10133_v28  ;;  %v3116_v50 = vpop.permute.xlu1 %3115 }
 0x302   : > { %vm1578_vm3 = vcmp.eq.f32.partialorder %v1577_v37, 8.507059e+37  ;;  %v2714_v12 = vmul.f32 0.6931472, %v10134_v4  ;;  %v2716_v34 = vmul.f32 0.6931472, %v10135_v38  ;;  %v2964_v59 = vmul.f32 %v7982_v19, %v10018_v29  ;;  %v3576_v4 = vld [vmem:[#allocation2 + $0x108] sm:$0xff] }
 0x303   : > { %v1572_v63 = vadd.f32 %v10131_v57, %v1571_v54  ;;  %v1566_v22 = vsel %vm1563_vm0, %v1565_v21, %v1561_v2  ;;  %v1580_v53 = vor.u32 1.1754944e-38, %v1579_v27  ;;  %v2718_v39 = vmul.f32 0.6931472, %v10136_v45 }
 0x304   : > { %v10137_v0 = vmax.f32 %v10109_v47, 0.0  ;;  %v10138_v58 = vmax.f32 %v10110_v61, 0.0  ;;  %v10139_v5 = vmax.f32 %v10111_v26, 0.0  ;;  %v2965_v60 = vmul.f32 %v7985_v16, %v10022_v9 }
 0x305   : > { %v1576_v17 = vsel %vm1575_vm2, %v10131_v57, %v1572_v63  ;;  %v10140_v44 = vmax.f32 %v10112_v24, 0.0  ;;  %v2966_v47 = vmul.f32 %v7988_v10, %v10025_v42  ;;  %v2967_v61 = vmul.f32 %v7991_v13, %v10026_v46 }
 0x306   : > { %v8051_v52 = vadd.f32 %v2712_v41, %v10137_v0  ;;  %v8055_v62 = vadd.f32 %v2714_v12, %v10138_v58  ;;  %v8059_v49 = vadd.f32 %v2716_v34, %v10139_v5  ;;  %v1581_v15 = vsel %vm1578_vm3, %v1580_v53, %v1576_v17  ;;  %v3574_v41 = vld [vmem:[#allocation2 + $0x120] sm:$0xff] }
 0x307   : > { %v8065_v7 = vadd.f32 %v2718_v39, %v10140_v44  ;;  %v3037_v40 = vmul.f32 %v7982_v19, %v10027_v18  ;;  %v3038_v2 = vmul.f32 %v7985_v16, %v10028_v31  ;;  %v3039_v37 = vmul.f32 %v7988_v10, %v10029_v8  ;;  %v3575_v16 = vld [vmem:[#allocation2 + $0x150] sm:$0xff]  ;;  %v3577_v12 = vld [vmem:[#allocation2 + $0x60] sm:$0xff] }
 0x308   : > { %v2891_v57 = vmin.f32 %v8051_v52, 100.0  ;;  %v2892_v26 = vmin.f32 %v8055_v62, 100.0  ;;  %v2893_v54 = vmin.f32 %v8059_v49, 100.0  ;;  %v3040_v21 = vmul.f32 %v7991_v13, %v10030_v3 }
 0x309   : > { %v2894_v24 = vmin.f32 %v8065_v7, 100.0  ;;  %v3510_v63 = vadd.f32 %v3037_v40, %v2964_v59  ;;  %vm3190_vm4 = vcmp.lt.f32.partialorder %v10031_v43, %v3116_v50  ;;  %vm3191_vm5 = vcmp.lt.f32.partialorder %v10032_v14, %v3116_v50  ;;  %v3830_v7 = vld [vmem:[#allocation3 + $0x190] sm:$0xff] }
 0x30a   : > { %vm3192_vm6 = vcmp.lt.f32.partialorder %v10033_v56, %v3116_v50  ;;  %v3511_v27 = vadd.f32 %v3038_v2, %v2965_v60  ;;  %v3512_v19 = vadd.f32 %v3039_v37, %v2966_v47  ;;  %v3513_v28 = vadd.f32 %v3040_v21, %v2967_v61 }
 0x30b   : > { %vm3193_vm7 = vcmp.lt.f32.partialorder %v10104_v1, %v3116_v50  ;;  %v3638_v10 = vmul.f32 %v3510_v63, %v1536_v23  ;;  %v5095_v38 = vsel %vm3190_vm4, 1.0, %v9835_v48  ;;  %v5096_v13 = vsel %vm3191_vm5, 1.0, %v9835_v48  ;;  %v4086_v23 = vld [vmem:[#allocation4 + $0x158] sm:$0xff]  ;;  %v4087_v63 = vld [vmem:[#allocation4 + $0x190] sm:$0xff] }
 0x30c   : > { %v5097_v34 = vsel %vm3192_vm6, 1.0, %v9835_v48  ;;  %v3639_v17 = vmul.f32 %v3511_v27, %v1551_v6  ;;  %v3640_v53 = vmul.f32 %v3512_v19, %v1566_v22  ;;  %v3641_v45 = vmul.f32 %v3513_v28, %v1581_v15  ;;  %v10141_v15 = vld [vmem:[#allocation67_spill] sm:$0xff]  ;;  %v3831_v27 = vld [vmem:[#allocation3 + $0x8] sm:$0xff]  ;;  %v10143_v19 = vld [vmem:[#allocation69_spill] sm:$0xff] }
 0x30d   : > { %v5098_v39 = vsel %vm3193_vm7, 1.0, %v9835_v48  ;;  %v3702_v0 = vadd.f32 %v3638_v10, %v3574_v41  ;;  %v3382_v52 = vmul.f32 %v5095_v38, %v2964_v59  ;;  %v3383_v58 = vmul.f32 %v5096_v13, %v2965_v60  ;;  %v3832_v59 = vld [vmem:[#allocation3 + $0x88] sm:$0xff]  ;;  %v10144_v28 = vld [vmem:[#allocation73_spill] sm:$0xff] }
 0x30e   : > { %v3384_v62 = vmul.f32 %v5097_v34, %v2966_v47  ;;  %v3703_v5 = vadd.f32 %v3639_v17, %v3575_v16  ;;  %v3704_v49 = vadd.f32 %v3640_v53, %v3576_v4  ;;  %v3705_v44 = vadd.f32 %v3641_v45, %v3577_v12  ;;  %v10142_v47 = vld [vmem:[#allocation68_spill] sm:$0xff]  ;;  %v10148_v53 = vld [vmem:[#allocation81_spill] sm:$0xff] }
 0x30f   : > { %v3385_v50 = vmul.f32 %v5098_v39, %v2967_v61  ;;  %3766 = vst [vmem:[#allocation2 + $0x120] sm:$0xff] %v3702_v0  ;;  %v3446_v32 = vadd.f32 %v3382_v52, %v3037_v40  ;;  %v3447_v6 = vadd.f32 %v3383_v58, %v3038_v2  ;;  %vm903_vm8 = vcmp.gt.f32.partialorder %v10141_v15, -4.0  ;;  %v3833_v61 = vld [vmem:[#allocation3 + $0x38] sm:$0xff]  ;;  %v10151_v58 = vld [vmem:[#allocation97_spill] sm:$0xff] }
 0x310   : > { %v3448_v22 = vadd.f32 %v3384_v62, %v3039_v37  ;;  %3767 = vst [vmem:[#allocation2 + $0x150] sm:$0xff] %v3703_v5  ;;  %vm904_vm9 = vcmp.gt.f32.partialorder %v10142_v47, -4.0  ;;  %vm905_vm10 = vcmp.gt.f32.partialorder %v10143_v19, -4.0  ;;  %vm906_vm11 = vcmp.gt.f32.partialorder %v10144_v28, -4.0  ;;  %v10149_v0 = vld [vmem:[#allocation98_spill] sm:$0xff]  ;;  %v10152_v5 = vld [vmem:[#allocation85_spill] sm:$0xff] }
 0x311   : > { %v3449_v60 = vadd.f32 %v3385_v50, %v3040_v21  ;;  %3768 = vst [vmem:[#allocation2 + $0x108] sm:$0xff] %v3704_v49  ;;  %v3894_v41 = vmul.f32 %v3446_v32, %v2891_v57  ;;  %v3895_v16 = vmul.f32 %v3447_v6, %v2892_v26  ;;  %v4150_v40 = vadd.f32 %v4086_v23, %v3446_v32  ;;  %v10145_v57 = vld [vmem:[#allocation96_spill] sm:$0xff] }
 0x312   : > { %v3896_v4 = vmul.f32 %v3448_v22, %v2893_v54  ;;  %3769 = vst [vmem:[#allocation2 + $0x60] sm:$0xff] %v3705_v44  ;;  %v4151_v37 = vadd.f32 %v4087_v63, %v3447_v6  ;;  %v4152_v12 = vadd.f32 %v4088_v11, %v3448_v22  ;;  %v8098_v34 = vsel %vm903_vm8, 1.0, %v9835_v48  ;;  %v10147_v54 = vld [vmem:[#allocation95_spill] sm:$0xff]  ;;  %v10155_v6 = vld [vmem:[#allocation101_spill] sm:$0xff] }
 0x313   : > { %v3897_v2 = vmul.f32 %v3449_v60, %v2894_v24  ;;  %v4153_v10 = vadd.f32 %v4089_v30, %v3449_v60  ;;  %v3958_v38 = vadd.f32 %v3894_v41, %v3830_v7  ;;  %v3959_v13 = vadd.f32 %v3895_v16, %v3831_v27  ;;  %4214 = vst [vmem:[#allocation4 + $0x158] sm:$0xff] %v4150_v40  ;;  %v10157_v27 = vld [vmem:[#allocation99_spill] sm:$0xff]  ;;  %v10158_v60 = vld [vmem:[#allocation88_spill] sm:$0xff] }
 0x314   : > { %v3960_v21 = vadd.f32 %v3896_v4, %v3832_v59  ;;  %4215 = vst [vmem:[#allocation4 + $0x190] sm:$0xff] %v4151_v37  ;;  %v8103_v32 = vsel %vm904_vm9, 1.0, %v9835_v48  ;;  %v8108_v30 = vsel %vm905_vm10, 1.0, %v9835_v48  ;;  %v8113_v11 = vsel %vm906_vm11, 1.0, %v9835_v48 }
 0x315   : > { %v3961_v17 = vadd.f32 %v3897_v2, %v3833_v61  ;;  %4022 = vst [vmem:[#allocation3 + $0x190] sm:$0xff] %v3958_v38  ;;  %v10146_v26 = vsub.f32 1.0, %v10145_v57  ;;  %vm1468_vm12 = vweird.f32 %v10148_v53  ;;  %vm1469_vm13 = vweird.f32 %v10147_v54  ;;  %v10164_v57 = vld [vmem:[#allocation94_spill] sm:$0xff] }
 0x316   : > { %v1472_v45 = vand.u32 2147483647, %v10148_v53  ;;  %4023 = vst [vmem:[#allocation3 + $0x8] sm:$0xff] %v3959_v13  ;;  %v1474_v39 = vand.u32 2147483648, %v10148_v53  ;;  %v10150_v52 = vsub.f32 1.0, %v10149_v0  ;;  %vm1483_vm14 = vweird.f32 %v10152_v5  ;;  %vm1470_vm1 = vmor %vm1468_vm12, %vm1469_vm13  ;;  %v10161_v13 = vld [vmem:[#allocation105_spill] sm:$0xff] }
 0x317   : > { %v1466_v24 = vmul.f32 %v10147_v54, %v10146_v26  ;;  %vm1484_vm15 = vweird.f32 %v10151_v58  ;;  %4024 = vst [vmem:[#allocation3 + $0x88] sm:$0xff] %v3960_v21  ;;  %v1487_v7 = vand.u32 2147483647, %v10152_v5  ;;  %v1489_v23 = vand.u32 2147483648, %v10152_v5 }
 0x318   : > { %v1481_v62 = vmul.f32 %v10151_v58, %v10150_v52  ;;  %vm8128_vm0 = vcmp.eq.f32.partialorder %v1472_v45, 8.507059e+37  ;;  %4025 = vst [vmem:[#allocation3 + $0x38] sm:$0xff] %v3961_v17  ;;  %v1475_v50 = vor.u32 1.1754944e-38, %v1474_v39  ;;  %v10156_v22 = vsub.f32 1.0, %v10155_v6  ;;  %vm1485_vm3 = vmor %vm1483_vm14, %vm1484_vm15  ;;  %v10163_v17 = vld [vmem:[#allocation100_spill] sm:$0xff]  ;;  %v10165_v39 = vld [vmem:[#allocation103_spill] sm:$0xff] }
 0x319   : > { %v1467_v49 = vadd.f32 %v10147_v54, %v1466_v24  ;;  %vm1498_vm2 = vweird.f32 %v10158_v60  ;;  %4216 = vst [vmem:[#allocation4 + $0x88] sm:$0xff] %v4152_v12  ;;  %vm1488_vm4 = vcmp.eq.f32.partialorder %v1487_v7, 8.507059e+37  ;;  %v1490_v41 = vor.u32 1.1754944e-38, %v1489_v23  ;;  %v10166_v52 = vld [vmem:[#allocation107_spill] sm:$0xff]  ;;  %v3111_v12 = vpop.permute.xlu0 %3110 }
 0x31a   : > { %v1482_v63 = vadd.f32 %v10151_v58, %v1481_v62  ;;  %v1496_v59 = vmul.f32 %v10157_v27, %v10156_v22  ;;  %vm1499_vm5 = vweird.f32 %v10157_v27  ;;  %4217 = vst [vmem:[#allocation4 + $0x60] sm:$0xff] %v4153_v10  ;;  %v1502_v2 = vand.u32 2147483647, %v10158_v60  ;;  %v10167_v62 = vld [vmem:[#allocation111_spill] sm:$0xff] }
 0x31b   : > { %v1471_v61 = vsel %vm1470_vm1, %v10147_v54, %v1467_v49  ;;  %vm8148_vm6 = vmor %vm1498_vm2, %vm1499_vm5  ;;  %v1504_v38 = vand.u32 2147483648, %v10158_v60  ;;  %v10162_v21 = vsub.f32 1.0, %v10161_v13  ;;  %vm1513_vm7 = vweird.f32 %v10164_v57 }
 0x31c   : > { %v1476_v16 = vsel %vm8128_vm0, %v1475_v50, %v1471_v61  ;;  %v1486_v4 = vsel %vm1485_vm3, %v10151_v58, %v1482_v63  ;;  %v1497_v40 = vadd.f32 %v10157_v27, %v1496_v59  ;;  %vm1503_vm8 = vcmp.eq.f32.partialorder %v1502_v2, 8.507059e+37  ;;  %v10168_v50 = vld [vmem:[#allocation114_spill] sm:$0xff] }
 0x31d   : > { %v1491_v37 = vsel %vm1488_vm4, %v1490_v41, %v1486_v4  ;;  %v1511_v10 = vmul.f32 %v10163_v17, %v10162_v21  ;;  %vm1514_vm9 = vweird.f32 %v10163_v17  ;;  %v1517_v54 = vand.u32 2147483647, %v10164_v57 }
 0x31e   : > { %v1501_v26 = vsel %vm8148_vm6, %v10157_v27, %v1497_v40  ;;  %v1505_v24 = vor.u32 1.1754944e-38, %v1504_v38  ;;  %v1519_v45 = vand.u32 2147483648, %v10164_v57  ;;  %v2704_v0 = vmul.f32 0.6931472, %v10165_v39  ;;  %vm1515_vm10 = vmor %vm1513_vm7, %vm1514_vm9  ;;  %v3573_v39 = vld [vmem:[#allocation2 + $0x98] sm:$0xff] }
 0x31f   : > { %v1512_v53 = vadd.f32 %v10163_v17, %v1511_v10  ;;  %vm1518_vm11 = vcmp.eq.f32.partialorder %v1517_v54, 8.507059e+37  ;;  %v2706_v58 = vmul.f32 0.6931472, %v10166_v52  ;;  %v2708_v5 = vmul.f32 0.6931472, %v10167_v62 }
 0x320   : > { %v2960_v49 = vmul.f32 %v8098_v34, %v10018_v29  ;;  %v1506_v44 = vsel %vm1503_vm8, %v1505_v24, %v1501_v26  ;;  %v1520_v23 = vor.u32 1.1754944e-38, %v1519_v45  ;;  %v2710_v63 = vmul.f32 0.6931472, %v10168_v50  ;;  %v3572_v45 = vld [vmem:[#allocation2 + $0x118] sm:$0xff] }
 0x321   : > { %v1516_v7 = vsel %vm1515_vm10, %v10163_v17, %v1512_v53  ;;  %v10169_v6 = vmax.f32 %v10141_v15, 0.0  ;;  %v10170_v27 = vmax.f32 %v10142_v47, 0.0  ;;  %v10171_v60 = vmax.f32 %v10143_v19, 0.0  ;;  %v3570_v53 = vld [vmem:[#allocation2 + $0x180] sm:$0xff] }
 0x322   : > { %v2961_v41 = vmul.f32 %v8103_v32, %v10022_v9  ;;  %v1521_v4 = vsel %vm1518_vm11, %v1520_v23, %v1516_v7  ;;  %v10172_v40 = vmax.f32 %v10144_v28, 0.0  ;;  %v2962_v15 = vmul.f32 %v8108_v30, %v10025_v42 }
 0x323   : > { %v8173_v22 = vadd.f32 %v2704_v0, %v10169_v6  ;;  %v8177_v59 = vadd.f32 %v2706_v58, %v10170_v27  ;;  %v8181_v61 = vadd.f32 %v2708_v5, %v10171_v60  ;;  %v2963_v47 = vmul.f32 %v8113_v11, %v10026_v46  ;;  %v3826_v60 = vld [vmem:[#allocation3 + $0x148] sm:$0xff] }
 0x324   : > { %v8187_v2 = vadd.f32 %v2710_v63, %v10172_v40  ;;  %v3033_v21 = vmul.f32 %v8098_v34, %v10027_v18  ;;  %v3034_v17 = vmul.f32 %v8103_v32, %v10028_v31  ;;  %v3035_v10 = vmul.f32 %v8108_v30, %v10029_v8  ;;  %v3571_v32 = vld [vmem:[#allocation2 + $0x110] sm:$0xff] }
 0x325   : > { %v2887_v38 = vmin.f32 %v8173_v22, 100.0  ;;  %v2888_v19 = vmin.f32 %v8177_v59, 100.0  ;;  %v2889_v13 = vmin.f32 %v8181_v61, 100.0  ;;  %v3036_v57 = vmul.f32 %v8113_v11, %v10030_v3  ;;  %v4083_v40 = vld [vmem:[#allocation4 + $0xd0] sm:$0xff] }
 0x326   : > { %v2890_v28 = vmin.f32 %v8187_v2, 100.0  ;;  %v3506_v26 = vadd.f32 %v3033_v21, %v2960_v49  ;;  %vm3186_vm12 = vcmp.lt.f32.partialorder %v10031_v43, %v3111_v12  ;;  %vm3187_vm13 = vcmp.lt.f32.partialorder %v10032_v14, %v3111_v12  ;;  %v4084_v2 = vld [vmem:[#allocation4 + $0x70] sm:$0xff] }
 0x327   : > { %vm3188_vm14 = vcmp.lt.f32.partialorder %v10033_v56, %v3111_v12  ;;  %v3507_v54 = vadd.f32 %v3034_v17, %v2961_v41  ;;  %v3508_v34 = vadd.f32 %v3035_v10, %v2962_v15  ;;  %v3509_v24 = vadd.f32 %v3036_v57, %v2963_v47 }
 0x328   : > { %vm3189_vm15 = vcmp.lt.f32.partialorder %v10104_v1, %v3111_v12  ;;  %v3634_v30 = vmul.f32 %v3506_v26, %v1476_v16  ;;  %v5091_v0 = vsel %vm3186_vm12, 1.0, %v9835_v48  ;;  %v5092_v11 = vsel %vm3187_vm13, 1.0, %v9835_v48  ;;  %v4082_v16 = vld [vmem:[#allocation4 + $0x100] sm:$0xff]  ;;  %v4085_v12 = vld [vmem:[#allocation4 + $0x168] sm:$0xff] }
 0x329   : > { %v5093_v52 = vsel %vm3188_vm14, 1.0, %v9835_v48  ;;  %v3635_v58 = vmul.f32 %v3507_v54, %v1491_v37  ;;  %v3636_v62 = vmul.f32 %v3508_v34, %v1506_v44  ;;  %v3637_v5 = vmul.f32 %v3509_v24, %v1521_v4  ;;  %v10173_v4 = vld [vmem:[#allocation175_spill] sm:$0xff]  ;;  %v3827_v54 = vld [vmem:[#allocation3 + $0x50] sm:$0xff]  ;;  %v10176_v24 = vld [vmem:[#allocation178_spill] sm:$0xff] }
 0x32a   : > { %v5094_v7 = vsel %vm3189_vm15, 1.0, %v9835_v48  ;;  %v3698_v23 = vadd.f32 %v3634_v30, %v3570_v53  ;;  %v3378_v50 = vmul.f32 %v5091_v0, %v2960_v49  ;;  %v3379_v63 = vmul.f32 %v5092_v11, %v2961_v41  ;;  %v3828_v49 = vld [vmem:[#allocation3 + $0x1f0] sm:$0xff] }
 0x32b   : > { %v3380_v6 = vmul.f32 %v5093_v52, %v2962_v15  ;;  %v3699_v22 = vadd.f32 %v3635_v58, %v3571_v32  ;;  %v3700_v27 = vadd.f32 %v3636_v62, %v3572_v45  ;;  %v3701_v59 = vadd.f32 %v3637_v5, %v3573_v39  ;;  %v10174_v15 = vld [vmem:[#allocation176_spill] sm:$0xff]  ;;  %v10175_v34 = vld [vmem:[#allocation177_spill] sm:$0xff]  ;;  %v10179_v5 = vld [vmem:[#allocation15_spill] sm:$0xff] }
 0x32c   : > { %v3381_v61 = vmul.f32 %v5094_v7, %v2963_v47  ;;  %3762 = vst [vmem:[#allocation2 + $0x180] sm:$0xff] %v3698_v23  ;;  %v3442_v26 = vadd.f32 %v3378_v50, %v3033_v21  ;;  %v3443_v37 = vadd.f32 %v3379_v63, %v3034_v17  ;;  %vm919_vm0 = vcmp.gt.f32.partialorder %v10173_v4, -4.0  ;;  %v3829_v47 = vld [vmem:[#allocation3 + $0x130] sm:$0xff] }
 0x32d   : > { %v3444_v44 = vadd.f32 %v3380_v6, %v3035_v10  ;;  %3763 = vst [vmem:[#allocation2 + $0x110] sm:$0xff] %v3699_v22  ;;  %vm920_vm1 = vcmp.gt.f32.partialorder %v10174_v15, -4.0  ;;  %vm921_vm2 = vcmp.gt.f32.partialorder %v10175_v34, -4.0  ;;  %vm922_vm3 = vcmp.gt.f32.partialorder %v10176_v24, -4.0  ;;  %v10180_v23 = vld [vmem:[#allocation181_spill] sm:$0xff]  ;;  %v10181_v6 = vld [vmem:[#allocation183_spill] sm:$0xff] }
 0x32e   : > { %v3445_v41 = vadd.f32 %v3381_v61, %v3036_v57  ;;  %3764 = vst [vmem:[#allocation2 + $0x118] sm:$0xff] %v3700_v27  ;;  %v3890_v53 = vmul.f32 %v3442_v26, %v2887_v38  ;;  %v3891_v32 = vmul.f32 %v3443_v37, %v2888_v19  ;;  %v4146_v21 = vadd.f32 %v4082_v16, %v3442_v26  ;;  %v10183_v27 = vld [vmem:[#allocation20_spill] sm:$0xff] }
 0x32f   : > { %v3892_v45 = vmul.f32 %v3444_v44, %v2889_v13  ;;  %3765 = vst [vmem:[#allocation2 + $0x98] sm:$0xff] %v3701_v59  ;;  %v4147_v10 = vadd.f32 %v4083_v40, %v3443_v37  ;;  %v4148_v39 = vadd.f32 %v4084_v2, %v3444_v44  ;;  %v8220_v52 = vsel %vm919_vm0, 1.0, %v9835_v48  ;;  %v10187_v37 = vld [vmem:[#allocation23_spill] sm:$0xff] }
 0x330   : > { %v3893_v17 = vmul.f32 %v3445_v41, %v2890_v28  ;;  %v4149_v30 = vadd.f32 %v4085_v12, %v3445_v41  ;;  %v3954_v0 = vadd.f32 %v3890_v53, %v3826_v60  ;;  %v3955_v11 = vadd.f32 %v3891_v32, %v3827_v54  ;;  %4210 = vst [vmem:[#allocation4 + $0x100] sm:$0xff] %v4146_v21  ;;  %v10177_v28 = vld [vmem:[#allocation22_spill] sm:$0xff]  ;;  %v10184_v60 = vld [vmem:[#allocation17_spill] sm:$0xff]  ;;  %v10189_v54 = vld [vmem:[#allocation16_spill] sm:$0xff] }
 0x331   : > { %v3956_v57 = vadd.f32 %v3892_v45, %v3828_v49  ;;  %4211 = vst [vmem:[#allocation4 + $0xd0] sm:$0xff] %v4147_v10  ;;  %v8225_v38 = vsel %vm920_vm1, 1.0, %v9835_v48  ;;  %v8230_v19 = vsel %vm921_vm2, 1.0, %v9835_v48  ;;  %v8235_v13 = vsel %vm922_vm3, 1.0, %v9835_v48  ;;  %v10190_v41 = vld [vmem:[#allocation12_spill] sm:$0xff] }
 0x332   : > { %v3957_v58 = vadd.f32 %v3893_v17, %v3829_v47  ;;  %4018 = vst [vmem:[#allocation3 + $0x148] sm:$0xff] %v3954_v0  ;;  %v10178_v62 = vsub.f32 1.0, %v10177_v28  ;;  %vm1708_vm4 = vweird.f32 %v10180_v23  ;;  %vm1709_vm5 = vweird.f32 %v10179_v5  ;;  %v10196_v28 = vld [vmem:[#allocation21_spill] sm:$0xff] }
 0x333   : > { %v1712_v50 = vand.u32 2147483647, %v10180_v23  ;;  %4019 = vst [vmem:[#allocation3 + $0x50] sm:$0xff] %v3955_v11  ;;  %v1714_v63 = vand.u32 2147483648, %v10180_v23  ;;  %v10182_v22 = vsub.f32 1.0, %v10181_v6  ;;  %vm1723_vm6 = vweird.f32 %v10184_v60  ;;  %vm1710_vm9 = vmor %vm1708_vm4, %vm1709_vm5  ;;  %v10193_v11 = vld [vmem:[#allocation25_spill] sm:$0xff] }
 0x334   : > { %v1706_v7 = vmul.f32 %v10179_v5, %v10178_v62  ;;  %vm1724_vm7 = vweird.f32 %v10183_v27  ;;  %4020 = vst [vmem:[#allocation3 + $0x1f0] sm:$0xff] %v3956_v57  ;;  %v1727_v40 = vand.u32 2147483647, %v10184_v60  ;;  %v1729_v2 = vand.u32 2147483648, %v10184_v60  ;;  %v10195_v57 = vld [vmem:[#allocation184_spill] sm:$0xff] }
 0x335   : > { %v1721_v59 = vmul.f32 %v10183_v27, %v10182_v22  ;;  %vm8250_vm8 = vcmp.eq.f32.partialorder %v1712_v50, 8.507059e+37  ;;  %4021 = vst [vmem:[#allocation3 + $0x130] sm:$0xff] %v3957_v58  ;;  %v1715_v12 = vor.u32 1.1754944e-38, %v1714_v63  ;;  %v10188_v44 = vsub.f32 1.0, %v10187_v37  ;;  %vm1725_vm11 = vmor %vm1723_vm6, %vm1724_vm7  ;;  %v10197_v63 = vld [vmem:[#allocation26_spill] sm:$0xff]  ;;  %v10198_v22 = vld [vmem:[#allocation27_spill] sm:$0xff] }
 0x336   : > { %v1707_v16 = vadd.f32 %v10179_v5, %v1706_v7  ;;  %vm1738_vm10 = vweird.f32 %v10190_v41  ;;  %4212 = vst [vmem:[#allocation4 + $0x70] sm:$0xff] %v4148_v39  ;;  %vm1728_vm12 = vcmp.eq.f32.partialorder %v1727_v40, 8.507059e+37  ;;  %v1730_v53 = vor.u32 1.1754944e-38, %v1729_v2 }
 0x337   : > { %v1722_v26 = vadd.f32 %v10183_v27, %v1721_v59  ;;  %v1736_v49 = vmul.f32 %v10189_v54, %v10188_v44  ;;  %vm1739_vm13 = vweird.f32 %v10189_v54  ;;  %4213 = vst [vmem:[#allocation4 + $0x168] sm:$0xff] %v4149_v30  ;;  %v1742_v17 = vand.u32 2147483647, %v10190_v41  ;;  %v10199_v59 = vld [vmem:[#allocation185_spill] sm:$0xff] }
 0x338   : > { %v1711_v47 = vsel %vm1710_vm9, %v10179_v5, %v1707_v16  ;;  %vm8274_vm14 = vmor %vm1738_vm10, %vm1739_vm13  ;;  %v1744_v0 = vand.u32 2147483648, %v10190_v41  ;;  %v10194_v30 = vsub.f32 1.0, %v10193_v11  ;;  %vm1753_vm15 = vweird.f32 %v10196_v28 }
 0x339   : > { %v8267_v32 = vsel %vm8250_vm8, %v1715_v12, %v1711_v47  ;;  %v1726_v45 = vsel %vm1725_vm11, %v10183_v27, %v1722_v26  ;;  %v1737_v21 = vadd.f32 %v10189_v54, %v1736_v49  ;;  %vm1743_vm0 = vcmp.eq.f32.partialorder %v1742_v17, 8.507059e+37  ;;  %v10200_v12 = vld [vmem:[#allocation186_spill] sm:$0xff] }
 0x33a   : > { %v8272_v10 = vsel %vm1728_vm12, %v1730_v53, %v1726_v45  ;;  %v1751_v58 = vmul.f32 %v10195_v57, %v10194_v30  ;;  %vm1754_vm1 = vweird.f32 %v10195_v57  ;;  %v1757_v5 = vand.u32 2147483647, %v10196_v28  ;;  %v3131_v45 = vpop.permute.xlu1 %3130 }
 0x33b   : > { %v1741_v62 = vsel %vm8274_vm14, %v10189_v54, %v1737_v21  ;;  %v1745_v7 = vor.u32 1.1754944e-38, %v1744_v0  ;;  %v1759_v50 = vand.u32 2147483648, %v10196_v28  ;;  %v2736_v6 = vmul.f32 0.6931472, %v10197_v63  ;;  %vm1755_vm2 = vmor %vm1753_vm15, %vm1754_vm1  ;;  %v3587_v63 = vld [vmem:[#allocation2 + $0xf8] sm:$0xff] }
 0x33c   : > { %v1752_v23 = vadd.f32 %v10195_v57, %v1751_v58  ;;  %vm1758_vm3 = vcmp.eq.f32.partialorder %v1757_v5, 8.507059e+37  ;;  %v2738_v27 = vmul.f32 0.6931472, %v10198_v22  ;;  %v2740_v60 = vmul.f32 0.6931472, %v10199_v59 }
 0x33d   : > { %v2976_v16 = vmul.f32 %v8220_v52, %v10018_v29  ;;  %v1746_v61 = vsel %vm1743_vm0, %v1745_v7, %v1741_v62  ;;  %v1760_v2 = vor.u32 1.1754944e-38, %v1759_v50  ;;  %v2742_v26 = vmul.f32 0.6931472, %v10200_v12  ;;  %v3586_v50 = vld [vmem:[#allocation2 + $0x1e8] sm:$0xff] }
 0x33e   : > { %v1756_v40 = vsel %vm1755_vm2, %v10195_v57, %v1752_v23  ;;  %v10201_v37 = vmax.f32 %v10173_v4, 0.0  ;;  %v10202_v54 = vmax.f32 %v10174_v15, 0.0  ;;  %v10203_v41 = vmax.f32 %v10175_v34, 0.0  ;;  %v3843_v12 = vld [vmem:[#allocation3 + $0x48] sm:$0xff] }
 0x33f   : > { %v2977_v53 = vmul.f32 %v8225_v38, %v10022_v9  ;;  %v1761_v21 = vsel %vm1758_vm3, %v1760_v2, %v1756_v40  ;;  %v10204_v17 = vmax.f32 %v10176_v24, 0.0  ;;  %v2978_v0 = vmul.f32 %v8230_v19, %v10025_v42  ;;  %v3589_v40 = vld [vmem:[#allocation2 + $0x30] sm:$0xff]  ;;  %v3842_v2 = vld [vmem:[#allocation3 + $0x58] sm:$0xff] }
 0x340   : > { %v2839_v44 = vadd.f32 %v2736_v6, %v10201_v37  ;;  %v2840_v49 = vadd.f32 %v2738_v27, %v10202_v54  ;;  %v2841_v47 = vadd.f32 %v2740_v60, %v10203_v41  ;;  %v2979_v4 = vmul.f32 %v8235_v13, %v10026_v46  ;;  %v3588_v6 = vld [vmem:[#allocation2 + $0x160] sm:$0xff] }
 0x341   : > { %v2842_v39 = vadd.f32 %v2742_v26, %v10204_v17  ;;  %v3049_v34 = vmul.f32 %v8220_v52, %v10027_v18  ;;  %v3050_v58 = vmul.f32 %v8225_v38, %v10028_v31  ;;  %v3051_v24 = vmul.f32 %v8230_v19, %v10029_v8  ;;  %v3845_v41 = vld [vmem:[#allocation3 + $0x1a0] sm:$0xff] }
 0x342   : > { %v2903_v11 = vmin.f32 %v2839_v44, 100.0  ;;  %v2904_v15 = vmin.f32 %v2840_v49, 100.0  ;;  %v2905_v30 = vmin.f32 %v2841_v47, 100.0  ;;  %v3052_v28 = vmul.f32 %v8235_v13, %v10030_v3  ;;  %v3844_v49 = vld [vmem:[#allocation3 + $0x40] sm:$0xff]  ;;  %v4098_v47 = vld [vmem:[#allocation4 + $0x1c8] sm:$0xff] }
 0x343   : > { %v2906_v57 = vmin.f32 %v2842_v39, 100.0  ;;  %vm3202_vm4 = vcmp.lt.f32.partialorder %v10031_v43, %v3131_v45  ;;  %vm3203_vm5 = vcmp.lt.f32.partialorder %v10032_v14, %v3131_v45  ;;  %vm3204_vm6 = vcmp.lt.f32.partialorder %v10033_v56, %v3131_v45 }
 0x344   : > { %vm3205_vm7 = vcmp.lt.f32.partialorder %v10104_v1, %v3131_v45  ;;  %v5107_v52 = vsel %vm3202_vm4, 1.0, %v9835_v48  ;;  %v5108_v62 = vsel %vm3203_vm5, 1.0, %v9835_v48  ;;  %v5109_v38 = vsel %vm3204_vm6, 1.0, %v9835_v48 }
 0x345   : > { %v5110_v5 = vsel %vm3205_vm7, 1.0, %v9835_v48  ;;  %v3394_v19 = vmul.f32 %v5107_v52, %v2976_v16  ;;  %v3395_v7 = vmul.f32 %v5108_v62, %v2977_v53  ;;  %v3396_v23 = vmul.f32 %v5109_v38, %v2978_v0 }
 0x346   : > { %v3397_v13 = vmul.f32 %v5110_v5, %v2979_v4  ;;  %v3522_v22 = vadd.f32 %v3049_v34, %v2976_v16  ;;  %v3523_v27 = vadd.f32 %v3050_v58, %v2977_v53  ;;  %v3524_v59 = vadd.f32 %v3051_v24, %v2978_v0  ;;  %v4099_v16 = vld [vmem:[#allocation4 + $0x188] sm:$0xff]  ;;  %v4100_v53 = vld [vmem:[#allocation4 + $0x150] sm:$0xff] }
 0x347   : > { %v3525_v60 = vadd.f32 %v3052_v28, %v2979_v4  ;;  %v3458_v26 = vadd.f32 %v3394_v19, %v3049_v34  ;;  %v3459_v37 = vadd.f32 %v3395_v7, %v3050_v58  ;;  %v3460_v44 = vadd.f32 %v3396_v23, %v3051_v24  ;;  %v4101_v0 = vld [vmem:[#allocation4 + $0xa8] sm:$0xff] }
 0x348   : > { %v3461_v54 = vadd.f32 %v3397_v13, %v3052_v28  ;;  %v3650_v45 = vmul.f32 %v3522_v22, %v8267_v32  ;;  %v3651_v17 = vmul.f32 %v3523_v27, %v8272_v10  ;;  %v3652_v39 = vmul.f32 %v3524_v59, %v1746_v61  ;;  %v10205_v22 = vld [vmem:[#allocation10_spill] sm:$0xff]  ;;  %v10209_v27 = vld [vmem:[#allocation36_spill] sm:$0xff] }
 0x349   : > { %v3653_v52 = vmul.f32 %v3525_v60, %v1761_v21  ;;  %v3906_v4 = vmul.f32 %v3458_v26, %v2903_v11  ;;  %v3907_v62 = vmul.f32 %v3459_v37, %v2904_v15  ;;  %v3908_v38 = vmul.f32 %v3460_v44, %v2905_v30  ;;  %v10206_v11 = vld [vmem:[#allocation11_spill] sm:$0xff]  ;;  %v10207_v15 = vld [vmem:[#allocation13_spill] sm:$0xff]  ;;  %v10208_v30 = vld [vmem:[#allocation14_spill] sm:$0xff] }
 0x34a   : > { %v3909_v5 = vmul.f32 %v3461_v54, %v2906_v57  ;;  %v3714_v34 = vadd.f32 %v3650_v45, %v3586_v50  ;;  %v3715_v58 = vadd.f32 %v3651_v17, %v3587_v63  ;;  %v3716_v24 = vadd.f32 %v3652_v39, %v3588_v6  ;;  %v10211_v60 = vld [vmem:[#allocation35_spill] sm:$0xff] }
 0x34b   : > { %v3717_v28 = vadd.f32 %v3653_v52, %v3589_v40  ;;  %v3970_v19 = vadd.f32 %v3906_v4, %v3842_v2  ;;  %v3971_v7 = vadd.f32 %v3907_v62, %v3843_v12  ;;  %v3972_v23 = vadd.f32 %v3908_v38, %v3844_v49  ;;  %v10212_v2 = vld [vmem:[#allocation24_spill] sm:$0xff]  ;;  %v10217_v49 = vld [vmem:[#allocation37_spill] sm:$0xff]  ;;  %v10223_v62 = vld [vmem:[#allocation39_spill] sm:$0xff] }
 0x34c   : > { %v3973_v13 = vadd.f32 %v3909_v5, %v3845_v41  ;;  %3778 = vst [vmem:[#allocation2 + $0x1e8] sm:$0xff] %v3714_v34  ;;  %v4162_v32 = vadd.f32 %v4098_v47, %v3458_v26  ;;  %v4163_v10 = vadd.f32 %v4099_v16, %v3459_v37  ;;  %v4164_v61 = vadd.f32 %v4100_v53, %v3460_v44  ;;  %v10215_v44 = vld [vmem:[#allocation40_spill] sm:$0xff]  ;;  %v10224_v5 = vld [vmem:[#allocation33_spill] sm:$0xff] }
 0x34d   : > { %v4165_v21 = vadd.f32 %v4101_v0, %v3461_v54  ;;  %3779 = vst [vmem:[#allocation2 + $0xf8] sm:$0xff] %v3715_v58  ;;  %vm915_vm8 = vcmp.gt.f32.partialorder %v10205_v22, -4.0  ;;  %vm916_vm9 = vcmp.gt.f32.partialorder %v10206_v11, -4.0  ;;  %vm917_vm10 = vcmp.gt.f32.partialorder %v10207_v15, -4.0  ;;  %v10218_v47 = vld [vmem:[#allocation32_spill] sm:$0xff]  ;;  %v10221_v0 = vld [vmem:[#allocation42_spill] sm:$0xff] }
 0x34e   : > { %vm918_vm11 = vcmp.gt.f32.partialorder %v10208_v30, -4.0  ;;  %3780 = vst [vmem:[#allocation2 + $0x160] sm:$0xff] %v3716_v24  ;;  %v8334_v57 = vsel %vm915_vm8, 1.0, %v9835_v48  ;;  %v8337_v50 = vsel %vm916_vm9, 1.0, %v9835_v48  ;;  %v8340_v63 = vsel %vm917_vm10, 1.0, %v9835_v48 }
 0x34f   : > { %v8343_v6 = vsel %vm918_vm11, 1.0, %v9835_v48  ;;  %3781 = vst [vmem:[#allocation2 + $0x30] sm:$0xff] %v3717_v28  ;;  %v10210_v59 = vsub.f32 1.0, %v10209_v27  ;;  %vm1648_vm12 = vweird.f32 %v10212_v2  ;;  %vm1649_vm13 = vweird.f32 %v10211_v60 }
 0x350   : > { %v1652_v12 = vand.u32 2147483647, %v10212_v2  ;;  %4034 = vst [vmem:[#allocation3 + $0x58] sm:$0xff] %v3970_v19  ;;  %vm8351_vm14 = vmor %vm1648_vm12, %vm1649_vm13  ;;  %v1654_v37 = vand.u32 2147483648, %v10212_v2  ;;  %v10216_v54 = vsub.f32 1.0, %v10215_v44  ;;  %vm1663_vm15 = vweird.f32 %v10218_v47  ;;  %v10230_v2 = vld [vmem:[#allocation34_spill] sm:$0xff] }
 0x351   : > { %v1646_v40 = vmul.f32 %v10211_v60, %v10210_v59  ;;  %vm1664_vm0 = vweird.f32 %v10217_v49  ;;  %4035 = vst [vmem:[#allocation3 + $0x48] sm:$0xff] %v3971_v7  ;;  %v1667_v39 = vand.u32 2147483647, %v10218_v47  ;;  %v1669_v52 = vand.u32 2147483648, %v10218_v47  ;;  %v10227_v59 = vld [vmem:[#allocation44_spill] sm:$0xff]  ;;  %v3582_v44 = vld [vmem:[#allocation2 + $0x80] sm:$0xff] }
 0x352   : > { %v1661_v41 = vmul.f32 %v10217_v49, %v10216_v54  ;;  %vm1653_vm1 = vcmp.eq.f32.partialorder %v1652_v12, 8.507059e+37  ;;  %vm8362_vm2 = vmor %vm1663_vm15, %vm1664_vm0  ;;  %4036 = vst [vmem:[#allocation3 + $0x40] sm:$0xff] %v3972_v23  ;;  %v1655_v16 = vor.u32 1.1754944e-38, %v1654_v37  ;;  %v10222_v4 = vsub.f32 1.0, %v10221_v0 }
 0x353   : > { %v1647_v45 = vadd.f32 %v10211_v60, %v1646_v40  ;;  %vm1678_vm3 = vweird.f32 %v10224_v5  ;;  %4037 = vst [vmem:[#allocation3 + $0x1a0] sm:$0xff] %v3973_v13  ;;  %vm1668_vm4 = vcmp.eq.f32.partialorder %v1667_v39, 8.507059e+37  ;;  %v1670_v58 = vor.u32 1.1754944e-38, %v1669_v52 }
 0x354   : > { %v1662_v53 = vadd.f32 %v10217_v49, %v1661_v41  ;;  %v1676_v38 = vmul.f32 %v10223_v62, %v10222_v4  ;;  %vm1679_vm5 = vweird.f32 %v10223_v62  ;;  %4226 = vst [vmem:[#allocation4 + $0x1c8] sm:$0xff] %v4162_v32  ;;  %v1682_v23 = vand.u32 2147483647, %v10224_v5  ;;  %v10229_v32 = vld [vmem:[#allocation41_spill] sm:$0xff]  ;;  %v10234_v41 = vld [vmem:[#allocation46_spill] sm:$0xff] }
 0x355   : > { %v1651_v34 = vsel %vm8351_vm14, %v10211_v60, %v1647_v45  ;;  %vm8381_vm6 = vmor %vm1678_vm3, %vm1679_vm5  ;;  %4227 = vst [vmem:[#allocation4 + $0x188] sm:$0xff] %v4163_v10  ;;  %v1684_v27 = vand.u32 2147483648, %v10224_v5  ;;  %v10228_v60 = vsub.f32 1.0, %v10227_v59  ;;  %vm1693_vm7 = vweird.f32 %v10230_v2  ;;  %v10235_v45 = vld [vmem:[#allocation48_spill] sm:$0xff] }
 0x356   : > { %v1656_v24 = vsel %vm1653_vm1, %v1655_v16, %v1651_v34  ;;  %v1666_v28 = vsel %vm8362_vm2, %v10217_v49, %v1662_v53  ;;  %v1677_v19 = vadd.f32 %v10223_v62, %v1676_v38  ;;  %4228 = vst [vmem:[#allocation4 + $0x150] sm:$0xff] %v4164_v61  ;;  %vm1683_vm8 = vcmp.eq.f32.partialorder %v1682_v23, 8.507059e+37  ;;  %v10233_v61 = vld [vmem:[#allocation43_spill] sm:$0xff]  ;;  %v10236_v53 = vld [vmem:[#allocation50_spill] sm:$0xff] }
 0x357   : > { %v1671_v13 = vsel %vm1668_vm4, %v1670_v58, %v1666_v28  ;;  %v1691_v40 = vmul.f32 %v10229_v32, %v10228_v60  ;;  %vm1694_vm9 = vweird.f32 %v10229_v32  ;;  %v1697_v26 = vand.u32 2147483647, %v10230_v2  ;;  %4229 = vst [vmem:[#allocation4 + $0xa8] sm:$0xff] %v4165_v21 }
 0x358   : > { %v1681_v12 = vsel %vm8381_vm6, %v10223_v62, %v1677_v19  ;;  %v1685_v10 = vor.u32 1.1754944e-38, %v1684_v27  ;;  %vm8397_vm10 = vmor %vm1693_vm7, %vm1694_vm9  ;;  %v1699_v54 = vand.u32 2147483648, %v10230_v2  ;;  %v2728_v49 = vmul.f32 0.6931472, %v10233_v61  ;;  %v3126_v27 = vpop.permute.xlu0 %3125  ;;  %v3585_v61 = vld [vmem:[#allocation2 + $0x28] sm:$0xff] }
 0x359   : > { %v1692_v37 = vadd.f32 %v10229_v32, %v1691_v40  ;;  %vm1698_vm11 = vcmp.eq.f32.partialorder %v1697_v26, 8.507059e+37  ;;  %v2730_v47 = vmul.f32 0.6931472, %v10234_v41  ;;  %v2732_v17 = vmul.f32 0.6931472, %v10235_v45 }
 0x35a   : > { %v2972_v39 = vmul.f32 %v8334_v57, %v10018_v29  ;;  %v1686_v21 = vsel %vm1683_vm8, %v1685_v10, %v1681_v12  ;;  %v1700_v16 = vor.u32 1.1754944e-38, %v1699_v54  ;;  %v2734_v0 = vmul.f32 0.6931472, %v10236_v53  ;;  %v3584_v54 = vld [vmem:[#allocation2 + $0x1b8] sm:$0xff] }
 0x35b   : > { %v1696_v52 = vsel %vm8397_vm10, %v10229_v32, %v1692_v37  ;;  %v10237_v4 = vmax.f32 %v10205_v22, 0.0  ;;  %v10238_v38 = vmax.f32 %v10206_v11, 0.0  ;;  %v10239_v34 = vmax.f32 %v10207_v15, 0.0 }
 0x35c   : > { %v2973_v28 = vmul.f32 %v8337_v50, %v10022_v9  ;;  %v1701_v19 = vsel %vm1698_vm11, %v1700_v16, %v1696_v52  ;;  %v10240_v7 = vmax.f32 %v10208_v30, 0.0  ;;  %v2974_v22 = vmul.f32 %v8340_v63, %v10025_v42 }
 0x35d   : > { %v8413_v62 = vadd.f32 %v2728_v49, %v10237_v4  ;;  %v8417_v5 = vadd.f32 %v2730_v47, %v10238_v38  ;;  %v8421_v58 = vadd.f32 %v2732_v17, %v10239_v34  ;;  %v2975_v11 = vmul.f32 %v8343_v6, %v10026_v46  ;;  %v3838_v34 = vld [vmem:[#allocation3 + $0x1c0] sm:$0xff] }
 0x35e   : > { %v8427_v23 = vadd.f32 %v2734_v0, %v10240_v7  ;;  %v3045_v32 = vmul.f32 %v8334_v57, %v10027_v18  ;;  %v3046_v40 = vmul.f32 %v8337_v50, %v10028_v31  ;;  %v3047_v2 = vmul.f32 %v8340_v63, %v10029_v8  ;;  %v3583_v50 = vld [vmem:[#allocation2 + $0x1a8] sm:$0xff]  ;;  %v4095_v7 = vld [vmem:[#allocation4 + $0x180] sm:$0xff] }
 0x35f   : > { %v2899_v59 = vmin.f32 %v8413_v62, 100.0  ;;  %v2900_v15 = vmin.f32 %v8417_v5, 100.0  ;;  %v2901_v60 = vmin.f32 %v8421_v58, 100.0  ;;  %v3048_v12 = vmul.f32 %v8343_v6, %v10030_v3 }
 0x360   : > { %v2902_v30 = vmin.f32 %v8427_v23, 100.0  ;;  %v3518_v26 = vadd.f32 %v3045_v32, %v2972_v39  ;;  %vm3198_vm12 = vcmp.lt.f32.partialorder %v10031_v43, %v3126_v27  ;;  %vm3199_vm13 = vcmp.lt.f32.partialorder %v10032_v14, %v3126_v27  ;;  %v4096_v23 = vld [vmem:[#allocation4 + $0x18] sm:$0xff] }
 0x361   : > { %vm3200_vm14 = vcmp.lt.f32.partialorder %v10033_v56, %v3126_v27  ;;  %v3519_v10 = vadd.f32 %v3046_v40, %v2973_v28  ;;  %v3520_v57 = vadd.f32 %v3047_v2, %v2974_v22  ;;  %v3521_v37 = vadd.f32 %v3048_v12, %v2975_v11 }
 0x362   : > { %vm3201_vm15 = vcmp.lt.f32.partialorder %v10104_v1, %v3126_v27  ;;  %v3646_v63 = vmul.f32 %v3518_v26, %v1656_v24  ;;  %v5103_v49 = vsel %vm3198_vm12, 1.0, %v9835_v48  ;;  %v5104_v6 = vsel %vm3199_vm13, 1.0, %v9835_v48  ;;  %v4094_v24 = vld [vmem:[#allocation4 + $0x78] sm:$0xff]  ;;  %v4097_v27 = vld [vmem:[#allocation4 + $0x148] sm:$0xff] }
 0x363   : > { %v5105_v41 = vsel %vm3200_vm14, 1.0, %v9835_v48  ;;  %v3647_v47 = vmul.f32 %v3519_v10, %v1671_v13  ;;  %v3648_v45 = vmul.f32 %v3520_v57, %v1686_v21  ;;  %v3649_v17 = vmul.f32 %v3521_v37, %v1701_v19  ;;  %v10241_v19 = vld [vmem:[#allocation187_spill] sm:$0xff]  ;;  %v3839_v10 = vld [vmem:[#allocation3 + $0x78] sm:$0xff]  ;;  %v10243_v57 = vld [vmem:[#allocation189_spill] sm:$0xff] }
 0x364   : > { %v5106_v52 = vsel %vm3201_vm15, 1.0, %v9835_v48  ;;  %v3710_v16 = vadd.f32 %v3646_v63, %v3582_v44  ;;  %v3390_v53 = vmul.f32 %v5103_v49, %v2972_v39  ;;  %v3391_v0 = vmul.f32 %v5104_v6, %v2973_v28  ;;  %v3840_v39 = vld [vmem:[#allocation3 + $0x108] sm:$0xff]  ;;  %v10244_v37 = vld [vmem:[#allocation190_spill] sm:$0xff] }
 0x365   : > { %v3392_v4 = vmul.f32 %v5105_v41, %v2974_v22  ;;  %v3711_v62 = vadd.f32 %v3647_v47, %v3583_v50  ;;  %v3712_v38 = vadd.f32 %v3648_v45, %v3584_v54  ;;  %v3713_v5 = vadd.f32 %v3649_v17, %v3585_v61  ;;  %v10242_v22 = vld [vmem:[#allocation188_spill] sm:$0xff]  ;;  %v10247_v17 = vld [vmem:[#allocation199_spill] sm:$0xff] }
 0x366   : > { %v3393_v58 = vmul.f32 %v5106_v52, %v2975_v11  ;;  %3774 = vst [vmem:[#allocation2 + $0x80] sm:$0xff] %v3710_v16  ;;  %v3454_v26 = vadd.f32 %v3390_v53, %v3045_v32  ;;  %v3455_v13 = vadd.f32 %v3391_v0, %v3046_v40  ;;  %vm931_vm0 = vcmp.gt.f32.partialorder %v10241_v19, -4.0  ;;  %v3841_v11 = vld [vmem:[#allocation3 + $0x80] sm:$0xff]  ;;  %v10248_v16 = vld [vmem:[#allocation192_spill] sm:$0xff] }
 0x367   : > { %v3456_v21 = vadd.f32 %v3392_v4, %v3047_v2  ;;  %3775 = vst [vmem:[#allocation2 + $0x1a8] sm:$0xff] %v3711_v62  ;;  %vm932_vm1 = vcmp.gt.f32.partialorder %v10242_v22, -4.0  ;;  %vm933_vm2 = vcmp.gt.f32.partialorder %v10243_v57, -4.0  ;;  %vm934_vm3 = vcmp.gt.f32.partialorder %v10244_v37, -4.0  ;;  %v10249_v4 = vld [vmem:[#allocation180_spill] sm:$0xff] }
 0x368   : > { %v3457_v28 = vadd.f32 %v3393_v58, %v3048_v12  ;;  %3776 = vst [vmem:[#allocation2 + $0x1b8] sm:$0xff] %v3712_v38  ;;  %v3902_v44 = vmul.f32 %v3454_v26, %v2899_v59  ;;  %v3903_v50 = vmul.f32 %v3455_v13, %v2900_v15  ;;  %v4158_v32 = vadd.f32 %v4094_v24, %v3454_v26  ;;  %v10251_v38 = vld [vmem:[#allocation8_spill] sm:$0xff] }
 0x369   : > { %v3904_v54 = vmul.f32 %v3456_v21, %v2901_v60  ;;  %3777 = vst [vmem:[#allocation2 + $0x28] sm:$0xff] %v3713_v5  ;;  %v4159_v2 = vadd.f32 %v4095_v7, %v3455_v13  ;;  %v4160_v61 = vadd.f32 %v4096_v23, %v3456_v21  ;;  %v8460_v41 = vsel %vm931_vm0, 1.0, %v9835_v48  ;;  %v10255_v13 = vld [vmem:[#allocation201_spill] sm:$0xff] }
 0x36a   : > { %v3905_v40 = vmul.f32 %v3457_v28, %v2902_v30  ;;  %v4161_v63 = vadd.f32 %v4097_v27, %v3457_v28  ;;  %v3966_v49 = vadd.f32 %v3902_v44, %v3838_v34  ;;  %v3967_v6 = vadd.f32 %v3903_v50, %v3839_v10  ;;  %4222 = vst [vmem:[#allocation4 + $0x78] sm:$0xff] %v4158_v32  ;;  %v10245_v30 = vld [vmem:[#allocation179_spill] sm:$0xff]  ;;  %v10258_v28 = vld [vmem:[#allocation196_spill] sm:$0xff] }
 0x36b   : > { %v3968_v12 = vadd.f32 %v3904_v54, %v3840_v39  ;;  %4223 = vst [vmem:[#allocation4 + $0x180] sm:$0xff] %v4159_v2  ;;  %v8465_v59 = vsel %vm932_vm1, 1.0, %v9835_v48  ;;  %v8470_v15 = vsel %vm933_vm2, 1.0, %v9835_v48  ;;  %v8475_v60 = vsel %vm934_vm3, 1.0, %v9835_v48  ;;  %v10252_v34 = vld [vmem:[#allocation195_spill] sm:$0xff] }
 0x36c   : > { %v3969_v47 = vadd.f32 %v3905_v40, %v3841_v11  ;;  %4030 = vst [vmem:[#allocation3 + $0x1c0] sm:$0xff] %v3966_v49  ;;  %v10246_v45 = vsub.f32 1.0, %v10245_v30  ;;  %vm1888_vm4 = vweird.f32 %v10248_v16  ;;  %vm1889_vm5 = vweird.f32 %v10247_v17  ;;  %v10257_v10 = vld [vmem:[#allocation7_spill] sm:$0xff]  ;;  %v10264_v30 = vld [vmem:[#allocation197_spill] sm:$0xff] }
 0x36d   : > { %v1892_v53 = vand.u32 2147483647, %v10248_v16  ;;  %4031 = vst [vmem:[#allocation3 + $0x78] sm:$0xff] %v3967_v6  ;;  %v1894_v0 = vand.u32 2147483648, %v10248_v16  ;;  %v10250_v62 = vsub.f32 1.0, %v10249_v4  ;;  %vm1903_vm6 = vweird.f32 %v10252_v34  ;;  %vm1890_vm9 = vmor %vm1888_vm4, %vm1889_vm5  ;;  %v10261_v6 = vld [vmem:[#allocation203_spill] sm:$0xff] }
 0x36e   : > { %v1886_v52 = vmul.f32 %v10247_v17, %v10246_v45  ;;  %vm1904_vm7 = vweird.f32 %v10251_v38  ;;  %4032 = vst [vmem:[#allocation3 + $0x108] sm:$0xff] %v3968_v12  ;;  %v1907_v7 = vand.u32 2147483647, %v10252_v34  ;;  %v1909_v23 = vand.u32 2147483648, %v10252_v34  ;;  %v10263_v12 = vld [vmem:[#allocation200_spill] sm:$0xff] }
 0x36f   : > { %v1901_v5 = vmul.f32 %v10251_v38, %v10250_v62  ;;  %vm8490_vm8 = vcmp.eq.f32.partialorder %v1892_v53, 8.507059e+37  ;;  %4033 = vst [vmem:[#allocation3 + $0x80] sm:$0xff] %v3969_v47  ;;  %v1895_v27 = vor.u32 1.1754944e-38, %v1894_v0  ;;  %v10256_v21 = vsub.f32 1.0, %v10255_v13  ;;  %vm1905_vm11 = vmor %vm1903_vm6, %vm1904_vm7  ;;  %v10265_v0 = vld [vmem:[#allocation202_spill] sm:$0xff]  ;;  %v10266_v62 = vld [vmem:[#allocation9_spill] sm:$0xff] }
 0x370   : > { %v1887_v24 = vadd.f32 %v10247_v17, %v1886_v52  ;;  %vm1918_vm10 = vweird.f32 %v10258_v28  ;;  %4224 = vst [vmem:[#allocation4 + $0x18] sm:$0xff] %v4160_v61  ;;  %vm1908_vm12 = vcmp.eq.f32.partialorder %v1907_v7, 8.507059e+37  ;;  %v1910_v44 = vor.u32 1.1754944e-38, %v1909_v23 }
 0x371   : > { %v1902_v26 = vadd.f32 %v10251_v38, %v1901_v5  ;;  %v1916_v39 = vmul.f32 %v10257_v10, %v10256_v21  ;;  %vm1919_vm13 = vweird.f32 %v10257_v10  ;;  %4225 = vst [vmem:[#allocation4 + $0x148] sm:$0xff] %v4161_v63  ;;  %v1922_v40 = vand.u32 2147483647, %v10258_v28  ;;  %v10267_v5 = vld [vmem:[#allocation182_spill] sm:$0xff] }
 0x372   : > { %v1891_v11 = vsel %vm1890_vm9, %v10247_v17, %v1887_v24  ;;  %vm8514_vm14 = vmor %vm1918_vm10, %vm1919_vm13  ;;  %v1924_v49 = vand.u32 2147483648, %v10258_v28  ;;  %v10262_v63 = vsub.f32 1.0, %v10261_v6  ;;  %vm1933_vm15 = vweird.f32 %v10264_v30 }
 0x373   : > { %v8507_v50 = vsel %vm8490_vm8, %v1895_v27, %v1891_v11  ;;  %v1906_v54 = vsel %vm1905_vm11, %v10251_v38, %v1902_v26  ;;  %v1917_v32 = vadd.f32 %v10257_v10, %v1916_v39  ;;  %vm1923_vm0 = vcmp.eq.f32.partialorder %v1922_v40, 8.507059e+37  ;;  %v10268_v27 = vld [vmem:[#allocation19_spill] sm:$0xff] }
 0x374   : > { %v8512_v2 = vsel %vm1908_vm12, %v1910_v44, %v1906_v54  ;;  %v1931_v47 = vmul.f32 %v10263_v12, %v10262_v63  ;;  %vm1934_vm1 = vweird.f32 %v10263_v12  ;;  %v1937_v17 = vand.u32 2147483647, %v10264_v30  ;;  %v3146_v54 = vpop.permute.xlu1 %3145 }
 0x375   : > { %v1921_v45 = vsel %vm8514_vm14, %v10257_v10, %v1917_v32  ;;  %v1925_v52 = vor.u32 1.1754944e-38, %v1924_v49  ;;  %v1939_v53 = vand.u32 2147483648, %v10264_v30  ;;  %v2760_v4 = vmul.f32 0.6931472, %v10265_v0  ;;  %vm1935_vm2 = vmor %vm1933_vm15, %vm1934_vm1  ;;  %v3599_v0 = vld [vmem:[#allocation2 + $0x1f8] sm:$0xff] }
 0x376   : > { %v1932_v16 = vadd.f32 %v10263_v12, %v1931_v47  ;;  %vm1938_vm3 = vcmp.eq.f32.partialorder %v1937_v17, 8.507059e+37  ;;  %v2762_v38 = vmul.f32 0.6931472, %v10266_v62  ;;  %v2764_v34 = vmul.f32 0.6931472, %v10267_v5 }
 0x377   : > { %v2988_v24 = vmul.f32 %v8460_v41, %v10018_v29  ;;  %v1926_v58 = vsel %vm1923_vm0, %v1925_v52, %v1921_v45  ;;  %v1940_v23 = vor.u32 1.1754944e-38, %v1939_v53  ;;  %v2766_v26 = vmul.f32 0.6931472, %v10268_v27  ;;  %v3598_v53 = vld [vmem:[#allocation2 + $0x40] sm:$0xff] }
 0x378   : > { %v1936_v7 = vsel %vm1935_vm2, %v10263_v12, %v1932_v16  ;;  %v10269_v13 = vmax.f32 %v10241_v19, 0.0  ;;  %v10270_v10 = vmax.f32 %v10242_v22, 0.0  ;;  %v10271_v28 = vmax.f32 %v10243_v57, 0.0  ;;  %v3855_v27 = vld [vmem:[#allocation3 + $0x140] sm:$0xff] }
 0x379   : > { %v2989_v44 = vmul.f32 %v8465_v59, %v10022_v9  ;;  %v1941_v32 = vsel %vm1938_vm3, %v1940_v23, %v1936_v7  ;;  %v10272_v40 = vmax.f32 %v10244_v37, 0.0  ;;  %v2990_v49 = vmul.f32 %v8470_v15, %v10025_v42  ;;  %v3601_v7 = vld [vmem:[#allocation2 + $0x128] sm:$0xff] }
 0x37a   : > { %v2851_v21 = vadd.f32 %v2760_v4, %v10269_v13  ;;  %v2852_v39 = vadd.f32 %v2762_v38, %v10270_v10  ;;  %v2853_v11 = vadd.f32 %v2764_v34, %v10271_v28  ;;  %v2991_v19 = vmul.f32 %v8475_v60, %v10026_v46  ;;  %v3600_v4 = vld [vmem:[#allocation2 + $0x20] sm:$0xff]  ;;  %v3854_v23 = vld [vmem:[#allocation3 + $0x1e8] sm:$0xff]  ;;  %v3857_v28 = vld [vmem:[#allocation3 + $0x98] sm:$0xff] }
 0x37b   : > { %v2854_v61 = vadd.f32 %v2766_v26, %v10272_v40  ;;  %v3061_v57 = vmul.f32 %v8460_v41, %v10027_v18  ;;  %v3062_v47 = vmul.f32 %v8465_v59, %v10028_v31  ;;  %v3063_v37 = vmul.f32 %v8470_v15, %v10029_v8 }
 0x37c   : > { %v2915_v6 = vmin.f32 %v2851_v21, 100.0  ;;  %v2916_v22 = vmin.f32 %v2852_v39, 100.0  ;;  %v2917_v63 = vmin.f32 %v2853_v11, 100.0  ;;  %v3064_v30 = vmul.f32 %v8475_v60, %v10030_v3  ;;  %v3856_v39 = vld [vmem:[#allocation3 + $0x60] sm:$0xff]  ;;  %v4110_v11 = vld [vmem:[#allocation4 + $0x30] sm:$0xff] }
 0x37d   : > { %v2918_v12 = vmin.f32 %v2854_v61, 100.0  ;;  %vm3214_vm4 = vcmp.lt.f32.partialorder %v10031_v43, %v3146_v54  ;;  %vm3215_vm5 = vcmp.lt.f32.partialorder %v10032_v14, %v3146_v54  ;;  %vm3216_vm6 = vcmp.lt.f32.partialorder %v10033_v56, %v3146_v54 }
 0x37e   : > { %vm3217_vm7 = vcmp.lt.f32.partialorder %v10104_v1, %v3146_v54  ;;  %v5119_v41 = vsel %vm3214_vm4, 1.0, %v9835_v48  ;;  %v5120_v45 = vsel %vm3215_vm5, 1.0, %v9835_v48  ;;  %v5121_v59 = vsel %vm3216_vm6, 1.0, %v9835_v48 }
 0x37f   : > { %v5122_v17 = vsel %vm3217_vm7, 1.0, %v9835_v48  ;;  %v3406_v15 = vmul.f32 %v5119_v41, %v2988_v24  ;;  %v3407_v52 = vmul.f32 %v5120_v45, %v2989_v44  ;;  %v3408_v16 = vmul.f32 %v5121_v59, %v2990_v49 }
 0x380   : > { %v3409_v60 = vmul.f32 %v5122_v17, %v2991_v19  ;;  %v3534_v62 = vadd.f32 %v3061_v57, %v2988_v24  ;;  %v3535_v38 = vadd.f32 %v3062_v47, %v2989_v44  ;;  %v3536_v5 = vadd.f32 %v3063_v37, %v2990_v49  ;;  %v4111_v24 = vld [vmem:[#allocation4 + $0x140] sm:$0xff]  ;;  %v4112_v44 = vld [vmem:[#allocation4 + $0x1d8] sm:$0xff]  ;;  %v4113_v49 = vld [vmem:[#allocation4 + $0x1e8] sm:$0xff] }
 0x381   : > { %v3537_v34 = vadd.f32 %v3064_v30, %v2991_v19  ;;  %v3470_v26 = vadd.f32 %v3406_v15, %v3061_v57  ;;  %v3471_v13 = vadd.f32 %v3407_v52, %v3062_v47  ;;  %v3472_v21 = vadd.f32 %v3408_v16, %v3063_v37 }
 0x382   : > { %v3473_v10 = vadd.f32 %v3409_v60, %v3064_v30  ;;  %v3662_v54 = vmul.f32 %v3534_v62, %v8507_v50  ;;  %v3663_v40 = vmul.f32 %v3535_v38, %v8512_v2  ;;  %v3664_v61 = vmul.f32 %v3536_v5, %v1926_v58  ;;  %v10273_v62 = vld [vmem:[#allocation28_spill] sm:$0xff] }
 0x383   : > { %v3665_v41 = vmul.f32 %v3537_v34, %v1941_v32  ;;  %v3918_v19 = vmul.f32 %v3470_v26, %v2915_v6  ;;  %v3919_v45 = vmul.f32 %v3471_v13, %v2916_v22  ;;  %v3920_v59 = vmul.f32 %v3472_v21, %v2917_v63  ;;  %v10274_v6 = vld [vmem:[#allocation29_spill] sm:$0xff]  ;;  %v10275_v22 = vld [vmem:[#allocation30_spill] sm:$0xff]  ;;  %v10276_v63 = vld [vmem:[#allocation31_spill] sm:$0xff] }
 0x384   : > { %v3921_v17 = vmul.f32 %v3473_v10, %v2918_v12  ;;  %v3726_v57 = vadd.f32 %v3662_v54, %v3598_v53  ;;  %v3727_v47 = vadd.f32 %v3663_v40, %v3599_v0  ;;  %v3728_v37 = vadd.f32 %v3664_v61, %v3600_v4  ;;  %v10277_v38 = vld [vmem:[#allocation56_spill] sm:$0xff]  ;;  %v10279_v34 = vld [vmem:[#allocation54_spill] sm:$0xff] }
 0x385   : > { %v3729_v30 = vadd.f32 %v3665_v41, %v3601_v7  ;;  %v3982_v15 = vadd.f32 %v3918_v19, %v3854_v23  ;;  %v3983_v52 = vadd.f32 %v3919_v45, %v3855_v27  ;;  %v3984_v16 = vadd.f32 %v3920_v59, %v3856_v39  ;;  %v10280_v23 = vld [vmem:[#allocation38_spill] sm:$0xff]  ;;  %v10285_v39 = vld [vmem:[#allocation57_spill] sm:$0xff]  ;;  %v10291_v45 = vld [vmem:[#allocation59_spill] sm:$0xff] }
 0x386   : > { %v3985_v60 = vadd.f32 %v3921_v17, %v3857_v28  ;;  %3790 = vst [vmem:[#allocation2 + $0x40] sm:$0xff] %v3726_v57  ;;  %v4174_v50 = vadd.f32 %v4110_v11, %v3470_v26  ;;  %v4175_v2 = vadd.f32 %v4111_v24, %v3471_v13  ;;  %v4176_v58 = vadd.f32 %v4112_v44, %v3472_v21  ;;  %v10283_v21 = vld [vmem:[#allocation58_spill] sm:$0xff]  ;;  %v10286_v11 = vld [vmem:[#allocation47_spill] sm:$0xff]  ;;  %v10292_v17 = vld [vmem:[#allocation53_spill] sm:$0xff] }
 0x387   : > { %v4177_v32 = vadd.f32 %v4113_v49, %v3473_v10  ;;  %3791 = vst [vmem:[#allocation2 + $0x1f8] sm:$0xff] %v3727_v47  ;;  %vm927_vm8 = vcmp.gt.f32.partialorder %v10273_v62, -4.0  ;;  %vm928_vm9 = vcmp.gt.f32.partialorder %v10274_v6, -4.0  ;;  %vm929_vm10 = vcmp.gt.f32.partialorder %v10275_v22, -4.0  ;;  %v10289_v49 = vld [vmem:[#allocation62_spill] sm:$0xff] }
 0x388   : > { %vm930_vm11 = vcmp.gt.f32.partialorder %v10276_v63, -4.0  ;;  %3792 = vst [vmem:[#allocation2 + $0x20] sm:$0xff] %v3728_v37  ;;  %v8574_v12 = vsel %vm927_vm8, 1.0, %v9835_v48  ;;  %v8577_v53 = vsel %vm928_vm9, 1.0, %v9835_v48  ;;  %v8580_v0 = vsel %vm929_vm10, 1.0, %v9835_v48 }
 0x389   : > { %v8583_v4 = vsel %vm930_vm11, 1.0, %v9835_v48  ;;  %3793 = vst [vmem:[#allocation2 + $0x128] sm:$0xff] %v3729_v30  ;;  %v10278_v5 = vsub.f32 1.0, %v10277_v38  ;;  %vm1828_vm12 = vweird.f32 %v10280_v23  ;;  %vm1829_vm13 = vweird.f32 %v10279_v34 }
 0x38a   : > { %v1832_v27 = vand.u32 2147483647, %v10280_v23  ;;  %4046 = vst [vmem:[#allocation3 + $0x1e8] sm:$0xff] %v3982_v15  ;;  %vm8591_vm14 = vmor %vm1828_vm12, %vm1829_vm13  ;;  %v1834_v13 = vand.u32 2147483648, %v10280_v23  ;;  %v10284_v10 = vsub.f32 1.0, %v10283_v21  ;;  %vm1843_vm15 = vweird.f32 %v10286_v11  ;;  %v10298_v23 = vld [vmem:[#allocation55_spill] sm:$0xff] }
 0x38b   : > { %v1826_v7 = vmul.f32 %v10279_v34, %v10278_v5  ;;  %vm1844_vm0 = vweird.f32 %v10285_v39  ;;  %4047 = vst [vmem:[#allocation3 + $0x140] sm:$0xff] %v3983_v52  ;;  %v1847_v61 = vand.u32 2147483647, %v10286_v11  ;;  %v1849_v41 = vand.u32 2147483648, %v10286_v11  ;;  %v10295_v5 = vld [vmem:[#allocation64_spill] sm:$0xff] }
 0x38c   : > { %v1841_v28 = vmul.f32 %v10285_v39, %v10284_v10  ;;  %vm1833_vm1 = vcmp.eq.f32.partialorder %v1832_v27, 8.507059e+37  ;;  %vm8602_vm2 = vmor %vm1843_vm15, %vm1844_vm0  ;;  %4048 = vst [vmem:[#allocation3 + $0x60] sm:$0xff] %v3984_v16  ;;  %v1835_v24 = vor.u32 1.1754944e-38, %v1834_v13  ;;  %v10290_v19 = vsub.f32 1.0, %v10289_v49  ;;  %v3594_v21 = vld [vmem:[#allocation2 + $0x148] sm:$0xff] }
 0x38d   : > { %v1827_v54 = vadd.f32 %v10279_v34, %v1826_v7  ;;  %vm1858_vm3 = vweird.f32 %v10292_v17  ;;  %4049 = vst [vmem:[#allocation3 + $0x98] sm:$0xff] %v3985_v60  ;;  %vm1848_vm4 = vcmp.eq.f32.partialorder %v1847_v61, 8.507059e+37  ;;  %v1850_v47 = vor.u32 1.1754944e-38, %v1849_v41 }
 0x38e   : > { %v1842_v44 = vadd.f32 %v10285_v39, %v1841_v28  ;;  %v1856_v59 = vmul.f32 %v10291_v45, %v10290_v19  ;;  %vm1859_vm5 = vweird.f32 %v10291_v45  ;;  %4238 = vst [vmem:[#allocation4 + $0x30] sm:$0xff] %v4174_v50  ;;  %v1862_v16 = vand.u32 2147483647, %v10292_v17  ;;  %v10297_v50 = vld [vmem:[#allocation61_spill] sm:$0xff]  ;;  %v10302_v28 = vld [vmem:[#allocation66_spill] sm:$0xff] }
 0x38f   : > { %v1831_v57 = vsel %vm8591_vm14, %v10279_v34, %v1827_v54  ;;  %vm8621_vm6 = vmor %vm1858_vm3, %vm1859_vm5  ;;  %4239 = vst [vmem:[#allocation4 + $0x140] sm:$0xff] %v4175_v2  ;;  %v1864_v38 = vand.u32 2147483648, %v10292_v17  ;;  %v10296_v34 = vsub.f32 1.0, %v10295_v5  ;;  %vm1873_vm7 = vweird.f32 %v10298_v23  ;;  %v10303_v54 = vld [vmem:[#allocation70_spill] sm:$0xff] }
 0x390   : > { %v1836_v37 = vsel %vm1833_vm1, %v1835_v24, %v1831_v57  ;;  %v1846_v30 = vsel %vm8602_vm2, %v10285_v39, %v1842_v44  ;;  %v1857_v15 = vadd.f32 %v10291_v45, %v1856_v59  ;;  %4240 = vst [vmem:[#allocation4 + $0x1d8] sm:$0xff] %v4176_v58  ;;  %vm1863_vm8 = vcmp.eq.f32.partialorder %v1862_v16, 8.507059e+37  ;;  %v10301_v58 = vld [vmem:[#allocation63_spill] sm:$0xff]  ;;  %v10304_v44 = vld [vmem:[#allocation72_spill] sm:$0xff] }
 0x391   : > { %v1851_v60 = vsel %vm1848_vm4, %v1850_v47, %v1846_v30  ;;  %v1871_v7 = vmul.f32 %v10297_v50, %v10296_v34  ;;  %vm1874_vm9 = vweird.f32 %v10297_v50  ;;  %v1877_v26 = vand.u32 2147483647, %v10298_v23  ;;  %4241 = vst [vmem:[#allocation4 + $0x1e8] sm:$0xff] %v4177_v32 }
 0x392   : > { %v1861_v27 = vsel %vm8621_vm6, %v10291_v45, %v1857_v15  ;;  %v1865_v2 = vor.u32 1.1754944e-38, %v1864_v38  ;;  %vm8637_vm10 = vmor %vm1873_vm7, %vm1874_vm9  ;;  %v1879_v10 = vand.u32 2147483648, %v10298_v23  ;;  %v2752_v39 = vmul.f32 0.6931472, %v10301_v58  ;;  %v3141_v38 = vpop.permute.xlu0 %3140  ;;  %v3597_v58 = vld [vmem:[#allocation2 + $0xc8] sm:$0xff] }
 0x393   : > { %v1872_v13 = vadd.f32 %v10297_v50, %v1871_v7  ;;  %vm1878_vm11 = vcmp.eq.f32.partialorder %v1877_v26, 8.507059e+37  ;;  %v2754_v11 = vmul.f32 0.6931472, %v10302_v28  ;;  %v2756_v40 = vmul.f32 0.6931472, %v10303_v54 }
 0x394   : > { %v2984_v61 = vmul.f32 %v8574_v12, %v10018_v29  ;;  %v1866_v32 = vsel %vm1863_vm8, %v1865_v2, %v1861_v27  ;;  %v1880_v24 = vor.u32 1.1754944e-38, %v1879_v10  ;;  %v2758_v49 = vmul.f32 0.6931472, %v10304_v44  ;;  %v3596_v10 = vld [vmem:[#allocation2 + $0x100] sm:$0xff] }
 0x395   : > { %v1876_v41 = vsel %vm8637_vm10, %v10297_v50, %v1872_v13  ;;  %v10305_v19 = vmax.f32 %v10273_v62, 0.0  ;;  %v10306_v59 = vmax.f32 %v10274_v6, 0.0  ;;  %v10307_v57 = vmax.f32 %v10275_v22, 0.0 }
 0x396   : > { %v2985_v30 = vmul.f32 %v8577_v53, %v10022_v9  ;;  %v1881_v15 = vsel %vm1878_vm11, %v1880_v24, %v1876_v41  ;;  %v10308_v52 = vmax.f32 %v10276_v63, 0.0  ;;  %v2986_v62 = vmul.f32 %v8580_v0, %v10025_v42 }
 0x397   : > { %v8653_v45 = vadd.f32 %v2752_v39, %v10305_v19  ;;  %v8657_v17 = vadd.f32 %v2754_v11, %v10306_v59  ;;  %v8661_v47 = vadd.f32 %v2756_v40, %v10307_v57  ;;  %v2987_v6 = vmul.f32 %v8583_v4, %v10026_v46  ;;  %v3850_v57 = vld [vmem:[#allocation3 + $0x1d8] sm:$0xff] }
 0x398   : > { %v8667_v16 = vadd.f32 %v2758_v49, %v10308_v52  ;;  %v3057_v50 = vmul.f32 %v8574_v12, %v10027_v18  ;;  %v3058_v7 = vmul.f32 %v8577_v53, %v10028_v31  ;;  %v3059_v23 = vmul.f32 %v8580_v0, %v10029_v8  ;;  %v3595_v53 = vld [vmem:[#allocation2 + $0x1d0] sm:$0xff]  ;;  %v4107_v52 = vld [vmem:[#allocation4 + $0x40] sm:$0xff] }
 0x399   : > { %v2911_v5 = vmin.f32 %v8653_v45, 100.0  ;;  %v2912_v22 = vmin.f32 %v8657_v17, 100.0  ;;  %v2913_v34 = vmin.f32 %v8661_v47, 100.0  ;;  %v3060_v27 = vmul.f32 %v8583_v4, %v10030_v3 }
 0x39a   : > { %v2914_v63 = vmin.f32 %v8667_v16, 100.0  ;;  %v3530_v26 = vadd.f32 %v3057_v50, %v2984_v61  ;;  %vm3210_vm12 = vcmp.lt.f32.partialorder %v10031_v43, %v3141_v38  ;;  %vm3211_vm13 = vcmp.lt.f32.partialorder %v10032_v14, %v3141_v38  ;;  %v4108_v16 = vld [vmem:[#allocation4 + $0x98] sm:$0xff] }
 0x39b   : > { %vm3212_vm14 = vcmp.lt.f32.partialorder %v10033_v56, %v3141_v38  ;;  %v3531_v2 = vadd.f32 %v3058_v7, %v2985_v30  ;;  %v3532_v12 = vadd.f32 %v3059_v23, %v2986_v62  ;;  %v3533_v13 = vadd.f32 %v3060_v27, %v2987_v6 }
 0x39c   : > { %vm3213_vm15 = vcmp.lt.f32.partialorder %v10104_v1, %v3141_v38  ;;  %v3658_v0 = vmul.f32 %v3530_v26, %v1836_v37  ;;  %v5115_v39 = vsel %vm3210_vm12, 1.0, %v9835_v48  ;;  %v5116_v4 = vsel %vm3211_vm13, 1.0, %v9835_v48  ;;  %v4106_v37 = vld [vmem:[#allocation4 + $0x38] sm:$0xff]  ;;  %v4109_v38 = vld [vmem:[#allocation4 + $0x90] sm:$0xff] }
 0x39d   : > { %v5117_v28 = vsel %vm3212_vm14, 1.0, %v9835_v48  ;;  %v3659_v11 = vmul.f32 %v3531_v2, %v1851_v60  ;;  %v3660_v54 = vmul.f32 %v3532_v12, %v1866_v32  ;;  %v3661_v40 = vmul.f32 %v3533_v13, %v1881_v15  ;;  %v10309_v15 = vld [vmem:[#allocation18_spill] sm:$0xff]  ;;  %v3851_v2 = vld [vmem:[#allocation3 + $0x28] sm:$0xff]  ;;  %v10311_v12 = vld [vmem:[#allocation205_spill] sm:$0xff] }
 0x39e   : > { %v5118_v41 = vsel %vm3213_vm15, 1.0, %v9835_v48  ;;  %v3722_v24 = vadd.f32 %v3658_v0, %v3594_v21  ;;  %v3402_v44 = vmul.f32 %v5115_v39, %v2984_v61  ;;  %v3403_v49 = vmul.f32 %v5116_v4, %v2985_v30  ;;  %v3852_v61 = vld [vmem:[#allocation3] sm:$0xff]  ;;  %v10312_v13 = vld [vmem:[#allocation206_spill] sm:$0xff] }
 0x39f   : > { %v3404_v19 = vmul.f32 %v5117_v28, %v2986_v62  ;;  %v3723_v45 = vadd.f32 %v3659_v11, %v3595_v53  ;;  %v3724_v59 = vadd.f32 %v3660_v54, %v3596_v10  ;;  %v3725_v17 = vadd.f32 %v3661_v40, %v3597_v58  ;;  %v10310_v62 = vld [vmem:[#allocation204_spill] sm:$0xff]  ;;  %v10315_v40 = vld [vmem:[#allocation227_spill] sm:$0xff] }
 0x3a0   : > { %v3405_v47 = vmul.f32 %v5118_v41, %v2987_v6  ;;  %3786 = vst [vmem:[#allocation2 + $0x148] sm:$0xff] %v3722_v24  ;;  %v3466_v26 = vadd.f32 %v3402_v44, %v3057_v50  ;;  %v3467_v60 = vadd.f32 %v3403_v49, %v3058_v7  ;;  %vm943_vm0 = vcmp.gt.f32.partialorder %v10309_v15, -4.0  ;;  %v3853_v6 = vld [vmem:[#allocation3 + $0x1c8] sm:$0xff]  ;;  %v10316_v24 = vld [vmem:[#allocation223_spill] sm:$0xff] }
 0x3a1   : > { %v3468_v32 = vadd.f32 %v3404_v19, %v3059_v23  ;;  %3787 = vst [vmem:[#allocation2 + $0x1d0] sm:$0xff] %v3723_v45  ;;  %vm944_vm1 = vcmp.gt.f32.partialorder %v10310_v62, -4.0  ;;  %vm945_vm2 = vcmp.gt.f32.partialorder %v10311_v12, -4.0  ;;  %vm946_vm3 = vcmp.gt.f32.partialorder %v10312_v13, -4.0  ;;  %v10317_v19 = vld [vmem:[#allocation231_spill] sm:$0xff] }
 0x3a2   : > { %v3469_v30 = vadd.f32 %v3405_v47, %v3060_v27  ;;  %3788 = vst [vmem:[#allocation2 + $0x100] sm:$0xff] %v3724_v59  ;;  %v3914_v21 = vmul.f32 %v3466_v26, %v2911_v5  ;;  %v3915_v53 = vmul.f32 %v3467_v60, %v2912_v22  ;;  %v4170_v50 = vadd.f32 %v4106_v37, %v3466_v26  ;;  %v10319_v59 = vld [vmem:[#allocation228_spill] sm:$0xff] }
 0x3a3   : > { %v3916_v10 = vmul.f32 %v3468_v32, %v2913_v34  ;;  %3789 = vst [vmem:[#allocation2 + $0xc8] sm:$0xff] %v3725_v17  ;;  %v4171_v23 = vadd.f32 %v4107_v52, %v3467_v60  ;;  %v4172_v58 = vadd.f32 %v4108_v16, %v3468_v32  ;;  %v8700_v28 = vsel %vm943_vm0, 1.0, %v9835_v48  ;;  %v10323_v60 = vld [vmem:[#allocation233_spill] sm:$0xff] }
 0x3a4   : > { %v3917_v7 = vmul.f32 %v3469_v30, %v2914_v63  ;;  %v4173_v0 = vadd.f32 %v4109_v38, %v3469_v30  ;;  %v3978_v39 = vadd.f32 %v3914_v21, %v3850_v57  ;;  %v3979_v4 = vadd.f32 %v3915_v53, %v3851_v2  ;;  %4234 = vst [vmem:[#allocation4 + $0x38] sm:$0xff] %v4170_v50  ;;  %v10313_v63 = vld [vmem:[#allocation229_spill] sm:$0xff]  ;;  %v10320_v57 = vld [vmem:[#allocation224_spill] sm:$0xff]  ;;  %v10325_v2 = vld [vmem:[#allocation230_spill] sm:$0xff] }
 0x3a5   : > { %v3980_v27 = vadd.f32 %v3916_v10, %v3852_v61  ;;  %4235 = vst [vmem:[#allocation4 + $0x40] sm:$0xff] %v4171_v23  ;;  %v8705_v5 = vsel %vm944_vm1, 1.0, %v9835_v48  ;;  %v8710_v22 = vsel %vm945_vm2, 1.0, %v9835_v48  ;;  %v8715_v34 = vsel %vm946_vm3, 1.0, %v9835_v48  ;;  %v10326_v30 = vld [vmem:[#allocation225_spill] sm:$0xff] }
 0x3a6   : > { %v3981_v11 = vadd.f32 %v3917_v7, %v3853_v6  ;;  %4042 = vst [vmem:[#allocation3 + $0x1d8] sm:$0xff] %v3978_v39  ;;  %v10314_v54 = vsub.f32 1.0, %v10313_v63  ;;  %vm2068_vm4 = vweird.f32 %v10316_v24  ;;  %vm2069_vm5 = vweird.f32 %v10315_v40  ;;  %v10332_v63 = vld [vmem:[#allocation226_spill] sm:$0xff] }
 0x3a7   : > { %v2072_v44 = vand.u32 2147483647, %v10316_v24  ;;  %4043 = vst [vmem:[#allocation3 + $0x28] sm:$0xff] %v3979_v4  ;;  %v2074_v49 = vand.u32 2147483648, %v10316_v24  ;;  %v10318_v45 = vsub.f32 1.0, %v10317_v19  ;;  %vm2083_vm6 = vweird.f32 %v10320_v57  ;;  %vm2070_vm9 = vmor %vm2068_vm4, %vm2069_vm5  ;;  %v10329_v4 = vld [vmem:[#allocation235_spill] sm:$0xff] }
 0x3a8   : > { %v2066_v41 = vmul.f32 %v10315_v40, %v10314_v54  ;;  %vm2084_vm7 = vweird.f32 %v10319_v59  ;;  %4044 = vst [vmem:[#allocation3] sm:$0xff] %v3980_v27  ;;  %v2087_v52 = vand.u32 2147483647, %v10320_v57  ;;  %v2089_v16 = vand.u32 2147483648, %v10320_v57  ;;  %v10331_v27 = vld [vmem:[#allocation232_spill] sm:$0xff] }
 0x3a9   : > { %v2081_v17 = vmul.f32 %v10319_v59, %v10318_v45  ;;  %vm8730_vm8 = vcmp.eq.f32.partialorder %v2072_v44, 8.507059e+37  ;;  %4045 = vst [vmem:[#allocation3 + $0x1c8] sm:$0xff] %v3981_v11  ;;  %v2075_v38 = vor.u32 1.1754944e-38, %v2074_v49  ;;  %v10324_v32 = vsub.f32 1.0, %v10323_v60  ;;  %vm2085_vm11 = vmor %vm2083_vm6, %vm2084_vm7  ;;  %v10333_v49 = vld [vmem:[#allocation234_spill] sm:$0xff]  ;;  %v10334_v45 = vld [vmem:[#allocation236_spill] sm:$0xff] }
 0x3aa   : > { %v2067_v37 = vadd.f32 %v10315_v40, %v2066_v41  ;;  %vm2098_vm10 = vweird.f32 %v10326_v30  ;;  %4236 = vst [vmem:[#allocation4 + $0x98] sm:$0xff] %v4172_v58  ;;  %vm2088_vm12 = vcmp.eq.f32.partialorder %v2087_v52, 8.507059e+37  ;;  %v2090_v21 = vor.u32 1.1754944e-38, %v2089_v16 }
 0x3ab   : > { %v2082_v26 = vadd.f32 %v10319_v59, %v2081_v17  ;;  %v2096_v61 = vmul.f32 %v10325_v2, %v10324_v32  ;;  %vm2099_vm13 = vweird.f32 %v10325_v2  ;;  %4237 = vst [vmem:[#allocation4 + $0x90] sm:$0xff] %v4173_v0  ;;  %v2102_v7 = vand.u32 2147483647, %v10326_v30  ;;  %v10335_v17 = vld [vmem:[#allocation191_spill] sm:$0xff] }
 0x3ac   : > { %v2071_v6 = vsel %vm2070_vm9, %v10315_v40, %v2067_v37  ;;  %vm8754_vm14 = vmor %vm2098_vm10, %vm2099_vm13  ;;  %v2104_v39 = vand.u32 2147483648, %v10326_v30  ;;  %v10330_v0 = vsub.f32 1.0, %v10329_v4  ;;  %vm2113_vm15 = vweird.f32 %v10332_v63 }
 0x3ad   : > { %v8747_v53 = vsel %vm8730_vm8, %v2075_v38, %v2071_v6  ;;  %v2086_v10 = vsel %vm2085_vm11, %v10319_v59, %v2082_v26  ;;  %v2097_v50 = vadd.f32 %v10325_v2, %v2096_v61  ;;  %vm2103_vm0 = vcmp.eq.f32.partialorder %v2102_v7, 8.507059e+37  ;;  %v10336_v38 = vld [vmem:[#allocation193_spill] sm:$0xff] }
 0x3ae   : > { %v8752_v23 = vsel %vm2088_vm12, %v2090_v21, %v2086_v10  ;;  %v2111_v11 = vmul.f32 %v10331_v27, %v10330_v0  ;;  %vm2114_vm1 = vweird.f32 %v10331_v27  ;;  %v2117_v40 = vand.u32 2147483647, %v10332_v63  ;;  %v3161_v10 = vpop.permute.xlu1 %3160 }
 0x3af   : > { %v2101_v54 = vsel %vm8754_vm14, %v10325_v2, %v2097_v50  ;;  %v2105_v41 = vor.u32 1.1754944e-38, %v2104_v39  ;;  %v2119_v44 = vand.u32 2147483648, %v10332_v63  ;;  %v2784_v19 = vmul.f32 0.6931472, %v10333_v49  ;;  %vm2115_vm2 = vmor %vm2113_vm15, %vm2114_vm1  ;;  %v3611_v49 = vld [vmem:[#allocation2 + $0x88] sm:$0xff] }
 0x3b0   : > { %v2112_v24 = vadd.f32 %v10331_v27, %v2111_v11  ;;  %vm2118_vm3 = vcmp.eq.f32.partialorder %v2117_v40, 8.507059e+37  ;;  %v2786_v59 = vmul.f32 0.6931472, %v10334_v45  ;;  %v2788_v57 = vmul.f32 0.6931472, %v10335_v17 }
 0x3b1   : > { %v3000_v37 = vmul.f32 %v8700_v28, %v10018_v29  ;;  %v2106_v47 = vsel %vm2103_vm0, %v2105_v41, %v2101_v54  ;;  %v2120_v16 = vor.u32 1.1754944e-38, %v2119_v44  ;;  %v2790_v26 = vmul.f32 0.6931472, %v10336_v38  ;;  %v3610_v44 = vld [vmem:[#allocation2 + $0xb8] sm:$0xff] }
 0x3b2   : > { %v2116_v52 = vsel %vm2115_vm2, %v10331_v27, %v2112_v24  ;;  %v10337_v60 = vmax.f32 %v10309_v15, 0.0  ;;  %v10338_v2 = vmax.f32 %v10310_v62, 0.0  ;;  %v10339_v30 = vmax.f32 %v10311_v12, 0.0  ;;  %v3867_v38 = vld [vmem:[#allocation3 + $0xb8] sm:$0xff] }
 0x3b3   : > { %v3001_v21 = vmul.f32 %v8705_v5, %v10022_v9  ;;  %v2121_v50 = vsel %vm2118_vm3, %v2120_v16, %v2116_v52  ;;  %v10340_v7 = vmax.f32 %v10312_v13, 0.0  ;;  %v3002_v39 = vmul.f32 %v8710_v22, %v10025_v42  ;;  %v3613_v52 = vld [vmem:[#allocation2 + $0x1c8] sm:$0xff]  ;;  %v3866_v16 = vld [vmem:[#allocation3 + $0x20] sm:$0xff] }
 0x3b4   : > { %v2863_v32 = vadd.f32 %v2784_v19, %v10337_v60  ;;  %v2864_v61 = vadd.f32 %v2786_v59, %v10338_v2  ;;  %v2865_v6 = vadd.f32 %v2788_v57, %v10339_v30  ;;  %v3003_v15 = vmul.f32 %v8715_v34, %v10026_v46  ;;  %v3612_v19 = vld [vmem:[#allocation2 + $0xa8] sm:$0xff]  ;;  %v3869_v30 = vld [vmem:[#allocation3 + $0x90] sm:$0xff] }
 0x3b5   : > { %v2866_v58 = vadd.f32 %v2790_v26, %v10340_v7  ;;  %v3073_v12 = vmul.f32 %v8700_v28, %v10027_v18  ;;  %v3074_v11 = vmul.f32 %v8705_v5, %v10028_v31  ;;  %v3075_v13 = vmul.f32 %v8710_v22, %v10029_v8 }
 0x3b6   : > { %v2927_v4 = vmin.f32 %v2863_v32, 100.0  ;;  %v2928_v62 = vmin.f32 %v2864_v61, 100.0  ;;  %v2929_v0 = vmin.f32 %v2865_v6, 100.0  ;;  %v3076_v63 = vmul.f32 %v8715_v34, %v10030_v3  ;;  %v3868_v61 = vld [vmem:[#allocation3 + $0x120] sm:$0xff]  ;;  %v4122_v6 = vld [vmem:[#allocation4 + $0x178] sm:$0xff] }
 0x3b7   : > { %v2930_v27 = vmin.f32 %v2866_v58, 100.0  ;;  %vm3226_vm4 = vcmp.lt.f32.partialorder %v10031_v43, %v3161_v10  ;;  %vm3227_vm5 = vcmp.lt.f32.partialorder %v10032_v14, %v3161_v10  ;;  %vm3228_vm6 = vcmp.lt.f32.partialorder %v10033_v56, %v3161_v10 }
 0x3b8   : > { %vm3229_vm7 = vcmp.lt.f32.partialorder %v10104_v1, %v3161_v10  ;;  %v5131_v28 = vsel %vm3226_vm4, 1.0, %v9835_v48  ;;  %v5132_v54 = vsel %vm3227_vm5, 1.0, %v9835_v48  ;;  %v5133_v5 = vsel %vm3228_vm6, 1.0, %v9835_v48 }
 0x3b9   : > { %v5134_v40 = vsel %vm3229_vm7, 1.0, %v9835_v48  ;;  %v3418_v22 = vmul.f32 %v5131_v28, %v3000_v37  ;;  %v3419_v41 = vmul.f32 %v5132_v54, %v3001_v21  ;;  %v3420_v24 = vmul.f32 %v5133_v5, %v3002_v39 }
 0x3ba   : > { %v3421_v34 = vmul.f32 %v5134_v40, %v3003_v15  ;;  %v3546_v45 = vadd.f32 %v3073_v12, %v3000_v37  ;;  %v3547_v59 = vadd.f32 %v3074_v11, %v3001_v21  ;;  %v3548_v17 = vadd.f32 %v3075_v13, %v3002_v39  ;;  %v4123_v37 = vld [vmem:[#allocation4 + $0x58] sm:$0xff]  ;;  %v4124_v21 = vld [vmem:[#allocation4 + $0x8] sm:$0xff]  ;;  %v4125_v39 = vld [vmem:[#allocation4 + $0x1c0] sm:$0xff] }
 0x3bb   : > { %v3549_v57 = vadd.f32 %v3076_v63, %v3003_v15  ;;  %v3482_v26 = vadd.f32 %v3418_v22, %v3073_v12  ;;  %v3483_v60 = vadd.f32 %v3419_v41, %v3074_v11  ;;  %v3484_v32 = vadd.f32 %v3420_v24, %v3075_v13 }
 0x3bc   : > { %v3485_v2 = vadd.f32 %v3421_v34, %v3076_v63  ;;  %v3674_v10 = vmul.f32 %v3546_v45, %v8747_v53  ;;  %v3675_v7 = vmul.f32 %v3547_v59, %v8752_v23  ;;  %v3676_v58 = vmul.f32 %v3548_v17, %v2106_v47  ;;  %v10341_v45 = vld [vmem:[#allocation45_spill] sm:$0xff]  ;;  %v10345_v59 = vld [vmem:[#allocation76_spill] sm:$0xff] }
 0x3bd   : > { %v3677_v28 = vmul.f32 %v3549_v57, %v2121_v50  ;;  %v3930_v15 = vmul.f32 %v3482_v26, %v2927_v4  ;;  %v3931_v54 = vmul.f32 %v3483_v60, %v2928_v62  ;;  %v3932_v5 = vmul.f32 %v3484_v32, %v2929_v0  ;;  %v10342_v4 = vld [vmem:[#allocation49_spill] sm:$0xff]  ;;  %v10343_v62 = vld [vmem:[#allocation51_spill] sm:$0xff]  ;;  %v10344_v0 = vld [vmem:[#allocation52_spill] sm:$0xff] }
 0x3be   : > { %v3933_v40 = vmul.f32 %v3485_v2, %v2930_v27  ;;  %v3738_v12 = vadd.f32 %v3674_v10, %v3610_v44  ;;  %v3739_v11 = vadd.f32 %v3675_v7, %v3611_v49  ;;  %v3740_v13 = vadd.f32 %v3676_v58, %v3612_v19  ;;  %v10347_v57 = vld [vmem:[#allocation74_spill] sm:$0xff] }
 0x3bf   : > { %v3741_v63 = vadd.f32 %v3677_v28, %v3613_v52  ;;  %v3994_v22 = vadd.f32 %v3930_v15, %v3866_v16  ;;  %v3995_v41 = vadd.f32 %v3931_v54, %v3867_v38  ;;  %v3996_v24 = vadd.f32 %v3932_v5, %v3868_v61  ;;  %v10348_v16 = vld [vmem:[#allocation60_spill] sm:$0xff]  ;;  %v10357_v15 = vld [vmem:[#allocation79_spill] sm:$0xff] }
 0x3c0   : > { %v3997_v34 = vadd.f32 %v3933_v40, %v3869_v30  ;;  %3802 = vst [vmem:[#allocation2 + $0xb8] sm:$0xff] %v3738_v12  ;;  %v4186_v53 = vadd.f32 %v4122_v6, %v3482_v26  ;;  %v4187_v23 = vadd.f32 %v4123_v37, %v3483_v60  ;;  %v4188_v47 = vadd.f32 %v4124_v21, %v3484_v32  ;;  %v10349_v60 = vld [vmem:[#allocation78_spill] sm:$0xff]  ;;  %v10352_v30 = vld [vmem:[#allocation65_spill] sm:$0xff]  ;;  %v10358_v5 = vld [vmem:[#allocation71_spill] sm:$0xff] }
 0x3c1   : > { %v4189_v50 = vadd.f32 %v4125_v39, %v3485_v2  ;;  %3803 = vst [vmem:[#allocation2 + $0x88] sm:$0xff] %v3739_v11  ;;  %vm939_vm8 = vcmp.gt.f32.partialorder %v10341_v45, -4.0  ;;  %vm940_vm9 = vcmp.gt.f32.partialorder %v10342_v4, -4.0  ;;  %vm941_vm10 = vcmp.gt.f32.partialorder %v10343_v62, -4.0  ;;  %v10351_v2 = vld [vmem:[#allocation77_spill] sm:$0xff]  ;;  %v10355_v21 = vld [vmem:[#allocation82_spill] sm:$0xff] }
 0x3c2   : > { %vm942_vm11 = vcmp.gt.f32.partialorder %v10344_v0, -4.0  ;;  %3804 = vst [vmem:[#allocation2 + $0xa8] sm:$0xff] %v3740_v13  ;;  %v8814_v27 = vsel %vm939_vm8, 1.0, %v9835_v48  ;;  %v8817_v44 = vsel %vm940_vm9, 1.0, %v9835_v48  ;;  %v8820_v49 = vsel %vm941_vm10, 1.0, %v9835_v48 }
 0x3c3   : > { %v8823_v19 = vsel %vm942_vm11, 1.0, %v9835_v48  ;;  %3805 = vst [vmem:[#allocation2 + $0x1c8] sm:$0xff] %v3741_v63  ;;  %v10346_v17 = vsub.f32 1.0, %v10345_v59  ;;  %vm2008_vm12 = vweird.f32 %v10348_v16  ;;  %vm2009_vm13 = vweird.f32 %v10347_v57  ;;  %v10361_v59 = vld [vmem:[#allocation84_spill] sm:$0xff] }
 0x3c4   : > { %v2012_v38 = vand.u32 2147483647, %v10348_v16  ;;  %4058 = vst [vmem:[#allocation3 + $0x20] sm:$0xff] %v3994_v22  ;;  %v2014_v26 = vand.u32 2147483648, %v10348_v16  ;;  %v10350_v32 = vsub.f32 1.0, %v10349_v60  ;;  %vm2023_vm14 = vweird.f32 %v10352_v30  ;;  %vm2010_vm1 = vmor %vm2008_vm12, %vm2009_vm13 }
 0x3c5   : > { %v2006_v52 = vmul.f32 %v10347_v57, %v10346_v17  ;;  %vm2024_vm15 = vweird.f32 %v10351_v2  ;;  %4059 = vst [vmem:[#allocation3 + $0xb8] sm:$0xff] %v3995_v41  ;;  %v2027_v7 = vand.u32 2147483647, %v10352_v30  ;;  %v2029_v58 = vand.u32 2147483648, %v10352_v30  ;;  %v10367_v30 = vld [vmem:[#allocation90_spill] sm:$0xff] }
 0x3c6   : > { %v2021_v61 = vmul.f32 %v10351_v2, %v10350_v32  ;;  %vm8838_vm0 = vcmp.eq.f32.partialorder %v2012_v38, 8.507059e+37  ;;  %4060 = vst [vmem:[#allocation3 + $0x120] sm:$0xff] %v3996_v24  ;;  %v2015_v28 = vor.u32 1.1754944e-38, %v2014_v26  ;;  %v10356_v39 = vsub.f32 1.0, %v10355_v21  ;;  %vm2025_vm3 = vmor %vm2023_vm14, %vm2024_vm15  ;;  %v10365_v32 = vld [vmem:[#allocation83_spill] sm:$0xff]  ;;  %v3156_v24 = vpop.permute.xlu0 %3155 }
 0x3c7   : > { %v2007_v6 = vadd.f32 %v10347_v57, %v2006_v52  ;;  %vm2038_vm2 = vweird.f32 %v10358_v5  ;;  %4061 = vst [vmem:[#allocation3 + $0x90] sm:$0xff] %v3997_v34  ;;  %vm2028_vm4 = vcmp.eq.f32.partialorder %v2027_v7, 8.507059e+37  ;;  %v2030_v12 = vor.u32 1.1754944e-38, %v2029_v58  ;;  %v10364_v52 = vld [vmem:[#allocation75_spill] sm:$0xff] }
 0x3c8   : > { %v2022_v37 = vadd.f32 %v10351_v2, %v2021_v61  ;;  %v2036_v54 = vmul.f32 %v10357_v15, %v10356_v39  ;;  %vm2039_vm5 = vweird.f32 %v10357_v15  ;;  %4250 = vst [vmem:[#allocation4 + $0x178] sm:$0xff] %v4186_v53  ;;  %v2042_v22 = vand.u32 2147483647, %v10358_v5  ;;  %v10363_v53 = vld [vmem:[#allocation80_spill] sm:$0xff] }
 0x3c9   : > { %v2011_v40 = vsel %vm2010_vm1, %v10347_v57, %v2007_v6  ;;  %4251 = vst [vmem:[#allocation4 + $0x58] sm:$0xff] %v4187_v23  ;;  %vm8858_vm6 = vmor %vm2038_vm2, %vm2039_vm5  ;;  %v2044_v34 = vand.u32 2147483648, %v10358_v5  ;;  %v10362_v17 = vsub.f32 1.0, %v10361_v59  ;;  %vm2053_vm7 = vweird.f32 %v10364_v52 }
 0x3ca   : > { %v2016_v11 = vsel %vm8838_vm0, %v2015_v28, %v2011_v40  ;;  %v2026_v13 = vsel %vm2025_vm3, %v10351_v2, %v2022_v37  ;;  %v2037_v63 = vadd.f32 %v10357_v15, %v2036_v54  ;;  %4252 = vst [vmem:[#allocation4 + $0x8] sm:$0xff] %v4188_v47  ;;  %vm2043_vm8 = vcmp.eq.f32.partialorder %v2042_v22, 8.507059e+37  ;;  %v10366_v47 = vld [vmem:[#allocation87_spill] sm:$0xff]  ;;  %v10368_v28 = vld [vmem:[#allocation93_spill] sm:$0xff] }
 0x3cb   : > { %v2031_v41 = vsel %vm2028_vm4, %v2030_v12, %v2026_v13  ;;  %v2051_v57 = vmul.f32 %v10363_v53, %v10362_v17  ;;  %vm2054_vm9 = vweird.f32 %v10363_v53  ;;  %v2057_v23 = vand.u32 2147483647, %v10364_v52  ;;  %4253 = vst [vmem:[#allocation4 + $0x1c0] sm:$0xff] %v4189_v50 }
 0x3cc   : > { %v2041_v16 = vsel %vm8858_vm6, %v10357_v15, %v2037_v63  ;;  %v2045_v38 = vor.u32 1.1754944e-38, %v2044_v34  ;;  %v2059_v60 = vand.u32 2147483648, %v10364_v52  ;;  %v2776_v2 = vmul.f32 0.6931472, %v10365_v32  ;;  %vm2055_vm10 = vmor %vm2053_vm7, %vm2054_vm9  ;;  %v3609_v32 = vld [vmem:[#allocation2 + $0xd0] sm:$0xff] }
 0x3cd   : > { %v2052_v26 = vadd.f32 %v10363_v53, %v2051_v57  ;;  %vm2058_vm11 = vcmp.eq.f32.partialorder %v2057_v23, 8.507059e+37  ;;  %v2778_v61 = vmul.f32 0.6931472, %v10366_v47  ;;  %v2780_v6 = vmul.f32 0.6931472, %v10367_v30 }
 0x3ce   : > { %v2996_v10 = vmul.f32 %v8814_v27, %v10018_v29  ;;  %v2046_v7 = vsel %vm2043_vm8, %v2045_v38, %v2041_v16  ;;  %v2060_v50 = vor.u32 1.1754944e-38, %v2059_v60  ;;  %v2782_v37 = vmul.f32 0.6931472, %v10368_v28  ;;  %v3608_v60 = vld [vmem:[#allocation2 + $0x1d8] sm:$0xff] }
 0x3cf   : > { %v2056_v58 = vsel %vm2055_vm10, %v10363_v53, %v2052_v26  ;;  %v10369_v21 = vmax.f32 %v10341_v45, 0.0  ;;  %v10370_v15 = vmax.f32 %v10342_v4, 0.0  ;;  %v10371_v5 = vmax.f32 %v10343_v62, 0.0  ;;  %v3606_v26 = vld [vmem:[#allocation2 + $0x70] sm:$0xff] }
 0x3d0   : > { %v2997_v12 = vmul.f32 %v8817_v44, %v10022_v9  ;;  %v2061_v13 = vsel %vm2058_vm11, %v2060_v50, %v2056_v58  ;;  %v10372_v63 = vmax.f32 %v10344_v0, 0.0  ;;  %v2998_v45 = vmul.f32 %v8820_v49, %v10025_v42 }
 0x3d1   : > { %v8883_v39 = vadd.f32 %v2776_v2, %v10369_v21  ;;  %v8887_v54 = vadd.f32 %v2778_v61, %v10370_v15  ;;  %v8891_v40 = vadd.f32 %v2780_v6, %v10371_v5  ;;  %v2999_v4 = vmul.f32 %v8823_v19, %v10026_v46  ;;  %v3862_v5 = vld [vmem:[#allocation3 + $0x178] sm:$0xff] }
 0x3d2   : > { %v8897_v22 = vadd.f32 %v2782_v37, %v10372_v63  ;;  %v3069_v17 = vmul.f32 %v8814_v27, %v10027_v18  ;;  %v3070_v53 = vmul.f32 %v8817_v44, %v10028_v31  ;;  %v3071_v57 = vmul.f32 %v8820_v49, %v10029_v8  ;;  %v3607_v44 = vld [vmem:[#allocation2 + $0x90] sm:$0xff]  ;;  %v4119_v63 = vld [vmem:[#allocation4 + $0xa0] sm:$0xff] }
 0x3d3   : > { %v2923_v34 = vmin.f32 %v8883_v39, 100.0  ;;  %v2924_v62 = vmin.f32 %v8887_v54, 100.0  ;;  %v2925_v59 = vmin.f32 %v8891_v40, 100.0  ;;  %v3072_v52 = vmul.f32 %v8823_v19, %v10030_v3 }
 0x3d4   : > { %v2926_v0 = vmin.f32 %v8897_v22, 100.0  ;;  %v3542_v16 = vadd.f32 %v3069_v17, %v2996_v10  ;;  %vm3222_vm12 = vcmp.lt.f32.partialorder %v10031_v43, %v3156_v24  ;;  %vm3223_vm13 = vcmp.lt.f32.partialorder %v10032_v14, %v3156_v24  ;;  %v4120_v22 = vld [vmem:[#allocation4 + $0x118] sm:$0xff] }
 0x3d5   : > { %vm3224_vm14 = vcmp.lt.f32.partialorder %v10033_v56, %v3156_v24  ;;  %v3543_v23 = vadd.f32 %v3070_v53, %v2997_v12  ;;  %v3544_v27 = vadd.f32 %v3071_v57, %v2998_v45  ;;  %v3545_v38 = vadd.f32 %v3072_v52, %v2999_v4 }
 0x3d6   : > { %vm3225_vm15 = vcmp.lt.f32.partialorder %v10104_v1, %v3156_v24  ;;  %v3670_v49 = vmul.f32 %v3542_v16, %v2016_v11  ;;  %v5127_v2 = vsel %vm3222_vm12, 1.0, %v9835_v48  ;;  %v5128_v19 = vsel %vm3223_vm13, 1.0, %v9835_v48  ;;  %v4118_v11 = vld [vmem:[#allocation4 + $0x110] sm:$0xff]  ;;  %v4121_v24 = vld [vmem:[#allocation4 + $0x198] sm:$0xff] }
 0x3d7   : > { %v5129_v47 = vsel %vm3224_vm14, 1.0, %v9835_v48  ;;  %v3671_v61 = vmul.f32 %v3543_v23, %v2031_v41  ;;  %v3672_v30 = vmul.f32 %v3544_v27, %v2046_v7  ;;  %v3673_v6 = vmul.f32 %v3545_v38, %v2061_v13  ;;  %v3863_v13 = vld [vmem:[#allocation3 + $0x180] sm:$0xff] }
 0x3d8   : > { %v5130_v58 = vsel %vm3225_vm15, 1.0, %v9835_v48  ;;  %v3734_v50 = vadd.f32 %v3670_v49, %v3606_v26  ;;  %v3414_v28 = vmul.f32 %v5127_v2, %v2996_v10  ;;  %v3415_v37 = vmul.f32 %v5128_v19, %v2997_v12  ;;  %v3864_v10 = vld [vmem:[#allocation3 + $0xb0] sm:$0xff] }
 0x3d9   : > { %v3416_v21 = vmul.f32 %v5129_v47, %v2998_v45  ;;  %v3735_v39 = vadd.f32 %v3671_v61, %v3607_v44  ;;  %v3736_v15 = vadd.f32 %v3672_v30, %v3608_v60  ;;  %v3737_v54 = vadd.f32 %v3673_v6, %v3609_v32  ;;  %v3865_v45 = vld [vmem:[#allocation3 + $0x110] sm:$0xff]  ;;  %v10374_v30 = vld [vmem:[#allocation194_spill] sm:$0xff]  ;;  %v10375_v6 = vld [vmem:[#allocation167_spill] sm:$0xff] }
 0x3da   : > { %v3417_v40 = vmul.f32 %v5130_v58, %v2999_v4  ;;  %3798 = vst [vmem:[#allocation2 + $0x70] sm:$0xff] %v3734_v50  ;;  %v3478_v16 = vadd.f32 %v3414_v28, %v3069_v17  ;;  %v3479_v41 = vadd.f32 %v3415_v37, %v3070_v53  ;;  %vm955_vm0 = vcmp.gt.f32.partialorder %v7784_v33, -4.0  ;;  %v10373_v47 = vld [vmem:[#allocation169_spill] sm:$0xff] }
 0x3db   : > { %v3480_v7 = vadd.f32 %v3416_v21, %v3071_v57  ;;  %3799 = vst [vmem:[#allocation2 + $0x90] sm:$0xff] %v3735_v39  ;;  %vm956_vm1 = vcmp.gt.f32.partialorder %v7786_v20, -4.0  ;;  %vm957_vm2 = vcmp.gt.f32.partialorder %v7788_v35, -4.0  ;;  %vm958_vm3 = vcmp.gt.f32.partialorder %v7790_v36, -4.0  ;;  %v10378_v39 = vld [vmem:[#allocation171_spill] sm:$0xff] }
 0x3dc   : > { %v3481_v12 = vadd.f32 %v3417_v40, %v3072_v52  ;;  %3800 = vst [vmem:[#allocation2 + $0x1d8] sm:$0xff] %v3736_v15  ;;  %v3926_v4 = vmul.f32 %v3478_v16, %v2923_v34  ;;  %v3927_v23 = vmul.f32 %v3479_v41, %v2924_v62  ;;  %v4182_v17 = vadd.f32 %v4118_v11, %v3478_v16 }
 0x3dd   : > { %v3928_v27 = vmul.f32 %v3480_v7, %v2925_v59  ;;  %3801 = vst [vmem:[#allocation2 + $0xd0] sm:$0xff] %v3737_v54  ;;  %v4183_v57 = vadd.f32 %v4119_v63, %v3479_v41  ;;  %v4184_v38 = vadd.f32 %v4120_v22, %v3480_v7  ;;  %v8930_v32 = vsel %vm955_vm0, 1.0, %v9835_v48  ;;  %v10379_v54 = vld [vmem:[#allocation198_spill] sm:$0xff]  ;;  %v10382_v63 = vld [vmem:[#allocation168_spill] sm:$0xff] }
 0x3de   : > { %v3929_v53 = vmul.f32 %v3481_v12, %v2926_v0  ;;  %v4185_v26 = vadd.f32 %v4121_v24, %v3481_v12  ;;  %v3990_v44 = vadd.f32 %v3926_v4, %v3862_v5  ;;  %v3991_v60 = vadd.f32 %v3927_v23, %v3863_v13  ;;  %4246 = vst [vmem:[#allocation4 + $0x110] sm:$0xff] %v4182_v17  ;;  %v10383_v13 = vld [vmem:[#allocation172_spill] sm:$0xff]  ;;  %v10384_v12 = vld [vmem:[#allocation162_spill] sm:$0xff] }
 0x3df   : > { %v3992_v52 = vadd.f32 %v3928_v27, %v3864_v10  ;;  %4247 = vst [vmem:[#allocation4 + $0xa0] sm:$0xff] %v4183_v57  ;;  %v8935_v34 = vsel %vm956_vm1, 1.0, %v9835_v48  ;;  %v8940_v62 = vsel %vm957_vm2, 1.0, %v9835_v48  ;;  %v8945_v59 = vsel %vm958_vm3, 1.0, %v9835_v48 }
 0x3e0   : > { %v3993_v49 = vadd.f32 %v3929_v53, %v3865_v45  ;;  %4054 = vst [vmem:[#allocation3 + $0x178] sm:$0xff] %v3990_v44  ;;  %v2245_v0 = vsub.f32 1.0, %v7901_v51  ;;  %vm2248_vm4 = vweird.f32 %v7833_v25  ;;  %vm2249_vm5 = vweird.f32 %v7891_v55 }
 0x3e1   : > { %v2252_v2 = vand.u32 2147483647, %v7833_v25  ;;  %4055 = vst [vmem:[#allocation3 + $0x180] sm:$0xff] %v3991_v60  ;;  %v2254_v19 = vand.u32 2147483648, %v7833_v25  ;;  %v2260_v61 = vsub.f32 1.0, %v10373_v47  ;;  %vm2263_vm6 = vweird.f32 %v10374_v30  ;;  %vm2250_vm12 = vmor %vm2248_vm4, %vm2249_vm5  ;;  %v10385_v25 = vld [vmem:[#allocation170_spill] sm:$0xff] }
 0x3e2   : > { %vm2264_vm7 = vweird.f32 %v10375_v6  ;;  %4056 = vst [vmem:[#allocation3 + $0xb0] sm:$0xff] %v3992_v52  ;;  %v2246_v58 = vmul.f32 %v7891_v55, %v2245_v0  ;;  %v2267_v50 = vand.u32 2147483647, %v10374_v30  ;;  %v2269_v28 = vand.u32 2147483648, %v10374_v30  ;;  %v3176_v0 = vpop.permute.xlu1 %3175 }
 0x3e3   : > { %vm8956_vm8 = vcmp.eq.f32.partialorder %v2252_v2, 8.507059e+37  ;;  %4057 = vst [vmem:[#allocation3 + $0x110] sm:$0xff] %v3993_v49  ;;  %v2255_v37 = vor.u32 1.1754944e-38, %v2254_v19  ;;  %v2261_v21 = vmul.f32 %v10375_v6, %v2260_v61  ;;  %v2275_v15 = vsub.f32 1.0, %v10378_v39  ;;  %vm2265_vm13 = vmor %vm2263_vm6, %vm2264_vm7  ;;  %v10387_v49 = vld [vmem:[#allocation165_spill] sm:$0xff]  ;;  %v10388_v19 = vld [vmem:[#allocation166_spill] sm:$0xff] }
 0x3e4   : > { %vm2278_vm9 = vweird.f32 %v10379_v54  ;;  %4248 = vst [vmem:[#allocation4 + $0x118] sm:$0xff] %v4184_v38  ;;  %v2247_v5 = vadd.f32 %v7891_v55, %v2246_v58  ;;  %vm8966_vm10 = vcmp.eq.f32.partialorder %v2267_v50, 8.507059e+37  ;;  %v2270_v40 = vor.u32 1.1754944e-38, %v2269_v28 }
 0x3e5   : > { %vm2279_vm11 = vweird.f32 %v10382_v63  ;;  %4249 = vst [vmem:[#allocation4 + $0x198] sm:$0xff] %v4185_v26  ;;  %v2262_v22 = vadd.f32 %v10375_v6, %v2261_v21  ;;  %v2276_v24 = vmul.f32 %v10382_v63, %v2275_v15  ;;  %v2282_v16 = vand.u32 2147483647, %v10379_v54  ;;  %v10386_v26 = vld [vmem:[#allocation164_spill] sm:$0xff] }
 0x3e6   : > { %v2284_v41 = vand.u32 2147483648, %v10379_v54  ;;  %v2251_v7 = vsel %vm2250_vm12, %v7891_v55, %v2247_v5  ;;  %v2290_v10 = vsub.f32 1.0, %v10383_v13  ;;  %vm2293_vm14 = vweird.f32 %v10384_v12  ;;  %vm2280_vm1 = vmor %vm2278_vm9, %vm2279_vm11 }
 0x3e7   : > { %vm2294_vm15 = vweird.f32 %v10385_v25  ;;  %v8989_v45 = vsel %vm8956_vm8, %v2255_v37, %v2251_v7  ;;  %v2266_v4 = vsel %vm2265_vm13, %v10375_v6, %v2262_v22  ;;  %v2277_v23 = vadd.f32 %v10382_v63, %v2276_v24  ;;  %v10389_v6 = vld [vmem:[#allocation173_spill] sm:$0xff] }
 0x3e8   : > { %vm2283_vm0 = vcmp.eq.f32.partialorder %v2282_v16, 8.507059e+37  ;;  %v8995_v55 = vsel %vm8966_vm10, %v2270_v40, %v2266_v4  ;;  %v2285_v27 = vor.u32 1.1754944e-38, %v2284_v41  ;;  %v2291_v17 = vmul.f32 %v10385_v25, %v2290_v10  ;;  %vm2295_vm3 = vmor %vm2293_vm14, %vm2294_vm15 }
 0x3e9   : > { %v2297_v53 = vand.u32 2147483647, %v10384_v12  ;;  %v2281_v57 = vsel %vm2280_vm1, %v10382_v63, %v2277_v23  ;;  %v2299_v38 = vand.u32 2147483648, %v10384_v12  ;;  %5692 = vlog2.f32 %v10386_v26  ;;  %v3623_v26 = vld [vmem:[#allocation2 + $0x10] sm:$0xff] }
 0x3ea   : > { %v3012_v44 = vmul.f32 %v8930_v32, %v10018_v29  ;;  %v9008_v60 = vsel %vm2283_vm0, %v2285_v27, %v2281_v57  ;;  %v2292_v52 = vadd.f32 %v10385_v25, %v2291_v17  ;;  %5694 = vlog2.f32 %v10387_v49 }
 0x3eb   : > { %vm2298_vm2 = vcmp.eq.f32.partialorder %v2297_v53, 8.507059e+37  ;;  %v2300_v2 = vor.u32 1.1754944e-38, %v2299_v38  ;;  %5696 = vlog2.f32 %v10388_v19  ;;  %v3013_v47 = vmul.f32 %v8935_v34, %v10022_v9  ;;  %v3622_v38 = vld [vmem:[#allocation2 + $0x158] sm:$0xff] }
 0x3ec   : > { %v3014_v61 = vmul.f32 %v8940_v62, %v10025_v42  ;;  %v2296_v30 = vsel %vm2295_vm3, %v10385_v25, %v2292_v52  ;;  %5698 = vlog2.f32 %v10389_v6  ;;  %v3015_v58 = vmul.f32 %v8945_v59, %v10026_v46  ;;  %v3624_v19 = vld [vmem:[#allocation2 + $0x58] sm:$0xff] }
 0x3ed   : > { %v3085_v51 = vmul.f32 %v8930_v32, %v10027_v18  ;;  %v2301_v50 = vsel %vm2298_vm2, %v2300_v2, %v2296_v30  ;;  %v3086_v28 = vmul.f32 %v8935_v34, %v10028_v31  ;;  %v3087_v37 = vmul.f32 %v8940_v62, %v10029_v8 }
 0x3ee   : > { %v3088_v21 = vmul.f32 %v8945_v59, %v10030_v3  ;;  %vm3238_vm4 = vcmp.lt.f32.partialorder %v10031_v43, %v3176_v0  ;;  %vm3239_vm5 = vcmp.lt.f32.partialorder %v10032_v14, %v3176_v0  ;;  %vm3240_vm6 = vcmp.lt.f32.partialorder %v10033_v56, %v3176_v0 }
 0x3ef   : > { %vm3241_vm7 = vcmp.lt.f32.partialorder %v10104_v1, %v3176_v0  ;;  %v5693_v39 = vpop.eup %5692  ;;  %v5143_v32 = vsel %vm3238_vm4, 1.0, %v9835_v48  ;;  %v5144_v15 = vsel %vm3239_vm5, 1.0, %v9835_v48  ;;  %v5145_v34 = vsel %vm3240_vm6, 1.0, %v9835_v48 }
 0x3f0   : > { %v5146_v62 = vsel %vm3241_vm7, 1.0, %v9835_v48  ;;  %v5695_v54 = vpop.eup %5694  ;;  %v2808_v5 = vmul.f32 0.6931472, %v5693_v39  ;;  %v3430_v59 = vmul.f32 %v5143_v32, %v3012_v44  ;;  %v3431_v11 = vmul.f32 %v5144_v15, %v3013_v47  ;;  %v3879_v39 = vld [vmem:[#allocation3 + $0x170] sm:$0xff]  ;;  %v4134_v32 = vld [vmem:[#allocation4 + $0x1a0] sm:$0xff] }
 0x3f1   : > { %v3432_v40 = vmul.f32 %v5145_v34, %v3014_v61  ;;  %v5697_v63 = vpop.eup %5696  ;;  %v2810_v22 = vmul.f32 0.6931472, %v5695_v54  ;;  %v3433_v24 = vmul.f32 %v5146_v62, %v3015_v58  ;;  %v3558_v16 = vadd.f32 %v3085_v51, %v3012_v44  ;;  %v4135_v15 = vld [vmem:[#allocation4 + $0xb0] sm:$0xff] }
 0x3f2   : > { %v3559_v41 = vadd.f32 %v3086_v28, %v3013_v47  ;;  %v5699_v7 = vpop.eup %5698  ;;  %v2812_v13 = vmul.f32 0.6931472, %v5697_v63  ;;  %v10390_v10 = vmax.f32 %v7784_v33, 0.0  ;;  %v3494_v25 = vadd.f32 %v3430_v59, %v3085_v51  ;;  %v3625_v47 = vld [vmem:[#allocation2 + $0xa0] sm:$0xff]  ;;  %v3878_v33 = vld [vmem:[#allocation3 + $0x1f8] sm:$0xff] }
 0x3f3   : > { %v3495_v4 = vadd.f32 %v3431_v11, %v3086_v28  ;;  %v2814_v23 = vmul.f32 0.6931472, %v5699_v7  ;;  %v10391_v27 = vmax.f32 %v7786_v20, 0.0  ;;  %v3496_v53 = vadd.f32 %v3432_v40, %v3087_v37  ;;  %v3881_v11 = vld [vmem:[#allocation3 + $0x118] sm:$0xff] }
 0x3f4   : > { %v2875_v12 = vadd.f32 %v2808_v5, %v10390_v10  ;;  %v3497_v57 = vadd.f32 %v3433_v24, %v3088_v21  ;;  %v10392_v52 = vmax.f32 %v7788_v35, 0.0  ;;  %v3560_v0 = vadd.f32 %v3087_v37, %v3014_v61  ;;  %v4136_v37 = vld [vmem:[#allocation4 + $0x48] sm:$0xff] }
 0x3f5   : > { %v2876_v17 = vadd.f32 %v2810_v22, %v10391_v27  ;;  %v3561_v2 = vadd.f32 %v3088_v21, %v3015_v58  ;;  %v10393_v30 = vmax.f32 %v7790_v36, 0.0  ;;  %v3686_v20 = vmul.f32 %v3558_v16, %v8989_v45  ;;  %v3880_v58 = vld [vmem:[#allocation3 + $0x1d0] sm:$0xff]  ;;  %v4137_v21 = vld [vmem:[#allocation4 + $0x128] sm:$0xff] }
 0x3f6   : > { %v2877_v49 = vadd.f32 %v2812_v13, %v10392_v52  ;;  %v2939_v44 = vmin.f32 %v2875_v12, 100.0  ;;  %v3687_v28 = vmul.f32 %v3559_v41, %v8995_v55  ;;  %v3688_v35 = vmul.f32 %v3560_v0, %v9008_v60  ;;  %v10394_v13 = vld [vmem:[#allocation106_spill] sm:$0xff]  ;;  %v10395_v12 = vld [vmem:[#allocation109_spill] sm:$0xff]  ;;  %v10400_v52 = vld [vmem:[#allocation135_spill] sm:$0xff] }
 0x3f7   : > { %v2878_v6 = vadd.f32 %v2814_v23, %v10393_v30  ;;  %v2940_v51 = vmin.f32 %v2876_v17, 100.0  ;;  %v3689_v62 = vmul.f32 %v3561_v2, %v2301_v50  ;;  %v3750_v5 = vadd.f32 %v3686_v20, %v3622_v38  ;;  %v10396_v23 = vld [vmem:[#allocation110_spill] sm:$0xff]  ;;  %v10397_v27 = vld [vmem:[#allocation113_spill] sm:$0xff] }
 0x3f8   : > { %v2941_v34 = vmin.f32 %v2877_v49, 100.0  ;;  %v3942_v61 = vmul.f32 %v3494_v25, %v2939_v44  ;;  %v3751_v36 = vadd.f32 %v3687_v28, %v3623_v26  ;;  %v3752_v40 = vadd.f32 %v3688_v35, %v3624_v19  ;;  %v10399_v26 = vld [vmem:[#allocation123_spill] sm:$0xff]  ;;  %v10401_v0 = vld [vmem:[#allocation142_spill] sm:$0xff] }
 0x3f9   : > { %v2942_v54 = vmin.f32 %v2878_v6, 100.0  ;;  %v3943_v59 = vmul.f32 %v3495_v4, %v2940_v51  ;;  %v3753_v45 = vadd.f32 %v3689_v62, %v3625_v47  ;;  %3814 = vst [vmem:[#allocation2 + $0x158] sm:$0xff] %v3750_v5  ;;  %v4198_v16 = vadd.f32 %v4134_v32, %v3494_v25  ;;  %v10402_v19 = vld [vmem:[#allocation126_spill] sm:$0xff]  ;;  %v10403_v47 = vld [vmem:[#allocation136_spill] sm:$0xff] }
 0x3fa   : > { %v3944_v63 = vmul.f32 %v3496_v53, %v2941_v34  ;;  %v4006_v55 = vadd.f32 %v3942_v61, %v3878_v33  ;;  %v4199_v41 = vadd.f32 %v4135_v15, %v3495_v4  ;;  %3815 = vst [vmem:[#allocation2 + $0x10] sm:$0xff] %v3751_v36  ;;  %v4200_v50 = vadd.f32 %v4136_v37, %v3496_v53  ;;  %v10407_v15 = vld [vmem:[#allocation129_spill] sm:$0xff] }
 0x3fb   : > { %v3945_v22 = vmul.f32 %v3497_v57, %v2942_v54  ;;  %v4007_v24 = vadd.f32 %v3943_v59, %v3879_v39  ;;  %v4201_v7 = vadd.f32 %v4137_v21, %v3497_v57  ;;  %vm951_vm8 = vcmp.gt.f32.partialorder %v10394_v13, -4.0  ;;  %3816 = vst [vmem:[#allocation2 + $0x58] sm:$0xff] %v3752_v40  ;;  %v10398_v57 = vld [vmem:[#allocation140_spill] sm:$0xff]  ;;  %v10406_v39 = vld [vmem:[#allocation143_spill] sm:$0xff]  ;;  %v10410_v61 = vld [vmem:[#allocation137_spill] sm:$0xff] }
 0x3fc   : > { %v4008_v60 = vadd.f32 %v3944_v63, %v3880_v58  ;;  %vm952_vm9 = vcmp.gt.f32.partialorder %v10395_v12, -4.0  ;;  %vm953_vm10 = vcmp.gt.f32.partialorder %v10396_v23, -4.0  ;;  %vm954_vm11 = vcmp.gt.f32.partialorder %v10397_v27, -4.0  ;;  %3817 = vst [vmem:[#allocation2 + $0xa0] sm:$0xff] %v3753_v45  ;;  %v10411_v36 = vld [vmem:[#allocation145_spill] sm:$0xff]  ;;  %v10413_v40 = vld [vmem:[#allocation139_spill] sm:$0xff] }
 0x3fd   : > { %v4009_v10 = vadd.f32 %v3945_v22, %v3881_v11  ;;  %v9057_v17 = vsel %vm951_vm8, 1.0, %v9835_v48  ;;  %v9060_v25 = vsel %vm952_vm9, 1.0, %v9835_v48  ;;  %v9063_v4 = vsel %vm953_vm10, 1.0, %v9835_v48  ;;  %4070 = vst [vmem:[#allocation3 + $0x1f8] sm:$0xff] %v4006_v55  ;;  %v10412_v11 = vld [vmem:[#allocation133_spill] sm:$0xff] }
 0x3fe   : > { %v9066_v53 = vsel %vm954_vm11, 1.0, %v9835_v48  ;;  %v2185_v38 = vsub.f32 1.0, %v10398_v57  ;;  %vm2188_vm12 = vweird.f32 %v10399_v26  ;;  %vm2189_vm13 = vweird.f32 %v10400_v52  ;;  %4071 = vst [vmem:[#allocation3 + $0x170] sm:$0xff] %v4007_v24 }
 0x3ff   : > { %v2192_v49 = vand.u32 2147483647, %v10399_v26  ;;  %v2194_v44 = vand.u32 2147483648, %v10399_v26  ;;  %v2200_v2 = vsub.f32 1.0, %v10401_v0  ;;  %vm2203_vm14 = vweird.f32 %v10402_v19  ;;  %4072 = vst [vmem:[#allocation3 + $0x1d0] sm:$0xff] %v4008_v60  ;;  %vm2190_vm4 = vmor %vm2188_vm12, %vm2189_vm13  ;;  %v10415_v26 = vld [vmem:[#allocation141_spill] sm:$0xff]  ;;  %v3171_v0 = vpop.permute.xlu0 %3170 }
 0x400   : > { %vm2204_vm15 = vweird.f32 %v10403_v47  ;;  %v2186_v33 = vmul.f32 %v10400_v52, %v2185_v38  ;;  %v2207_v6 = vand.u32 2147483647, %v10402_v19  ;;  %v2209_v51 = vand.u32 2147483648, %v10402_v19  ;;  %4073 = vst [vmem:[#allocation3 + $0x118] sm:$0xff] %v4009_v10  ;;  %v10417_v19 = vld [vmem:[#allocation147_spill] sm:$0xff] }
 0x401   : > { %vm9077_vm0 = vcmp.eq.f32.partialorder %v2192_v49, 8.507059e+37  ;;  %v2195_v20 = vor.u32 1.1754944e-38, %v2194_v44  ;;  %v2201_v28 = vmul.f32 %v10403_v47, %v2200_v2  ;;  %v2215_v32 = vsub.f32 1.0, %v10406_v39  ;;  %4262 = vst [vmem:[#allocation4 + $0x1a0] sm:$0xff] %v4198_v16  ;;  %vm2205_vm5 = vmor %vm2203_vm14, %vm2204_vm15  ;;  %v10416_v49 = vld [vmem:[#allocation144_spill] sm:$0xff] }
 0x402   : > { %vm2218_vm1 = vweird.f32 %v10407_v15  ;;  %v2187_v34 = vadd.f32 %v10400_v52, %v2186_v33  ;;  %vm9087_vm2 = vcmp.eq.f32.partialorder %v2207_v6, 8.507059e+37  ;;  %v2210_v62 = vor.u32 1.1754944e-38, %v2209_v51  ;;  %4263 = vst [vmem:[#allocation4 + $0xb0] sm:$0xff] %v4199_v41 }
 0x403   : > { %vm2219_vm3 = vweird.f32 %v10410_v61  ;;  %v2202_v58 = vadd.f32 %v10403_v47, %v2201_v28  ;;  %v2216_v37 = vmul.f32 %v10410_v61, %v2215_v32  ;;  %v2222_v21 = vand.u32 2147483647, %v10407_v15  ;;  %4264 = vst [vmem:[#allocation4 + $0x48] sm:$0xff] %v4200_v50  ;;  %v3618_v28 = vld [vmem:[#allocation2 + $0x198] sm:$0xff]  ;;  %v3621_v32 = vld [vmem:[#allocation2 + $0x1c0] sm:$0xff] }
 0x404   : > { %v2224_v54 = vand.u32 2147483648, %v10407_v15  ;;  %v2191_v5 = vsel %vm2190_vm4, %v10400_v52, %v2187_v34  ;;  %v2230_v59 = vsub.f32 1.0, %v10411_v36  ;;  %vm2233_vm6 = vweird.f32 %v10412_v11  ;;  %4265 = vst [vmem:[#allocation4 + $0x128] sm:$0xff] %v4201_v7  ;;  %vm2220_vm9 = vmor %vm2218_vm1, %vm2219_vm3  ;;  %v10414_v7 = vld [vmem:[#allocation138_spill] sm:$0xff] }
 0x405   : > { %vm2234_vm7 = vweird.f32 %v10413_v40  ;;  %v2196_v45 = vsel %vm9077_vm0, %v2195_v20, %v2191_v5  ;;  %v2206_v63 = vsel %vm2205_vm5, %v10403_v47, %v2202_v58  ;;  %v2217_v55 = vadd.f32 %v10410_v61, %v2216_v37 }
 0x406   : > { %vm2223_vm8 = vcmp.eq.f32.partialorder %v2222_v21, 8.507059e+37  ;;  %v2211_v22 = vsel %vm9087_vm2, %v2210_v62, %v2206_v63  ;;  %v2225_v24 = vor.u32 1.1754944e-38, %v2224_v54  ;;  %v2231_v16 = vmul.f32 %v10413_v40, %v2230_v59  ;;  %vm2235_vm11 = vmor %vm2233_vm6, %vm2234_vm7 }
 0x407   : > { %v2237_v41 = vand.u32 2147483647, %v10412_v11  ;;  %v2221_v60 = vsel %vm2220_vm9, %v10410_v61, %v2217_v55  ;;  %v2239_v50 = vand.u32 2147483648, %v10412_v11  ;;  %5700 = vlog2.f32 %v10414_v7 }
 0x408   : > { %v3008_v10 = vmul.f32 %v9057_v17, %v10018_v29  ;;  %v2226_v57 = vsel %vm2223_vm8, %v2225_v24, %v2221_v60  ;;  %v2232_v38 = vadd.f32 %v10413_v40, %v2231_v16  ;;  %5702 = vlog2.f32 %v10415_v26 }
 0x409   : > { %vm2238_vm10 = vcmp.eq.f32.partialorder %v2237_v41, 8.507059e+37  ;;  %v2240_v52 = vor.u32 1.1754944e-38, %v2239_v50  ;;  %5704 = vlog2.f32 %v10416_v49  ;;  %v3009_v44 = vmul.f32 %v9060_v25, %v10022_v9  ;;  %v4131_v41 = vld [vmem:[#allocation4 + $0x20] sm:$0xff] }
 0x40a   : > { %v3010_v29 = vmul.f32 %v9063_v4, %v10025_v42  ;;  %v2236_v2 = vsel %vm2235_vm11, %v10413_v40, %v2232_v38  ;;  %5706 = vlog2.f32 %v10417_v19  ;;  %v3011_v47 = vmul.f32 %v9066_v53, %v10026_v46 }
 0x40b   : > { %v3081_v33 = vmul.f32 %v9057_v17, %v10027_v18  ;;  %v2241_v30 = vsel %vm2238_vm10, %v2240_v52, %v2236_v2  ;;  %v3082_v6 = vmul.f32 %v9060_v25, %v10028_v31  ;;  %v3083_v9 = vmul.f32 %v9063_v4, %v10029_v8  ;;  %v3619_v8 = vld [vmem:[#allocation2 + $0x38] sm:$0xff]  ;;  %v3620_v4 = vld [vmem:[#allocation2 + $0xc0] sm:$0xff]  ;;  %v3877_v2 = vld [vmem:[#allocation3 + $0x128] sm:$0xff] }
 0x40c   : > { %v3084_v42 = vmul.f32 %v9066_v53, %v10030_v3  ;;  %vm3234_vm12 = vcmp.lt.f32.partialorder %v10031_v43, %v3171_v0  ;;  %vm3235_vm13 = vcmp.lt.f32.partialorder %v10032_v14, %v3171_v0  ;;  %vm3236_vm14 = vcmp.lt.f32.partialorder %v10033_v56, %v3171_v0 }
 0x40d   : > { %v3554_v51 = vadd.f32 %v3081_v33, %v3008_v10  ;;  %v5701_v46 = vpop.eup %5700  ;;  %v3555_v20 = vadd.f32 %v3082_v6, %v3009_v44  ;;  %v3556_v18 = vadd.f32 %v3083_v9, %v3010_v29  ;;  %vm3237_vm15 = vcmp.lt.f32.partialorder %v10104_v1, %v3171_v0  ;;  %v3874_v1 = vld [vmem:[#allocation3 + $0x1b0] sm:$0xff] }
 0x40e   : > { %v3557_v17 = vadd.f32 %v3084_v42, %v3011_v47  ;;  %v5703_v31 = vpop.eup %5702  ;;  %v2800_v25 = vmul.f32 0.6931472, %v5701_v46  ;;  %v5139_v3 = vsel %vm3234_vm12, 1.0, %v9835_v48  ;;  %v5140_v43 = vsel %vm3235_vm13, 1.0, %v9835_v48  ;;  %v3876_v0 = vld [vmem:[#allocation3 + $0xf0] sm:$0xff]  ;;  %v4133_v46 = vld [vmem:[#allocation4 + $0xe0] sm:$0xff] }
 0x40f   : > { %v3682_v39 = vmul.f32 %v3554_v51, %v2196_v45  ;;  %v5705_v53 = vpop.eup %5704  ;;  %v2802_v14 = vmul.f32 0.6931472, %v5703_v31  ;;  %v3683_v15 = vmul.f32 %v3555_v20, %v2211_v22  ;;  %v3684_v34 = vmul.f32 %v3556_v18, %v2226_v57  ;;  %v4132_v51 = vld [vmem:[#allocation4 + $0xf8] sm:$0xff] }
 0x410   : > { %v3685_v35 = vmul.f32 %v3557_v17, %v2241_v30  ;;  %v5707_v62 = vpop.eup %5706  ;;  %v2804_v61 = vmul.f32 0.6931472, %v5705_v53  ;;  %v10418_v58 = vmax.f32 %v10394_v13, 0.0  ;;  %v5141_v54 = vsel %vm3236_vm14, 1.0, %v9835_v48 }
 0x411   : > { %v3746_v21 = vadd.f32 %v3682_v39, %v3618_v28  ;;  %v2806_v5 = vmul.f32 0.6931472, %v5707_v62  ;;  %v10419_v36 = vmax.f32 %v10395_v12, 0.0  ;;  %v3747_v11 = vadd.f32 %v3683_v15, %v3619_v8  ;;  %v4130_v12 = vld [vmem:[#allocation4 + $0x170] sm:$0xff] }
 0x412   : > { %v2871_v37 = vadd.f32 %v2800_v25, %v10418_v58  ;;  %v3748_v40 = vadd.f32 %v3684_v34, %v3620_v4  ;;  %v10420_v45 = vmax.f32 %v10396_v23, 0.0  ;;  %v3749_v55 = vadd.f32 %v3685_v35, %v3621_v32 }
 0x413   : > { %v2872_v59 = vadd.f32 %v2802_v14, %v10419_v36  ;;  %3810 = vst [vmem:[#allocation2 + $0x198] sm:$0xff] %v3746_v21  ;;  %v5142_v13 = vsel %vm3237_vm15, 1.0, %v9835_v48  ;;  %v10421_v22 = vmax.f32 %v10397_v27, 0.0  ;;  %v3426_v56 = vmul.f32 %v5139_v3, %v3008_v10  ;;  %v3875_v48 = vld [vmem:[#allocation3 + $0x18] sm:$0xff] }
 0x414   : > { %v2873_v63 = vadd.f32 %v2804_v61, %v10420_v45  ;;  %3811 = vst [vmem:[#allocation2 + $0x38] sm:$0xff] %v3747_v11  ;;  %v3427_v16 = vmul.f32 %v5140_v43, %v3009_v44  ;;  %v3428_v60 = vmul.f32 %v5141_v54, %v3010_v29  ;;  %v3429_v50 = vmul.f32 %v5142_v13, %v3011_v47 }
 0x415   : > { %v2874_v24 = vadd.f32 %v2806_v5, %v10421_v22  ;;  %3812 = vst [vmem:[#allocation2 + $0xc0] sm:$0xff] %v3748_v40  ;;  %v2935_v7 = vmin.f32 %v2871_v37, 100.0  ;;  %v2936_v23 = vmin.f32 %v2872_v59, 100.0  ;;  %v3490_v57 = vadd.f32 %v3426_v56, %v3081_v33 }
 0x416   : > { %3813 = vst [vmem:[#allocation2 + $0x1c0] sm:$0xff] %v3749_v55  ;;  %v3491_v38 = vadd.f32 %v3427_v16, %v3082_v6  ;;  %v2937_v26 = vmin.f32 %v2873_v63, 100.0  ;;  %v3492_v49 = vadd.f32 %v3428_v60, %v3083_v9  ;;  %v3493_v27 = vadd.f32 %v3429_v50, %v3084_v42 }
 0x417   : > { %v2938_v52 = vmin.f32 %v2874_v24, 100.0  ;;  %v3938_v10 = vmul.f32 %v3490_v57, %v2935_v7  ;;  %v4194_v19 = vadd.f32 %v4130_v12, %v3490_v57 }
 0x418   : > { %v3939_v44 = vmul.f32 %v3491_v38, %v2936_v23  ;;  %v4195_v30 = vadd.f32 %v4131_v41, %v3491_v38  ;;  %v3940_v29 = vmul.f32 %v3492_v49, %v2937_v26  ;;  %v4196_v17 = vadd.f32 %v4132_v51, %v3492_v49 }
 0x419   : > { %v3941_v47 = vmul.f32 %v3493_v27, %v2938_v52  ;;  %v4002_v20 = vadd.f32 %v3938_v10, %v3874_v1  ;;  %4258 = vst [vmem:[#allocation4 + $0x170] sm:$0xff] %v4194_v19  ;;  %v4197_v9 = vadd.f32 %v4133_v46, %v3493_v27 }
 0x41a   : > { %v4003_v18 = vadd.f32 %v3939_v44, %v3875_v48  ;;  %v4004_v33 = vadd.f32 %v3940_v29, %v3876_v0  ;;  %4259 = vst [vmem:[#allocation4 + $0x20] sm:$0xff] %v4195_v30 }
 0x41b   : > { %v4005_v6 = vadd.f32 %v3941_v47, %v3877_v2  ;;  %4066 = vst [vmem:[#allocation3 + $0x1b0] sm:$0xff] %v4002_v20 }
 0x41c   : > { %4067 = vst [vmem:[#allocation3 + $0x18] sm:$0xff] %v4003_v18  ;;  %4269 = sbr.rel (%p5147_p8) target bundleno = 1304 (0x518), region = 52 }
 0x41d   : > { %4068 = vst [vmem:[#allocation3 + $0xf0] sm:$0xff] %v4004_v33 }
 0x41e   : > { %4069 = vst [vmem:[#allocation3 + $0x128] sm:$0xff] %v4005_v6 }
 0x41f   : > { %4260 = vst [vmem:[#allocation4 + $0xf8] sm:$0xff] %v4196_v17 }
 0x420   : > { %4261 = vst [vmem:[#allocation4 + $0xe0] sm:$0xff] %v4197_v9 }
 0x421   : > { %v4286_v42 = vld [vmem:[#allocation2 + $0xe0] sm:$0xff]  ;;  %v4287_v28 = vld [vmem:[#allocation2 + $0x188] sm:$0xff]  ;;  %v4288_v31 = vld [vmem:[#allocation2 + $0x138] sm:$0xff]  ;;  %vm4414_vm0 = vcmask 7168  }
 0x422   : > { %v4354_v25 = vadd.f32 %v4287_v28, %v4286_v42  ;;  %v4278_v8 = vld [vmem:[#allocation2 + $0x180] sm:$0xff]  ;;  %v4279_v4 = vld [vmem:[#allocation2 + $0x110] sm:$0xff]  ;;  %v4280_v3 = vld [vmem:[#allocation2 + $0x118] sm:$0xff] }
 0x423   : > { %v4289_v39 = vld [vmem:[#allocation2 + $0x140] sm:$0xff]  ;;  %v4344_v43 = vadd.f32 %v4279_v4, %v4278_v8  ;;  %v4270_v53 = vld [vmem:[#allocation2 + $0xb0] sm:$0xff]  ;;  %v4281_v32 = vld [vmem:[#allocation2 + $0x98] sm:$0xff] }
 0x424   : > { %v4355_v14 = vadd.f32 %v4354_v25, %v4288_v31  ;;  %v4271_v15 = vld [vmem:[#allocation2 + $0x1b0] sm:$0xff]  ;;  %v4272_v34 = vld [vmem:[#allocation2 + $0xd8] sm:$0xff]  ;;  %v4290_v61 = vld [vmem:[#allocation2 + $0x80] sm:$0xff] }
 0x425   : > { %v4345_v35 = vadd.f32 %v4344_v43, %v4280_v3  ;;  %v4334_v62 = vadd.f32 %v4271_v15, %v4270_v53  ;;  %v4291_v58 = vld [vmem:[#allocation2 + $0x1a8] sm:$0xff]  ;;  %v4292_v37 = vld [vmem:[#allocation2 + $0x1b8] sm:$0xff]  ;;  %v4282_v36 = vld [vmem:[#allocation2 + $0x120] sm:$0xff] }
 0x426   : > { %v4356_v21 = vadd.f32 %v4355_v14, %v4289_v39  ;;  %v4273_v54 = vld [vmem:[#allocation2 + $0x18] sm:$0xff]  ;;  %v4359_v5 = vadd.f32 %v4291_v58, %v4290_v61  ;;  %v4283_v59 = vld [vmem:[#allocation2 + $0x150] sm:$0xff]  ;;  %v4284_v45 = vld [vmem:[#allocation2 + $0x108] sm:$0xff] }
 0x427   : > { %v4346_v11 = vadd.f32 %v4345_v35, %v4281_v32  ;;  %v4335_v40 = vadd.f32 %v4334_v62, %v4272_v34  ;;  %v4349_v63 = vadd.f32 %v4283_v59, %v4282_v36  ;;  %v4274_v55 = vld [vmem:[#allocation2 + $0x50] sm:$0xff]  ;;  %v4275_v22 = vld [vmem:[#allocation2 + $0x168] sm:$0xff]  ;;  %v4285_v7 = vld [vmem:[#allocation2 + $0x60] sm:$0xff] }
 0x428   : > { %4357 = vadd.xlane.f32.xlu2 %v4356_v21  ;;  %v4360_v13 = vadd.f32 %v4359_v5, %v4292_v37  ;;  %v4276_v24 = vld [vmem:[#allocation2 + $0x130] sm:$0xff]  ;;  %v4293_v16 = vld [vmem:[#allocation2 + $0x28] sm:$0xff]  ;;  %v4339_v41 = vadd.f32 %v4275_v22, %v4274_v55  ;;  %v4298_v23 = vld [vmem:[#allocation2 + $0x1e0] sm:$0xff] }
 0x429   : > { %4347 = vadd.xlane.f32.xlu1 %v4346_v11  ;;  %v4336_v56 = vadd.f32 %v4335_v40, %v4273_v54  ;;  %v4350_v12 = vadd.f32 %v4349_v63, %v4284_v45  ;;  %v4302_v60 = vld [vmem:[#allocation2 + $0x148] sm:$0xff]  ;;  %v4303_v50 = vld [vmem:[#allocation2 + $0x1d0] sm:$0xff]  ;;  %v4299_v57 = vld [vmem:[#allocation2] sm:$0xff] }
 0x42a   : > { %v4340_v38 = vadd.f32 %v4339_v41, %v4276_v24  ;;  %v4361_v26 = vadd.f32 %v4360_v13, %v4293_v16  ;;  %v4277_v52 = vld [vmem:[#allocation2 + $0x48] sm:$0xff]  ;;  %v4374_v1 = vadd.f32 %v4303_v50, %v4302_v60  ;;  %v4295_v49 = vld [vmem:[#allocation2 + $0xf8] sm:$0xff]  ;;  %v4304_v0 = vld [vmem:[#allocation2 + $0x100] sm:$0xff]  ;;  %v4369_v2 = vadd.f32 %v4299_v57, %v4298_v23 }
 0x42b   : > { %4337 = vadd.xlane.f32.xlu0 %v4336_v56  ;;  %v4294_v48 = vld [vmem:[#allocation2 + $0x1e8] sm:$0xff]  ;;  %v4351_v27 = vadd.f32 %v4350_v12, %v4285_v7  ;;  %v4300_v10 = vld [vmem:[#allocation2 + $0xf0] sm:$0xff]  ;;  %v4296_v51 = vld [vmem:[#allocation2 + $0x160] sm:$0xff] }
 0x42c   : > { %v4341_v44 = vadd.f32 %v4340_v38, %v4277_v52  ;;  %v4364_v19 = vadd.f32 %v4295_v49, %v4294_v48  ;;  %v4375_v30 = vadd.f32 %v4374_v1, %v4304_v0  ;;  %v4305_v29 = vld [vmem:[#allocation2 + $0xc8] sm:$0xff]  ;;  %v4370_v47 = vadd.f32 %v4369_v2, %v4300_v10  ;;  %v4314_v46 = vld [vmem:[#allocation2 + $0x70] sm:$0xff]  ;;  %v4310_v33 = vld [vmem:[#allocation2 + $0x1a0] sm:$0xff] }
 0x42d   : > { %v4315_v20 = vld [vmem:[#allocation2 + $0x90] sm:$0xff]  ;;  %v4301_v18 = vld [vmem:[#allocation2 + $0x8] sm:$0xff]  ;;  %v4306_v31 = vld [vmem:[#allocation2 + $0x40] sm:$0xff] }
 0x42e   : > { %v4311_v6 = vld [vmem:[#allocation2 + $0x1f0] sm:$0xff]  ;;  %v4365_v17 = vadd.f32 %v4364_v19, %v4296_v51  ;;  %v4376_v9 = vadd.f32 %v4375_v30, %v4305_v29  ;;  %v4389_v28 = vadd.f32 %v4315_v20, %v4314_v46  ;;  %v4307_v25 = vld [vmem:[#allocation2 + $0x1f8] sm:$0xff]  ;;  %v4371_v8 = vadd.f32 %v4370_v47, %v4301_v18  ;;  %v4312_v3 = vld [vmem:[#allocation2 + $0xe8] sm:$0xff] }
 0x42f   : > { %v4297_v42 = vld [vmem:[#allocation2 + $0x30] sm:$0xff]  ;;  %v4316_v4 = vld [vmem:[#allocation2 + $0x1d8] sm:$0xff]  ;;  %v4384_v39 = vadd.f32 %v4311_v6, %v4310_v33  ;;  %v4379_v53 = vadd.f32 %v4307_v25, %v4306_v31  ;;  %v4308_v32 = vld [vmem:[#allocation2 + $0x20] sm:$0xff] }
 0x430   : > { %4362 = vadd.xlane.f32.xlu2 %v4361_v26  ;;  %v4366_v43 = vadd.f32 %v4365_v17, %v4297_v42  ;;  %v4390_v14 = vadd.f32 %v4389_v28, %v4316_v4  ;;  %v4317_v15 = vld [vmem:[#allocation2 + $0xd0] sm:$0xff]  ;;  %v4326_v35 = vld [vmem:[#allocation2 + $0x198] sm:$0xff]  ;;  %v4309_v5 = vld [vmem:[#allocation2 + $0x128] sm:$0xff] }
 0x431   : > { %4352 = vadd.xlane.f32.xlu1 %v4351_v27  ;;  %v4385_v34 = vadd.f32 %v4384_v39, %v4312_v3  ;;  %v4327_v62 = vld [vmem:[#allocation2 + $0x38] sm:$0xff]  ;;  %v4322_v58 = vld [vmem:[#allocation2 + $0x170] sm:$0xff]  ;;  %v4380_v21 = vadd.f32 %v4379_v53, %v4308_v32  ;;  %v4319_v11 = vld [vmem:[#allocation2 + $0x88] sm:$0xff] }
 0x432   : > { %v4313_v61 = vld [vmem:[#allocation2 + $0x78] sm:$0xff]  ;;  %v4391_v54 = vadd.f32 %v4390_v14, %v4317_v15  ;;  %v4404_v36 = vadd.f32 %v4327_v62, %v4326_v35  ;;  %v4328_v45 = vld [vmem:[#allocation2 + $0xc0] sm:$0xff]  ;;  %v4324_v55 = vld [vmem:[#allocation2 + $0x68] sm:$0xff] }
 0x433   : > { %4342 = vadd.xlane.f32.xlu0 %v4341_v44  ;;  %v4323_v37 = vld [vmem:[#allocation2 + $0x178] sm:$0xff]  ;;  %v4386_v40 = vadd.f32 %v4385_v34, %v4313_v61  ;;  %v4381_v13 = vadd.f32 %v4380_v21, %v4309_v5  ;;  %v4320_v56 = vld [vmem:[#allocation2 + $0xa8] sm:$0xff]  ;;  %v4329_v16 = vld [vmem:[#allocation2 + $0x1c0] sm:$0xff] }
 0x434   : > { %v4318_v59 = vld [vmem:[#allocation2 + $0xb8] sm:$0xff]  ;;  %v4399_v63 = vadd.f32 %v4323_v37, %v4322_v58  ;;  %v4405_v24 = vadd.f32 %v4404_v36, %v4328_v45  ;;  %v4435_v41 = vld [vmem:[#allocation3 + $0xd0] sm:$0xff]  ;;  %v4431_v7 = vld [vmem:[#allocation3 + $0x68] sm:$0xff] }
 0x435   : > { %v4394_v22 = vadd.f32 %v4319_v11, %v4318_v59  ;;  %v4436_v60 = vld [vmem:[#allocation3 + $0xd8] sm:$0xff]  ;;  %v4325_v50 = vld [vmem:[#allocation2 + $0x190] sm:$0xff]  ;;  %v4321_v26 = vld [vmem:[#allocation2 + $0x1c8] sm:$0xff] }
 0x436   : > { %v4400_v12 = vadd.f32 %v4399_v63, %v4324_v55  ;;  %v4432_v23 = vld [vmem:[#allocation3 + $0x150] sm:$0xff]  ;;  %v4406_v38 = vadd.f32 %v4405_v24, %v4329_v16  ;;  %v4500_v52 = vadd.f32 %v4436_v60, %v4435_v41  ;;  %v4330_v1 = vld [vmem:[#allocation2 + $0x158] sm:$0xff]  ;;  %v4437_v27 = vld [vmem:[#allocation3 + $0x1e0] sm:$0xff] }
 0x437   : > { %v4395_v57 = vadd.f32 %v4394_v22, %v4320_v56  ;;  %v4331_v48 = vld [vmem:[#allocation2 + $0x10] sm:$0xff]  ;;  %v4495_v0 = vadd.f32 %v4432_v23, %v4431_v7  ;;  %v4332_v30 = vld [vmem:[#allocation2 + $0x58] sm:$0xff]  ;;  %v4447_v47 = vld [vmem:[#allocation3 + $0xe0] sm:$0xff] }
 0x438   : > { %4377 = vadd.xlane.f32.xlu2 %v4376_v9  ;;  %v4401_v49 = vadd.f32 %v4400_v12, %v4325_v50  ;;  %v4433_v2 = vld [vmem:[#allocation3 + $0x70] sm:$0xff]  ;;  %v4409_v44 = vadd.f32 %v4331_v48, %v4330_v1  ;;  %v4501_v19 = vadd.f32 %v4500_v52, %v4437_v27  ;;  %v4434_v20 = vld [vmem:[#allocation3 + $0x160] sm:$0xff]  ;;  %v4444_v33 = vld [vmem:[#allocation3 + $0x8] sm:$0xff] }
 0x439   : > { %4372 = vadd.xlane.f32.xlu1 %v4371_v8  ;;  %v4396_v10 = vadd.f32 %v4395_v57, %v4321_v26  ;;  %v4438_v51 = vld [vmem:[#allocation3 + $0x30] sm:$0xff]  ;;  %v4496_v29 = vadd.f32 %v4495_v0, %v4433_v2  ;;  %v4333_v9 = vld [vmem:[#allocation2 + $0xa0] sm:$0xff]  ;;  %v4439_v28 = vld [vmem:[#allocation3 + $0x148] sm:$0xff] }
 0x43a   : > { %v4448_v46 = vld [vmem:[#allocation3 + $0x10] sm:$0xff]  ;;  %v4410_v6 = vadd.f32 %v4409_v44, %v4332_v30  ;;  %v4502_v17 = vadd.f32 %v4501_v19, %v4438_v51  ;;  %v4449_v8 = vld [vmem:[#allocation3 + $0x1a8] sm:$0xff]  ;;  %v4450_v32 = vld [vmem:[#allocation3 + $0xa0] sm:$0xff] }
 0x43b   : > { %4367 = vadd.xlane.f32.xlu0 %v4366_v43  ;;  %v4443_v18 = vld [vmem:[#allocation3 + $0x190] sm:$0xff]  ;;  %v4515_v42 = vadd.f32 %v4448_v46, %v4447_v47  ;;  %v4497_v25 = vadd.f32 %v4496_v29, %v4434_v20  ;;  %v4445_v39 = vld [vmem:[#allocation3 + $0x88] sm:$0xff]  ;;  %v4459_v34 = vld [vmem:[#allocation3 + $0x198] sm:$0xff] }
 0x43c   : > { %v4440_v31 = vld [vmem:[#allocation3 + $0x50] sm:$0xff]  ;;  %v4510_v4 = vadd.f32 %v4444_v33, %v4443_v18  ;;  %v4411_v3 = vadd.f32 %v4410_v6, %v4333_v9  ;;  %v4460_v35 = vld [vmem:[#allocation3 + $0xe8] sm:$0xff]  ;;  %v4446_v62 = vld [vmem:[#allocation3 + $0x38] sm:$0xff] }
 0x43d   : > { %v4505_v43 = vadd.f32 %v4440_v31, %v4439_v28  ;;  %v4516_v53 = vadd.f32 %v4515_v42, %v4449_v8  ;;  %v4441_v14 = vld [vmem:[#allocation3 + $0x1f0] sm:$0xff]  ;;  %v4455_v61 = vld [vmem:[#allocation3 + $0x58] sm:$0xff]  ;;  %v4456_v58 = vld [vmem:[#allocation3 + $0x48] sm:$0xff]  ;;  %v4530_v5 = vadd.f32 %v4460_v35, %v4459_v34 }
 0x43e   : > { %v4511_v15 = vadd.f32 %v4510_v4, %v4445_v39  ;;  %v4451_v36 = vld [vmem:[#allocation3 + $0x1c0] sm:$0xff]  ;;  %v4452_v59 = vld [vmem:[#allocation3 + $0x78] sm:$0xff]  ;;  %v4525_v45 = vadd.f32 %v4456_v58, %v4455_v61  ;;  %v4453_v24 = vld [vmem:[#allocation3 + $0x108] sm:$0xff] }
 0x43f   : > { %v4506_v37 = vadd.f32 %v4505_v43, %v4441_v14  ;;  %v4517_v21 = vadd.f32 %v4516_v53, %v4450_v32  ;;  %v4457_v63 = vld [vmem:[#allocation3 + $0x40] sm:$0xff]  ;;  %v4462_v56 = vld [vmem:[#allocation3 + $0x158] sm:$0xff]  ;;  %v4467_v50 = vld [vmem:[#allocation3 + $0x1e8] sm:$0xff] }
 0x440   : > { %4392 = vadd.xlane.f32.xlu2 %v4391_v54  ;;  %v4442_v54 = vld [vmem:[#allocation3 + $0x130] sm:$0xff]  ;;  %v4512_v11 = vadd.f32 %v4511_v15, %v4446_v62  ;;  %v4526_v16 = vadd.f32 %v4525_v45, %v4457_v63  ;;  %v4471_v12 = vld [vmem:[#allocation3 + $0x1b8] sm:$0xff]  ;;  %v4472_v41 = vld [vmem:[#allocation3 + $0x100] sm:$0xff] }
 0x441   : > { %4387 = vadd.xlane.f32.xlu1 %v4386_v40  ;;  %v4461_v40 = vld [vmem:[#allocation3 + $0x168] sm:$0xff]  ;;  %v4507_v55 = vadd.f32 %v4506_v37, %v4442_v54  ;;  %v4458_v60 = vld [vmem:[#allocation3 + $0x1a0] sm:$0xff]  ;;  %v4545_v26 = vadd.f32 %v4472_v41, %v4471_v12  ;;  %v4463_v52 = vld [vmem:[#allocation3 + $0x1d8] sm:$0xff] }
 0x442   : > { %v4531_v22 = vadd.f32 %v4530_v5, %v4461_v40  ;;  %v4468_v7 = vld [vmem:[#allocation3 + $0x140] sm:$0xff]  ;;  %v4464_v1 = vld [vmem:[#allocation3 + $0x28] sm:$0xff]  ;;  %v4527_v48 = vadd.f32 %v4526_v16, %v4458_v60  ;;  %v4474_v30 = vld [vmem:[#allocation3 + $0xf8] sm:$0xff] }
 0x443   : > { %4382 = vadd.xlane.f32.xlu0 %v4381_v13  ;;  %v4520_v13 = vadd.f32 %v4452_v59, %v4451_v36  ;;  %v4540_v27 = vadd.f32 %v4468_v7, %v4467_v50  ;;  %v4469_v0 = vld [vmem:[#allocation3 + $0x60] sm:$0xff]  ;;  %v4483_v29 = vld [vmem:[#allocation3 + $0xa8] sm:$0xff]  ;;  %v4470_v46 = vld [vmem:[#allocation3 + $0x98] sm:$0xff] }
 0x444   : > { %v4532_v57 = vadd.f32 %v4531_v22, %v4462_v56  ;;  %v4465_v19 = vld [vmem:[#allocation3] sm:$0xff]  ;;  %v4480_v18 = vld [vmem:[#allocation3 + $0xb8] sm:$0xff]  ;;  %v4477_v53 = vld [vmem:[#allocation3 + $0xb0] sm:$0xff] }
 0x445   : > { %v4521_v23 = vadd.f32 %v4520_v13, %v4453_v24  ;;  %v4541_v51 = vadd.f32 %v4540_v27, %v4469_v0  ;;  %v4484_v47 = vld [vmem:[#allocation3 + $0xc0] sm:$0xff]  ;;  %v4475_v42 = vld [vmem:[#allocation3 + $0x178] sm:$0xff]  ;;  %v4486_v14 = vld [vmem:[#allocation3 + $0x188] sm:$0xff] }
 0x446   : > { %v4479_v20 = vld [vmem:[#allocation3 + $0x20] sm:$0xff]  ;;  %v4560_v9 = vadd.f32 %v4484_v47, %v4483_v29  ;;  %v4592_v34 = vld [vmem:[#allocation4 + $0x138] sm:$0xff]  ;;  %v4482_v35 = vld [vmem:[#allocation3 + $0x90] sm:$0xff] }
 0x447   : > { %v4476_v28 = vld [vmem:[#allocation3 + $0x180] sm:$0xff]  ;;  %v4542_v31 = vadd.f32 %v4541_v51, %v4470_v46  ;;  %v4555_v8 = vadd.f32 %v4480_v18, %v4479_v20  ;;  %v4491_v62 = vld [vmem:[#allocation3 + $0x1f8] sm:$0xff]  ;;  %v4492_v61 = vld [vmem:[#allocation3 + $0x170] sm:$0xff] }
 0x448   : > { %4407 = vadd.xlane.f32.xlu2 %v4406_v38  ;;  %v4454_v38 = vld [vmem:[#allocation3 + $0x80] sm:$0xff]  ;;  %v4487_v5 = vld [vmem:[#allocation3 + $0x1b0] sm:$0xff]  ;;  %v4488_v36 = vld [vmem:[#allocation3 + $0x18] sm:$0xff]  ;;  %v4570_v40 = vadd.f32 %v4492_v61, %v4491_v62 }
 0x449   : > { %4402 = vadd.xlane.f32.xlu1 %v4401_v49  ;;  %v4473_v49 = vld [vmem:[#allocation3 + $0xc8] sm:$0xff]  ;;  %v4522_v2 = vadd.f32 %v4521_v23, %v4454_v38  ;;  %v4481_v4 = vld [vmem:[#allocation3 + $0x120] sm:$0xff]  ;;  %v4493_v45 = vld [vmem:[#allocation3 + $0x1d0] sm:$0xff] }
 0x44a   : > { %v4546_v44 = vadd.f32 %v4545_v26, %v4473_v49  ;;  %v4556_v32 = vadd.f32 %v4555_v8, %v4481_v4  ;;  %v4591_v15 = vld [vmem:[#allocation4 + $0xc0] sm:$0xff]  ;;  %v4489_v22 = vld [vmem:[#allocation3 + $0xf0] sm:$0xff]  ;;  %v4594_v24 = vld [vmem:[#allocation4 + $0xc8] sm:$0xff]  ;;  %v4571_v56 = vadd.f32 %v4570_v40, %v4493_v45 }
 0x44b   : > { %4397 = vadd.xlane.f32.xlu0 %v4396_v10  ;;  %v4535_v10 = vadd.f32 %v4464_v1, %v4463_v52  ;;  %v4655_v54 = vadd.f32 %v4592_v34, %v4591_v15  ;;  %v4603_v16 = vld [vmem:[#allocation4 + $0x158] sm:$0xff]  ;;  %v4604_v12 = vld [vmem:[#allocation4 + $0x190] sm:$0xff]  ;;  %v4599_v60 = vld [vmem:[#allocation4 + $0x100] sm:$0xff] }
 0x44c   : > { %v4547_v6 = vadd.f32 %v4546_v44, %v4474_v30  ;;  %v4557_v59 = vadd.f32 %v4556_v32, %v4482_v35  ;;  %v4494_v41 = vld [vmem:[#allocation3 + $0x118] sm:$0xff]  ;;  %v4600_v50 = vld [vmem:[#allocation4 + $0xd0] sm:$0xff]  ;;  %v4670_v38 = vadd.f32 %v4604_v12, %v4603_v16  ;;  %v4596_v52 = vld [vmem:[#allocation4 + $0x160] sm:$0xff] }
 0x44d   : > { %v4536_v33 = vadd.f32 %v4535_v10, %v4465_v19  ;;  %v4595_v26 = vld [vmem:[#allocation4 + $0x1d0] sm:$0xff]  ;;  %v4572_v1 = vadd.f32 %v4571_v56, %v4494_v41  ;;  %v4665_v49 = vadd.f32 %v4600_v50, %v4599_v60  ;;  %v4606_v19 = vld [vmem:[#allocation4 + $0x60] sm:$0xff]  ;;  %v4615_v51 = vld [vmem:[#allocation4 + $0x1c8] sm:$0xff] }
 0x44e   : > { %v4601_v27 = vld [vmem:[#allocation4 + $0x70] sm:$0xff]  ;;  %v4616_v29 = vld [vmem:[#allocation4 + $0x188] sm:$0xff]  ;;  %v4611_v46 = vld [vmem:[#allocation4 + $0x78] sm:$0xff] }
 0x44f   : > { %v4597_v44 = vld [vmem:[#allocation4 + $0x1f0] sm:$0xff]  ;;  %v4666_v30 = vadd.f32 %v4665_v49, %v4601_v27  ;;  %v4602_v47 = vld [vmem:[#allocation4 + $0x168] sm:$0xff]  ;;  %v4612_v20 = vld [vmem:[#allocation4 + $0x180] sm:$0xff] }
 0x450   : > { %4503 = vadd.xlane.f32.xlu2 %v4502_v17  ;;  %v4466_v17 = vld [vmem:[#allocation3 + $0x1c8] sm:$0xff]  ;;  %v4613_v8 = vld [vmem:[#allocation4 + $0x18] sm:$0xff]  ;;  %v4627_v32 = vld [vmem:[#allocation4 + $0x30] sm:$0xff] }
 0x451   : > { %4498 = vadd.xlane.f32.xlu1 %v4497_v25  ;;  %v4485_v25 = vld [vmem:[#allocation3 + $0x138] sm:$0xff]  ;;  %v4537_v39 = vadd.f32 %v4536_v33, %v4466_v17  ;;  %v4685_v17 = vadd.f32 %v4616_v29, %v4615_v51  ;;  %v4628_v15 = vld [vmem:[#allocation4 + $0x140] sm:$0xff]  ;;  %v4614_v34 = vld [vmem:[#allocation4 + $0x148] sm:$0xff] }
 0x452   : > { %v4561_v43 = vadd.f32 %v4560_v9, %v4485_v25  ;;  %v4607_v9 = vld [vmem:[#allocation4 + $0x68] sm:$0xff]  ;;  %v4680_v25 = vadd.f32 %v4612_v20, %v4611_v46  ;;  %v4623_v35 = vld [vmem:[#allocation4 + $0x38] sm:$0xff]  ;;  %v4624_v62 = vld [vmem:[#allocation4 + $0x40] sm:$0xff] }
 0x453   : > { %4412 = vadd.xlane.f32.xlu0 %v4411_v3  ;;  %v4550_v3 = vadd.f32 %v4476_v28, %v4475_v42  ;;  %v4608_v42 = vld [vmem:[#allocation4 + $0xd8] sm:$0xff]  ;;  %v4667_v28 = vadd.f32 %v4666_v30, %v4602_v47  ;;  %v4626_v12 = vld [vmem:[#allocation4 + $0x90] sm:$0xff]  ;;  %v4636_v60 = vld [vmem:[#allocation4 + $0xa0] sm:$0xff] }
 0x454   : > { %v4562_v37 = vadd.f32 %v4561_v43, %v4486_v14  ;;  %v4609_v43 = vld [vmem:[#allocation4 + $0xf0] sm:$0xff]  ;;  %v4681_v14 = vadd.f32 %v4680_v25, %v4613_v8  ;;  %v4625_v40 = vld [vmem:[#allocation4 + $0x98] sm:$0xff]  ;;  %v4651_v30 = vld [vmem:[#allocation4 + $0x1a0] sm:$0xff] }
 0x455   : > { %v4551_v58 = vadd.f32 %v4550_v3, %v4477_v53  ;;  %v4618_v53 = vld [vmem:[#allocation4 + $0xa8] sm:$0xff]  ;;  %v4639_v56 = vld [vmem:[#allocation4 + $0x178] sm:$0xff]  ;;  %v4635_v41 = vld [vmem:[#allocation4 + $0x110] sm:$0xff] }
 0x456   : > { %v4640_v16 = vld [vmem:[#allocation4 + $0x58] sm:$0xff]  ;;  %v4652_v51 = vld [vmem:[#allocation4 + $0xb0] sm:$0xff]  ;;  %v4648_v46 = vld [vmem:[#allocation4 + $0x20] sm:$0xff] }
 0x457   : > { %v4637_v49 = vld [vmem:[#allocation4 + $0x118] sm:$0xff]  ;;  %v4647_v47 = vld [vmem:[#allocation4 + $0x170] sm:$0xff] }
 0x458   : > { %4518 = vadd.xlane.f32.xlu2 %v4517_v21  ;;  %v4478_v21 = vld [vmem:[#allocation3 + $0x110] sm:$0xff]  ;;  %v4638_v29 = vld [vmem:[#allocation4 + $0x198] sm:$0xff] }
 0x459   : > { %4513 = vadd.xlane.f32.xlu1 %v4512_v11  ;;  %v4593_v11 = vld [vmem:[#allocation4] sm:$0xff]  ;;  %v4552_v63 = vadd.f32 %v4551_v58, %v4478_v21  ;;  %v4700_v21 = vadd.f32 %v4628_v15, %v4627_v32  ;;  %v4649_v25 = vld [vmem:[#allocation4 + $0xf8] sm:$0xff] }
 0x45a   : > { %v4656_v13 = vadd.f32 %v4655_v54, %v4593_v11  ;;  %v4619_v54 = vld [vmem:[#allocation4 + $0x108] sm:$0xff]  ;;  %v4695_v11 = vadd.f32 %v4624_v62, %v4623_v35  ;;  %v4646_v62 = vld [vmem:[#allocation4 + $0x10] sm:$0xff] }
 0x45b   : > { %4508 = vadd.xlane.f32.xlu0 %v4507_v55  ;;  %v4565_v55 = vadd.f32 %v4488_v36, %v4487_v5  ;;  %v4620_v5 = vld [vmem:[#allocation4 + $0x50] sm:$0xff]  ;;  %v4682_v36 = vadd.f32 %v4681_v14, %v4614_v34  ;;  %v4650_v14 = vld [vmem:[#allocation4 + $0xe0] sm:$0xff] }
 0x45c   : > { %v4657_v23 = vadd.f32 %v4656_v13, %v4594_v24  ;;  %v4621_v13 = vld [vmem:[#allocation4 + $0xb8] sm:$0xff]  ;;  %v4696_v24 = vadd.f32 %v4695_v11, %v4625_v40 }
 0x45d   : > { %v4566_v7 = vadd.f32 %v4565_v55, %v4489_v22  ;;  %v4630_v22 = vld [vmem:[#allocation4 + $0x1e8] sm:$0xff] }
 0x460   : > { %4533 = vadd.xlane.f32.xlu2 %v4532_v57  ;;  %v4490_v57 = vld [vmem:[#allocation3 + $0x128] sm:$0xff] }
 0x461   : > { %4528 = vadd.xlane.f32.xlu1 %v4527_v48  ;;  %v4605_v48 = vld [vmem:[#allocation4 + $0x88] sm:$0xff]  ;;  %v4567_v0 = vadd.f32 %v4566_v7, %v4490_v57  ;;  %v4715_v57 = vadd.f32 %v4640_v16, %v4639_v56 }
 0x462   : > { %v4671_v10 = vadd.f32 %v4670_v38, %v4605_v48  ;;  %v4631_v38 = vld [vmem:[#allocation4 + $0x1a8] sm:$0xff]  ;;  %v4710_v48 = vadd.f32 %v4636_v60, %v4635_v41 }
 0x463   : > { %4523 = vadd.xlane.f32.xlu0 %v4522_v2  ;;  %v4660_v2 = vadd.f32 %v4596_v52, %v4595_v26  ;;  %v4632_v26 = vld [vmem:[#allocation4 + $0x1e0] sm:$0xff]  ;;  %v4697_v52 = vadd.f32 %v4696_v24, %v4626_v12 }
 0x464   : > { %v4672_v33 = vadd.f32 %v4671_v10, %v4606_v19  ;;  %v4633_v10 = vld [vmem:[#allocation4 + $0x1b0] sm:$0xff]  ;;  %v4711_v19 = vadd.f32 %v4710_v48, %v4637_v49 }
 0x465   : > { %v4661_v18 = vadd.f32 %v4660_v2, %v4597_v44  ;;  %v4642_v44 = vld [vmem:[#allocation4 + $0x1c0] sm:$0xff] }
 0x468   : > { %4548 = vadd.xlane.f32.xlu2 %v4547_v6  ;;  %v4598_v6 = vld [vmem:[#allocation4 + $0xe8] sm:$0xff] }
 0x469   : > { %4543 = vadd.xlane.f32.xlu1 %v4542_v31  ;;  %v4617_v31 = vld [vmem:[#allocation4 + $0x150] sm:$0xff]  ;;  %v4662_v4 = vadd.f32 %v4661_v18, %v4598_v6  ;;  %v4730_v6 = vadd.f32 %v4652_v51, %v4651_v30 }
 0x46a   : > { %v4686_v3 = vadd.f32 %v4685_v17, %v4617_v31  ;;  %v4643_v17 = vld [vmem:[#allocation4 + $0x1f8] sm:$0xff]  ;;  %v4725_v31 = vadd.f32 %v4648_v46, %v4647_v47 }
 0x46b   : > { %4538 = vadd.xlane.f32.xlu0 %v4537_v39  ;;  %v4675_v39 = vadd.f32 %v4608_v42, %v4607_v9  ;;  %v4644_v9 = vld [vmem:[#allocation4 + $0x130] sm:$0xff]  ;;  %v4712_v42 = vadd.f32 %v4711_v19, %v4638_v29 }
 0x46c   : > { %v4687_v58 = vadd.f32 %v4686_v3, %v4618_v53  ;;  %v4645_v3 = vld [vmem:[#allocation4 + $0x120] sm:$0xff]  ;;  %v4726_v53 = vadd.f32 %v4725_v31, %v4649_v25 }
 0x46d   : > { %v4676_v61 = vadd.f32 %v4675_v39, %v4609_v43  ;;  %v4654_v43 = vld [vmem:[#allocation4 + $0x128] sm:$0xff] }
 0x470   : > { %4563 = vadd.xlane.f32.xlu2 %v4562_v37  ;;  %v4610_v37 = vld [vmem:[#allocation4 + $0x80] sm:$0xff] }
 0x471   : > { %4558 = vadd.xlane.f32.xlu1 %v4557_v59  ;;  %v4629_v59 = vld [vmem:[#allocation4 + $0x1d8] sm:$0xff]  ;;  %v4677_v45 = vadd.f32 %v4676_v61, %v4610_v37  ;;  %v4727_v61 = vadd.f32 %v4726_v53, %v4650_v14 }
 0x472   : > { %v4701_v55 = vadd.f32 %v4700_v21, %v4629_v59 }
 0x473   : > { %4553 = vadd.xlane.f32.xlu0 %v4552_v63  ;;  %v4690_v63 = vadd.f32 %v4620_v5, %v4619_v54 }
 0x474   : > { %v4702_v7 = vadd.f32 %v4701_v55, %v4630_v22 }
 0x475   : > { %v4691_v50 = vadd.f32 %v4690_v63, %v4621_v13 }
 0x478   : > { %4658 = vadd.xlane.f32.xlu2 %v4657_v23  ;;  %v4622_v23 = vld [vmem:[#allocation4 + $0x28] sm:$0xff] }
 0x479   : > { %4573 = vadd.xlane.f32.xlu1 %v4572_v1  ;;  %v4641_v1 = vld [vmem:[#allocation4 + $0x8] sm:$0xff]  ;;  %v4692_v27 = vadd.f32 %v4691_v50, %v4622_v23 }
 0x47a   : > { %v4716_v2 = vadd.f32 %v4715_v57, %v4641_v1 }
 0x47b   : > { %4568 = vadd.xlane.f32.xlu0 %v4567_v0  ;;  %v4705_v0 = vadd.f32 %v4632_v26, %v4631_v38 }
 0x47c   : > { %v4717_v18 = vadd.f32 %v4716_v2, %v4642_v44 }
 0x47d   : > { %v4706_v20 = vadd.f32 %v4705_v0, %v4633_v10 }
 0x480   : > { %4673 = vadd.xlane.f32.xlu2 %v4672_v33  ;;  %v4634_v33 = vld [vmem:[#allocation4 + $0x1b8] sm:$0xff] }
 0x481   : > { %4668 = vadd.xlane.f32.xlu1 %v4667_v28  ;;  %v4653_v28 = vld [vmem:[#allocation4 + $0x48] sm:$0xff]  ;;  %v4707_v8 = vadd.f32 %v4706_v20, %v4634_v33 }
 0x482   : > { %v4731_v39 = vadd.f32 %v4730_v6, %v4653_v28 }
 0x483   : > { %4663 = vadd.xlane.f32.xlu0 %v4662_v4  ;;  %v4720_v4 = vadd.f32 %v4644_v9, %v4643_v17 }
 0x484   : > { %v4732_v35 = vadd.f32 %v4731_v39, %v4654_v43 }
 0x485   : > { %v4721_v15 = vadd.f32 %v4720_v4, %v4645_v3 }
 0x487   : > { %v4722_v37 = vadd.f32 %v4721_v15, %v4646_v62 }
 0x488   : > { %4688 = vadd.xlane.f32.xlu2 %v4687_v58 }
 0x489   : > { %4683 = vadd.xlane.f32.xlu1 %v4682_v36 }
 0x48b   : > { %4678 = vadd.xlane.f32.xlu0 %v4677_v45 }
 0x490   : > { %4703 = vadd.xlane.f32.xlu2 %v4702_v7 }
 0x491   : > { %4698 = vadd.xlane.f32.xlu1 %v4697_v52 }
 0x493   : > { %4693 = vadd.xlane.f32.xlu0 %v4692_v27 }
 0x498   : > { %4718 = vadd.xlane.f32.xlu2 %v4717_v18 }
 0x499   : > { %4713 = vadd.xlane.f32.xlu1 %v4712_v42 }
 0x49b   : > { %4708 = vadd.xlane.f32.xlu0 %v4707_v8  ;;  %v4358_v32 = vpop.xlane.xlu2 %4357 }
 0x49c   : > { %4419 = vst.msk [vmem:[%s5860_s19 + $0x20] sm:$0xff] %vm4414_vm0, %v4358_v32  ;;  %v4348_v34 = vpop.xlane.xlu1 %4347 }
 0x49d   : > { %4417 = vst.msk [vmem:[%s5860_s19 + $0x10] sm:$0xff] %vm4414_vm0, %v4348_v34 }
 0x49e   : > { %v4338_v58 = vpop.xlane.xlu0 %4337 }
 0x49f   : > { %4415 = vst.msk [vmem:[%s5860_s19] sm:$0xff] %vm4414_vm0, %v4338_v58 }
 0x4a0   : > { %4733 = vadd.xlane.f32.xlu2 %v4732_v35 }
 0x4a1   : > { %4728 = vadd.xlane.f32.xlu1 %v4727_v61 }
 0x4a3   : > { %4723 = vadd.xlane.f32.xlu0 %v4722_v37  ;;  %v4363_v21 = vpop.xlane.xlu2 %4362 }
 0x4a4   : > { %4420 = vst.msk [vmem:[%s5860_s19 + $0x28] sm:$0xff] %vm4414_vm0, %v4363_v21  ;;  %v4353_v54 = vpop.xlane.xlu1 %4352 }
 0x4a5   : > { %4418 = vst.msk [vmem:[%s5860_s19 + $0x18] sm:$0xff] %vm4414_vm0, %v4353_v54 }
 0x4a6   : > { %v4343_v5 = vpop.xlane.xlu0 %4342 }
 0x4a7   : > { %4416 = vst.msk [vmem:[%s5860_s19 + $0x8] sm:$0xff] %vm4414_vm0, %v4343_v5 }
 0x4ab   : > { %v4378_v36 = vpop.xlane.xlu2 %4377 }
 0x4ac   : > { %4423 = vst.msk [vmem:[%s5860_s19 + $0x40] sm:$0xff] %vm4414_vm0, %v4378_v36  ;;  %v4373_v59 = vpop.xlane.xlu1 %4372 }
 0x4ad   : > { %4422 = vst.msk [vmem:[%s5860_s19 + $0x38] sm:$0xff] %vm4414_vm0, %v4373_v59 }
 0x4ae   : > { %v4368_v11 = vpop.xlane.xlu0 %4367 }
 0x4af   : > { %4421 = vst.msk [vmem:[%s5860_s19 + $0x30] sm:$0xff] %vm4414_vm0, %v4368_v11 }
 0x4b3   : > { %v4393_v40 = vpop.xlane.xlu2 %4392 }
 0x4b4   : > { %4426 = vst.msk [vmem:[%s5860_s19 + $0x58] sm:$0xff] %vm4414_vm0, %v4393_v40  ;;  %v4388_v45 = vpop.xlane.xlu1 %4387 }
 0x4b5   : > { %4425 = vst.msk [vmem:[%s5860_s19 + $0x50] sm:$0xff] %vm4414_vm0, %v4388_v45 }
 0x4b6   : > { %v4383_v63 = vpop.xlane.xlu0 %4382 }
 0x4b7   : > { %4424 = vst.msk [vmem:[%s5860_s19 + $0x48] sm:$0xff] %vm4414_vm0, %v4383_v63 }
 0x4bb   : > { %v4408_v55 = vpop.xlane.xlu2 %4407 }
 0x4bc   : > { %4429 = vst.msk [vmem:[%s5860_s19 + $0x70] sm:$0xff] %vm4414_vm0, %v4408_v55  ;;  %v4403_v13 = vpop.xlane.xlu1 %4402 }
 0x4bd   : > { %4428 = vst.msk [vmem:[%s5860_s19 + $0x68] sm:$0xff] %vm4414_vm0, %v4403_v13 }
 0x4be   : > { %v4398_v22 = vpop.xlane.xlu0 %4397 }
 0x4bf   : > { %4427 = vst.msk [vmem:[%s5860_s19 + $0x60] sm:$0xff] %vm4414_vm0, %v4398_v22 }
 0x4c3   : > { %v4504_v24 = vpop.xlane.xlu2 %4503 }
 0x4c4   : > { %4576 = vst.msk [vmem:[%s5865_s22 + $0x8] sm:$0xff] %vm4414_vm0, %v4504_v24  ;;  %v4499_v56 = vpop.xlane.xlu1 %4498 }
 0x4c5   : > { %4575 = vst.msk [vmem:[%s5865_s22] sm:$0xff] %vm4414_vm0, %v4499_v56 }
 0x4c6   : > { %v4413_v16 = vpop.xlane.xlu0 %4412 }
 0x4c7   : > { %4430 = vst.msk [vmem:[%s5860_s19 + $0x78] sm:$0xff] %vm4414_vm0, %v4413_v16 }
 0x4cb   : > { %v4519_v12 = vpop.xlane.xlu2 %4518 }
 0x4cc   : > { %4579 = vst.msk [vmem:[%s5865_s22 + $0x20] sm:$0xff] %vm4414_vm0, %v4519_v12  ;;  %v4514_v41 = vpop.xlane.xlu1 %4513 }
 0x4cd   : > { %4578 = vst.msk [vmem:[%s5865_s22 + $0x18] sm:$0xff] %vm4414_vm0, %v4514_v41 }
 0x4ce   : > { %v4509_v60 = vpop.xlane.xlu0 %4508 }
 0x4cf   : > { %4577 = vst.msk [vmem:[%s5865_s22 + $0x10] sm:$0xff] %vm4414_vm0, %v4509_v60 }
 0x4d3   : > { %v4534_v50 = vpop.xlane.xlu2 %4533 }
 0x4d4   : > { %4582 = vst.msk [vmem:[%s5865_s22 + $0x38] sm:$0xff] %vm4414_vm0, %v4534_v50  ;;  %v4529_v7 = vpop.xlane.xlu1 %4528 }
 0x4d5   : > { %4581 = vst.msk [vmem:[%s5865_s22 + $0x30] sm:$0xff] %vm4414_vm0, %v4529_v7 }
 0x4d6   : > { %v4524_v23 = vpop.xlane.xlu0 %4523 }
 0x4d7   : > { %4580 = vst.msk [vmem:[%s5865_s22 + $0x28] sm:$0xff] %vm4414_vm0, %v4524_v23 }
 0x4db   : > { %v4549_v57 = vpop.xlane.xlu2 %4548 }
 0x4dc   : > { %4585 = vst.msk [vmem:[%s5865_s22 + $0x50] sm:$0xff] %vm4414_vm0, %v4549_v57  ;;  %v4544_v38 = vpop.xlane.xlu1 %4543 }
 0x4dd   : > { %4584 = vst.msk [vmem:[%s5865_s22 + $0x48] sm:$0xff] %vm4414_vm0, %v4544_v38 }
 0x4de   : > { %v4539_v26 = vpop.xlane.xlu0 %4538 }
 0x4df   : > { %4583 = vst.msk [vmem:[%s5865_s22 + $0x40] sm:$0xff] %vm4414_vm0, %v4539_v26 }
 0x4e3   : > { %v4564_v52 = vpop.xlane.xlu2 %4563 }
 0x4e4   : > { %4588 = vst.msk [vmem:[%s5865_s22 + $0x68] sm:$0xff] %vm4414_vm0, %v4564_v52  ;;  %v4559_v1 = vpop.xlane.xlu1 %4558 }
 0x4e5   : > { %4587 = vst.msk [vmem:[%s5865_s22 + $0x60] sm:$0xff] %vm4414_vm0, %v4559_v1 }
 0x4e6   : > { %v4554_v48 = vpop.xlane.xlu0 %4553 }
 0x4e7   : > { %4586 = vst.msk [vmem:[%s5865_s22 + $0x58] sm:$0xff] %vm4414_vm0, %v4554_v48 }
 0x4eb   : > { %v4659_v49 = vpop.xlane.xlu2 %4658 }
 0x4ec   : > { %4735 = vst.msk [vmem:[%s5870_s26] sm:$0xff] %vm4414_vm0, %v4659_v49  ;;  %v4574_v27 = vpop.xlane.xlu1 %4573 }
 0x4ed   : > { %4590 = vst.msk [vmem:[%s5865_s22 + $0x78] sm:$0xff] %vm4414_vm0, %v4574_v27 }
 0x4ee   : > { %v4569_v0 = vpop.xlane.xlu0 %4568 }
 0x4ef   : > { %4589 = vst.msk [vmem:[%s5865_s22 + $0x70] sm:$0xff] %vm4414_vm0, %v4569_v0 }
 0x4f3   : > { %v4674_v2 = vpop.xlane.xlu2 %4673 }
 0x4f4   : > { %4738 = vst.msk [vmem:[%s5870_s26 + $0x18] sm:$0xff] %vm4414_vm0, %v4674_v2  ;;  %v4669_v10 = vpop.xlane.xlu1 %4668 }
 0x4f5   : > { %4737 = vst.msk [vmem:[%s5870_s26 + $0x10] sm:$0xff] %vm4414_vm0, %v4669_v10 }
 0x4f6   : > { %v4664_v44 = vpop.xlane.xlu0 %4663 }
 0x4f7   : > { %4736 = vst.msk [vmem:[%s5870_s26 + $0x8] sm:$0xff] %vm4414_vm0, %v4664_v44 }
 0x4fb   : > { %v4689_v19 = vpop.xlane.xlu2 %4688 }
 0x4fc   : > { %4741 = vst.msk [vmem:[%s5870_s26 + $0x30] sm:$0xff] %vm4414_vm0, %v4689_v19  ;;  %v4684_v30 = vpop.xlane.xlu1 %4683 }
 0x4fd   : > { %4740 = vst.msk [vmem:[%s5870_s26 + $0x28] sm:$0xff] %vm4414_vm0, %v4684_v30 }
 0x4fe   : > { %v4679_v51 = vpop.xlane.xlu0 %4678 }
 0x4ff   : > { %4739 = vst.msk [vmem:[%s5870_s26 + $0x20] sm:$0xff] %vm4414_vm0, %v4679_v51 }
 0x503   : > { %v4704_v29 = vpop.xlane.xlu2 %4703 }
 0x504   : > { %4744 = vst.msk [vmem:[%s5870_s26 + $0x48] sm:$0xff] %vm4414_vm0, %v4704_v29  ;;  %v4699_v47 = vpop.xlane.xlu1 %4698 }
 0x505   : > { %4743 = vst.msk [vmem:[%s5870_s26 + $0x40] sm:$0xff] %vm4414_vm0, %v4699_v47 }
 0x506   : > { %v4694_v46 = vpop.xlane.xlu0 %4693 }
 0x507   : > { %4742 = vst.msk [vmem:[%s5870_s26 + $0x38] sm:$0xff] %vm4414_vm0, %v4694_v46 }
 0x50b   : > { %v4719_v20 = vpop.xlane.xlu2 %4718 }
 0x50c   : > { %4747 = vst.msk [vmem:[%s5870_s26 + $0x60] sm:$0xff] %vm4414_vm0, %v4719_v20  ;;  %v4714_v18 = vpop.xlane.xlu1 %4713 }
 0x50d   : > { %4746 = vst.msk [vmem:[%s5870_s26 + $0x58] sm:$0xff] %vm4414_vm0, %v4714_v18 }
 0x50e   : > { %v4709_v33 = vpop.xlane.xlu0 %4708 }
 0x50f   : > { %4745 = vst.msk [vmem:[%s5870_s26 + $0x50] sm:$0xff] %vm4414_vm0, %v4709_v33 }
 0x513   : > { %v4734_v6 = vpop.xlane.xlu2 %4733 }
 0x514   : > { %4750 = vst.msk [vmem:[%s5870_s26 + $0x78] sm:$0xff] %vm4414_vm0, %v4734_v6  ;;  %v4729_v17 = vpop.xlane.xlu1 %4728 }
 0x515   : > { %4749 = vst.msk [vmem:[%s5870_s26 + $0x70] sm:$0xff] %vm4414_vm0, %v4729_v17 }
 0x516   : > { %v4724_v9 = vpop.xlane.xlu0 %4723 }
 0x517   : > { %4748 = vst.msk [vmem:[%s5870_s26 + $0x68] sm:$0xff] %vm4414_vm0, %v4724_v9 }
 0x518 PF: > { %s19_s9 = sadd.s32 1, %s5746_s9   ;;  %s10422_s0 = sld [smem:[#allocation5_spill]] }
 0x519   : > { %p16_p9 = scmp.ge.s32.totalorder %s19_s9, 18   ;;  %s10423_s11 = sld [smem:[#allocation6_spill]] }
 0x51a   : > { %s10424_s27 = smov %s5738_s29  ;;  %s10425_s28 = smov %s5742_s30 }
 0x51b   :  { %18 = sbr.rel (!%p16_p9) target bundleno = 4 (0x4), region = 121 }
 0x51e   : > { %s10426_s29 = smov %s10422_s0 }
 0x51f   : > { %s10427_s30 = smov %s10423_s11 }

</bundles_post_ra>
